<compile_context>
chip_gen: v7x
topology: tpu7x:2x2x1
jax: 0.10.0
libtpu: 0.0.40
codegen_flags: <defaults>
</compile_context>

<pallas_src>
import functools

import jax
import jax.numpy as jnp
from jax.experimental import pallas as pl
from jax.experimental.pallas import tpu as pltpu


# --------------------------------------------------------------------------- #
# Pallas kernels
# --------------------------------------------------------------------------- #

def _conv_pool_bn_sigmoid_kernel(p_ref, w_ref, b_ref, g_ref, beta_ref,
                                 o_ref, conv_ref):
    """Fused Conv3x3(same) + MaxPool2x2 + BatchNorm2d(train) + Sigmoid.

    p_ref   : [4*P, K] f32   im2col patches, pooling-phase-major row order
    w_ref   : [K, C]   bf16  conv weight, K = Cin*9 (cin-major, tap-minor)
    b_ref   : [1, C]   f32   conv bias
    g_ref   : [1, C]   f32   BN gamma
    beta_ref: [1, C]   f32   BN beta
    o_ref   : [P, C]   f32   pooled+BN+sigmoid output, rows = (b, oh, ow)
    conv_ref: [4*P, C] f32   VMEM scratch holding the conv matmul result
    """
    P = o_ref.shape[0]
    # Conv as a single MXU matmul (bf16 operands, f32 accumulate) + bias.
    conv_ref[...] = (
        jnp.dot(p_ref[...].astype(jnp.bfloat16), w_ref[...],
                preferred_element_type=jnp.float32)
        + b_ref[...]
    )
    # MaxPool2x2: rows are ordered (phase, b, oh, ow) so pooling is an
    # elementwise max of four tile-aligned row blocks.
    pooled = jnp.maximum(
        jnp.maximum(conv_ref[0 * P:1 * P, :], conv_ref[1 * P:2 * P, :]),
        jnp.maximum(conv_ref[2 * P:3 * P, :], conv_ref[3 * P:4 * P, :]),
    )
    # BatchNorm2d in training mode: biased batch statistics over (N, H, W).
    mean = jnp.mean(pooled, axis=0, keepdims=True)
    var = jnp.mean(jnp.square(pooled - mean), axis=0, keepdims=True)
    scale = g_ref[...] * jax.lax.rsqrt(var + 1e-5)
    shift = beta_ref[...] - mean * scale
    o_ref[...] = jax.nn.sigmoid(pooled * scale + shift)


def conv_block(patches, w, b, gamma, beta):
    """patches:[4P,K] f32, w:[K,C] bf16, b/gamma/beta:[1,C] f32 -> [P,C] f32."""
    R, K = patches.shape
    C = w.shape[1]
    P = R // 4
    return pl.pallas_call(
        _conv_pool_bn_sigmoid_kernel,
        out_shape=jax.ShapeDtypeStruct((P, C), jnp.float32),
        grid=(1,),
        in_specs=[
            pl.BlockSpec((R, K), lambda i: (0, 0)),
            pl.BlockSpec((K, C), lambda i: (0, 0)),
            pl.BlockSpec((1, C), lambda i: (0, 0)),
            pl.BlockSpec((1, C), lambda i: (0, 0)),
            pl.BlockSpec((1, C), lambda i: (0, 0)),
        ],
        out_specs=pl.BlockSpec((P, C), lambda i: (0, 0)),
        scratch_shapes=[pltpu.VMEM((R, C), jnp.float32)],
    )(patches, w, b, gamma, beta)


def _fc12_kernel(x_ref, w1_ref, b1_ref, w2_ref, b2_ref, o_ref):
    """sigmoid(sigmoid(x@w1+b1)@w2+b2) with bf16 weights, f32 accumulate."""
    h1 = jnp.dot(x_ref[...].astype(jnp.bfloat16), w1_ref[...],
                 preferred_element_type=jnp.float32) + b1_ref[...]
    h1 = jax.nn.sigmoid(h1)
    h2 = jnp.dot(h1.astype(jnp.bfloat16), w2_ref[...],
                 preferred_element_type=jnp.float32) + b2_ref[...]
    o_ref[...] = jax.nn.sigmoid(h2)


def fc12(x, w1, b1, w2, b2):
    M, K1 = x.shape
    N1 = w1.shape[1]
    K2, N2 = w2.shape
    return pl.pallas_call(
        _fc12_kernel,
        out_shape=jax.ShapeDtypeStruct((M, N2), jnp.float32),
        grid=(1,),
        in_specs=[
            pl.BlockSpec((M, K1), lambda i: (0, 0)),
            pl.BlockSpec((K1, N1), lambda i: (0, 0)),
            pl.BlockSpec((1, N1), lambda i: (0, 0)),
            pl.BlockSpec((K2, N2), lambda i: (0, 0)),
            pl.BlockSpec((1, N2), lambda i: (0, 0)),
        ],
        out_specs=pl.BlockSpec((M, N2), lambda i: (0, 0)),
        compiler_params=pltpu.CompilerParams(
            vmem_limit_bytes=32 * 1024 * 1024),
    )(x, w1, b1, w2, b2)


def _fc3_kernel(x_ref, w_ref, b_ref, o_ref):
    y = jnp.dot(x_ref[...].astype(jnp.bfloat16), w_ref[...],
                preferred_element_type=jnp.float32) + b_ref[...]
    o_ref[...] = jax.nn.sigmoid(y)


def fc3(x, w, b, *, tn=256):
    """Final Linear(2432,4864)+Sigmoid, streaming the bf16 weight over N tiles."""
    M, K = x.shape
    N = w.shape[1]
    assert N % tn == 0
    return pl.pallas_call(
        _fc3_kernel,
        out_shape=jax.ShapeDtypeStruct((M, N), jnp.float32),
        grid=(N // tn,),
        in_specs=[
            pl.BlockSpec((M, K), lambda j: (0, 0)),     # activations resident
            pl.BlockSpec((K, tn), lambda j: (0, j)),    # weight streamed over N
            pl.BlockSpec((1, tn), lambda j: (0, j)),
        ],
        out_specs=pl.BlockSpec((M, tn), lambda j: (0, j)),
        compiler_params=pltpu.CompilerParams(
            dimension_semantics=("parallel",),          # 2-TC sharding on v7x
            vmem_limit_bytes=32 * 1024 * 1024),
    )(x, w, b)


# --------------------------------------------------------------------------- #
# XLA glue: pooling-phase-major im2col (tiny tensors, built once per block)
# --------------------------------------------------------------------------- #

def im2col_pool_order_nhwc(x_nhwc):
    """NHWC -> im2col patches [(2*2)*B*Ho*Wo, C*9] for Conv3x3 'same' + MaxPool2x2.

    Row order: (pool-phase hp, wp, b, oh, ow); column order: (cin, tap) which matches
    the PyTorch weight flattened as [Cout, Cin*3*3].
    """
    B, H, W, C = x_nhwc.shape
    Ho, Wo = H // 2, W // 2
    xp = jnp.pad(x_nhwc, ((0, 0), (1, 1), (1, 1), (0, 0)))
    taps = [xp[:, i:i + H, j:j + W, :] for i in range(3) for j in range(3)]
    p = jnp.stack(taps, axis=4)                    # [B, H, W, C, 9]
    p = p.reshape(B, Ho, 2, Wo, 2, C, 9)           # split H=Ho*2, W=Wo*2
    p = p.transpose(2, 4, 0, 1, 3, 5, 6)           # [2, 2, B, Ho, Wo, C, 9]
    return p.reshape(4 * B * Ho * Wo, C * 9)


# --------------------------------------------------------------------------- #
# Parameters (pre-laid-out, bf16 weights / f32 bias+BN)
# --------------------------------------------------------------------------- #

def init_params(key):
    ks = jax.random.split(key, 10)

    def u(k, shape, fan_in):
        bound = 1.0 / jnp.sqrt(fan_in)
        return jax.random.uniform(k, shape, jnp.float32, -bound, bound)

    p = {}
    # Conv2d(97, 128, 3x3): PyTorch layout [Cout,Cin,3,3] -> [Cin*9, Cout] bf16.
    w1 = u(ks[0], (128, 97, 3, 3), 97 * 9)
    p["conv1_w"] = w1.reshape(128, 97 * 9).T.astype(jnp.bfloat16)
    p["conv1_b"] = u(ks[1], (128,), 97 * 9).reshape(1, 128)
    # Conv2d(128, 128, 3x3)
    w2 = u(ks[2], (128, 128, 3, 3), 128 * 9)
    p["conv2_w"] = w2.reshape(128, 128 * 9).T.astype(jnp.bfloat16)
    p["conv2_b"] = u(ks[3], (128,), 128 * 9).reshape(1, 128)
    # BatchNorm2d defaults: weight=1, bias=0.
    p["bn1_gamma"] = jnp.ones((1, 128), jnp.float32)
    p["bn1_beta"] = jnp.zeros((1, 128), jnp.float32)
    p["bn2_gamma"] = jnp.ones((1, 128), jnp.float32)
    p["bn2_beta"] = jnp.zeros((1, 128), jnp.float32)

    # PolicyHead linears, stored as [in, out].
    fc1_w = u(ks[4], (512, 1024), 512)
    # Permute fc1 rows so an NHWC-flattened activation (h*2+w)*128+c matches
    # PyTorch's NCHW flatten order c*4+h*2+w.
    hh, ww, cc = jnp.meshgrid(jnp.arange(2), jnp.arange(2), jnp.arange(128),
                              indexing="ij")
    nchw_row = (cc * 4 + hh * 2 + ww).reshape(-1)
    p["fc1_w"] = fc1_w[nchw_row, :].astype(jnp.bfloat16)
    p["fc1_b"] = u(ks[5], (1024,), 512).reshape(1, 1024)
    p["fc2_w"] = u(ks[6], (1024, 2432), 1024).astype(jnp.bfloat16)
    p["fc2_b"] = u(ks[7], (2432,), 1024).reshape(1, 2432)
    p["fc3_w"] = u(ks[8], (2432, 4864), 2432).astype(jnp.bfloat16)
    p["fc3_b"] = u(ks[9], (4864,), 2432).reshape(1, 4864)
    return p


# --------------------------------------------------------------------------- #
# Forward pass
# --------------------------------------------------------------------------- #

def network_forward(params, x_nchw, do_softmax=False):
    B = x_nchw.shape[0]

    # Block 1: Conv(97->128) -> MaxPool -> BN -> Sigmoid  (one fused kernel)
    x_nhwc = jnp.transpose(x_nchw, (0, 2, 3, 1))            # [B,8,8,97]
    patches1 = im2col_pool_order_nhwc(x_nhwc)               # [4*B*16, 873]
    h1 = conv_block(patches1, params["conv1_w"], params["conv1_b"],
                    params["bn1_gamma"], params["bn1_beta"])  # [B*16, 128]
    h1 = h1.reshape(B, 4, 4, 128)                           # NHWC pooled activation

    # Block 2: Conv(128->128) -> MaxPool -> BN -> Sigmoid  (one fused kernel)
    patches2 = im2col_pool_order_nhwc(h1)                   # [4*B*4, 1152]
    h2 = conv_block(patches2, params["conv2_w"], params["conv2_b"],
                    params["bn2_gamma"], params["bn2_beta"])  # [B*4, 128]

    # Flatten (NHWC order; fc1_w rows were permuted at init to match NCHW flatten).
    flat = h2.reshape(B, 512)

    # PolicyHead: Linear(512,1024)+Sig and Linear(1024,2432)+Sig fused into one
    # kernel; Linear(2432,4864)+Sig streams its weight over an N-tiled grid.
    h3 = fc12(flat, params["fc1_w"], params["fc1_b"],
              params["fc2_w"], params["fc2_b"])             # [B, 2432]
    y = fc3(h3, params["fc3_w"], params["fc3_b"])           # [B, 4864]

    if do_softmax:
        y = jax.nn.softmax(y, axis=1)
    return y


# --------------------------------------------------------------------------- #
# Main
# --------------------------------------------------------------------------- #

if __name__ == "__main__":
    key = jax.random.PRNGKey(0)
    pkey, xkey = jax.random.split(key)
    params = init_params(pkey)

    # Input spatial size is constrained by Flatten -> Linear(512,...):
    # 128 * (H/4) * (W/4) = 512  =>  H = W = 8.  Input: [B, 97, 8, 8].
    x = jax.random.normal(xkey, (2, 97, 8, 8), jnp.float32)

    fwd = jax.jit(functools.partial(network_forward, do_softmax=False))
    out = jax.block_until_ready(fwd(params, x))
    assert out.shape == (2, 4864), out.shape
    assert bool(jnp.isfinite(out).all())
    print("KERNEL_OK")
</pallas_src>

<mosaic_0001>
module attributes {stable_mosaic.version = 11 : i64} {
  func.func @_conv_pool_bn_sigmoid_kernel(%arg0: i32, %arg1: memref<128x873xf32, #tpu.memory_space<vmem>>, %arg2: memref<873x128xbf16, #tpu.memory_space<vmem>>, %arg3: memref<1x128xf32, #tpu.memory_space<vmem>>, %arg4: memref<1x128xf32, #tpu.memory_space<vmem>>, %arg5: memref<1x128xf32, #tpu.memory_space<vmem>>, %arg6: memref<32x128xf32, #tpu.memory_space<vmem>>, %arg7: memref<128x128xf32, #tpu.memory_space<vmem>>) attributes {dimension_semantics = [#tpu.dimension_semantics<arbitrary>], iteration_bounds = array<i64: 1>, scalar_prefetch = 0 : i64, scratch_operands = 1 : i64, tpu.core_type = #tpu.core_type<tc>, window_params = [{pipeline_mode = #tpu.pipeline_mode<synchronous>, transform_indices = @transform_0, window_bounds = array<i64: 128, 873>}, {pipeline_mode = #tpu.pipeline_mode<synchronous>, transform_indices = @transform_1, window_bounds = array<i64: 873, 128>}, {pipeline_mode = #tpu.pipeline_mode<synchronous>, transform_indices = @transform_2, window_bounds = array<i64: 1, 128>}, {pipeline_mode = #tpu.pipeline_mode<synchronous>, transform_indices = @transform_3, window_bounds = array<i64: 1, 128>}, {pipeline_mode = #tpu.pipeline_mode<synchronous>, transform_indices = @transform_4, window_bounds = array<i64: 1, 128>}, {pipeline_mode = #tpu.pipeline_mode<synchronous>, transform_indices = @transform_5, window_bounds = array<i64: 32, 128>}]} {
    %c0 = arith.constant 0 : index
    %c0_0 = arith.constant 0 : index
    %0 = vector.load %arg1[%c0, %c0_0] : memref<128x873xf32, #tpu.memory_space<vmem>>, vector<128x873xf32>
    %1 = arith.truncf %0 : vector<128x873xf32> to vector<128x873xbf16>
    %c0_1 = arith.constant 0 : index
    %c0_2 = arith.constant 0 : index
    %2 = vector.load %arg2[%c0_1, %c0_2] : memref<873x128xbf16, #tpu.memory_space<vmem>>, vector<873x128xbf16>
    %cst = arith.constant dense<0.000000e+00> : vector<128x128xf32>
    %3 = tpu.matmul %1, %2, %cst {dimension_numbers = #tpu.dot_dimension_numbers<[1], [0], [0], [1], [0, 0, 1, 1], [], []>} : vector<128x873xbf16>, vector<873x128xbf16>, vector<128x128xf32> -> vector<128x128xf32>
    %c0_3 = arith.constant 0 : index
    %c0_4 = arith.constant 0 : index
    %4 = vector.load %arg3[%c0_3, %c0_4] : memref<1x128xf32, #tpu.memory_space<vmem>>, vector<1x128xf32>
    %5 = vector.broadcast %4 : vector<1x128xf32> to vector<128x128xf32>
    %6 = arith.addf %3, %5 : vector<128x128xf32>
    %c0_5 = arith.constant 0 : index
    %c0_6 = arith.constant 0 : index
    %7 = vector.load %arg7[%c0_5, %c0_6] : memref<128x128xf32, #tpu.memory_space<vmem>>, vector<128x128xf32>
    tpu.vector_store %arg7[%c0_5, %c0_6], %6 {strides = array<i32>} : memref<128x128xf32, #tpu.memory_space<vmem>>, vector<128x128xf32>,
    %c0_7 = arith.constant 0 : index
    %c0_8 = arith.constant 0 : index
    %8 = vector.load %arg7[%c0_7, %c0_8] : memref<128x128xf32, #tpu.memory_space<vmem>>, vector<32x128xf32>
    %c32 = arith.constant 32 : index
    %c0_9 = arith.constant 0 : index
    %9 = vector.load %arg7[%c32, %c0_9] : memref<128x128xf32, #tpu.memory_space<vmem>>, vector<32x128xf32>
    %10 = arith.maximumf %8, %9 : vector<32x128xf32>
    %c64 = arith.constant 64 : index
    %c0_10 = arith.constant 0 : index
    %11 = vector.load %arg7[%c64, %c0_10] : memref<128x128xf32, #tpu.memory_space<vmem>>, vector<32x128xf32>
    %c96 = arith.constant 96 : index
    %c0_11 = arith.constant 0 : index
    %12 = vector.load %arg7[%c96, %c0_11] : memref<128x128xf32, #tpu.memory_space<vmem>>, vector<32x128xf32>
    %13 = arith.maximumf %11, %12 : vector<32x128xf32>
    %14 = arith.maximumf %10, %13 : vector<32x128xf32>
    %cst_12 = arith.constant dense<0.000000e+00> : vector<128xf32>
    %15 = vector.multi_reduction <add>, %14, %cst_12 [0] : vector<32x128xf32> to vector<128xf32>
    %16 = vector.shape_cast %15 : vector<128xf32> to vector<1x128xf32>
    %cst_13 = arith.constant 3.200000e+01 : f32
    %17 = vector.broadcast %cst_13 : f32 to vector<1x128xf32>
    %18 = arith.divf %16, %17 : vector<1x128xf32>
    %19 = vector.broadcast %18 : vector<1x128xf32> to vector<32x128xf32>
    %20 = arith.subf %14, %19 : vector<32x128xf32>
    %21 = arith.mulf %20, %20 : vector<32x128xf32>
    %cst_14 = arith.constant dense<0.000000e+00> : vector<128xf32>
    %22 = vector.multi_reduction <add>, %21, %cst_14 [0] : vector<32x128xf32> to vector<128xf32>
    %23 = vector.shape_cast %22 : vector<128xf32> to vector<1x128xf32>
    %cst_15 = arith.constant 3.200000e+01 : f32
    %24 = vector.broadcast %cst_15 : f32 to vector<1x128xf32>
    %25 = arith.divf %23, %24 : vector<1x128xf32>
    %c0_16 = arith.constant 0 : index
    %c0_17 = arith.constant 0 : index
    %26 = vector.load %arg4[%c0_16, %c0_17] : memref<1x128xf32, #tpu.memory_space<vmem>>, vector<1x128xf32>
    %cst_18 = arith.constant 9.99999974E-6 : f32
    %27 = vector.broadcast %cst_18 : f32 to vector<1x128xf32>
    %28 = arith.addf %25, %27 : vector<1x128xf32>
    %29 = math.rsqrt %28 : vector<1x128xf32>
    %30 = arith.mulf %26, %29 : vector<1x128xf32>
    %c0_19 = arith.constant 0 : index
    %c0_20 = arith.constant 0 : index
    %31 = vector.load %arg5[%c0_19, %c0_20] : memref<1x128xf32, #tpu.memory_space<vmem>>, vector<1x128xf32>
    %32 = arith.mulf %18, %30 : vector<1x128xf32>
    %33 = arith.subf %31, %32 : vector<1x128xf32>
    %34 = vector.broadcast %30 : vector<1x128xf32> to vector<32x128xf32>
    %35 = arith.mulf %14, %34 : vector<32x128xf32>
    %36 = vector.broadcast %33 : vector<1x128xf32> to vector<32x128xf32>
    %37 = arith.addf %35, %36 : vector<32x128xf32>
    %38 = arith.negf %37 : vector<32x128xf32>
    %39 = math.exp %38 : vector<32x128xf32>
    %cst_21 = arith.constant 1.000000e+00 : f32
    %40 = vector.broadcast %cst_21 : f32 to vector<32x128xf32>
    %41 = arith.addf %40, %39 : vector<32x128xf32>
    %42 = arith.divf %40, %41 : vector<32x128xf32>
    %c0_22 = arith.constant 0 : index
    %c0_23 = arith.constant 0 : index
    %43 = vector.load %arg6[%c0_22, %c0_23] : memref<32x128xf32, #tpu.memory_space<vmem>>, vector<32x128xf32>
    tpu.vector_store %arg6[%c0_22, %c0_23], %42 {strides = array<i32>} : memref<32x128xf32, #tpu.memory_space<vmem>>, vector<32x128xf32>,
    return
  }
  func.func @transform_0(%arg0: i32) -> (i32, i32) {
    %c0_i32 = arith.constant 0 : i32
    %c0_i32_0 = arith.constant 0 : i32
    %c0_i32_1 = arith.constant 0 : i32
    return %c0_i32, %c0_i32_0 : i32, i32
  }
  func.func @transform_1(%arg0: i32) -> (i32, i32) {
    %c0_i32 = arith.constant 0 : i32
    %c0_i32_0 = arith.constant 0 : i32
    %c0_i32_1 = arith.constant 0 : i32
    return %c0_i32, %c0_i32_0 : i32, i32
  }
  func.func @transform_2(%arg0: i32) -> (i32, i32) {
    %c0_i32 = arith.constant 0 : i32
    %c0_i32_0 = arith.constant 0 : i32
    %c0_i32_1 = arith.constant 0 : i32
    return %c0_i32, %c0_i32_0 : i32, i32
  }
  func.func @transform_3(%arg0: i32) -> (i32, i32) {
    %c0_i32 = arith.constant 0 : i32
    %c0_i32_0 = arith.constant 0 : i32
    %c0_i32_1 = arith.constant 0 : i32
    return %c0_i32, %c0_i32_0 : i32, i32
  }
  func.func @transform_4(%arg0: i32) -> (i32, i32) {
    %c0_i32 = arith.constant 0 : i32
    %c0_i32_0 = arith.constant 0 : i32
    %c0_i32_1 = arith.constant 0 : i32
    return %c0_i32, %c0_i32_0 : i32, i32
  }
  func.func @transform_5(%arg0: i32) -> (i32, i32) {
    %c0_i32 = arith.constant 0 : i32
    %c0_i32_0 = arith.constant 0 : i32
    %c0_i32_1 = arith.constant 0 : i32
    return %c0_i32, %c0_i32_0 : i32, i32
  }
}

module attributes {stable_mosaic.version = 11 : i64} {
  func.func @_conv_pool_bn_sigmoid_kernel(%arg0: i32, %arg1: memref<32x1152xf32, #tpu.memory_space<vmem>>, %arg2: memref<1152x128xbf16, #tpu.memory_space<vmem>>, %arg3: memref<1x128xf32, #tpu.memory_space<vmem>>, %arg4: memref<1x128xf32, #tpu.memory_space<vmem>>, %arg5: memref<1x128xf32, #tpu.memory_space<vmem>>, %arg6: memref<8x128xf32, #tpu.memory_space<vmem>>, %arg7: memref<32x128xf32, #tpu.memory_space<vmem>>) attributes {dimension_semantics = [#tpu.dimension_semantics<arbitrary>], iteration_bounds = array<i64: 1>, scalar_prefetch = 0 : i64, scratch_operands = 1 : i64, tpu.core_type = #tpu.core_type<tc>, window_params = [{pipeline_mode = #tpu.pipeline_mode<synchronous>, transform_indices = @transform_0, window_bounds = array<i64: 32, 1152>}, {pipeline_mode = #tpu.pipeline_mode<synchronous>, transform_indices = @transform_1, window_bounds = array<i64: 1152, 128>}, {pipeline_mode = #tpu.pipeline_mode<synchronous>, transform_indices = @transform_2, window_bounds = array<i64: 1, 128>}, {pipeline_mode = #tpu.pipeline_mode<synchronous>, transform_indices = @transform_3, window_bounds = array<i64: 1, 128>}, {pipeline_mode = #tpu.pipeline_mode<synchronous>, transform_indices = @transform_4, window_bounds = array<i64: 1, 128>}, {pipeline_mode = #tpu.pipeline_mode<synchronous>, transform_indices = @transform_5, window_bounds = array<i64: 8, 128>}]} {
    %c0 = arith.constant 0 : index
    %c0_0 = arith.constant 0 : index
    %0 = vector.load %arg1[%c0, %c0_0] : memref<32x1152xf32, #tpu.memory_space<vmem>>, vector<32x1152xf32>
    %1 = arith.truncf %0 : vector<32x1152xf32> to vector<32x1152xbf16>
    %c0_1 = arith.constant 0 : index
    %c0_2 = arith.constant 0 : index
    %2 = vector.load %arg2[%c0_1, %c0_2] : memref<1152x128xbf16, #tpu.memory_space<vmem>>, vector<1152x128xbf16>
    %cst = arith.constant dense<0.000000e+00> : vector<32x128xf32>
    %3 = tpu.matmul %1, %2, %cst {dimension_numbers = #tpu.dot_dimension_numbers<[1], [0], [0], [1], [0, 0, 1, 1], [], []>} : vector<32x1152xbf16>, vector<1152x128xbf16>, vector<32x128xf32> -> vector<32x128xf32>
    %c0_3 = arith.constant 0 : index
    %c0_4 = arith.constant 0 : index
    %4 = vector.load %arg3[%c0_3, %c0_4] : memref<1x128xf32, #tpu.memory_space<vmem>>, vector<1x128xf32>
    %5 = vector.broadcast %4 : vector<1x128xf32> to vector<32x128xf32>
    %6 = arith.addf %3, %5 : vector<32x128xf32>
    %c0_5 = arith.constant 0 : index
    %c0_6 = arith.constant 0 : index
    %7 = vector.load %arg7[%c0_5, %c0_6] : memref<32x128xf32, #tpu.memory_space<vmem>>, vector<32x128xf32>
    tpu.vector_store %arg7[%c0_5, %c0_6], %6 {strides = array<i32>} : memref<32x128xf32, #tpu.memory_space<vmem>>, vector<32x128xf32>,
    %c0_7 = arith.constant 0 : index
    %c0_8 = arith.constant 0 : index
    %8 = vector.load %arg7[%c0_7, %c0_8] : memref<32x128xf32, #tpu.memory_space<vmem>>, vector<8x128xf32>
    %c8 = arith.constant 8 : index
    %c0_9 = arith.constant 0 : index
    %9 = vector.load %arg7[%c8, %c0_9] : memref<32x128xf32, #tpu.memory_space<vmem>>, vector<8x128xf32>
    %10 = arith.maximumf %8, %9 : vector<8x128xf32>
    %c16 = arith.constant 16 : index
    %c0_10 = arith.constant 0 : index
    %11 = vector.load %arg7[%c16, %c0_10] : memref<32x128xf32, #tpu.memory_space<vmem>>, vector<8x128xf32>
    %c24 = arith.constant 24 : index
    %c0_11 = arith.constant 0 : index
    %12 = vector.load %arg7[%c24, %c0_11] : memref<32x128xf32, #tpu.memory_space<vmem>>, vector<8x128xf32>
    %13 = arith.maximumf %11, %12 : vector<8x128xf32>
    %14 = arith.maximumf %10, %13 : vector<8x128xf32>
    %cst_12 = arith.constant dense<0.000000e+00> : vector<128xf32>
    %15 = vector.multi_reduction <add>, %14, %cst_12 [0] : vector<8x128xf32> to vector<128xf32>
    %16 = vector.shape_cast %15 : vector<128xf32> to vector<1x128xf32>
    %cst_13 = arith.constant 8.000000e+00 : f32
    %17 = vector.broadcast %cst_13 : f32 to vector<1x128xf32>
    %18 = arith.divf %16, %17 : vector<1x128xf32>
    %19 = vector.broadcast %18 : vector<1x128xf32> to vector<8x128xf32>
    %20 = arith.subf %14, %19 : vector<8x128xf32>
    %21 = arith.mulf %20, %20 : vector<8x128xf32>
    %cst_14 = arith.constant dense<0.000000e+00> : vector<128xf32>
    %22 = vector.multi_reduction <add>, %21, %cst_14 [0] : vector<8x128xf32> to vector<128xf32>
    %23 = vector.shape_cast %22 : vector<128xf32> to vector<1x128xf32>
    %cst_15 = arith.constant 8.000000e+00 : f32
    %24 = vector.broadcast %cst_15 : f32 to vector<1x128xf32>
    %25 = arith.divf %23, %24 : vector<1x128xf32>
    %c0_16 = arith.constant 0 : index
    %c0_17 = arith.constant 0 : index
    %26 = vector.load %arg4[%c0_16, %c0_17] : memref<1x128xf32, #tpu.memory_space<vmem>>, vector<1x128xf32>
    %cst_18 = arith.constant 9.99999974E-6 : f32
    %27 = vector.broadcast %cst_18 : f32 to vector<1x128xf32>
    %28 = arith.addf %25, %27 : vector<1x128xf32>
    %29 = math.rsqrt %28 : vector<1x128xf32>
    %30 = arith.mulf %26, %29 : vector<1x128xf32>
    %c0_19 = arith.constant 0 : index
    %c0_20 = arith.constant 0 : index
    %31 = vector.load %arg5[%c0_19, %c0_20] : memref<1x128xf32, #tpu.memory_space<vmem>>, vector<1x128xf32>
    %32 = arith.mulf %18, %30 : vector<1x128xf32>
    %33 = arith.subf %31, %32 : vector<1x128xf32>
    %34 = vector.broadcast %30 : vector<1x128xf32> to vector<8x128xf32>
    %35 = arith.mulf %14, %34 : vector<8x128xf32>
    %36 = vector.broadcast %33 : vector<1x128xf32> to vector<8x128xf32>
    %37 = arith.addf %35, %36 : vector<8x128xf32>
    %38 = arith.negf %37 : vector<8x128xf32>
    %39 = math.exp %38 : vector<8x128xf32>
    %cst_21 = arith.constant 1.000000e+00 : f32
    %40 = vector.broadcast %cst_21 : f32 to vector<8x128xf32>
    %41 = arith.addf %40, %39 : vector<8x128xf32>
    %42 = arith.divf %40, %41 : vector<8x128xf32>
    %c0_22 = arith.constant 0 : index
    %c0_23 = arith.constant 0 : index
    %43 = vector.load %arg6[%c0_22, %c0_23] : memref<8x128xf32, #tpu.memory_space<vmem>>, vector<8x128xf32>
    tpu.vector_store %arg6[%c0_22, %c0_23], %42 {strides = array<i32>} : memref<8x128xf32, #tpu.memory_space<vmem>>, vector<8x128xf32>,
    return
  }
  func.func @transform_0(%arg0: i32) -> (i32, i32) {
    %c0_i32 = arith.constant 0 : i32
    %c0_i32_0 = arith.constant 0 : i32
    %c0_i32_1 = arith.constant 0 : i32
    return %c0_i32, %c0_i32_0 : i32, i32
  }
  func.func @transform_1(%arg0: i32) -> (i32, i32) {
    %c0_i32 = arith.constant 0 : i32
    %c0_i32_0 = arith.constant 0 : i32
    %c0_i32_1 = arith.constant 0 : i32
    return %c0_i32, %c0_i32_0 : i32, i32
  }
  func.func @transform_2(%arg0: i32) -> (i32, i32) {
    %c0_i32 = arith.constant 0 : i32
    %c0_i32_0 = arith.constant 0 : i32
    %c0_i32_1 = arith.constant 0 : i32
    return %c0_i32, %c0_i32_0 : i32, i32
  }
  func.func @transform_3(%arg0: i32) -> (i32, i32) {
    %c0_i32 = arith.constant 0 : i32
    %c0_i32_0 = arith.constant 0 : i32
    %c0_i32_1 = arith.constant 0 : i32
    return %c0_i32, %c0_i32_0 : i32, i32
  }
  func.func @transform_4(%arg0: i32) -> (i32, i32) {
    %c0_i32 = arith.constant 0 : i32
    %c0_i32_0 = arith.constant 0 : i32
    %c0_i32_1 = arith.constant 0 : i32
    return %c0_i32, %c0_i32_0 : i32, i32
  }
  func.func @transform_5(%arg0: i32) -> (i32, i32) {
    %c0_i32 = arith.constant 0 : i32
    %c0_i32_0 = arith.constant 0 : i32
    %c0_i32_1 = arith.constant 0 : i32
    return %c0_i32, %c0_i32_0 : i32, i32
  }
}

module attributes {stable_mosaic.version = 11 : i64} {
  func.func @_fc12_kernel(%arg0: i32, %arg1: memref<2x512xf32, #tpu.memory_space<vmem>>, %arg2: memref<512x1024xbf16, #tpu.memory_space<vmem>>, %arg3: memref<1x1024xf32, #tpu.memory_space<vmem>>, %arg4: memref<1024x2432xbf16, #tpu.memory_space<vmem>>, %arg5: memref<1x2432xf32, #tpu.memory_space<vmem>>, %arg6: memref<2x2432xf32, #tpu.memory_space<vmem>>) attributes {dimension_semantics = [#tpu.dimension_semantics<arbitrary>], iteration_bounds = array<i64: 1>, scalar_prefetch = 0 : i64, scratch_operands = 0 : i64, tpu.core_type = #tpu.core_type<tc>, window_params = [{pipeline_mode = #tpu.pipeline_mode<synchronous>, transform_indices = @transform_0, window_bounds = array<i64: 2, 512>}, {pipeline_mode = #tpu.pipeline_mode<synchronous>, transform_indices = @transform_1, window_bounds = array<i64: 512, 1024>}, {pipeline_mode = #tpu.pipeline_mode<synchronous>, transform_indices = @transform_2, window_bounds = array<i64: 1, 1024>}, {pipeline_mode = #tpu.pipeline_mode<synchronous>, transform_indices = @transform_3, window_bounds = array<i64: 1024, 2432>}, {pipeline_mode = #tpu.pipeline_mode<synchronous>, transform_indices = @transform_4, window_bounds = array<i64: 1, 2432>}, {pipeline_mode = #tpu.pipeline_mode<synchronous>, transform_indices = @transform_5, window_bounds = array<i64: 2, 2432>}]} {
    %c0 = arith.constant 0 : index
    %c0_0 = arith.constant 0 : index
    %0 = vector.load %arg1[%c0, %c0_0] : memref<2x512xf32, #tpu.memory_space<vmem>>, vector<2x512xf32>
    %1 = arith.truncf %0 : vector<2x512xf32> to vector<2x512xbf16>
    %c0_1 = arith.constant 0 : index
    %c0_2 = arith.constant 0 : index
    %2 = vector.load %arg2[%c0_1, %c0_2] : memref<512x1024xbf16, #tpu.memory_space<vmem>>, vector<512x1024xbf16>
    %cst = arith.constant dense<0.000000e+00> : vector<2x1024xf32>
    %3 = tpu.matmul %1, %2, %cst {dimension_numbers = #tpu.dot_dimension_numbers<[1], [0], [0], [1], [0, 0, 1, 1], [], []>} : vector<2x512xbf16>, vector<512x1024xbf16>, vector<2x1024xf32> -> vector<2x1024xf32>
    %c0_3 = arith.constant 0 : index
    %c0_4 = arith.constant 0 : index
    %4 = vector.load %arg3[%c0_3, %c0_4] : memref<1x1024xf32, #tpu.memory_space<vmem>>, vector<1x1024xf32>
    %5 = vector.broadcast %4 : vector<1x1024xf32> to vector<2x1024xf32>
    %6 = arith.addf %3, %5 : vector<2x1024xf32>
    %7 = arith.negf %6 : vector<2x1024xf32>
    %8 = math.exp %7 : vector<2x1024xf32>
    %cst_5 = arith.constant 1.000000e+00 : f32
    %9 = vector.broadcast %cst_5 : f32 to vector<2x1024xf32>
    %10 = arith.addf %9, %8 : vector<2x1024xf32>
    %11 = arith.divf %9, %10 : vector<2x1024xf32>
    %12 = arith.truncf %11 : vector<2x1024xf32> to vector<2x1024xbf16>
    %c0_6 = arith.constant 0 : index
    %c0_7 = arith.constant 0 : index
    %13 = vector.load %arg4[%c0_6, %c0_7] : memref<1024x2432xbf16, #tpu.memory_space<vmem>>, vector<1024x2432xbf16>
    %cst_8 = arith.constant dense<0.000000e+00> : vector<2x2432xf32>
    %14 = tpu.matmul %12, %13, %cst_8 {dimension_numbers = #tpu.dot_dimension_numbers<[1], [0], [0], [1], [0, 0, 1, 1], [], []>} : vector<2x1024xbf16>, vector<1024x2432xbf16>, vector<2x2432xf32> -> vector<2x2432xf32>
    %c0_9 = arith.constant 0 : index
    %c0_10 = arith.constant 0 : index
    %15 = vector.load %arg5[%c0_9, %c0_10] : memref<1x2432xf32, #tpu.memory_space<vmem>>, vector<1x2432xf32>
    %16 = vector.broadcast %15 : vector<1x2432xf32> to vector<2x2432xf32>
    %17 = arith.addf %14, %16 : vector<2x2432xf32>
    %18 = arith.negf %17 : vector<2x2432xf32>
    %19 = math.exp %18 : vector<2x2432xf32>
    %cst_11 = arith.constant 1.000000e+00 : f32
    %20 = vector.broadcast %cst_11 : f32 to vector<2x2432xf32>
    %21 = arith.addf %20, %19 : vector<2x2432xf32>
    %22 = arith.divf %20, %21 : vector<2x2432xf32>
    %c0_12 = arith.constant 0 : index
    %c0_13 = arith.constant 0 : index
    %23 = vector.load %arg6[%c0_12, %c0_13] : memref<2x2432xf32, #tpu.memory_space<vmem>>, vector<2x2432xf32>
    tpu.vector_store %arg6[%c0_12, %c0_13], %22 {strides = array<i32>} : memref<2x2432xf32, #tpu.memory_space<vmem>>, vector<2x2432xf32>,
    return
  }
  func.func @transform_0(%arg0: i32) -> (i32, i32) {
    %c0_i32 = arith.constant 0 : i32
    %c0_i32_0 = arith.constant 0 : i32
    %c0_i32_1 = arith.constant 0 : i32
    return %c0_i32, %c0_i32_0 : i32, i32
  }
  func.func @transform_1(%arg0: i32) -> (i32, i32) {
    %c0_i32 = arith.constant 0 : i32
    %c0_i32_0 = arith.constant 0 : i32
    %c0_i32_1 = arith.constant 0 : i32
    return %c0_i32, %c0_i32_0 : i32, i32
  }
  func.func @transform_2(%arg0: i32) -> (i32, i32) {
    %c0_i32 = arith.constant 0 : i32
    %c0_i32_0 = arith.constant 0 : i32
    %c0_i32_1 = arith.constant 0 : i32
    return %c0_i32, %c0_i32_0 : i32, i32
  }
  func.func @transform_3(%arg0: i32) -> (i32, i32) {
    %c0_i32 = arith.constant 0 : i32
    %c0_i32_0 = arith.constant 0 : i32
    %c0_i32_1 = arith.constant 0 : i32
    return %c0_i32, %c0_i32_0 : i32, i32
  }
  func.func @transform_4(%arg0: i32) -> (i32, i32) {
    %c0_i32 = arith.constant 0 : i32
    %c0_i32_0 = arith.constant 0 : i32
    %c0_i32_1 = arith.constant 0 : i32
    return %c0_i32, %c0_i32_0 : i32, i32
  }
  func.func @transform_5(%arg0: i32) -> (i32, i32) {
    %c0_i32 = arith.constant 0 : i32
    %c0_i32_0 = arith.constant 0 : i32
    %c0_i32_1 = arith.constant 0 : i32
    return %c0_i32, %c0_i32_0 : i32, i32
  }
}

module attributes {stable_mosaic.version = 11 : i64} {
  func.func @_fc3_kernel(%arg0: i32, %arg1: memref<2x2432xf32, #tpu.memory_space<vmem>>, %arg2: memref<2432x256xbf16, #tpu.memory_space<vmem>>, %arg3: memref<1x256xf32, #tpu.memory_space<vmem>>, %arg4: memref<2x256xf32, #tpu.memory_space<vmem>>) attributes {dimension_semantics = [#tpu.dimension_semantics<parallel>], iteration_bounds = array<i64: 19>, scalar_prefetch = 0 : i64, scratch_operands = 0 : i64, tpu.core_type = #tpu.core_type<tc>, window_params = [{pipeline_mode = #tpu.pipeline_mode<synchronous>, transform_indices = @transform_0, window_bounds = array<i64: 2, 2432>}, {transform_indices = @transform_1, window_bounds = array<i64: 2432, 256>}, {transform_indices = @transform_2, window_bounds = array<i64: 1, 256>}, {transform_indices = @transform_3, window_bounds = array<i64: 2, 256>}]} {
    %c0 = arith.constant 0 : index
    %c0_0 = arith.constant 0 : index
    %0 = vector.load %arg1[%c0, %c0_0] : memref<2x2432xf32, #tpu.memory_space<vmem>>, vector<2x2432xf32>
    %1 = arith.truncf %0 : vector<2x2432xf32> to vector<2x2432xbf16>
    %c0_1 = arith.constant 0 : index
    %c0_2 = arith.constant 0 : index
    %2 = vector.load %arg2[%c0_1, %c0_2] : memref<2432x256xbf16, #tpu.memory_space<vmem>>, vector<2432x256xbf16>
    %cst = arith.constant dense<0.000000e+00> : vector<2x256xf32>
    %3 = tpu.matmul %1, %2, %cst {dimension_numbers = #tpu.dot_dimension_numbers<[1], [0], [0], [1], [0, 0, 1, 1], [], []>} : vector<2x2432xbf16>, vector<2432x256xbf16>, vector<2x256xf32> -> vector<2x256xf32>
    %c0_3 = arith.constant 0 : index
    %c0_4 = arith.constant 0 : index
    %4 = vector.load %arg3[%c0_3, %c0_4] : memref<1x256xf32, #tpu.memory_space<vmem>>, vector<1x256xf32>
    %5 = vector.broadcast %4 : vector<1x256xf32> to vector<2x256xf32>
    %6 = arith.addf %3, %5 : vector<2x256xf32>
    %7 = arith.negf %6 : vector<2x256xf32>
    %8 = math.exp %7 : vector<2x256xf32>
    %cst_5 = arith.constant 1.000000e+00 : f32
    %9 = vector.broadcast %cst_5 : f32 to vector<2x256xf32>
    %10 = arith.addf %9, %8 : vector<2x256xf32>
    %11 = arith.divf %9, %10 : vector<2x256xf32>
    %c0_6 = arith.constant 0 : index
    %c0_7 = arith.constant 0 : index
    %12 = vector.load %arg4[%c0_6, %c0_7] : memref<2x256xf32, #tpu.memory_space<vmem>>, vector<2x256xf32>
    tpu.vector_store %arg4[%c0_6, %c0_7], %11 {strides = array<i32>} : memref<2x256xf32, #tpu.memory_space<vmem>>, vector<2x256xf32>,
    return
  }
  func.func @transform_0(%arg0: i32) -> (i32, i32) {
    %c0_i32 = arith.constant 0 : i32
    %c0_i32_0 = arith.constant 0 : i32
    %c0_i32_1 = arith.constant 0 : i32
    return %c0_i32, %c0_i32_0 : i32, i32
  }
  func.func @transform_1(%arg0: i32) -> (i32, i32) {
    %c0_i32 = arith.constant 0 : i32
    %c0_i32_0 = arith.constant 0 : i32
    return %c0_i32, %arg0 : i32, i32
  }
  func.func @transform_2(%arg0: i32) -> (i32, i32) {
    %c0_i32 = arith.constant 0 : i32
    %c0_i32_0 = arith.constant 0 : i32
    return %c0_i32, %arg0 : i32, i32
  }
  func.func @transform_3(%arg0: i32) -> (i32, i32) {
    %c0_i32 = arith.constant 0 : i32
    %c0_i32_0 = arith.constant 0 : i32
    return %c0_i32, %arg0 : i32, i32
  }
}

</mosaic_0001>

<bundles_post_ra>
// kernel: network_forward.4
= control target key start
LH: loop header
LB: loop body
LE: loop exit
PB: predicated region body
PF: predicated region fallthrough
CT: control target
= control target key end

     0   :  { %vm660_vm0 = vcmask 1043456   ;;  %vm661_vm1 = vcmask 1044480   ;;  %vm635_vm2 = vcmask 859136   ;;  %s2206_s1 = inlined_call_operand.vmem [shape: bf16[873,128], index: 1, kind: input, shape index: {}]   ;;  %s2207_s0 = inlined_call_operand.vmem [shape: f32[128,873], index: 0, kind: input, shape index: {}]   ;;  %s2208_s2 = inlined_call_operand.vmem [shape: f32[1,128], index: 2, kind: input, shape index: {}]   ;;  %s2209_s3 = inlined_call_operand.vmem [shape: f32[1,128], index: 3, kind: input, shape index: {}]   ;;  %s2210_s4 = inlined_call_operand.vmem [shape: f32[1,128], index: 4, kind: input, shape index: {}]   ;;  %s2211_s5 = inlined_call_operand.vmem [shape: f32[32,128], index: 5, kind: output, shape index: {}]  }
   0x1   :  { %v1493_v0 = vld [vmem:[%s2206_s1 + $0x40] sm:$0xff]   ;;  %v1497_v4 = vld [vmem:[%s2206_s1 + $0x48] sm:$0xff]   ;;  %v1501_v8 = vld [vmem:[%s2206_s1 + $0x50] sm:$0xff]  }
   0x2   :  { %v1494_v1 = vld [vmem:[%s2206_s1] sm:$0xff]   ;;  %1255 = vmatprep.subr.bf16.mxu0 %v1493_v0  ;;  %v1498_v5 = vld [vmem:[%s2206_s1 + $0x8] sm:$0xff]   ;;  %v1502_v9 = vld [vmem:[%s2206_s1 + $0x10] sm:$0xff]  }
   0x3   :  { %v1495_v2 = vld [vmem:[%s2206_s1 + $0xc0] sm:$0xff]   ;;  %1256 = vmatpush3.bf16.msra.mxu0 %v1494_v1  ;;  %v1499_v6 = vld [vmem:[%s2206_s1 + $0xc8] sm:$0xff]   ;;  %v1503_v10 = vld [vmem:[%s2206_s1 + $0xd0] sm:$0xff]  }
   0x4   :  { %v1496_v3 = vld [vmem:[%s2206_s1 + $0x80] sm:$0xff]   ;;  %1319 = vmatprep.subr.bf16.mxu1 %v1495_v2  ;;  %1257 = vmatprep.subr.bf16.mxu0 %v1497_v4  ;;  %v1500_v7 = vld [vmem:[%s2206_s1 + $0x88] sm:$0xff]   ;;  %v1504_v11 = vld [vmem:[%s2206_s1 + $0x90] sm:$0xff]  }
   0x5   :  { %1320 = vmatpush3.bf16.msra.mxu1 %v1496_v3  ;;  %v1505_v12 = vld [vmem:[%s2206_s1 + $0x58] sm:$0xff]   ;;  %v1509_v16 = vld [vmem:[%s2206_s1 + $0x60] sm:$0xff]   ;;  %v1513_v20 = vld [vmem:[%s2206_s1 + $0x68] sm:$0xff]  }
   0x6   :  { %1321 = vmatprep.subr.bf16.mxu1 %v1499_v6  ;;  %v1506_v13 = vld [vmem:[%s2206_s1 + $0x18] sm:$0xff]   ;;  %v1510_v17 = vld [vmem:[%s2206_s1 + $0x20] sm:$0xff]   ;;  %v1514_v21 = vld [vmem:[%s2206_s1 + $0x28] sm:$0xff]  }
   0x7   :  { %1258 = vmatpush3.bf16.msra.mxu0 %v1498_v5  ;;  %v1507_v14 = vld [vmem:[%s2206_s1 + $0xd8] sm:$0xff]   ;;  %v1511_v18 = vld [vmem:[%s2206_s1 + $0xe0] sm:$0xff]   ;;  %v1515_v22 = vld [vmem:[%s2206_s1 + $0xe8] sm:$0xff]  }
   0x8   :  { %1259 = vmatprep.subr.bf16.mxu0 %v1501_v8  ;;  %v1508_v15 = vld [vmem:[%s2206_s1 + $0x98] sm:$0xff]   ;;  %v1512_v19 = vld [vmem:[%s2206_s1 + $0xa0] sm:$0xff]   ;;  %v1516_v23 = vld [vmem:[%s2206_s1 + $0xa8] sm:$0xff]  }
   0x9   :  { %1322 = vmatpush3.bf16.msra.mxu1 %v1500_v7  ;;  %v1517_v24 = vld [vmem:[%s2206_s1 + $0x70] sm:$0xff]   ;;  %v1521_v28 = vld [vmem:[%s2206_s1 + $0x78] sm:$0xff]   ;;  %v22_v31 = vld [vmem:[%s2207_s0 + $0x8] sm:$0xff] }
   0xa   :  { %1323 = vmatprep.subr.bf16.mxu1 %v1503_v10  ;;  %v1518_v25 = vld [vmem:[%s2206_s1 + $0x30] sm:$0xff]   ;;  %v1522_v29 = vld [vmem:[%s2206_s1 + $0x38] sm:$0xff]   ;;  %v29_v32 = vld [vmem:[%s2207_s0 + $0x40] sm:$0xff] }
   0xb   :  { %1260 = vmatpush3.bf16.msra.mxu0 %v1502_v9  ;;  %v1519_v26 = vld [vmem:[%s2206_s1 + $0xf0] sm:$0xff]   ;;  %v1523_v30 = vld [vmem:[%s2206_s1 + $0xf8] sm:$0xff]   ;;  %v134_v33 = vpack.c.bf16 %v29_v32, %v22_v31  ;;  %v21_v35 = vld [vmem:[%s2207_s0] sm:$0xff] }
   0xc   :  { %1261 = vmatprep.subr.bf16.mxu0 %v1505_v12  ;;  %v1520_v27 = vld [vmem:[%s2206_s1 + $0xb0] sm:$0xff]   ;;  %v1524_v34 = vld [vmem:[%s2206_s1 + $0xb8] sm:$0xff]   ;;  %v1525_v38 = vld [vmem:[%s2206_s1 + $0x140] sm:$0xff]  }
   0xd   :  { %1324 = vmatpush3.bf16.msra.mxu1 %v1504_v11  ;;  %v28_v36 = vld [vmem:[%s2207_s0 + $0x38] sm:$0xff]  ;;  %699 = vmatprep.mubr.bf16.mxu0 %v134_v33  ;;  %v31_v40 = vld [vmem:[%s2207_s0 + $0x50] sm:$0xff]  ;;  %v1526_v42 = vld [vmem:[%s2206_s1 + $0x100] sm:$0xff]  }
   0xe   :  { %1325 = vmatprep.subr.bf16.mxu1 %v1507_v14  ;;  %v133_v37 = vpack.c.bf16 %v28_v36, %v21_v35  ;;  %v24_v39 = vld [vmem:[%s2207_s0 + $0x18] sm:$0xff]  ;;  %v23_v43 = vld [vmem:[%s2207_s0 + $0x10] sm:$0xff]  ;;  %v30_v44 = vld [vmem:[%s2207_s0 + $0x48] sm:$0xff] }
   0xf   :  { %1262 = vmatpush3.bf16.msra.mxu0 %v1506_v13  ;;  %v136_v41 = vpack.c.bf16 %v31_v40, %v24_v39  ;;  %v36_v45 = vld [vmem:[%s2207_s0 + $0x78] sm:$0xff]  ;;  %v135_v46 = vpack.c.bf16 %v30_v44, %v23_v43  ;;  %v43_v47 = vld [vmem:[%s2207_s0 + $0xb0] sm:$0xff]  ;;  %v42_v49 = vld [vmem:[%s2207_s0 + $0xa8] sm:$0xff] }
  0x10   :  { %1263 = vmatprep.subr.bf16.mxu0 %v1509_v16  ;;  %v35_v48 = vld [vmem:[%s2207_s0 + $0x70] sm:$0xff]  ;;  %v141_v50 = vpack.c.bf16 %v43_v47, %v36_v45  ;;  %v1527_v51 = vld [vmem:[%s2206_s1 + $0x148] sm:$0xff]   ;;  %v45_v53 = vld [vmem:[%s2207_s0 + $0xc0] sm:$0xff] }
  0x11   :  { %1326 = vmatpush3.bf16.msra.mxu1 %v1508_v15  ;;  %796 = vmatprep.mubr.bf16.mxu1 %v136_v41  ;;  %v38_v52 = vld [vmem:[%s2207_s0 + $0x88] sm:$0xff]  ;;  %v140_v54 = vpack.c.bf16 %v42_v49, %v35_v48  ;;  %v37_v57 = vld [vmem:[%s2207_s0 + $0x80] sm:$0xff]  ;;  %v44_v58 = vld [vmem:[%s2207_s0 + $0xb8] sm:$0xff] }
  0x12   :  { %1327 = vmatprep.subr.bf16.mxu1 %v1511_v18  ;;  %v143_v55 = vpack.c.bf16 %v45_v53, %v38_v52  ;;  %v1528_v56 = vld [vmem:[%s2206_s1 + $0x108] sm:$0xff]   ;;  %v57_v60 = vld [vmem:[%s2207_s0 + $0x120] sm:$0xff]  ;;  %v142_v62 = vpack.c.bf16 %v44_v58, %v37_v57  ;;  %v1529_v63 = vld [vmem:[%s2206_s1 + $0x150] sm:$0xff]  }
  0x13   :  { %1264 = vmatpush3.bf16.msra.mxu0 %v1510_v17  ;;  %v50_v59 = vld [vmem:[%s2207_s0 + $0xe8] sm:$0xff]  ;;  %v52_v0 = vld [vmem:[%s2207_s0 + $0xf8] sm:$0xff]  ;;  %v59_v1 = vld [vmem:[%s2207_s0 + $0x130] sm:$0xff] }
  0x14   :  { %1265 = vmatprep.subr.bf16.mxu0 %v1513_v20  ;;  %v148_v61 = vpack.c.bf16 %v57_v60, %v50_v59  ;;  %v49_v2 = vld [vmem:[%s2207_s0 + $0xe0] sm:$0xff]  ;;  %v56_v3 = vld [vmem:[%s2207_s0 + $0x118] sm:$0xff]  ;;  %v150_v4 = vpack.c.bf16 %v59_v1, %v52_v0  ;;  %v1530_v5 = vld [vmem:[%s2206_s1 + $0x110] sm:$0xff]   ;;  %v1566_v1 = vmov 65535  }
  0x15   :  { %1328 = vmatpush3.bf16.msra.mxu1 %v1512_v19  ;;  %v51_v6 = vld [vmem:[%s2207_s0 + $0xf0] sm:$0xff]  ;;  %v64_v7 = vld [vmem:[%s2207_s0 + $0x158] sm:$0xff]  ;;  %v58_v9 = vld [vmem:[%s2207_s0 + $0x128] sm:$0xff]  ;;  %v147_v10 = vpack.c.bf16 %v56_v3, %v49_v2  ;;  %v662_v2 = vsel %vm660_vm0, 4294967295, %v1566_v1 }
  0x16   :  { %1329 = vmatprep.subr.bf16.mxu1 %v1515_v22  ;;  %v71_v8 = vld [vmem:[%s2207_s0 + $0x190] sm:$0xff]  ;;  %v1531_v11 = vld [vmem:[%s2206_s1 + $0x158] sm:$0xff]   ;;  %v66_v12 = vld [vmem:[%s2207_s0 + $0x168] sm:$0xff]  ;;  %v149_v16 = vpack.c.bf16 %v58_v9, %v51_v6 }
  0x17   :  { %1266 = vmatpush3.bf16.msra.mxu0 %v1514_v21  ;;  %v73_v13 = vld [vmem:[%s2207_s0 + $0x1a0] sm:$0xff]  ;;  %v155_v14 = vpack.c.bf16 %v71_v8, %v64_v7  ;;  %v1532_v15 = vld [vmem:[%s2206_s1 + $0x118] sm:$0xff]   ;;  %v63_v17 = vld [vmem:[%s2207_s0 + $0x150] sm:$0xff]  ;;  %v663_v7 = vsel %vm661_vm1, %v662_v2, 0 }
  0x18   :  { %1267 = vmatprep.subr.bf16.mxu0 %v1517_v24  ;;  %v70_v18 = vld [vmem:[%s2207_s0 + $0x188] sm:$0xff]  ;;  %v157_v19 = vpack.c.bf16 %v73_v13, %v66_v12  ;;  %v1533_v20 = vld [vmem:[%s2206_s1 + $0x160] sm:$0xff]   ;;  %v92_v39 = vld [vmem:[%s2207_s0 + $0x238] sm:$0xff] }
  0x19   :  { %1330 = vmatpush3.bf16.msra.mxu1 %v1516_v23  ;;  %v1534_v21 = vld [vmem:[%s2206_s1 + $0x180] sm:$0xff]   ;;  %v78_v22 = vld [vmem:[%s2207_s0 + $0x1c8] sm:$0xff]  ;;  %v99_v40 = vld [vmem:[%s2207_s0 + $0x270] sm:$0xff] }
  0x1a   :  { %1331 = vmatprep.subr.bf16.mxu1 %v1519_v26  ;;  %v85_v23 = vld [vmem:[%s2207_s0 + $0x200] sm:$0xff]  ;;  %v1536_v31 = vld [vmem:[%s2206_s1 + $0x168] sm:$0xff]   ;;  %v1539_v43 = vld [vmem:[%s2206_s1 + $0x170] sm:$0xff]   ;;  %v169_v44 = vpack.c.bf16 %v99_v40, %v92_v39 }
  0x1b   :  { %1268 = vmatpush3.bf16.msra.mxu0 %v1518_v25  ;;  %v1535_v24 = vld [vmem:[%s2206_s1 + $0x120] sm:$0xff]   ;;  %v154_v25 = vpack.c.bf16 %v70_v18, %v63_v17  ;;  %v1537_v36 = vld [vmem:[%s2206_s1 + $0x128] sm:$0xff]   ;;  %v1540_v47 = vld [vmem:[%s2206_s1 + $0x190] sm:$0xff]  }
  0x1c   :  { %1269 = vmatprep.subr.bf16.mxu0 %v1521_v28  ;;  %v65_v26 = vld [vmem:[%s2207_s0 + $0x160] sm:$0xff]  ;;  %v162_v28 = vpack.c.bf16 %v85_v23, %v78_v22  ;;  %v86_v41 = vld [vmem:[%s2207_s0 + $0x208] sm:$0xff]  ;;  %v1541_v48 = vld [vmem:[%s2206_s1 + $0x130] sm:$0xff]  }
  0x1d   :  { %1332 = vmatpush3.bf16.msra.mxu1 %v1520_v27  ;;  %v72_v27 = vld [vmem:[%s2207_s0 + $0x198] sm:$0xff]  ;;  %v77_v33 = vld [vmem:[%s2207_s0 + $0x1c0] sm:$0xff]  ;;  %v94_v45 = vld [vmem:[%s2207_s0 + $0x248] sm:$0xff] }
  0x1e   :  { %1333 = vmatprep.subr.bf16.mxu1 %v1523_v30  ;;  %v87_v30 = vld [vmem:[%s2207_s0 + $0x210] sm:$0xff]  ;;  %v156_v32 = vpack.c.bf16 %v72_v27, %v65_v26  ;;  %v1542_v52 = vld [vmem:[%s2206_s1 + $0x198] sm:$0xff]   ;;  %v98_v53 = vld [vmem:[%s2207_s0 + $0x268] sm:$0xff] }
  0x1f   :  { %1270 = vmatpush3.bf16.msra.mxu0 %v1522_v29  ;;  %v80_v29 = vld [vmem:[%s2207_s0 + $0x1d8] sm:$0xff]  ;;  %v1544_v58 = vld [vmem:[%s2206_s1 + $0x1a0] sm:$0xff]   ;;  %v1547_v9 = vld [vmem:[%s2206_s1 + $0x1b0] sm:$0x1f]  }
  0x20   :  { %1383 = vmatprep.subr.bf16.mxu0 %v1525_v38  ;;  %v164_v35 = vpack.c.bf16 %v87_v30, %v80_v29  ;;  %v79_v38 = vld [vmem:[%s2207_s0 + $0x1d0] sm:$0xff]  ;;  %v1543_v57 = vld [vmem:[%s2206_s1 + $0x178] sm:$0xff]   ;;  %v665_v12 = vand.u32 %v1547_v9, %v663_v7  ;;  %v122_v17 = vld [vmem:[%s2207_s0 + $0x328] sm:$0xff] }
  0x21   :  { %1334 = vmatpush3.bf16.msra.mxu1 %v1524_v34  ;;  %v84_v34 = vld [vmem:[%s2207_s0 + $0x1f8] sm:$0xff]  ;;  %v163_v49 = vpack.c.bf16 %v86_v41, %v79_v38  ;;  %v129_v18 = vld [vmem:[%s2207_s0 + $0x360] sm:$0xff]  ;;  %v126_v22 = vld [vmem:[%s2207_s0 + $0x348] sm:$0xff] }
  0x22   :  { %700 = vmatmul.mubr.bf16.vlgmr.msra.gmra.mrb[0].mxu0 %v133_v37  ;;  %1462 = vmatprep.subr.bf16.mxu1 %v1534_v21  ;;  %v1538_v37 = vld [vmem:[%s2206_s1 + $0x188] sm:$0xff]   ;;  %v100_v60 = vld [vmem:[%s2207_s0 + $0x278] sm:$0xff]  ;;  %v121_v26 = vld [vmem:[%s2207_s0 + $0x320] sm:$0xff] }
  0x23   :  { %1384 = vmatpush3.bf16.msra.mxu0 %v1526_v42  ;;  %707 = vmatprep.mubr.bf16.mxu0 %v141_v50  ;;  %v161_v42 = vpack.c.bf16 %v84_v34, %v77_v33  ;;  %v91_v50 = vld [vmem:[%s2207_s0 + $0x230] sm:$0xff]  ;;  %v1545_v0 = vld [vmem:[%s2206_s1 + $0x138] sm:$0xff]   ;;  %v26_v23 = vld [vmem:[%s2207_s0 + $0x28] sm:$0xff] }
  0x24   :  { %797 = vmatmul.mubr.bf16.vlgmr.msra.gmra.mrb[0].mxu1 %v135_v46  ;;  %1385 = vmatprep.subr.bf16.mxu0 %v1527_v51  ;;  %v101_v46 = vld [vmem:[%s2207_s0 + $0x280] sm:$0xff]  ;;  %v168_v59 = vpack.c.bf16 %v98_v53, %v91_v50  ;;  %v112_v8 = vld [vmem:[%s2207_s0 + $0x2d8] sm:$0xff]  ;;  %v27_v29 = vld [vmem:[%s2207_s0 + $0x30] sm:$0xff] }
  0x25   :  { %804 = vmatprep.mubr.bf16.mxu1 %v143_v55  ;;  %1463 = vmatpush3.bf16.msra.mxu1 %v1534_v21  ;;  %v171_v51 = vpack.c.bf16 %v101_v46, %v94_v45  ;;  %v113_v55 = vld [vmem:[%s2207_s0 + $0x2e0] sm:$0xff]  ;;  %v119_v21 = vld [vmem:[%s2207_s0 + $0x310] sm:$0xff]  ;;  %v128_v27 = vld [vmem:[%s2207_s0 + $0x358] sm:$0xff] }
  0x26   :  { %1464 = vmatprep.subr.bf16.mxu1 %v1538_v37  ;;  %v34_v30 = vld [vmem:[%s2207_s0 + $0x68] sm:$0xff]  ;;  %v25_v33 = vld [vmem:[%s2207_s0 + $0x20] sm:$0xff]  ;;  %v32_v34 = vld [vmem:[%s2207_s0 + $0x58] sm:$0xff] }
  0x27   :  { %1386 = vmatpush3.bf16.msra.mxu0 %v1528_v56  ;;  %v93_v56 = vld [vmem:[%s2207_s0 + $0x240] sm:$0xff]  ;;  %v48_v39 = vld [vmem:[%s2207_s0 + $0xd8] sm:$0xff]  ;;  %v55_v41 = vld [vmem:[%s2207_s0 + $0x110] sm:$0xff] }
  0x28   :  { %1387 = vmatprep.subr.bf16.mxu0 %v1529_v63  ;;  %v115_v63 = vld [vmem:[%s2207_s0 + $0x2f0] sm:$0xff]  ;;  %v170_v3 = vpack.c.bf16 %v100_v60, %v93_v56  ;;  %v41_v38 = vld [vmem:[%s2207_s0 + $0xa0] sm:$0xff]  ;;  %v46_v46 = vld [vmem:[%s2207_s0 + $0xc8] sm:$0xff] }
  0x29   :  { %1465 = vmatpush3.bf16.msra.mxu1 %v1538_v37  ;;  %v137_v37 = vpack.c.bf16 %v32_v34, %v25_v33  ;;  %v39_v45 = vld [vmem:[%s2207_s0 + $0x90] sm:$0xff]  ;;  %v69_v50 = vld [vmem:[%s2207_s0 + $0x180] sm:$0xff]  ;;  %v118_v2 = vld [vmem:[%s2207_s0 + $0x308] sm:$0xff] }
  0x2a   :  { %708 = vmatmul.mubr.bf16.gmra.mrb[4].mxu0 %v140_v54  ;;  %1466 = vmatprep.subr.bf16.mxu1 %v1540_v47  ;;  %v106_v54 = vld [vmem:[%s2207_s0 + $0x2a8] sm:$0xff]  ;;  %v83_v53 = vld [vmem:[%s2207_s0 + $0x1f0] sm:$0xff] }
  0x2b   :  { %715 = vmatprep.mubr.bf16.mxu0 %v148_v61  ;;  %1388 = vmatpush3.bf16.msra.mxu0 %v1530_v5  ;;  %v108_v61 = vld [vmem:[%s2207_s0 + $0x2b8] sm:$0xff]  ;;  %v105_v5 = vld [vmem:[%s2207_s0 + $0x2a0] sm:$0xff]  ;;  %v75_v60 = vld [vmem:[%s2207_s0 + $0x1b0] sm:$0xff] }
  0x2c   :  { %805 = vmatmul.mubr.bf16.gmra.mrb[4].mxu1 %v142_v62  ;;  %1389 = vmatprep.subr.bf16.mxu0 %v1531_v11  ;;  %v176_v62 = vpack.c.bf16 %v113_v55, %v106_v54  ;;  %v178_v6 = vpack.c.bf16 %v115_v63, %v108_v61  ;;  %v127_v11 = vld [vmem:[%s2207_s0 + $0x350] sm:$0xff]  ;;  %v175_v13 = vpack.c.bf16 %v112_v8, %v105_v5  ;;  %v90_v54 = vld [vmem:[%s2207_s0 + $0x228] sm:$0xff]  ;;  %v104_v63 = vld [vmem:[%s2207_s0 + $0x298] sm:$0xff] }
  0x2d   :  { %812 = vmatprep.mubr.bf16.mxu1 %v150_v4  ;;  %1467 = vmatpush3.bf16.msra.mxu1 %v1540_v47  ;;  %v1546_v4 = vld [vmem:[%s2206_s1 + $0x1a8] sm:$0xff]   ;;  %v167_v56 = vpack.c.bf16 %v90_v54, %v83_v53  ;;  %v111_v1 = vld [vmem:[%s2207_s0 + $0x2d0] sm:$0xff]  ;;  %v89_v8 = vld [vmem:[%s2207_s0 + $0x220] sm:$0xff] }
  0x2e   :  { %1468 = vmatprep.subr.bf16.mxu1 %v1542_v52  ;;  %v54_v47 = vld [vmem:[%s2207_s0 + $0x108] sm:$0xff]  ;;  %v67_v5 = vld [vmem:[%s2207_s0 + $0x170] sm:$0xff] }
  0x2f   :  { %1390 = vmatpush3.bf16.msra.mxu0 %v1532_v15  ;;  %v114_v15 = vld [vmem:[%s2207_s0 + $0x2e8] sm:$0xff] }
  0x30   :  { %1391 = vmatprep.subr.bf16.mxu0 %v1533_v20  ;;  %v185_v20 = vpack.c.bf16 %v129_v18, %v122_v17  ;;  %v82_v7 = vld [vmem:[%s2207_s0 + $0x1e8] sm:$0xff]  ;;  %v103_v17 = vld [vmem:[%s2207_s0 + $0x290] sm:$0xff] }
  0x31   :  { %1469 = vmatpush3.bf16.msra.mxu1 %v1542_v52  ;;  %v130_v33 = vld [vmem:[%s2207_s0 + $0x368] sm:$0xff] }
  0x32   :  { %716 = vmatmul.mubr.bf16.gmra.mrb[8].mxu0 %v147_v10  ;;  %1470 = vmatprep.subr.bf16.mxu1 %v1544_v58  ;;  %v120_v10 = vld [vmem:[%s2207_s0 + $0x318] sm:$0xff] }
  0x33   :  { %723 = vmatprep.mubr.bf16.mxu0 %v155_v14  ;;  %1392 = vmatpush3.bf16.msra.mxu0 %v1535_v24  ;;  %v107_v14 = vld [vmem:[%s2207_s0 + $0x2b0] sm:$0xff]  ;;  %v33_v24 = vld [vmem:[%s2207_s0 + $0x60] sm:$0xff] }
  0x34   :  { %813 = vmatmul.mubr.bf16.gmra.mrb[8].mxu1 %v149_v16  ;;  %1393 = vmatprep.subr.bf16.mxu0 %v1536_v31  ;;  %v183_v16 = vpack.c.bf16 %v127_v11, %v120_v10  ;;  %v184_v31 = vpack.c.bf16 %v128_v27, %v121_v26  ;;  %v125_v10 = vld [vmem:[%s2207_s0 + $0x340] sm:$0xff]  ;;  %v132_v11 = vld [vmem:[%s2207_s0 + $0x378] sm:$0xff] }
  0x35   :  { %820 = vmatprep.mubr.bf16.mxu1 %v157_v19  ;;  %1471 = vmatpush3.bf16.msra.mxu1 %v1544_v58  ;;  %v177_v19 = vpack.c.bf16 %v114_v15, %v107_v14  ;;  %v60_v58 = vld [vmem:[%s2207_s0 + $0x138] sm:$0xff]  ;;  %v81_v14 = vld [vmem:[%s2207_s0 + $0x1e0] sm:$0xff] }
  0x36   :  { %1472 = vmatprep.subr.bf16.mxu1 %v1546_v4  ;;  %v88_v15 = vld [vmem:[%s2207_s0 + $0x218] sm:$0xff]  ;;  %v109_v26 = vld [vmem:[%s2207_s0 + $0x2c0] sm:$0xff] }
  0x37   :  { %1394 = vmatpush3.bf16.msra.mxu0 %v1537_v36  ;;  %v47_v36 = vld [vmem:[%s2207_s0 + $0xd0] sm:$0xff]  ;;  %v165_v18 = vpack.c.bf16 %v88_v15, %v81_v14  ;;  %v116_v27 = vld [vmem:[%s2207_s0 + $0x2f8] sm:$0xff] }
  0x38   :  { %1395 = vmatprep.subr.bf16.mxu0 %v1539_v43  ;;  %v146_v43 = vpack.c.bf16 %v48_v39, %v41_v38 }
  0x39   :  { %1473 = vmatpush3.bf16.msra.mxu1 %v1546_v4  ;;  %v181_v4 = vpack.c.bf16 %v118_v2, %v111_v1 }
  0x3a   :  { %724 = vmatmul.mubr.bf16.gmra.mrb[12].mxu0 %v154_v25  ;;  %1474 = vmatprep.subr.bf16.mxu1 %v665_v12  ;;  %v182_v25 = vpack.c.bf16 %v126_v22, %v119_v21  ;;  %v102_v21 = vld [vmem:[%s2207_s0 + $0x288] sm:$0xff] }
  0x3b   :  { %731 = vmatprep.mubr.bf16.mxu0 %v162_v28  ;;  %1396 = vmatpush3.bf16.msra.mxu0 %v1541_v48  ;;  %v138_v28 = vpack.c.bf16 %v33_v24, %v26_v23  ;;  %v61_v48 = vld [vmem:[%s2207_s0 + $0x140] sm:$0xff]  ;;  %v110_v22 = vld [vmem:[%s2207_s0 + $0x2c8] sm:$0xff] }
  0x3c   :  { %821 = vmatmul.mubr.bf16.gmra.mrb[12].mxu1 %v156_v32  ;;  %1397 = vmatprep.subr.bf16.mxu0 %v1543_v57  ;;  %v139_v32 = vpack.c.bf16 %v34_v30, %v27_v29  ;;  %v152_v52 = vpack.c.bf16 %v61_v48, %v54_v47  ;;  %v53_v57 = vld [vmem:[%s2207_s0 + $0x100] sm:$0xff]  ;;  %v131_v29 = vld [vmem:[%s2207_s0 + $0x370] sm:$0xff]  ;;  %v179_v30 = vpack.c.bf16 %v116_v27, %v109_v26 }
  0x3d   :  { %828 = vmatprep.mubr.bf16.mxu1 %v164_v35  ;;  %1475 = vmatpush3.bf16.msra.mxu1 %v665_v12  ;;  %v40_v35 = vld [vmem:[%s2207_s0 + $0x98] sm:$0xff]  ;;  %v151_v61 = vpack.c.bf16 %v60_v58, %v53_v57  ;;  %v166_v12 = vpack.c.bf16 %v89_v8, %v82_v7  ;;  %v117_v23 = vld [vmem:[%s2207_s0 + $0x300] sm:$0xff] }
  0x3e   :  { %v145_v40 = vpack.c.bf16 %v47_v36, %v40_v35  ;;  %v2110_v36 = vld [vmem:[%s2208_s2] ss:$0 sm:$0xff] }
  0x3f   :  { %1398 = vmatpush3.bf16.msra.mxu0 %v1545_v0 }
  0x42   :  { %732 = vmatmul.mubr.bf16.gmra.mrb[16].mxu0 %v161_v42  ;;  %v62_v42 = vld [vmem:[%s2207_s0 + $0x148] sm:$0xff] }
  0x43   :  { %739 = vmatprep.mubr.bf16.mxu0 %v169_v44  ;;  %v153_v44 = vpack.c.bf16 %v62_v42, %v55_v41 }
  0x44   :  { %829 = vmatmul.mubr.bf16.gmra.mrb[16].mxu1 %v163_v49  ;;  %v144_v49 = vpack.c.bf16 %v46_v46, %v39_v45 }
  0x45   :  { %836 = vmatprep.mubr.bf16.mxu1 %v171_v51  ;;  %v76_v51 = vld [vmem:[%s2207_s0 + $0x1b8] sm:$0xff] }
  0x46   :  { %v160_v55 = vpack.c.bf16 %v76_v51, %v69_v50 }
  0x4a   :  { %740 = vmatmul.mubr.bf16.gmra.mrb[20].mxu0 %v168_v59  ;;  %v68_v59 = vld [vmem:[%s2207_s0 + $0x178] sm:$0xff] }
  0x4b   :  { %747 = vmatprep.mubr.bf16.mxu0 %v176_v62  ;;  %v97_v62 = vld [vmem:[%s2207_s0 + $0x260] sm:$0xff]  ;;  %v159_v0 = vpack.c.bf16 %v75_v60, %v68_v59 }
  0x4c   :  { %837 = vmatmul.mubr.bf16.gmra.mrb[20].mxu1 %v170_v3  ;;  %v174_v3 = vpack.c.bf16 %v104_v63, %v97_v62 }
  0x4d   :  { %844 = vmatprep.mubr.bf16.mxu1 %v178_v6  ;;  %v74_v6 = vld [vmem:[%s2207_s0 + $0x1a8] sm:$0xff] }
  0x4e   :  { %v158_v9 = vpack.c.bf16 %v74_v6, %v67_v5 }
  0x52   :  { %748 = vmatmul.mubr.bf16.gmra.mrb[24].mxu0 %v175_v13  ;;  %v188_v13 = vpack.c.bf16 %v132_v11, %v125_v10 }
  0x53   :  { %755 = vmatprep.mubr.bf16.mxu0 %v183_v16  ;;  %v96_v16 = vld [vmem:[%s2207_s0 + $0x258] sm:$0xff] }
  0x54   :  { %845 = vmatmul.mubr.bf16.gmra.mrb[24].mxu1 %v177_v19  ;;  %v173_v19 = vpack.c.bf16 %v103_v17, %v96_v16 }
  0x55   :  { %852 = vmatprep.mubr.bf16.mxu1 %v185_v20  ;;  %v95_v20 = vld [vmem:[%s2207_s0 + $0x250] sm:$0xff] }
  0x56   :  { %v172_v24 = vpack.c.bf16 %v102_v21, %v95_v20 }
  0x5a   :  { %756 = vmatmul.mubr.bf16.gmra.mrb[28].mxu0 %v182_v25  ;;  %v180_v25 = vpack.c.bf16 %v117_v23, %v110_v22 }
  0x5b   :  { %893 = vmatprep.mubr.bf16.mxu0 %v138_v28  ;;  %v124_v28 = vld [vmem:[%s2207_s0 + $0x338] sm:$0xff] }
  0x5c   :  { %853 = vmatmul.mubr.bf16.gmra.mrb[28].mxu1 %v184_v31  ;;  %v187_v31 = vpack.c.bf16 %v131_v29, %v124_v28 }
  0x5d   :  { %1476 = vmatprep.mubr.msk.bf16.mxu1 %vm635_vm2, %v139_v32  ;;  %v123_v32 = vld [vmem:[%s2207_s0 + $0x330] sm:$0xff] }
  0x5e   :  { %v186_v34 = vpack.c.bf16 %v130_v33, %v123_v32 }
  0x62   :  { %894 = vmatmul.mubr.bf16.vlgmr.msra.gmra.mrb[32].mxu0 %v137_v37 }
  0x63   :  { %901 = vmatprep.mubr.bf16.mxu0 %v145_v40 }
  0x64   :  { %1477 = vmatmul.mubr.msk.bf16.vlgmr.msra.gmra.mrb[32].mxu1 %vm635_vm2, %v146_v43 }
  0x65   :  { %1480 = vmatprep.mubr.msk.bf16.mxu1 %vm635_vm2, %v153_v44 }
  0x6a   :  { %902 = vmatmul.mubr.bf16.gmra.mrb[36].mxu0 %v144_v49 }
  0x6b   :  { %909 = vmatprep.mubr.bf16.mxu0 %v152_v52 }
  0x6c   :  { %1481 = vmatmul.mubr.msk.bf16.gmra.mrb[36].mxu1 %vm635_vm2, %v160_v55 }
  0x6d   :  { %1484 = vmatprep.mubr.msk.bf16.mxu1 %vm635_vm2, %v167_v56 }
  0x72   :  { %910 = vmatmul.mubr.bf16.gmra.mrb[40].mxu0 %v151_v61 }
  0x73   :  { %917 = vmatprep.mubr.bf16.mxu0 %v159_v0 }
  0x74   :  { %1485 = vmatmul.mubr.msk.bf16.gmra.mrb[40].mxu1 %vm635_vm2, %v174_v3 }
  0x75   :  { %1488 = vmatprep.mubr.msk.bf16.mxu1 %vm635_vm2, %v181_v4 }
  0x7a   :  { %918 = vmatmul.mubr.bf16.gmra.mrb[44].mxu0 %v158_v9 }
  0x7b   :  { %925 = vmatprep.mubr.bf16.mxu0 %v166_v12 }
  0x7c   :  { %1489 = vmatmul.mubr.msk.bf16.gmra.mrb[44].mxu1 %vm635_vm2, %v188_v13 }
  0x82   :  { %926 = vmatmul.mubr.bf16.gmra.mrb[48].mxu0 %v165_v18 }
  0x83   :  { %933 = vmatprep.mubr.bf16.mxu0 %v173_v19 }
  0x8a   :  { %934 = vmatmul.mubr.bf16.gmra.mrb[52].mxu0 %v172_v24 }
  0x8b   :  { %941 = vmatprep.mubr.bf16.mxu0 %v180_v25 }
  0x92   :  { %942 = vmatmul.mubr.bf16.gmra.mrb[56].mxu0 %v179_v30 }
  0x93   :  { %949 = vmatprep.mubr.bf16.mxu0 %v187_v31 }
  0x9a   :  { %950 = vmatmul.mubr.bf16.gmra.mrb[60].mxu0 %v186_v34 }
  0xf5   :  { %v1271_v35 = vpop.f32.mrb[0].mxu0 }
  0xf6   :  { %v1272_v37 = vpop.f32.mrb[1].mxu0 }
  0xf7   :  { %v1273_v38 = vadd.f32 %v1272_v37, %v1271_v35  ;;  %v1274_v39 = vpop.f32.mrb[2].mxu0  ;;  %v1335_v40 = vpop.f32.mrb[0].mxu1 }
  0xf8   :  { %v1275_v41 = vpop.f32.mrb[3].mxu0  ;;  %v1336_v44 = vpop.f32.mrb[1].mxu1 }
  0xf9   :  { %v702_v42 = vadd.f32 %v1273_v38, %v2110_v36  ;;  %v1276_v43 = vadd.f32 %v1275_v41, %v1274_v39  ;;  %v1337_v45 = vadd.f32 %v1336_v44, %v1335_v40  ;;  %v1338_v46 = vpop.f32.mrb[2].mxu1 }
  0xfa   :  { %v1339_v48 = vpop.f32.mrb[3].mxu1 }
  0xfb   :  { %v705_v47 = vadd.f32 %v1276_v43, %v2110_v36  ;;  %v2114_v49 = vadd.f32 %v1337_v45, %v702_v42  ;;  %v1340_v50 = vadd.f32 %v1339_v48, %v1338_v46 }
  0xfd   :  { %v1277_v51 = vpop.f32.mrb[4].mxu0  ;;  %v2116_v52 = vadd.f32 %v1340_v50, %v705_v47 }
  0xfe   :  { %v1278_v53 = vpop.f32.mrb[5].mxu0 }
  0xff   :  { %v1279_v54 = vadd.f32 %v1278_v53, %v1277_v51  ;;  %v1280_v55 = vpop.f32.mrb[6].mxu0  ;;  %v1341_v56 = vpop.f32.mrb[4].mxu1 }
 0x100   :  { %v1281_v57 = vpop.f32.mrb[7].mxu0  ;;  %v1342_v60 = vpop.f32.mrb[5].mxu1 }
 0x101   :  { %v710_v58 = vadd.f32 %v1279_v54, %v2110_v36  ;;  %v1282_v59 = vadd.f32 %v1281_v57, %v1280_v55  ;;  %v1343_v61 = vadd.f32 %v1342_v60, %v1341_v56  ;;  %v1344_v62 = vpop.f32.mrb[6].mxu1 }
 0x102   :  { %v1345_v0 = vpop.f32.mrb[7].mxu1 }
 0x103   :  { %v713_v63 = vadd.f32 %v1282_v59, %v2110_v36  ;;  %v2120_v1 = vadd.f32 %v1343_v61, %v710_v58  ;;  %v1346_v2 = vadd.f32 %v1345_v0, %v1344_v62 }
 0x105   :  { %v1283_v3 = vpop.f32.mrb[8].mxu0  ;;  %v2122_v4 = vadd.f32 %v1346_v2, %v713_v63 }
 0x106   :  { %v1284_v5 = vpop.f32.mrb[9].mxu0 }
 0x107   :  { %v1285_v6 = vadd.f32 %v1284_v5, %v1283_v3  ;;  %v1286_v7 = vpop.f32.mrb[10].mxu0  ;;  %v1347_v8 = vpop.f32.mrb[8].mxu1 }
 0x108   :  { %v1287_v9 = vpop.f32.mrb[11].mxu0  ;;  %v1348_v12 = vpop.f32.mrb[9].mxu1 }
 0x109   :  { %v718_v10 = vadd.f32 %v1285_v6, %v2110_v36  ;;  %v1288_v11 = vadd.f32 %v1287_v9, %v1286_v7  ;;  %v1349_v13 = vadd.f32 %v1348_v12, %v1347_v8  ;;  %v1350_v14 = vpop.f32.mrb[10].mxu1 }
 0x10a   :  { %v1351_v16 = vpop.f32.mrb[11].mxu1 }
 0x10b   :  { %v721_v15 = vadd.f32 %v1288_v11, %v2110_v36  ;;  %v2126_v17 = vadd.f32 %v1349_v13, %v718_v10  ;;  %v1352_v18 = vadd.f32 %v1351_v16, %v1350_v14 }
 0x10d   :  { %v1289_v19 = vpop.f32.mrb[12].mxu0  ;;  %v2128_v20 = vadd.f32 %v1352_v18, %v721_v15 }
 0x10e   :  { %v1290_v21 = vpop.f32.mrb[13].mxu0 }
 0x10f   :  { %v1291_v22 = vadd.f32 %v1290_v21, %v1289_v19  ;;  %v1292_v23 = vpop.f32.mrb[14].mxu0  ;;  %v1353_v24 = vpop.f32.mrb[12].mxu1 }
 0x110   :  { %v1293_v25 = vpop.f32.mrb[15].mxu0  ;;  %v1354_v28 = vpop.f32.mrb[13].mxu1 }
 0x111   :  { %v726_v26 = vadd.f32 %v1291_v22, %v2110_v36  ;;  %v1294_v27 = vadd.f32 %v1293_v25, %v1292_v23  ;;  %v1355_v29 = vadd.f32 %v1354_v28, %v1353_v24  ;;  %v1356_v30 = vpop.f32.mrb[14].mxu1 }
 0x112   :  { %v1357_v32 = vpop.f32.mrb[15].mxu1 }
 0x113   :  { %v729_v31 = vadd.f32 %v1294_v27, %v2110_v36  ;;  %v2132_v33 = vadd.f32 %v1355_v29, %v726_v26  ;;  %v1358_v34 = vadd.f32 %v1357_v32, %v1356_v30 }
 0x115   :  { %v1295_v35 = vpop.f32.mrb[16].mxu0  ;;  %v2134_v37 = vadd.f32 %v1358_v34, %v729_v31 }
 0x116   :  { %v1296_v38 = vpop.f32.mrb[17].mxu0 }
 0x117   :  { %v1297_v39 = vadd.f32 %v1296_v38, %v1295_v35  ;;  %v1298_v40 = vpop.f32.mrb[18].mxu0  ;;  %v1359_v41 = vpop.f32.mrb[16].mxu1 }
 0x118   :  { %v1299_v42 = vpop.f32.mrb[19].mxu0  ;;  %v1360_v45 = vpop.f32.mrb[17].mxu1 }
 0x119   :  { %v734_v43 = vadd.f32 %v1297_v39, %v2110_v36  ;;  %v1300_v44 = vadd.f32 %v1299_v42, %v1298_v40  ;;  %v1361_v46 = vadd.f32 %v1360_v45, %v1359_v41  ;;  %v1362_v47 = vpop.f32.mrb[18].mxu1 }
 0x11a   :  { %v1363_v50 = vpop.f32.mrb[19].mxu1 }
 0x11b   :  { %v737_v48 = vadd.f32 %v1300_v44, %v2110_v36  ;;  %v2138_v51 = vadd.f32 %v1361_v46, %v734_v43  ;;  %v1364_v53 = vadd.f32 %v1363_v50, %v1362_v47 }
 0x11d   :  { %v1301_v54 = vpop.f32.mrb[20].mxu0  ;;  %v2140_v55 = vadd.f32 %v1364_v53, %v737_v48 }
 0x11e   :  { %v1302_v56 = vpop.f32.mrb[21].mxu0 }
 0x11f   :  { %v1303_v57 = vadd.f32 %v1302_v56, %v1301_v54  ;;  %v1304_v58 = vpop.f32.mrb[22].mxu0  ;;  %v1365_v59 = vpop.f32.mrb[20].mxu1 }
 0x120   :  { %v1305_v60 = vpop.f32.mrb[23].mxu0  ;;  %v1366_v63 = vpop.f32.mrb[21].mxu1 }
 0x121   :  { %v742_v61 = vadd.f32 %v1303_v57, %v2110_v36  ;;  %v1306_v62 = vadd.f32 %v1305_v60, %v1304_v58  ;;  %v1367_v0 = vadd.f32 %v1366_v63, %v1365_v59  ;;  %v1368_v2 = vpop.f32.mrb[22].mxu1 }
 0x122   :  { %v1369_v5 = vpop.f32.mrb[23].mxu1 }
 0x123   :  { %v745_v3 = vadd.f32 %v1306_v62, %v2110_v36  ;;  %v2144_v6 = vadd.f32 %v1367_v0, %v742_v61  ;;  %v1370_v7 = vadd.f32 %v1369_v5, %v1368_v2 }
 0x125   :  { %v1307_v8 = vpop.f32.mrb[24].mxu0  ;;  %v2146_v9 = vadd.f32 %v1370_v7, %v745_v3 }
 0x126   :  { %v1308_v10 = vpop.f32.mrb[25].mxu0 }
 0x127   :  { %v1309_v11 = vadd.f32 %v1308_v10, %v1307_v8  ;;  %v1310_v12 = vpop.f32.mrb[26].mxu0  ;;  %v1371_v13 = vpop.f32.mrb[24].mxu1 }
 0x128   :  { %v1311_v14 = vpop.f32.mrb[27].mxu0  ;;  %v1372_v18 = vpop.f32.mrb[25].mxu1 }
 0x129   :  { %v750_v15 = vadd.f32 %v1309_v11, %v2110_v36  ;;  %v1312_v16 = vadd.f32 %v1311_v14, %v1310_v12  ;;  %v1373_v19 = vadd.f32 %v1372_v18, %v1371_v13  ;;  %v1374_v21 = vpop.f32.mrb[26].mxu1 }
 0x12a   :  { %v1375_v23 = vpop.f32.mrb[27].mxu1 }
 0x12b   :  { %v753_v22 = vadd.f32 %v1312_v16, %v2110_v36  ;;  %v2150_v24 = vadd.f32 %v1373_v19, %v750_v15  ;;  %v1376_v25 = vadd.f32 %v1375_v23, %v1374_v21 }
 0x12d   :  { %v1313_v26 = vpop.f32.mrb[28].mxu0  ;;  %v2152_v27 = vadd.f32 %v1376_v25, %v753_v22 }
 0x12e   :  { %v1314_v28 = vpop.f32.mrb[29].mxu0 }
 0x12f   :  { %v1315_v29 = vadd.f32 %v1314_v28, %v1313_v26  ;;  %v1316_v30 = vpop.f32.mrb[30].mxu0  ;;  %v1377_v31 = vpop.f32.mrb[28].mxu1 }
 0x130   :  { %v1317_v32 = vpop.f32.mrb[31].mxu0  ;;  %v1378_v38 = vpop.f32.mrb[29].mxu1 }
 0x131   :  { %v758_v34 = vadd.f32 %v1315_v29, %v2110_v36  ;;  %v1318_v35 = vadd.f32 %v1317_v32, %v1316_v30  ;;  %v1379_v39 = vadd.f32 %v1378_v38, %v1377_v31  ;;  %v1380_v40 = vpop.f32.mrb[30].mxu1 }
 0x132   :  { %v1381_v42 = vpop.f32.mrb[31].mxu1 }
 0x133   :  { %v761_v41 = vadd.f32 %v1318_v35, %v2110_v36  ;;  %v2156_v43 = vadd.f32 %v1379_v39, %v758_v34  ;;  %v1382_v44 = vadd.f32 %v1381_v42, %v1380_v40 }
 0x135   :  { %v1399_v45 = vpop.f32.mrb[32].mxu0  ;;  %v2158_v46 = vadd.f32 %v1382_v44, %v761_v41 }
 0x136   :  { %v1400_v47 = vpop.f32.mrb[33].mxu0 }
 0x137   :  { %v1401_v48 = vadd.f32 %v1400_v47, %v1399_v45  ;;  %v1402_v50 = vpop.f32.mrb[34].mxu0  ;;  %v1478_v54 = vpop.f32.mrb[32].mxu1 }
 0x138   :  { %v1403_v53 = vpop.f32.mrb[35].mxu0  ;;  %v992_v58 = vpop.f32.mrb[33].mxu1 }
 0x139   :  { %v1404_v56 = vadd.f32 %v1403_v53, %v1402_v50  ;;  %v896_v57 = vadd.f32 %v1401_v48, %v2114_v49  ;;  %v1479_v59 = vpop.f32.mrb[34].mxu1 }
 0x13a   :  { %v995_v61 = vpop.f32.mrb[35].mxu1 }
 0x13b   :  { %v2161_v60 = vadd.f32 %v992_v58, %v896_v57  ;;  %v899_v36 = vadd.f32 %v1404_v56, %v2116_v52 }
 0x13d   :  { %v2164_v62 = vadd.f32 %v995_v61, %v899_v36  ;;  %v1405_v63 = vpop.f32.mrb[36].mxu0 }
 0x13e   :  { %v1406_v0 = vpop.f32.mrb[37].mxu0 }
 0x13f   :  { %v1407_v2 = vadd.f32 %v1406_v0, %v1405_v63  ;;  %v1408_v3 = vpop.f32.mrb[38].mxu0  ;;  %v1482_v7 = vpop.f32.mrb[36].mxu1 }
 0x140   :  { %v1409_v5 = vpop.f32.mrb[39].mxu0  ;;  %v1008_v11 = vpop.f32.mrb[37].mxu1 }
 0x141   :  { %v904_v8 = vadd.f32 %v1407_v2, %v2120_v1  ;;  %v1410_v10 = vadd.f32 %v1409_v5, %v1408_v3  ;;  %v1483_v49 = vpop.f32.mrb[38].mxu1 }
 0x142   :  { %v1011_v14 = vpop.f32.mrb[39].mxu1 }
 0x143   :  { %v2167_v12 = vadd.f32 %v1478_v54, %v904_v8  ;;  %v907_v13 = vadd.f32 %v1410_v10, %v2122_v4 }
 0x145   :  { %v2170_v52 = vadd.f32 %v1479_v59, %v907_v13  ;;  %v1411_v15 = vpop.f32.mrb[40].mxu0 }
 0x146   :  { %v1412_v16 = vpop.f32.mrb[41].mxu0 }
 0x147   :  { %v1413_v18 = vadd.f32 %v1412_v16, %v1411_v15  ;;  %v1414_v19 = vpop.f32.mrb[42].mxu0  ;;  %v1486_v22 = vpop.f32.mrb[40].mxu1 }
 0x148   :  { %v1415_v21 = vpop.f32.mrb[43].mxu0  ;;  %v1024_v1 = vpop.f32.mrb[41].mxu1 }
 0x149   :  { %v1416_v23 = vadd.f32 %v1415_v21, %v1414_v19  ;;  %v912_v25 = vadd.f32 %v1413_v18, %v2126_v17  ;;  %v1487_v26 = vpop.f32.mrb[42].mxu1 }
 0x14a   :  { %v1027_v30 = vpop.f32.mrb[43].mxu1 }
 0x14b   :  { %v1009_v28 = vadd.f32 %v1008_v11, %v912_v25  ;;  %v915_v29 = vadd.f32 %v1416_v23, %v2128_v20 }
 0x14d   :  { %v1079_v4 = vmax.f32 %v2161_v60, %v1009_v28  ;;  %v1012_v31 = vadd.f32 %v1011_v14, %v915_v29  ;;  %v1417_v32 = vpop.f32.mrb[44].mxu0 }
 0x14e   :  { %v1418_v34 = vpop.f32.mrb[45].mxu0 }
 0x14f   :  { %v1080_v35 = vmax.f32 %v2164_v62, %v1012_v31  ;;  %v1419_v38 = vadd.f32 %v1418_v34, %v1417_v32  ;;  %v1420_v39 = vpop.f32.mrb[46].mxu0  ;;  %v1490_v41 = vpop.f32.mrb[44].mxu1 }
 0x150   :  { %v1421_v40 = vpop.f32.mrb[47].mxu0  ;;  %v1040_v44 = vpop.f32.mrb[45].mxu1 }
 0x151   :  { %v920_v42 = vadd.f32 %v1419_v38, %v2132_v33  ;;  %v1422_v17 = vadd.f32 %v1421_v40, %v1420_v39  ;;  %v1491_v45 = vpop.f32.mrb[46].mxu1 }
 0x152   :  { %v1043_v48 = vpop.f32.mrb[47].mxu1 }
 0x153   :  { %v1017_v47 = vadd.f32 %v1482_v7, %v920_v42  ;;  %v923_v20 = vadd.f32 %v1422_v17, %v2134_v37 }
 0x155   :  { %v1081_v50 = vmax.f32 %v2167_v12, %v1017_v47  ;;  %v1020_v53 = vadd.f32 %v1483_v49, %v923_v20  ;;  %v1423_v54 = vpop.f32.mrb[48].mxu0 }
 0x156   :  { %v1424_v56 = vpop.f32.mrb[49].mxu0 }
 0x157   :  { %v1082_v57 = vmax.f32 %v2170_v52, %v1020_v53  ;;  %v1425_v58 = vadd.f32 %v1424_v56, %v1423_v54  ;;  %v1426_v59 = vpop.f32.mrb[50].mxu0 }
 0x158   :  { %v1427_v60 = vpop.f32.mrb[51].mxu0 }
 0x159   :  { %v1428_v36 = vadd.f32 %v1427_v60, %v1426_v59  ;;  %v928_v33 = vadd.f32 %v1425_v58, %v2138_v51 }
 0x15b   :  { %v1025_v61 = vadd.f32 %v1024_v1, %v928_v33  ;;  %v931_v62 = vadd.f32 %v1428_v36, %v2140_v55 }
 0x15d   :  { %v1028_v63 = vadd.f32 %v1027_v30, %v931_v62  ;;  %v1429_v0 = vpop.f32.mrb[52].mxu0 }
 0x15e   :  { %v1430_v37 = vpop.f32.mrb[53].mxu0 }
 0x15f   :  { %v1431_v2 = vadd.f32 %v1430_v37, %v1429_v0  ;;  %v1432_v3 = vpop.f32.mrb[54].mxu0 }
 0x160   :  { %v1433_v5 = vpop.f32.mrb[55].mxu0 }
 0x161   :  { %v936_v7 = vadd.f32 %v1431_v2, %v2144_v6  ;;  %v1434_v8 = vadd.f32 %v1433_v5, %v1432_v3  ;;  %v1136_v3 = vlaneseq }
 0x163   :  { %v1033_v10 = vadd.f32 %v1486_v22, %v936_v7  ;;  %v939_v11 = vadd.f32 %v1434_v8, %v2146_v9  ;;  %v1137_v5 = vshrl.u32 %v1136_v3, 7  ;;  %v1128_v7 = vld [vmem:[%s2209_s3] sm:$0x1] }
 0x165   :  { %v1036_v49 = vadd.f32 %v1487_v26, %v939_v11  ;;  %v1435_v12 = vpop.f32.mrb[56].mxu0  ;;  %v1138_v8 = vsub.s32 0, %v1137_v5 }
 0x166   :  { %v1436_v13 = vpop.f32.mrb[57].mxu0 }
 0x167   :  { %v1437_v14 = vadd.f32 %v1436_v13, %v1435_v12  ;;  %v1438_v51 = vpop.f32.mrb[58].mxu0 }
 0x168   :  { %v1439_v52 = vpop.f32.mrb[59].mxu0 }
 0x169   :  { %v1440_v15 = vadd.f32 %v1439_v52, %v1438_v51  ;;  %v944_v55 = vadd.f32 %v1437_v14, %v2150_v24 }
 0x16b   :  { %v1041_v16 = vadd.f32 %v1040_v44, %v944_v55  ;;  %v947_v18 = vadd.f32 %v1440_v15, %v2152_v27 }
 0x16d   :  { %v1091_v19 = vmax.f32 %v1025_v61, %v1041_v16  ;;  %v1044_v21 = vadd.f32 %v1043_v48, %v947_v18  ;;  %v1441_v23 = vpop.f32.mrb[60].mxu0 }
 0x16e   :  { %v1442_v6 = vpop.f32.mrb[61].mxu0 }
 0x16f   :  { %v1095_v25 = vmax.f32 %v1079_v4, %v1091_v19  ;;  %v1092_v22 = vmax.f32 %v1028_v63, %v1044_v21  ;;  %v1443_v1 = vadd.f32 %v1442_v6, %v1441_v23  ;;  %v1444_v9 = vpop.f32.mrb[62].mxu0 }
 0x170   :  { %v1445_v26 = vpop.f32.mrb[63].mxu0 }
 0x171   :  { %v1096_v28 = vmax.f32 %v1080_v35, %v1092_v22  ;;  %v952_v29 = vadd.f32 %v1443_v1, %v2156_v43  ;;  %v1446_v30 = vadd.f32 %v1445_v26, %v1444_v9 }
 0x173   :  { %v1099_v31 = vadd.f32 %v1096_v28, %v1095_v25  ;;  %v1049_v32 = vadd.f32 %v1490_v41, %v952_v29  ;;  %v955_v24 = vadd.f32 %v1446_v30, %v2158_v46 }
 0x175   :  { %v1093_v34 = vmax.f32 %v1033_v10, %v1049_v32  ;;  %v1052_v38 = vadd.f32 %v1491_v45, %v955_v24 }
 0x177   :  { %v1097_v27 = vmax.f32 %v1081_v50, %v1093_v34  ;;  %v1094_v39 = vmax.f32 %v1036_v49, %v1052_v38  ;;  %v1132_v49 = vld [vmem:[%s2210_s4] sm:$0x1] }
 0x179   :  { %v1100_v40 = vadd.f32 %v1099_v31, %v1097_v27  ;;  %v1098_v42 = vmax.f32 %v1082_v57, %v1094_v39 }
 0x17b   :  { %v1101_v17 = vadd.f32 %v1100_v40, %v1098_v42 }
 0x17d   :  { %v1102_v4 = vrot.slane %v1101_v17, 4 }
 0x17f   :  { %v1103_v44 = vadd.f32 %v1102_v4, %v1101_v17 }
 0x181   :  { %v1104_v47 = vrot.slane %v1103_v44, 2 }
 0x183   :  { %v1105_v20 = vadd.f32 %v1104_v47, %v1103_v44 }
 0x185   :  { %v1106_v48 = vrot.slane %v1105_v20, 1 }
 0x187   :  { %v1107_v35 = vadd.f32 %v1106_v48, %v1105_v20 }
 0x189   :  { %v1109_v53 = vmul.f32 0.03125, %v1107_v35 }
 0x18b   :  { %v1110_v43 = vsub.f32 %v1095_v25, %v1109_v53  ;;  %v1111_v54 = vsub.f32 %v1096_v28, %v1109_v53  ;;  %v1112_v56 = vsub.f32 %v1097_v27, %v1109_v53  ;;  %v1113_v41 = vsub.f32 %v1098_v42, %v1109_v53 }
 0x18d   :  { %v1114_v58 = vmul.f32 %v1110_v43, %v1110_v43  ;;  %v1115_v46 = vmul.f32 %v1111_v54, %v1111_v54  ;;  %v1116_v59 = vmul.f32 %v1112_v56, %v1112_v56  ;;  %v1117_v50 = vmul.f32 %v1113_v41, %v1113_v41 }
 0x18f   :  { %v1118_v45 = vadd.f32 %v1115_v46, %v1114_v58 }
 0x191   :  { %v1119_v60 = vadd.f32 %v1118_v45, %v1116_v59 }
 0x193   :  { %v1120_v36 = vadd.f32 %v1119_v60, %v1117_v50 }
 0x195   :  { %v1121_v57 = vrot.slane %v1120_v36, 4 }
 0x197   :  { %v1122_v33 = vadd.f32 %v1121_v57, %v1120_v36 }
 0x199   :  { %v1123_v61 = vrot.slane %v1122_v33, 2 }
 0x19b   :  { %v1124_v62 = vadd.f32 %v1123_v61, %v1122_v33 }
 0x19d   :  { %v1125_v63 = vrot.slane %v1124_v62, 1 }
 0x19f   :  { %v1126_v0 = vadd.f32 %v1125_v63, %v1124_v62 }
 0x1a1   :  { %v1127_v37 = vmul.f32 0.03125, %v1126_v0 }
 0x1a3   :  { %v1129_v2 = vadd.f32 1e-05, %v1127_v37 }
 0x1a5   :  { %1548 = vrsqrt.f32 %v1129_v2 }
 0x1af   :  { %v1549_v10 = vpop.eup %1548 }
 0x1b0   :  { %v1131_v11 = vmul.f32 %v1549_v10, %v1128_v7 }
 0x1b2   :  { %v1133_v12 = vmul.f32 %v1131_v11, %v1109_v53  ;;  %v1139_v13 = vrot.slane %v1131_v11, %v1138_v8 }
 0x1b4   :  { %v1134_v14 = vsub.f32 %v1132_v49, %v1133_v12  ;;  %v1141_v51 = vmul.f32 %v1139_v13, %v1095_v25  ;;  %v1142_v52 = vmul.f32 %v1139_v13, %v1096_v28  ;;  %v1143_v15 = vmul.f32 %v1139_v13, %v1097_v27 }
 0x1b5   :  { %v1144_v55 = vmul.f32 %v1139_v13, %v1098_v42 }
 0x1b6   :  { %v1149_v16 = vrot.slane %v1134_v14, %v1138_v8 }
 0x1b8   :  { %v1151_v18 = vadd.f32 %v1149_v16, %v1141_v51  ;;  %v1152_v19 = vadd.f32 %v1149_v16, %v1142_v52  ;;  %v1153_v21 = vadd.f32 %v1149_v16, %v1143_v15  ;;  %v1154_v23 = vadd.f32 %v1149_v16, %v1144_v55 }
 0x1ba   :  { %v1251_v6 = vmul.f32 -1.442695, %v1151_v18  ;;  %v1252_v22 = vmul.f32 -1.442695, %v1152_v19  ;;  %v1253_v1 = vmul.f32 -1.442695, %v1153_v21 }
 0x1bb   :  { %v1254_v9 = vmul.f32 -1.442695, %v1154_v23 }
 0x1bc   :  { %1550 = vpow2.f32 %v1251_v6 }
 0x1bd   :  { %1552 = vpow2.f32 %v1252_v22 }
 0x1be   :  { %1554 = vpow2.f32 %v1253_v1 }
 0x1bf   :  { %1556 = vpow2.f32 %v1254_v9 }
 0x1c6   :  { %v1551_v26 = vpop.eup %1550 }
 0x1c7   :  { %v1553_v29 = vpop.eup %1552  ;;  %v1167_v30 = vadd.f32 1.0, %v1551_v26 }
 0x1c8   :  { %v1555_v25 = vpop.eup %1554  ;;  %v1168_v28 = vadd.f32 1.0, %v1553_v29 }
 0x1c9   :  { %v1557_v31 = vpop.eup %1556  ;;  %v1169_v32 = vadd.f32 1.0, %v1555_v25  ;;  %1558 = vrcp.f32 %v1167_v30 }
 0x1ca   :  { %v1170_v24 = vadd.f32 1.0, %v1557_v31  ;;  %1560 = vrcp.f32 %v1168_v28 }
 0x1cb   :  { %1562 = vrcp.f32 %v1169_v32 }
 0x1cc   :  { %1564 = vrcp.f32 %v1170_v24 }
 0x1d3   :  { %v1559_v34 = vpop.eup %1558 }
 0x1d4   :  { %v1561_v38 = vpop.eup %1560  ;;  %1179 = vst [vmem:[%s2211_s5] sm:$0xff] %v1559_v34 }
 0x1d5   :  { %v1563_v27 = vpop.eup %1562  ;;  %1180 = vst [vmem:[%s2211_s5 + $0x8] sm:$0xff] %v1561_v38 }
 0x1d6   :  { %v1565_v39 = vpop.eup %1564  ;;  %1181 = vst [vmem:[%s2211_s5 + $0x10] sm:$0xff] %v1563_v27 }
 0x1d7   :  { %1182 = vst [vmem:[%s2211_s5 + $0x18] sm:$0xff] %v1565_v39 }

// kernel: network_forward.5
= control target key start
LH: loop header
LB: loop body
LE: loop exit
PB: predicated region body
PF: predicated region fallthrough
CT: control target
= control target key end

     0   :  { %s1623_s1 = inlined_call_operand.vmem [shape: bf16[1152,128], index: 1, kind: input, shape index: {}]   ;;  %s1624_s0 = inlined_call_operand.vmem [shape: f32[32,1152], index: 0, kind: input, shape index: {}]   ;;  %s1625_s2 = inlined_call_operand.vmem [shape: f32[1,128], index: 2, kind: input, shape index: {}]   ;;  %s1626_s3 = inlined_call_operand.vmem [shape: f32[1,128], index: 3, kind: input, shape index: {}]   ;;  %s1627_s4 = inlined_call_operand.vmem [shape: f32[1,128], index: 4, kind: input, shape index: {}]   ;;  %s1628_s5 = inlined_call_operand.vmem [shape: f32[8,128], index: 5, kind: output, shape index: {}]  }
   0x1   :  { %v1179_v0 = vld [vmem:[%s1623_s1 + $0x40] sm:$0xff]   ;;  %v1183_v4 = vld [vmem:[%s1623_s1 + $0x48] sm:$0xff]   ;;  %v1187_v8 = vld [vmem:[%s1623_s1 + $0x50] sm:$0xff]  }
   0x2   :  { %v1180_v1 = vld [vmem:[%s1623_s1] sm:$0xff]   ;;  %1037 = vmatprep.subr.bf16.mxu0 %v1179_v0  ;;  %v1184_v5 = vld [vmem:[%s1623_s1 + $0x8] sm:$0xff]   ;;  %v1188_v9 = vld [vmem:[%s1623_s1 + $0x10] sm:$0xff]  }
   0x3   :  { %v1181_v2 = vld [vmem:[%s1623_s1 + $0xc0] sm:$0xff]   ;;  %1038 = vmatpush3.bf16.msra.mxu0 %v1180_v1  ;;  %v1185_v6 = vld [vmem:[%s1623_s1 + $0xc8] sm:$0xff]   ;;  %v1189_v10 = vld [vmem:[%s1623_s1 + $0xd0] sm:$0xff]  }
   0x4   :  { %v1182_v3 = vld [vmem:[%s1623_s1 + $0x80] sm:$0xff]   ;;  %1065 = vmatprep.subr.bf16.mxu1 %v1181_v2  ;;  %1039 = vmatprep.subr.bf16.mxu0 %v1183_v4  ;;  %v1186_v7 = vld [vmem:[%s1623_s1 + $0x88] sm:$0xff]   ;;  %v1190_v11 = vld [vmem:[%s1623_s1 + $0x90] sm:$0xff]  }
   0x5   :  { %1066 = vmatpush3.bf16.msra.mxu1 %v1182_v3  ;;  %v1191_v12 = vld [vmem:[%s1623_s1 + $0x58] sm:$0xff]   ;;  %v1195_v16 = vld [vmem:[%s1623_s1 + $0x60] sm:$0xff]   ;;  %v1199_v20 = vld [vmem:[%s1623_s1 + $0x68] sm:$0xff]  }
   0x6   :  { %1067 = vmatprep.subr.bf16.mxu1 %v1185_v6  ;;  %v1192_v13 = vld [vmem:[%s1623_s1 + $0x18] sm:$0xff]   ;;  %v1196_v17 = vld [vmem:[%s1623_s1 + $0x20] sm:$0xff]   ;;  %v1200_v21 = vld [vmem:[%s1623_s1 + $0x28] sm:$0xff]  }
   0x7   :  { %1040 = vmatpush3.bf16.msra.mxu0 %v1184_v5  ;;  %v1193_v14 = vld [vmem:[%s1623_s1 + $0xd8] sm:$0xff]   ;;  %v1197_v18 = vld [vmem:[%s1623_s1 + $0xe0] sm:$0xff]   ;;  %v1201_v22 = vld [vmem:[%s1623_s1 + $0xe8] sm:$0xff]  }
   0x8   :  { %1041 = vmatprep.subr.bf16.mxu0 %v1187_v8  ;;  %v1194_v15 = vld [vmem:[%s1623_s1 + $0x98] sm:$0xff]   ;;  %v1198_v19 = vld [vmem:[%s1623_s1 + $0xa0] sm:$0xff]   ;;  %v1202_v23 = vld [vmem:[%s1623_s1 + $0xa8] sm:$0xff]  }
   0x9   :  { %1068 = vmatpush3.bf16.msra.mxu1 %v1186_v7  ;;  %v1203_v24 = vld [vmem:[%s1623_s1 + $0x70] sm:$0xff]   ;;  %v1207_v28 = vld [vmem:[%s1623_s1 + $0x78] sm:$0xff]   ;;  %v22_v31 = vld [vmem:[%s1624_s0 + $0x8] sm:$0xff] }
   0xa   :  { %1069 = vmatprep.subr.bf16.mxu1 %v1189_v10  ;;  %v1204_v25 = vld [vmem:[%s1623_s1 + $0x30] sm:$0xff]   ;;  %v1208_v29 = vld [vmem:[%s1623_s1 + $0x38] sm:$0xff]   ;;  %v21_v35 = vld [vmem:[%s1624_s0] sm:$0xff] }
   0xb   :  { %1042 = vmatpush3.bf16.msra.mxu0 %v1188_v9  ;;  %v1205_v26 = vld [vmem:[%s1623_s1 + $0xf0] sm:$0xff]   ;;  %v1209_v30 = vld [vmem:[%s1623_s1 + $0xf8] sm:$0xff]   ;;  %v30_v36 = vld [vmem:[%s1624_s0 + $0x48] sm:$0xff] }
   0xc   :  { %1043 = vmatprep.subr.bf16.mxu0 %v1191_v12  ;;  %v1206_v27 = vld [vmem:[%s1623_s1 + $0xb0] sm:$0xff]   ;;  %v1210_v34 = vld [vmem:[%s1623_s1 + $0xb8] sm:$0xff]   ;;  %v57_v37 = vpack.c.bf16 %v30_v36, %v21_v35  ;;  %v1211_v38 = vld [vmem:[%s1623_s1 + $0x140] sm:$0xff]  }
   0xd   :  { %1070 = vmatpush3.bf16.msra.mxu1 %v1190_v11  ;;  %v31_v32 = vld [vmem:[%s1624_s0 + $0x50] sm:$0xff]  ;;  %v24_v39 = vld [vmem:[%s1624_s0 + $0x18] sm:$0xff]  ;;  %v33_v40 = vld [vmem:[%s1624_s0 + $0x60] sm:$0xff] }
   0xe   :  { %1071 = vmatprep.subr.bf16.mxu1 %v1193_v14  ;;  %v58_v33 = vpack.c.bf16 %v31_v32, %v22_v31  ;;  %v60_v41 = vpack.c.bf16 %v33_v40, %v24_v39  ;;  %v1212_v42 = vld [vmem:[%s1623_s1 + $0x100] sm:$0xff]   ;;  %v23_v43 = vld [vmem:[%s1624_s0 + $0x10] sm:$0xff]  ;;  %v32_v44 = vld [vmem:[%s1624_s0 + $0x58] sm:$0xff] }
   0xf   :  { %1044 = vmatpush3.bf16.msra.mxu0 %v1192_v13  ;;  %v59_v45 = vpack.c.bf16 %v32_v44, %v23_v43  ;;  %v1213_v46 = vld [vmem:[%s1623_s1 + $0x1c0] sm:$0xff]   ;;  %v1215_v48 = vld [vmem:[%s1623_s1 + $0x148] sm:$0xff]   ;;  %v1219_v52 = vld [vmem:[%s1623_s1 + $0x150] sm:$0xff]  }
  0x10   :  { %1045 = vmatprep.subr.bf16.mxu0 %v1195_v16  ;;  %690 = vmatprep.mubr.bf16.mxu0 %v58_v33  ;;  %v1214_v47 = vld [vmem:[%s1623_s1 + $0x180] sm:$0xff]   ;;  %v1216_v49 = vld [vmem:[%s1623_s1 + $0x108] sm:$0xff]   ;;  %v1220_v53 = vld [vmem:[%s1623_s1 + $0x110] sm:$0xff]  }
  0x11   :  { %1072 = vmatpush3.bf16.msra.mxu1 %v1194_v15  ;;  %739 = vmatprep.mubr.bf16.mxu1 %v60_v41  ;;  %v1217_v50 = vld [vmem:[%s1623_s1 + $0x1c8] sm:$0xff]   ;;  %v1221_v54 = vld [vmem:[%s1623_s1 + $0x1d0] sm:$0xff]   ;;  %v1223_v56 = vld [vmem:[%s1623_s1 + $0x158] sm:$0xff]  }
  0x12   :  { %1073 = vmatprep.subr.bf16.mxu1 %v1197_v18  ;;  %v1218_v51 = vld [vmem:[%s1623_s1 + $0x188] sm:$0xff]   ;;  %v1222_v55 = vld [vmem:[%s1623_s1 + $0x190] sm:$0xff]   ;;  %v1224_v57 = vld [vmem:[%s1623_s1 + $0x118] sm:$0xff]  }
  0x13   :  { %1046 = vmatpush3.bf16.msra.mxu0 %v1196_v17  ;;  %v1225_v58 = vld [vmem:[%s1623_s1 + $0x1d8] sm:$0xff]   ;;  %v1227_v60 = vld [vmem:[%s1623_s1 + $0x160] sm:$0xff]   ;;  %v1231_v0 = vld [vmem:[%s1623_s1 + $0x168] sm:$0xff]  }
  0x14   :  { %1047 = vmatprep.subr.bf16.mxu0 %v1199_v20  ;;  %v1226_v59 = vld [vmem:[%s1623_s1 + $0x198] sm:$0xff]   ;;  %v1228_v61 = vld [vmem:[%s1623_s1 + $0x120] sm:$0xff]   ;;  %v1232_v4 = vld [vmem:[%s1623_s1 + $0x128] sm:$0xff]  }
  0x15   :  { %1074 = vmatpush3.bf16.msra.mxu1 %v1198_v19  ;;  %v1229_v62 = vld [vmem:[%s1623_s1 + $0x1e0] sm:$0xff]   ;;  %v40_v1 = vld [vmem:[%s1624_s0 + $0x98] sm:$0xff]  ;;  %v39_v5 = vld [vmem:[%s1624_s0 + $0x90] sm:$0xff] }
  0x16   :  { %1075 = vmatprep.subr.bf16.mxu1 %v1201_v22  ;;  %v1230_v63 = vld [vmem:[%s1623_s1 + $0x1a0] sm:$0xff]   ;;  %v48_v6 = vld [vmem:[%s1624_s0 + $0xd8] sm:$0xff]  ;;  %v1233_v8 = vld [vmem:[%s1623_s1 + $0x1e8] sm:$0xff]  }
  0x17   :  { %1048 = vmatpush3.bf16.msra.mxu0 %v1200_v21  ;;  %v49_v2 = vld [vmem:[%s1624_s0 + $0xe0] sm:$0xff]  ;;  %v66_v7 = vpack.c.bf16 %v48_v6, %v39_v5  ;;  %v42_v9 = vld [vmem:[%s1624_s0 + $0xa8] sm:$0xff]  ;;  %v51_v10 = vld [vmem:[%s1624_s0 + $0xf0] sm:$0xff] }
  0x18   :  { %1049 = vmatprep.subr.bf16.mxu0 %v1203_v24  ;;  %v67_v3 = vpack.c.bf16 %v49_v2, %v40_v1  ;;  %v69_v11 = vpack.c.bf16 %v51_v10, %v42_v9  ;;  %v1234_v12 = vld [vmem:[%s1623_s1 + $0x1a8] sm:$0xff]   ;;  %v41_v13 = vld [vmem:[%s1624_s0 + $0xa0] sm:$0xff]  ;;  %v1235_v16 = vld [vmem:[%s1623_s1 + $0x170] sm:$0xff]  }
  0x19   :  { %1076 = vmatpush3.bf16.msra.mxu1 %v1202_v23  ;;  %v50_v14 = vld [vmem:[%s1624_s0 + $0xe8] sm:$0xff]  ;;  %v1236_v17 = vld [vmem:[%s1623_s1 + $0x130] sm:$0xff]   ;;  %v1239_v20 = vld [vmem:[%s1623_s1 + $0x178] sm:$0xff]  }
  0x1a   :  { %1077 = vmatprep.subr.bf16.mxu1 %v1205_v26  ;;  %v68_v15 = vpack.c.bf16 %v50_v14, %v41_v13  ;;  %v1237_v18 = vld [vmem:[%s1623_s1 + $0x1f0] sm:$0xff]   ;;  %v1240_v21 = vld [vmem:[%s1623_s1 + $0x138] sm:$0xff]   ;;  %v26_v23 = vld [vmem:[%s1624_s0 + $0x28] sm:$0xff] }
  0x1b   :  { %1050 = vmatpush3.bf16.msra.mxu0 %v1204_v25  ;;  %v1238_v19 = vld [vmem:[%s1623_s1 + $0x1b0] sm:$0xff]   ;;  %v1241_v22 = vld [vmem:[%s1623_s1 + $0x1f8] sm:$0xff]   ;;  %v37_v32 = vld [vmem:[%s1624_s0 + $0x80] sm:$0xff] }
  0x1c   :  { %1051 = vmatprep.subr.bf16.mxu0 %v1207_v28  ;;  %v35_v24 = vld [vmem:[%s1624_s0 + $0x70] sm:$0xff]  ;;  %v1242_v26 = vld [vmem:[%s1623_s1 + $0x1b8] sm:$0xff]   ;;  %v34_v28 = vld [vmem:[%s1624_s0 + $0x68] sm:$0xff] }
  0x1d   :  { %1078 = vmatpush3.bf16.msra.mxu1 %v1206_v27  ;;  %v62_v25 = vpack.c.bf16 %v35_v24, %v26_v23  ;;  %v25_v27 = vld [vmem:[%s1624_s0 + $0x20] sm:$0xff]  ;;  %v28_v31 = vld [vmem:[%s1624_s0 + $0x38] sm:$0xff]  ;;  %v27_v33 = vld [vmem:[%s1624_s0 + $0x30] sm:$0xff] }
  0x1e   :  { %1079 = vmatprep.subr.bf16.mxu1 %v1209_v30  ;;  %v1243_v30 = vld [vmem:[%s1623_s1 + $0x200] sm:$0xff]   ;;  %v64_v35 = vpack.c.bf16 %v37_v32, %v28_v31  ;;  %v43_v40 = vld [vmem:[%s1624_s0 + $0xb0] sm:$0xff]  ;;  %v46_v44 = vld [vmem:[%s1624_s0 + $0xc8] sm:$0xff] }
  0x1f   :  { %1052 = vmatpush3.bf16.msra.mxu0 %v1208_v29  ;;  %v61_v29 = vpack.c.bf16 %v34_v28, %v25_v27  ;;  %v53_v39 = vld [vmem:[%s1624_s0 + $0x100] sm:$0xff]  ;;  %v1245_v43 = vld [vmem:[%s1623_s1 + $0x210] sm:$0xff]  }
  0x20   :  { %1093 = vmatprep.subr.bf16.mxu0 %v1211_v38  ;;  %v44_v38 = vld [vmem:[%s1624_s0 + $0xb8] sm:$0xff] }
  0x21   :  { %1080 = vmatpush3.bf16.msra.mxu1 %v1210_v34  ;;  %v36_v34 = vld [vmem:[%s1624_s0 + $0x78] sm:$0xff]  ;;  %v71_v41 = vpack.c.bf16 %v53_v39, %v44_v38 }
  0x22   :  { %691 = vmatmul.mubr.bf16.vlgmr.msra.gmra.mrb[0].mxu0 %v57_v37  ;;  %1121 = vmatprep.subr.bf16.mxu1 %v1213_v46  ;;  %v63_v36 = vpack.c.bf16 %v36_v34, %v27_v33  ;;  %v1244_v37 = vld [vmem:[%s1623_s1 + $0x208] sm:$0xff]  }
  0x23   :  { %1094 = vmatpush3.bf16.msra.mxu0 %v1212_v42  ;;  %698 = vmatprep.mubr.bf16.mxu0 %v67_v3  ;;  %v52_v42 = vld [vmem:[%s1624_s0 + $0xf8] sm:$0xff] }
  0x24   :  { %740 = vmatmul.mubr.bf16.vlgmr.msra.gmra.mrb[0].mxu1 %v59_v45  ;;  %1095 = vmatprep.subr.bf16.mxu0 %v1215_v48  ;;  %v55_v45 = vld [vmem:[%s1624_s0 + $0x110] sm:$0xff]  ;;  %v70_v46 = vpack.c.bf16 %v52_v42, %v43_v40  ;;  %v45_v48 = vld [vmem:[%s1624_s0 + $0xc0] sm:$0xff] }
  0x25   :  { %1122 = vmatpush3.bf16.msra.mxu1 %v1214_v47  ;;  %747 = vmatprep.mubr.bf16.mxu1 %v69_v11  ;;  %v73_v47 = vpack.c.bf16 %v55_v45, %v46_v44 }
  0x26   :  { %1123 = vmatprep.subr.bf16.mxu1 %v1217_v50  ;;  %v1246_v50 = vld [vmem:[%s1623_s1 + $0x218] sm:$0xff]  }
  0x27   :  { %1096 = vmatpush3.bf16.msra.mxu0 %v1216_v49  ;;  %v54_v49 = vld [vmem:[%s1624_s0 + $0x108] sm:$0xff] }
  0x28   :  { %1097 = vmatprep.subr.bf16.mxu0 %v1219_v52  ;;  %v29_v52 = vld [vmem:[%s1624_s0 + $0x40] sm:$0xff] }
  0x29   :  { %1124 = vmatpush3.bf16.msra.mxu1 %v1218_v51  ;;  %v72_v51 = vpack.c.bf16 %v54_v49, %v45_v48 }
  0x2a   :  { %1125 = vmatprep.subr.bf16.mxu1 %v1221_v54  ;;  %699 = vmatmul.mubr.bf16.gmra.mrb[4].mxu0 %v66_v7  ;;  %v38_v54 = vld [vmem:[%s1624_s0 + $0x88] sm:$0xff] }
  0x2b   :  { %1098 = vmatpush3.bf16.msra.mxu0 %v1220_v53  ;;  %788 = vmatprep.mubr.bf16.mxu0 %v62_v25  ;;  %v1247_v53 = vld [vmem:[%s1623_s1 + $0x220] sm:$0xff]  }
  0x2c   :  { %1099 = vmatprep.subr.bf16.mxu0 %v1223_v56  ;;  %748 = vmatmul.mubr.bf16.gmra.mrb[4].mxu1 %v68_v15  ;;  %v1248_v56 = vld [vmem:[%s1623_s1 + $0x228] sm:$0xff]  }
  0x2d   :  { %1126 = vmatpush3.bf16.msra.mxu1 %v1222_v55  ;;  %837 = vmatprep.mubr.bf16.mxu1 %v64_v35  ;;  %v65_v55 = vpack.c.bf16 %v38_v54, %v29_v52 }
  0x2e   :  { %1127 = vmatprep.subr.bf16.mxu1 %v1225_v58  ;;  %v1250_v58 = vld [vmem:[%s1623_s1 + $0x238] sm:$0xff]  }
  0x2f   :  { %1100 = vmatpush3.bf16.msra.mxu0 %v1224_v57  ;;  %v1249_v57 = vld [vmem:[%s1623_s1 + $0x230] sm:$0xff]  }
  0x30   :  { %1101 = vmatprep.subr.bf16.mxu0 %v1227_v60  ;;  %v56_v60 = vld [vmem:[%s1624_s0 + $0x118] sm:$0xff] }
  0x31   :  { %1128 = vmatpush3.bf16.msra.mxu1 %v1226_v59  ;;  %v47_v59 = vld [vmem:[%s1624_s0 + $0xd0] sm:$0xff] }
  0x32   :  { %1129 = vmatprep.subr.bf16.mxu1 %v1229_v62 }
  0x33   :  { %1102 = vmatpush3.bf16.msra.mxu0 %v1228_v61  ;;  %v74_v61 = vpack.c.bf16 %v56_v60, %v47_v59 }
  0x34   :  { %1103 = vmatprep.subr.bf16.mxu0 %v1231_v0 }
  0x35   :  { %1130 = vmatpush3.bf16.msra.mxu1 %v1230_v63  ;;  %v963_v63 = vld [vmem:[%s1625_s2] ss:$0 sm:$0xff] }
  0x36   :  { %1131 = vmatprep.subr.bf16.mxu1 %v1233_v8 }
  0x37   :  { %1104 = vmatpush3.bf16.msra.mxu0 %v1232_v4 }
  0x38   :  { %1105 = vmatprep.subr.bf16.mxu0 %v1235_v16 }
  0x39   :  { %1132 = vmatpush3.bf16.msra.mxu1 %v1234_v12 }
  0x3a   :  { %1133 = vmatprep.subr.bf16.mxu1 %v1237_v18 }
  0x3b   :  { %1106 = vmatpush3.bf16.msra.mxu0 %v1236_v17 }
  0x3c   :  { %1107 = vmatprep.subr.bf16.mxu0 %v1239_v20 }
  0x3d   :  { %1134 = vmatpush3.bf16.msra.mxu1 %v1238_v19 }
  0x3e   :  { %1135 = vmatprep.subr.bf16.mxu1 %v1241_v22 }
  0x3f   :  { %1108 = vmatpush3.bf16.msra.mxu0 %v1240_v21 }
  0x40   :  { %1159 = vmatprep.subr.bf16.mxu0 %v1243_v30 }
  0x41   :  { %1136 = vmatpush3.bf16.msra.mxu1 %v1242_v26 }
  0x42   :  { %789 = vmatmul.mubr.bf16.vlgmr.msra.gmra.mrb[8].mxu0 %v61_v29 }
  0x43   :  { %1160 = vmatpush3.bf16.msra.mxu0 %v1243_v30  ;;  %796 = vmatprep.mubr.bf16.mxu0 %v71_v41 }
  0x44   :  { %1161 = vmatprep.subr.bf16.mxu0 %v1244_v37  ;;  %838 = vmatmul.mubr.bf16.vlgmr.msra.gmra.mrb[8].mxu1 %v63_v36 }
  0x45   :  { %845 = vmatprep.mubr.bf16.mxu1 %v73_v47 }
  0x47   :  { %1162 = vmatpush3.bf16.msra.mxu0 %v1244_v37 }
  0x48   :  { %1163 = vmatprep.subr.bf16.mxu0 %v1245_v43 }
  0x4a   :  { %797 = vmatmul.mubr.bf16.gmra.mrb[12].mxu0 %v70_v46 }
  0x4b   :  { %1164 = vmatpush3.bf16.msra.mxu0 %v1245_v43  ;;  %1175 = vmatprep.mubr.bf16.mxu0 %v65_v55 }
  0x4c   :  { %1165 = vmatprep.subr.bf16.mxu0 %v1246_v50  ;;  %846 = vmatmul.mubr.bf16.gmra.mrb[12].mxu1 %v72_v51 }
  0x4f   :  { %1166 = vmatpush3.bf16.msra.mxu0 %v1246_v50 }
  0x50   :  { %1167 = vmatprep.subr.bf16.mxu0 %v1247_v53 }
  0x53   :  { %1168 = vmatpush3.bf16.msra.mxu0 %v1247_v53 }
  0x54   :  { %1169 = vmatprep.subr.bf16.mxu0 %v1248_v56 }
  0x57   :  { %1170 = vmatpush3.bf16.msra.mxu0 %v1248_v56 }
  0x58   :  { %1171 = vmatprep.subr.bf16.mxu0 %v1249_v57 }
  0x5b   :  { %1172 = vmatpush3.bf16.msra.mxu0 %v1249_v57 }
  0x5c   :  { %1173 = vmatprep.subr.bf16.mxu0 %v1250_v58 }
  0x5f   :  { %1174 = vmatpush3.bf16.msra.mxu0 %v1250_v58 }
  0x62   :  { %1176 = vmatmul.mubr.bf16.vlgmr.msra.gmra.mrb[16].mxu0 %v74_v61 }
  0xf5   :  { %v1053_v62 = vpop.f32.mrb[0].mxu0 }
  0xf6   :  { %v1054_v0 = vpop.f32.mrb[1].mxu0 }
  0xf7   :  { %v1055_v1 = vadd.f32 %v1054_v0, %v1053_v62  ;;  %v1056_v2 = vpop.f32.mrb[2].mxu0  ;;  %v1081_v3 = vpop.f32.mrb[0].mxu1 }
  0xf8   :  { %v1057_v4 = vpop.f32.mrb[3].mxu0  ;;  %v1082_v7 = vpop.f32.mrb[1].mxu1 }
  0xf9   :  { %v693_v5 = vadd.f32 %v1055_v1, %v963_v63  ;;  %v1058_v6 = vadd.f32 %v1057_v4, %v1056_v2  ;;  %v1083_v8 = vadd.f32 %v1082_v7, %v1081_v3  ;;  %v1084_v9 = vpop.f32.mrb[2].mxu1 }
  0xfa   :  { %v1085_v11 = vpop.f32.mrb[3].mxu1 }
  0xfb   :  { %v696_v10 = vadd.f32 %v1058_v6, %v963_v63  ;;  %v742_v12 = vadd.f32 %v1083_v8, %v693_v5  ;;  %v1086_v13 = vadd.f32 %v1085_v11, %v1084_v9 }
  0xfd   :  { %v745_v14 = vadd.f32 %v1086_v13, %v696_v10  ;;  %v1059_v15 = vpop.f32.mrb[4].mxu0 }
  0xfe   :  { %v1060_v16 = vpop.f32.mrb[5].mxu0 }
  0xff   :  { %v1061_v17 = vadd.f32 %v1060_v16, %v1059_v15  ;;  %v1062_v18 = vpop.f32.mrb[6].mxu0  ;;  %v1087_v21 = vpop.f32.mrb[4].mxu1 }
 0x100   :  { %v1063_v19 = vpop.f32.mrb[7].mxu0  ;;  %v1088_v23 = vpop.f32.mrb[5].mxu1 }
 0x101   :  { %v701_v20 = vadd.f32 %v1061_v17, %v963_v63  ;;  %v1064_v22 = vadd.f32 %v1063_v19, %v1062_v18  ;;  %v1089_v25 = vadd.f32 %v1088_v23, %v1087_v21  ;;  %v1090_v26 = vpop.f32.mrb[6].mxu1 }
 0x102   :  { %v1091_v27 = vpop.f32.mrb[7].mxu1 }
 0x103   :  { %v704_v24 = vadd.f32 %v1064_v22, %v963_v63  ;;  %v750_v28 = vadd.f32 %v1089_v25, %v701_v20  ;;  %v1092_v29 = vadd.f32 %v1091_v27, %v1090_v26  ;;  %v939_v27 = vlaneseq }
 0x105   :  { %v753_v30 = vadd.f32 %v1092_v29, %v704_v24  ;;  %v931_v29 = vld [vmem:[%s1626_s3] sm:$0x1] }
 0x115   :  { %v1109_v31 = vpop.f32.mrb[8].mxu0 }
 0x116   :  { %v1110_v32 = vpop.f32.mrb[9].mxu0 }
 0x117   :  { %v1111_v33 = vadd.f32 %v1110_v32, %v1109_v31  ;;  %v1112_v34 = vpop.f32.mrb[10].mxu0  ;;  %v1137_v35 = vpop.f32.mrb[8].mxu1 }
 0x118   :  { %v1113_v36 = vpop.f32.mrb[11].mxu0  ;;  %v1138_v39 = vpop.f32.mrb[9].mxu1 }
 0x119   :  { %v791_v37 = vadd.f32 %v1111_v33, %v742_v12  ;;  %v1114_v38 = vadd.f32 %v1113_v36, %v1112_v34  ;;  %v1139_v40 = vadd.f32 %v1138_v39, %v1137_v35  ;;  %v1140_v41 = vpop.f32.mrb[10].mxu1  ;;  %v935_v33 = vld [vmem:[%s1627_s4] sm:$0x1] }
 0x11a   :  { %v1141_v43 = vpop.f32.mrb[11].mxu1 }
 0x11b   :  { %v794_v42 = vadd.f32 %v1114_v38, %v745_v14  ;;  %v1142_v44 = vadd.f32 %v1141_v43, %v1140_v41  ;;  %v840_v45 = vadd.f32 %v1139_v40, %v791_v37 }
 0x11d   :  { %v1115_v46 = vpop.f32.mrb[12].mxu0  ;;  %v843_v48 = vadd.f32 %v1142_v44, %v794_v42 }
 0x11e   :  { %v1116_v47 = vpop.f32.mrb[13].mxu0 }
 0x11f   :  { %v1117_v49 = vadd.f32 %v1116_v47, %v1115_v46  ;;  %v1118_v50 = vpop.f32.mrb[14].mxu0  ;;  %v1143_v51 = vpop.f32.mrb[12].mxu1 }
 0x120   :  { %v1119_v52 = vpop.f32.mrb[15].mxu0  ;;  %v1144_v55 = vpop.f32.mrb[13].mxu1 }
 0x121   :  { %v799_v53 = vadd.f32 %v1117_v49, %v750_v28  ;;  %v1120_v54 = vadd.f32 %v1119_v52, %v1118_v50  ;;  %v1145_v56 = vadd.f32 %v1144_v55, %v1143_v51  ;;  %v1146_v57 = vpop.f32.mrb[14].mxu1  ;;  %v940_v28 = vshrl.u32 %v939_v27, 7 }
 0x122   :  { %v1147_v59 = vpop.f32.mrb[15].mxu1 }
 0x123   :  { %v802_v58 = vadd.f32 %v1120_v54, %v753_v30  ;;  %v1148_v60 = vadd.f32 %v1147_v59, %v1146_v57  ;;  %v848_v61 = vadd.f32 %v1145_v56, %v799_v53  ;;  %v941_v30 = vsub.s32 0, %v940_v28 }
 0x125   :  { %v851_v62 = vadd.f32 %v1148_v60, %v802_v58 }
 0x135   :  { %v1177_v63 = vpop.f32.mrb[16].mxu0 }
 0x136   :  { %v897_v0 = vadd.f32 %v1177_v63, %v848_v61  ;;  %v888_v1 = vpop.f32.mrb[17].mxu0 }
 0x137   :  { %v889_v2 = vadd.f32 %v888_v1, %v840_v45  ;;  %v1178_v3 = vpop.f32.mrb[18].mxu0 }
 0x138   :  { %v900_v4 = vadd.f32 %v1178_v3, %v851_v62  ;;  %v891_v5 = vpop.f32.mrb[19].mxu0 }
 0x139   :  { %v892_v6 = vadd.f32 %v891_v5, %v843_v48 }
 0x13a   :  { %v912_v7 = vmax.f32 %v897_v0, %v900_v4 }
 0x13b   :  { %v909_v8 = vmax.f32 %v889_v2, %v892_v6 }
 0x13d   :  { %v913_v9 = vmax.f32 %v909_v8, %v912_v7 }
 0x13f   :  { %v914_v10 = vrot.slane %v913_v9, 4 }
 0x141   :  { %v915_v11 = vadd.f32 %v914_v10, %v913_v9 }
 0x143   :  { %v916_v12 = vrot.slane %v915_v11, 2 }
 0x145   :  { %v917_v13 = vadd.f32 %v916_v12, %v915_v11 }
 0x147   :  { %v918_v14 = vrot.slane %v917_v13, 1 }
 0x149   :  { %v919_v15 = vadd.f32 %v918_v14, %v917_v13 }
 0x14b   :  { %v921_v16 = vmul.f32 0.125, %v919_v15 }
 0x14d   :  { %v922_v17 = vsub.f32 %v913_v9, %v921_v16 }
 0x14f   :  { %v923_v18 = vmul.f32 %v922_v17, %v922_v17 }
 0x151   :  { %v924_v19 = vrot.slane %v923_v18, 4 }
 0x153   :  { %v925_v20 = vadd.f32 %v924_v19, %v923_v18 }
 0x155   :  { %v926_v21 = vrot.slane %v925_v20, 2 }
 0x157   :  { %v927_v22 = vadd.f32 %v926_v21, %v925_v20 }
 0x159   :  { %v928_v23 = vrot.slane %v927_v22, 1 }
 0x15b   :  { %v929_v24 = vadd.f32 %v928_v23, %v927_v22 }
 0x15d   :  { %v930_v25 = vmul.f32 0.125, %v929_v24 }
 0x15f   :  { %v932_v26 = vadd.f32 1e-05, %v930_v25 }
 0x161   :  { %1251 = vrsqrt.f32 %v932_v26 }
 0x16b   :  { %v1252_v31 = vpop.eup %1251 }
 0x16c   :  { %v934_v32 = vmul.f32 %v1252_v31, %v931_v29 }
 0x16e   :  { %v936_v34 = vmul.f32 %v934_v32, %v921_v16  ;;  %v942_v35 = vrot.slane %v934_v32, %v941_v30 }
 0x170   :  { %v937_v36 = vsub.f32 %v935_v33, %v936_v34  ;;  %v944_v37 = vmul.f32 %v942_v35, %v913_v9 }
 0x172   :  { %v949_v38 = vrot.slane %v937_v36, %v941_v30 }
 0x174   :  { %v951_v39 = vadd.f32 %v949_v38, %v944_v37 }
 0x176   :  { %v1036_v40 = vmul.f32 -1.442695, %v951_v39 }
 0x178   :  { %1253 = vpow2.f32 %v1036_v40 }
 0x182   :  { %v1254_v41 = vpop.eup %1253 }
 0x183   :  { %v955_v42 = vadd.f32 1.0, %v1254_v41 }
 0x185   :  { %1255 = vrcp.f32 %v955_v42 }
 0x18f   :  { %v1256_v43 = vpop.eup %1255 }
 0x190   :  { %958 = vst [vmem:[%s1628_s5] sm:$0xff] %v1256_v43 }

// kernel: network_forward.7
= control target key start
LH: loop header
LB: loop body
LE: loop exit
PB: predicated region body
PF: predicated region fallthrough
CT: control target
= control target key end

     0   :  { %8 = vsyncpa [#allocation4], 0  ;;  %s6025_s0 = inlined_call_operand.vmem [shape: f32[2,2432], index: 0, kind: input, shape index: {}]   ;;  %s6026_s1 = inlined_call_operand.vmem [shape: bf16[2432,4864], index: 1, kind: input, shape index: {}]   ;;  %s6027_s2 = inlined_call_operand.vmem [shape: f32[1,4864], index: 2, kind: input, shape index: {}]   ;;  %s6028_s3 = inlined_call_operand.hbm [shape: f32[2,4864], index: 3, kind: output, shape index: {}]  }
   0x1   :  { %10 = vsyncpa [#allocation4 + $0x1], 0  ;;  %s4888_s12 = smov 0   ;;  %s4890_s13 = smov 0  }
   0x2   :  { %s4892_s14 = smov 0   ;;  %s4894_s15 = smov 0  }
   0x3 LB: > { %s4909_s16 = sadd.s32 4294967295, %s4863_s15   ;;  %s3929_s17 = sadd.s32 4294967294, %s4863_s15   ;;  %s4863_s15 = sphi %s4894_s15, %s6034_s15   ;;  %s4859_s14 = sphi %s4892_s14, %s6033_s14   ;;  %s4855_s13 = sphi %s4890_s13, %s6032_s13   ;;  %s4851_s12 = sphi %s4888_s12, %s6031_s12  }
   0x4   : > { %s4913_s18 = sadd.s32 1, %s4863_s15   ;;  %s44_s19 = sadd.s32 1, %s4859_s14 }
   0x5   : > { %s41_s20 = ssub.s32 %s4863_s15, %s4913_s18  ;;  %p51_p0 = scmp.ne.s32.totalorder %s4859_s14, %s4855_s13 }
   0x6   : > { %p42_p1 = scmp.eq.s32.totalorder %s41_s20, 0  ;;  %p52_p2 = scmp.eq.s32.totalorder %s4863_s15, 0 }
   0x7   : > { %p107_p3 = scmp.eq.s32.totalorder %s4909_s16, 18  ;;  %p112_p4 = scmp.ne.s32.totalorder %s4855_s13, %s4851_s12 }
   0x8   : > { %s4925_s21 = scalar_select %p42_p1, %s4859_s14, %s44_s19  }
   0x9   : > { %p53_p5 = por %p52_p2, %p51_p0  ;;  %p4927_p6 = por %p107_p3, %p51_p0 }
   0xa   : > { %p113_p7 = scmp.eq.s32.totalorder %s3929_s17, 18  ;;  %p3931_p9 = scmp.ge.s32.totalorder %s4863_s15, 19 }
   0xc   : > { %p4931_p8 = por %p113_p7, %p112_p4  ;;  %132 = sbr.rel (%p3931_p9) target bundleno = 176 (0xb0), region = 20 }
  0x13   : > { %135 = sbr.rel (!%p53_p5) target bundleno = 176 (0xb0), region = 24  ;;  %s137_s24 = sand.u32 (%p53_p5), 1, %s4859_s14  }
  0x14   : > { %s4249_s25 = sshll.u32 (%p53_p5), %s4863_s15, 3  ;;  %s4287_s26 = smul.u32 (%p53_p5), 2432, %s137_s24 }
  0x15   : > { %s4941_s29 = scalar_lea.vmem (%p53_p5), %s6026_s1, %s4249_s25 }
  0x16   : > { %v776_v0 = vld [vmem:[%s4941_s29] sm:$0xff] (%p53_p5)  ;;  %v778_v1 = vld [vmem:[%s4941_s29 + $0x98] sm:$0xff] (%p53_p5)  ;;  %v780_v2 = vld [vmem:[%s4941_s29 + $0x130] sm:$0xff] (%p53_p5)  ;;  %s4949_s30 = scalar_lea.vmem (%p53_p5), [#allocation2], %s4287_s26 }
  0x17   : > { %v782_v3 = vld [vmem:[%s4941_s29 + $0x1c8] sm:$0xff] (%p53_p5)  ;;  %v784_v4 = vld [vmem:[%s4941_s29 + $0x260] sm:$0xff] (%p53_p5)  ;;  %v786_v5 = vld [vmem:[%s4941_s29 + $0x2f8] sm:$0xff] (%p53_p5)  ;;  %777 = vst [vmem:[%s4949_s30] sm:$0xff] (%p53_p5), %v776_v0 }
  0x18   : > { %779 = vst [vmem:[%s4949_s30 + $0x8] sm:$0xff] (%p53_p5), %v778_v1  ;;  %781 = vst [vmem:[%s4949_s30 + $0x10] sm:$0xff] (%p53_p5), %v780_v2  ;;  %v788_v6 = vld [vmem:[%s4941_s29 + $0x390] sm:$0xff] (%p53_p5)  ;;  %v790_v7 = vld [vmem:[%s4941_s29 + $0x428] sm:$0xff] (%p53_p5) }
  0x19   : > { %783 = vst [vmem:[%s4949_s30 + $0x18] sm:$0xff] (%p53_p5), %v782_v3  ;;  %785 = vst [vmem:[%s4949_s30 + $0x20] sm:$0xff] (%p53_p5), %v784_v4  ;;  %v792_v8 = vld [vmem:[%s4941_s29 + $0x4c0] sm:$0xff] (%p53_p5)  ;;  %v794_v9 = vld [vmem:[%s4941_s29 + $0x558] sm:$0xff] (%p53_p5) }
  0x1a   : > { %787 = vst [vmem:[%s4949_s30 + $0x28] sm:$0xff] %v786_v5  ;;  %789 = vst [vmem:[%s4949_s30 + $0x30] sm:$0xff] %v788_v6  ;;  %v796_v10 = vld [vmem:[%s4941_s29 + $0x5f0] sm:$0xff]  ;;  %v798_v11 = vld [vmem:[%s4941_s29 + $0x688] sm:$0xff] }
  0x1b   : > { %791 = vst [vmem:[%s4949_s30 + $0x38] sm:$0xff] %v790_v7  ;;  %793 = vst [vmem:[%s4949_s30 + $0x40] sm:$0xff] %v792_v8  ;;  %v800_v12 = vld [vmem:[%s4941_s29 + $0x720] sm:$0xff]  ;;  %v802_v13 = vld [vmem:[%s4941_s29 + $0x7b8] sm:$0xff] }
  0x1c   : > { %795 = vst [vmem:[%s4949_s30 + $0x48] sm:$0xff] %v794_v9  ;;  %797 = vst [vmem:[%s4949_s30 + $0x50] sm:$0xff] %v796_v10  ;;  %v804_v14 = vld [vmem:[%s4941_s29 + $0x850] sm:$0xff]  ;;  %v806_v15 = vld [vmem:[%s4941_s29 + $0x8e8] sm:$0xff] }
  0x1d   : > { %799 = vst [vmem:[%s4949_s30 + $0x58] sm:$0xff] %v798_v11  ;;  %801 = vst [vmem:[%s4949_s30 + $0x60] sm:$0xff] %v800_v12  ;;  %v808_v16 = vld [vmem:[%s4941_s29 + $0x980] sm:$0xff]  ;;  %v810_v17 = vld [vmem:[%s4941_s29 + $0xa18] sm:$0xff] }
  0x1e   : > { %803 = vst [vmem:[%s4949_s30 + $0x68] sm:$0xff] %v802_v13  ;;  %805 = vst [vmem:[%s4949_s30 + $0x70] sm:$0xff] %v804_v14  ;;  %v812_v18 = vld [vmem:[%s4941_s29 + $0xab0] sm:$0xff]  ;;  %v814_v19 = vld [vmem:[%s4941_s29 + $0xb48] sm:$0xff] }
  0x1f   : > { %807 = vst [vmem:[%s4949_s30 + $0x78] sm:$0xff] %v806_v15  ;;  %809 = vst [vmem:[%s4949_s30 + $0x80] sm:$0xff] %v808_v16  ;;  %v816_v20 = vld [vmem:[%s4941_s29 + $0xbe0] sm:$0xff]  ;;  %v818_v21 = vld [vmem:[%s4941_s29 + $0xc78] sm:$0xff] }
  0x20   : > { %811 = vst [vmem:[%s4949_s30 + $0x88] sm:$0xff] %v810_v17  ;;  %813 = vst [vmem:[%s4949_s30 + $0x90] sm:$0xff] %v812_v18  ;;  %v820_v22 = vld [vmem:[%s4941_s29 + $0xd10] sm:$0xff]  ;;  %v822_v23 = vld [vmem:[%s4941_s29 + $0xda8] sm:$0xff] }
  0x21   : > { %815 = vst [vmem:[%s4949_s30 + $0x98] sm:$0xff] %v814_v19  ;;  %817 = vst [vmem:[%s4949_s30 + $0xa0] sm:$0xff] %v816_v20  ;;  %v824_v24 = vld [vmem:[%s4941_s29 + $0xe40] sm:$0xff]  ;;  %v826_v25 = vld [vmem:[%s4941_s29 + $0xed8] sm:$0xff] }
  0x22   : > { %819 = vst [vmem:[%s4949_s30 + $0xa8] sm:$0xff] %v818_v21  ;;  %821 = vst [vmem:[%s4949_s30 + $0xb0] sm:$0xff] %v820_v22  ;;  %v828_v26 = vld [vmem:[%s4941_s29 + $0xf70] sm:$0xff]  ;;  %v830_v27 = vld [vmem:[%s4941_s29 + $0x1008] sm:$0xff] }
  0x23   : > { %823 = vst [vmem:[%s4949_s30 + $0xb8] sm:$0xff] %v822_v23  ;;  %825 = vst [vmem:[%s4949_s30 + $0xc0] sm:$0xff] %v824_v24  ;;  %v832_v28 = vld [vmem:[%s4941_s29 + $0x10a0] sm:$0xff]  ;;  %v834_v29 = vld [vmem:[%s4941_s29 + $0x1138] sm:$0xff] }
  0x24   : > { %827 = vst [vmem:[%s4949_s30 + $0xc8] sm:$0xff] %v826_v25  ;;  %829 = vst [vmem:[%s4949_s30 + $0xd0] sm:$0xff] %v828_v26  ;;  %v836_v30 = vld [vmem:[%s4941_s29 + $0x11d0] sm:$0xff]  ;;  %v838_v31 = vld [vmem:[%s4941_s29 + $0x1268] sm:$0xff] }
  0x25   : > { %831 = vst [vmem:[%s4949_s30 + $0xd8] sm:$0xff] %v830_v27  ;;  %833 = vst [vmem:[%s4949_s30 + $0xe0] sm:$0xff] %v832_v28  ;;  %v840_v32 = vld [vmem:[%s4941_s29 + $0x1300] sm:$0xff]  ;;  %v842_v33 = vld [vmem:[%s4941_s29 + $0x1398] sm:$0xff] }
  0x26   : > { %835 = vst [vmem:[%s4949_s30 + $0xe8] sm:$0xff] %v834_v29  ;;  %837 = vst [vmem:[%s4949_s30 + $0xf0] sm:$0xff] %v836_v30  ;;  %v844_v34 = vld [vmem:[%s4941_s29 + $0x1430] sm:$0xff]  ;;  %v846_v35 = vld [vmem:[%s4941_s29 + $0x14c8] sm:$0xff] }
  0x27   : > { %839 = vst [vmem:[%s4949_s30 + $0xf8] sm:$0xff] %v838_v31  ;;  %841 = vst [vmem:[%s4949_s30 + $0x100] sm:$0xff] %v840_v32  ;;  %v848_v36 = vld [vmem:[%s4941_s29 + $0x1560] sm:$0xff]  ;;  %v850_v37 = vld [vmem:[%s4941_s29 + $0x15f8] sm:$0xff] }
  0x28   : > { %843 = vst [vmem:[%s4949_s30 + $0x108] sm:$0xff] %v842_v33  ;;  %845 = vst [vmem:[%s4949_s30 + $0x110] sm:$0xff] %v844_v34  ;;  %v852_v38 = vld [vmem:[%s4941_s29 + $0x1690] sm:$0xff]  ;;  %v854_v39 = vld [vmem:[%s4941_s29 + $0x1728] sm:$0xff] }
  0x29   : > { %847 = vst [vmem:[%s4949_s30 + $0x118] sm:$0xff] %v846_v35  ;;  %849 = vst [vmem:[%s4949_s30 + $0x120] sm:$0xff] %v848_v36  ;;  %v856_v40 = vld [vmem:[%s4941_s29 + $0x17c0] sm:$0xff]  ;;  %v858_v41 = vld [vmem:[%s4941_s29 + $0x1858] sm:$0xff] }
  0x2a   : > { %851 = vst [vmem:[%s4949_s30 + $0x128] sm:$0xff] %v850_v37  ;;  %853 = vst [vmem:[%s4949_s30 + $0x130] sm:$0xff] %v852_v38  ;;  %v860_v42 = vld [vmem:[%s4941_s29 + $0x18f0] sm:$0xff]  ;;  %v862_v43 = vld [vmem:[%s4941_s29 + $0x1988] sm:$0xff] }
  0x2b   : > { %855 = vst [vmem:[%s4949_s30 + $0x138] sm:$0xff] %v854_v39  ;;  %857 = vst [vmem:[%s4949_s30 + $0x140] sm:$0xff] %v856_v40  ;;  %v864_v44 = vld [vmem:[%s4941_s29 + $0x1a20] sm:$0xff]  ;;  %v866_v45 = vld [vmem:[%s4941_s29 + $0x1ab8] sm:$0xff] }
  0x2c   : > { %859 = vst [vmem:[%s4949_s30 + $0x148] sm:$0xff] %v858_v41  ;;  %861 = vst [vmem:[%s4949_s30 + $0x150] sm:$0xff] %v860_v42  ;;  %v868_v46 = vld [vmem:[%s4941_s29 + $0x1b50] sm:$0xff]  ;;  %v870_v47 = vld [vmem:[%s4941_s29 + $0x1be8] sm:$0xff] }
  0x2d   : > { %863 = vst [vmem:[%s4949_s30 + $0x158] sm:$0xff] %v862_v43  ;;  %865 = vst [vmem:[%s4949_s30 + $0x160] sm:$0xff] %v864_v44  ;;  %v872_v48 = vld [vmem:[%s4941_s29 + $0x1c80] sm:$0xff]  ;;  %v874_v49 = vld [vmem:[%s4941_s29 + $0x1d18] sm:$0xff] }
  0x2e   : > { %867 = vst [vmem:[%s4949_s30 + $0x168] sm:$0xff] %v866_v45  ;;  %869 = vst [vmem:[%s4949_s30 + $0x170] sm:$0xff] %v868_v46  ;;  %v876_v50 = vld [vmem:[%s4941_s29 + $0x1db0] sm:$0xff]  ;;  %v878_v51 = vld [vmem:[%s4941_s29 + $0x1e48] sm:$0xff] }
  0x2f   : > { %871 = vst [vmem:[%s4949_s30 + $0x178] sm:$0xff] %v870_v47  ;;  %873 = vst [vmem:[%s4949_s30 + $0x180] sm:$0xff] %v872_v48  ;;  %v880_v52 = vld [vmem:[%s4941_s29 + $0x1ee0] sm:$0xff]  ;;  %v882_v53 = vld [vmem:[%s4941_s29 + $0x1f78] sm:$0xff] }
  0x30   : > { %875 = vst [vmem:[%s4949_s30 + $0x188] sm:$0xff] %v874_v49  ;;  %877 = vst [vmem:[%s4949_s30 + $0x190] sm:$0xff] %v876_v50  ;;  %v884_v54 = vld [vmem:[%s4941_s29 + $0x2010] sm:$0xff]  ;;  %v886_v55 = vld [vmem:[%s4941_s29 + $0x20a8] sm:$0xff] }
  0x31   : > { %879 = vst [vmem:[%s4949_s30 + $0x198] sm:$0xff] %v878_v51  ;;  %881 = vst [vmem:[%s4949_s30 + $0x1a0] sm:$0xff] %v880_v52  ;;  %v888_v56 = vld [vmem:[%s4941_s29 + $0x2140] sm:$0xff]  ;;  %v890_v57 = vld [vmem:[%s4941_s29 + $0x21d8] sm:$0xff] }
  0x32   : > { %883 = vst [vmem:[%s4949_s30 + $0x1a8] sm:$0xff] %v882_v53  ;;  %885 = vst [vmem:[%s4949_s30 + $0x1b0] sm:$0xff] %v884_v54  ;;  %v892_v58 = vld [vmem:[%s4941_s29 + $0x2270] sm:$0xff]  ;;  %v894_v59 = vld [vmem:[%s4941_s29 + $0x2308] sm:$0xff] }
  0x33   : > { %887 = vst [vmem:[%s4949_s30 + $0x1b8] sm:$0xff] %v886_v55  ;;  %889 = vst [vmem:[%s4949_s30 + $0x1c0] sm:$0xff] %v888_v56  ;;  %v896_v60 = vld [vmem:[%s4941_s29 + $0x23a0] sm:$0xff]  ;;  %v898_v61 = vld [vmem:[%s4941_s29 + $0x2438] sm:$0xff] }
  0x34   : > { %891 = vst [vmem:[%s4949_s30 + $0x1c8] sm:$0xff] %v890_v57  ;;  %893 = vst [vmem:[%s4949_s30 + $0x1d0] sm:$0xff] %v892_v58  ;;  %v900_v62 = vld [vmem:[%s4941_s29 + $0x24d0] sm:$0xff]  ;;  %v902_v63 = vld [vmem:[%s4941_s29 + $0x2568] sm:$0xff] }
  0x35   : > { %895 = vst [vmem:[%s4949_s30 + $0x1d8] sm:$0xff] %v894_v59  ;;  %897 = vst [vmem:[%s4949_s30 + $0x1e0] sm:$0xff] %v896_v60  ;;  %v904_v0 = vld [vmem:[%s4941_s29 + $0x2600] sm:$0xff]  ;;  %v906_v1 = vld [vmem:[%s4941_s29 + $0x2698] sm:$0xff] }
  0x36   : > { %899 = vst [vmem:[%s4949_s30 + $0x1e8] sm:$0xff] %v898_v61  ;;  %901 = vst [vmem:[%s4949_s30 + $0x1f0] sm:$0xff] %v900_v62  ;;  %v908_v2 = vld [vmem:[%s4941_s29 + $0x2730] sm:$0xff]  ;;  %v910_v3 = vld [vmem:[%s4941_s29 + $0x27c8] sm:$0xff] }
  0x37   : > { %903 = vst [vmem:[%s4949_s30 + $0x1f8] sm:$0xff] %v902_v63  ;;  %905 = vst [vmem:[%s4949_s30 + $0x200] sm:$0xff] %v904_v0  ;;  %v912_v4 = vld [vmem:[%s4941_s29 + $0x2860] sm:$0xff]  ;;  %v914_v5 = vld [vmem:[%s4941_s29 + $0x28f8] sm:$0xff] }
  0x38   : > { %907 = vst [vmem:[%s4949_s30 + $0x208] sm:$0xff] %v906_v1  ;;  %909 = vst [vmem:[%s4949_s30 + $0x210] sm:$0xff] %v908_v2  ;;  %v916_v6 = vld [vmem:[%s4941_s29 + $0x2990] sm:$0xff]  ;;  %v918_v7 = vld [vmem:[%s4941_s29 + $0x2a28] sm:$0xff] }
  0x39   : > { %911 = vst [vmem:[%s4949_s30 + $0x218] sm:$0xff] %v910_v3  ;;  %913 = vst [vmem:[%s4949_s30 + $0x220] sm:$0xff] %v912_v4  ;;  %v920_v8 = vld [vmem:[%s4941_s29 + $0x2ac0] sm:$0xff]  ;;  %v922_v9 = vld [vmem:[%s4941_s29 + $0x2b58] sm:$0xff] }
  0x3a   : > { %915 = vst [vmem:[%s4949_s30 + $0x228] sm:$0xff] %v914_v5  ;;  %917 = vst [vmem:[%s4949_s30 + $0x230] sm:$0xff] %v916_v6  ;;  %v924_v10 = vld [vmem:[%s4941_s29 + $0x2bf0] sm:$0xff]  ;;  %v926_v11 = vld [vmem:[%s4941_s29 + $0x2c88] sm:$0xff] }
  0x3b   : > { %919 = vst [vmem:[%s4949_s30 + $0x238] sm:$0xff] %v918_v7  ;;  %921 = vst [vmem:[%s4949_s30 + $0x240] sm:$0xff] %v920_v8  ;;  %v928_v12 = vld [vmem:[%s4941_s29 + $0x2d20] sm:$0xff]  ;;  %v930_v13 = vld [vmem:[%s4941_s29 + $0x2db8] sm:$0xff] }
  0x3c   : > { %923 = vst [vmem:[%s4949_s30 + $0x248] sm:$0xff] %v922_v9  ;;  %925 = vst [vmem:[%s4949_s30 + $0x250] sm:$0xff] %v924_v10  ;;  %v932_v14 = vld [vmem:[%s4941_s29 + $0x2e50] sm:$0xff]  ;;  %v934_v15 = vld [vmem:[%s4941_s29 + $0x2ee8] sm:$0xff] }
  0x3d   : > { %927 = vst [vmem:[%s4949_s30 + $0x258] sm:$0xff] %v926_v11  ;;  %929 = vst [vmem:[%s4949_s30 + $0x260] sm:$0xff] %v928_v12  ;;  %v936_v16 = vld [vmem:[%s4941_s29 + $0x2f80] sm:$0xff]  ;;  %v938_v17 = vld [vmem:[%s4941_s29 + $0x3018] sm:$0xff] }
  0x3e   : > { %931 = vst [vmem:[%s4949_s30 + $0x268] sm:$0xff] %v930_v13  ;;  %933 = vst [vmem:[%s4949_s30 + $0x270] sm:$0xff] %v932_v14  ;;  %v940_v18 = vld [vmem:[%s4941_s29 + $0x30b0] sm:$0xff]  ;;  %v942_v19 = vld [vmem:[%s4941_s29 + $0x3148] sm:$0xff] }
  0x3f   : > { %935 = vst [vmem:[%s4949_s30 + $0x278] sm:$0xff] %v934_v15  ;;  %937 = vst [vmem:[%s4949_s30 + $0x280] sm:$0xff] %v936_v16  ;;  %v944_v20 = vld [vmem:[%s4941_s29 + $0x31e0] sm:$0xff]  ;;  %v946_v21 = vld [vmem:[%s4941_s29 + $0x3278] sm:$0xff] }
  0x40   : > { %939 = vst [vmem:[%s4949_s30 + $0x288] sm:$0xff] %v938_v17  ;;  %941 = vst [vmem:[%s4949_s30 + $0x290] sm:$0xff] %v940_v18  ;;  %v948_v22 = vld [vmem:[%s4941_s29 + $0x3310] sm:$0xff]  ;;  %v950_v23 = vld [vmem:[%s4941_s29 + $0x33a8] sm:$0xff] }
  0x41   : > { %943 = vst [vmem:[%s4949_s30 + $0x298] sm:$0xff] %v942_v19  ;;  %945 = vst [vmem:[%s4949_s30 + $0x2a0] sm:$0xff] %v944_v20  ;;  %v952_v24 = vld [vmem:[%s4941_s29 + $0x3440] sm:$0xff]  ;;  %v954_v25 = vld [vmem:[%s4941_s29 + $0x34d8] sm:$0xff] }
  0x42   : > { %947 = vst [vmem:[%s4949_s30 + $0x2a8] sm:$0xff] %v946_v21  ;;  %949 = vst [vmem:[%s4949_s30 + $0x2b0] sm:$0xff] %v948_v22  ;;  %v956_v26 = vld [vmem:[%s4941_s29 + $0x3570] sm:$0xff]  ;;  %v958_v27 = vld [vmem:[%s4941_s29 + $0x3608] sm:$0xff] }
  0x43   : > { %951 = vst [vmem:[%s4949_s30 + $0x2b8] sm:$0xff] %v950_v23  ;;  %953 = vst [vmem:[%s4949_s30 + $0x2c0] sm:$0xff] %v952_v24  ;;  %v960_v28 = vld [vmem:[%s4941_s29 + $0x36a0] sm:$0xff]  ;;  %v962_v29 = vld [vmem:[%s4941_s29 + $0x3738] sm:$0xff] }
  0x44   : > { %955 = vst [vmem:[%s4949_s30 + $0x2c8] sm:$0xff] %v954_v25  ;;  %957 = vst [vmem:[%s4949_s30 + $0x2d0] sm:$0xff] %v956_v26  ;;  %v964_v30 = vld [vmem:[%s4941_s29 + $0x37d0] sm:$0xff]  ;;  %v966_v31 = vld [vmem:[%s4941_s29 + $0x3868] sm:$0xff] }
  0x45   : > { %959 = vst [vmem:[%s4949_s30 + $0x2d8] sm:$0xff] %v958_v27  ;;  %961 = vst [vmem:[%s4949_s30 + $0x2e0] sm:$0xff] %v960_v28  ;;  %v968_v32 = vld [vmem:[%s4941_s29 + $0x3900] sm:$0xff]  ;;  %v970_v33 = vld [vmem:[%s4941_s29 + $0x3998] sm:$0xff] }
  0x46   : > { %963 = vst [vmem:[%s4949_s30 + $0x2e8] sm:$0xff] %v962_v29  ;;  %965 = vst [vmem:[%s4949_s30 + $0x2f0] sm:$0xff] %v964_v30  ;;  %v972_v34 = vld [vmem:[%s4941_s29 + $0x3a30] sm:$0xff]  ;;  %v974_v35 = vld [vmem:[%s4941_s29 + $0x3ac8] sm:$0xff] }
  0x47   : > { %967 = vst [vmem:[%s4949_s30 + $0x2f8] sm:$0xff] %v966_v31  ;;  %969 = vst [vmem:[%s4949_s30 + $0x300] sm:$0xff] %v968_v32  ;;  %v976_v36 = vld [vmem:[%s4941_s29 + $0x3b60] sm:$0xff]  ;;  %v978_v37 = vld [vmem:[%s4941_s29 + $0x3bf8] sm:$0xff] }
  0x48   : > { %971 = vst [vmem:[%s4949_s30 + $0x308] sm:$0xff] %v970_v33  ;;  %973 = vst [vmem:[%s4949_s30 + $0x310] sm:$0xff] %v972_v34  ;;  %v980_v38 = vld [vmem:[%s4941_s29 + $0x3c90] sm:$0xff]  ;;  %v982_v39 = vld [vmem:[%s4941_s29 + $0x3d28] sm:$0xff] }
  0x49   : > { %975 = vst [vmem:[%s4949_s30 + $0x318] sm:$0xff] %v974_v35  ;;  %977 = vst [vmem:[%s4949_s30 + $0x320] sm:$0xff] %v976_v36  ;;  %v984_v40 = vld [vmem:[%s4941_s29 + $0x3dc0] sm:$0xff]  ;;  %v986_v41 = vld [vmem:[%s4941_s29 + $0x3e58] sm:$0xff] }
  0x4a   : > { %979 = vst [vmem:[%s4949_s30 + $0x328] sm:$0xff] %v978_v37  ;;  %981 = vst [vmem:[%s4949_s30 + $0x330] sm:$0xff] %v980_v38  ;;  %v988_v42 = vld [vmem:[%s4941_s29 + $0x3ef0] sm:$0xff]  ;;  %v990_v43 = vld [vmem:[%s4941_s29 + $0x3f88] sm:$0xff] }
  0x4b   : > { %983 = vst [vmem:[%s4949_s30 + $0x338] sm:$0xff] %v982_v39  ;;  %985 = vst [vmem:[%s4949_s30 + $0x340] sm:$0xff] %v984_v40  ;;  %v992_v44 = vld [vmem:[%s4941_s29 + $0x4020] sm:$0xff]  ;;  %v994_v45 = vld [vmem:[%s4941_s29 + $0x40b8] sm:$0xff] }
  0x4c   : > { %987 = vst [vmem:[%s4949_s30 + $0x348] sm:$0xff] %v986_v41  ;;  %989 = vst [vmem:[%s4949_s30 + $0x350] sm:$0xff] %v988_v42  ;;  %v996_v46 = vld [vmem:[%s4941_s29 + $0x4150] sm:$0xff]  ;;  %v998_v47 = vld [vmem:[%s4941_s29 + $0x41e8] sm:$0xff] }
  0x4d   : > { %991 = vst [vmem:[%s4949_s30 + $0x358] sm:$0xff] %v990_v43  ;;  %993 = vst [vmem:[%s4949_s30 + $0x360] sm:$0xff] %v992_v44  ;;  %v1000_v48 = vld [vmem:[%s4941_s29 + $0x4280] sm:$0xff]  ;;  %v1002_v49 = vld [vmem:[%s4941_s29 + $0x4318] sm:$0xff] }
  0x4e   : > { %995 = vst [vmem:[%s4949_s30 + $0x368] sm:$0xff] %v994_v45  ;;  %997 = vst [vmem:[%s4949_s30 + $0x370] sm:$0xff] %v996_v46  ;;  %v1004_v50 = vld [vmem:[%s4941_s29 + $0x43b0] sm:$0xff]  ;;  %v1006_v51 = vld [vmem:[%s4941_s29 + $0x4448] sm:$0xff] }
  0x4f   : > { %999 = vst [vmem:[%s4949_s30 + $0x378] sm:$0xff] %v998_v47  ;;  %1001 = vst [vmem:[%s4949_s30 + $0x380] sm:$0xff] %v1000_v48  ;;  %v1008_v52 = vld [vmem:[%s4941_s29 + $0x44e0] sm:$0xff]  ;;  %v1010_v53 = vld [vmem:[%s4941_s29 + $0x4578] sm:$0xff] }
  0x50   : > { %1003 = vst [vmem:[%s4949_s30 + $0x388] sm:$0xff] %v1002_v49  ;;  %1005 = vst [vmem:[%s4949_s30 + $0x390] sm:$0xff] %v1004_v50  ;;  %v1012_v54 = vld [vmem:[%s4941_s29 + $0x4610] sm:$0xff]  ;;  %v1014_v55 = vld [vmem:[%s4941_s29 + $0x46a8] sm:$0xff] }
  0x51   : > { %1007 = vst [vmem:[%s4949_s30 + $0x398] sm:$0xff] %v1006_v51  ;;  %1009 = vst [vmem:[%s4949_s30 + $0x3a0] sm:$0xff] %v1008_v52  ;;  %v1016_v56 = vld [vmem:[%s4941_s29 + $0x4740] sm:$0xff]  ;;  %v1018_v57 = vld [vmem:[%s4941_s29 + $0x47d8] sm:$0xff] }
  0x52   : > { %1011 = vst [vmem:[%s4949_s30 + $0x3a8] sm:$0xff] %v1010_v53  ;;  %1013 = vst [vmem:[%s4949_s30 + $0x3b0] sm:$0xff] %v1012_v54  ;;  %v1020_v58 = vld [vmem:[%s4941_s29 + $0x4870] sm:$0xff]  ;;  %v1022_v59 = vld [vmem:[%s4941_s29 + $0x4908] sm:$0xff] }
  0x53   : > { %1015 = vst [vmem:[%s4949_s30 + $0x3b8] sm:$0xff] %v1014_v55  ;;  %1017 = vst [vmem:[%s4949_s30 + $0x3c0] sm:$0xff] %v1016_v56  ;;  %v1024_v60 = vld [vmem:[%s4941_s29 + $0x49a0] sm:$0xff]  ;;  %v1026_v61 = vld [vmem:[%s4941_s29 + $0x4a38] sm:$0xff] }
  0x54   : > { %1019 = vst [vmem:[%s4949_s30 + $0x3c8] sm:$0xff] %v1018_v57  ;;  %1021 = vst [vmem:[%s4949_s30 + $0x3d0] sm:$0xff] %v1020_v58  ;;  %v1028_v62 = vld [vmem:[%s4941_s29 + $0x4ad0] sm:$0xff]  ;;  %v1030_v63 = vld [vmem:[%s4941_s29 + $0x4b68] sm:$0xff] }
  0x55   : > { %1023 = vst [vmem:[%s4949_s30 + $0x3d8] sm:$0xff] %v1022_v59  ;;  %1025 = vst [vmem:[%s4949_s30 + $0x3e0] sm:$0xff] %v1024_v60  ;;  %v1032_v0 = vld [vmem:[%s4941_s29 + $0x4c00] sm:$0xff]  ;;  %v1034_v1 = vld [vmem:[%s4941_s29 + $0x4c98] sm:$0xff] }
  0x56   : > { %1027 = vst [vmem:[%s4949_s30 + $0x3e8] sm:$0xff] %v1026_v61  ;;  %1029 = vst [vmem:[%s4949_s30 + $0x3f0] sm:$0xff] %v1028_v62  ;;  %v1036_v2 = vld [vmem:[%s4941_s29 + $0x4d30] sm:$0xff]  ;;  %v1038_v3 = vld [vmem:[%s4941_s29 + $0x4dc8] sm:$0xff] }
  0x57   : > { %1031 = vst [vmem:[%s4949_s30 + $0x3f8] sm:$0xff] %v1030_v63  ;;  %1033 = vst [vmem:[%s4949_s30 + $0x400] sm:$0xff] %v1032_v0  ;;  %v1040_v4 = vld [vmem:[%s4941_s29 + $0x4e60] sm:$0xff]  ;;  %v1042_v5 = vld [vmem:[%s4941_s29 + $0x4ef8] sm:$0xff] }
  0x58   : > { %1035 = vst [vmem:[%s4949_s30 + $0x408] sm:$0xff] %v1034_v1  ;;  %1037 = vst [vmem:[%s4949_s30 + $0x410] sm:$0xff] %v1036_v2  ;;  %v1044_v6 = vld [vmem:[%s4941_s29 + $0x4f90] sm:$0xff]  ;;  %v1046_v7 = vld [vmem:[%s4941_s29 + $0x5028] sm:$0xff] }
  0x59   : > { %1039 = vst [vmem:[%s4949_s30 + $0x418] sm:$0xff] %v1038_v3  ;;  %1041 = vst [vmem:[%s4949_s30 + $0x420] sm:$0xff] %v1040_v4  ;;  %v1048_v8 = vld [vmem:[%s4941_s29 + $0x50c0] sm:$0xff]  ;;  %v1050_v9 = vld [vmem:[%s4941_s29 + $0x5158] sm:$0xff] }
  0x5a   : > { %1043 = vst [vmem:[%s4949_s30 + $0x428] sm:$0xff] %v1042_v5  ;;  %1045 = vst [vmem:[%s4949_s30 + $0x430] sm:$0xff] %v1044_v6  ;;  %v1052_v10 = vld [vmem:[%s4941_s29 + $0x51f0] sm:$0xff]  ;;  %v1054_v11 = vld [vmem:[%s4941_s29 + $0x5288] sm:$0xff] }
  0x5b   : > { %1047 = vst [vmem:[%s4949_s30 + $0x438] sm:$0xff] %v1046_v7  ;;  %1049 = vst [vmem:[%s4949_s30 + $0x440] sm:$0xff] %v1048_v8  ;;  %v1056_v12 = vld [vmem:[%s4941_s29 + $0x5320] sm:$0xff]  ;;  %v1058_v13 = vld [vmem:[%s4941_s29 + $0x53b8] sm:$0xff] }
  0x5c   : > { %1051 = vst [vmem:[%s4949_s30 + $0x448] sm:$0xff] %v1050_v9  ;;  %1053 = vst [vmem:[%s4949_s30 + $0x450] sm:$0xff] %v1052_v10  ;;  %v1060_v14 = vld [vmem:[%s4941_s29 + $0x5450] sm:$0xff]  ;;  %v1062_v15 = vld [vmem:[%s4941_s29 + $0x54e8] sm:$0xff] }
  0x5d   : > { %1055 = vst [vmem:[%s4949_s30 + $0x458] sm:$0xff] %v1054_v11  ;;  %1057 = vst [vmem:[%s4949_s30 + $0x460] sm:$0xff] %v1056_v12  ;;  %v1064_v16 = vld [vmem:[%s4941_s29 + $0x5580] sm:$0xff]  ;;  %v1066_v17 = vld [vmem:[%s4941_s29 + $0x5618] sm:$0xff] }
  0x5e   : > { %1059 = vst [vmem:[%s4949_s30 + $0x468] sm:$0xff] %v1058_v13  ;;  %1061 = vst [vmem:[%s4949_s30 + $0x470] sm:$0xff] %v1060_v14  ;;  %v1068_v18 = vld [vmem:[%s4941_s29 + $0x56b0] sm:$0xff]  ;;  %v1070_v19 = vld [vmem:[%s4941_s29 + $0x5748] sm:$0xff] }
  0x5f   : > { %1063 = vst [vmem:[%s4949_s30 + $0x478] sm:$0xff] %v1062_v15  ;;  %1065 = vst [vmem:[%s4949_s30 + $0x480] sm:$0xff] %v1064_v16  ;;  %v1072_v20 = vld [vmem:[%s4941_s29 + $0x57e0] sm:$0xff]  ;;  %v1074_v21 = vld [vmem:[%s4941_s29 + $0x5878] sm:$0xff] }
  0x60   : > { %1067 = vst [vmem:[%s4949_s30 + $0x488] sm:$0xff] %v1066_v17  ;;  %1069 = vst [vmem:[%s4949_s30 + $0x490] sm:$0xff] %v1068_v18  ;;  %v1076_v22 = vld [vmem:[%s4941_s29 + $0x5910] sm:$0xff]  ;;  %v1078_v23 = vld [vmem:[%s4941_s29 + $0x59a8] sm:$0xff] }
  0x61   : > { %1071 = vst [vmem:[%s4949_s30 + $0x498] sm:$0xff] %v1070_v19  ;;  %1073 = vst [vmem:[%s4949_s30 + $0x4a0] sm:$0xff] %v1072_v20  ;;  %v1080_v24 = vld [vmem:[%s4941_s29 + $0x5a40] sm:$0xff]  ;;  %v1082_v25 = vld [vmem:[%s4941_s29 + $0x5ad8] sm:$0xff] }
  0x62   : > { %1075 = vst [vmem:[%s4949_s30 + $0x4a8] sm:$0xff] %v1074_v21  ;;  %1077 = vst [vmem:[%s4949_s30 + $0x4b0] sm:$0xff] %v1076_v22  ;;  %v1084_v26 = vld [vmem:[%s4941_s29 + $0x5b70] sm:$0xff]  ;;  %v1086_v27 = vld [vmem:[%s4941_s29 + $0x5c08] sm:$0xff] }
  0x63   : > { %1079 = vst [vmem:[%s4949_s30 + $0x4b8] sm:$0xff] %v1078_v23  ;;  %1081 = vst [vmem:[%s4949_s30 + $0x4c0] sm:$0xff] %v1080_v24  ;;  %v1088_v28 = vld [vmem:[%s4941_s29 + $0x5ca0] sm:$0xff]  ;;  %v1090_v29 = vld [vmem:[%s4941_s29 + $0x5d38] sm:$0xff] }
  0x64   : > { %1083 = vst [vmem:[%s4949_s30 + $0x4c8] sm:$0xff] %v1082_v25  ;;  %1085 = vst [vmem:[%s4949_s30 + $0x4d0] sm:$0xff] %v1084_v26  ;;  %v1092_v30 = vld [vmem:[%s4941_s29 + $0x5dd0] sm:$0xff]  ;;  %v1094_v31 = vld [vmem:[%s4941_s29 + $0x5e68] sm:$0xff] }
  0x65   : > { %1087 = vst [vmem:[%s4949_s30 + $0x4d8] sm:$0xff] %v1086_v27  ;;  %1089 = vst [vmem:[%s4949_s30 + $0x4e0] sm:$0xff] %v1088_v28  ;;  %v1096_v32 = vld [vmem:[%s4941_s29 + $0x5f00] sm:$0xff]  ;;  %v1098_v33 = vld [vmem:[%s4941_s29 + $0x5f98] sm:$0xff] }
  0x66   : > { %1091 = vst [vmem:[%s4949_s30 + $0x4e8] sm:$0xff] %v1090_v29  ;;  %1093 = vst [vmem:[%s4949_s30 + $0x4f0] sm:$0xff] %v1092_v30  ;;  %v1100_v34 = vld [vmem:[%s4941_s29 + $0x6030] sm:$0xff]  ;;  %v1102_v35 = vld [vmem:[%s4941_s29 + $0x60c8] sm:$0xff] }
  0x67   : > { %1095 = vst [vmem:[%s4949_s30 + $0x4f8] sm:$0xff] %v1094_v31  ;;  %1097 = vst [vmem:[%s4949_s30 + $0x500] sm:$0xff] %v1096_v32  ;;  %v1104_v36 = vld [vmem:[%s4941_s29 + $0x6160] sm:$0xff]  ;;  %v1106_v37 = vld [vmem:[%s4941_s29 + $0x61f8] sm:$0xff] }
  0x68   : > { %1099 = vst [vmem:[%s4949_s30 + $0x508] sm:$0xff] %v1098_v33  ;;  %1101 = vst [vmem:[%s4949_s30 + $0x510] sm:$0xff] %v1100_v34  ;;  %v1108_v38 = vld [vmem:[%s4941_s29 + $0x6290] sm:$0xff]  ;;  %v1110_v39 = vld [vmem:[%s4941_s29 + $0x6328] sm:$0xff] }
  0x69   : > { %1103 = vst [vmem:[%s4949_s30 + $0x518] sm:$0xff] %v1102_v35  ;;  %1105 = vst [vmem:[%s4949_s30 + $0x520] sm:$0xff] %v1104_v36  ;;  %v1112_v40 = vld [vmem:[%s4941_s29 + $0x63c0] sm:$0xff]  ;;  %v1114_v41 = vld [vmem:[%s4941_s29 + $0x6458] sm:$0xff] }
  0x6a   : > { %1107 = vst [vmem:[%s4949_s30 + $0x528] sm:$0xff] %v1106_v37  ;;  %1109 = vst [vmem:[%s4949_s30 + $0x530] sm:$0xff] %v1108_v38  ;;  %v1116_v42 = vld [vmem:[%s4941_s29 + $0x64f0] sm:$0xff]  ;;  %v1118_v43 = vld [vmem:[%s4941_s29 + $0x6588] sm:$0xff] }
  0x6b   : > { %1111 = vst [vmem:[%s4949_s30 + $0x538] sm:$0xff] %v1110_v39  ;;  %1113 = vst [vmem:[%s4949_s30 + $0x540] sm:$0xff] %v1112_v40  ;;  %v1120_v44 = vld [vmem:[%s4941_s29 + $0x6620] sm:$0xff]  ;;  %v1122_v45 = vld [vmem:[%s4941_s29 + $0x66b8] sm:$0xff] }
  0x6c   : > { %1115 = vst [vmem:[%s4949_s30 + $0x548] sm:$0xff] %v1114_v41  ;;  %1117 = vst [vmem:[%s4949_s30 + $0x550] sm:$0xff] %v1116_v42  ;;  %v1124_v46 = vld [vmem:[%s4941_s29 + $0x6750] sm:$0xff]  ;;  %v1126_v47 = vld [vmem:[%s4941_s29 + $0x67e8] sm:$0xff] }
  0x6d   : > { %1119 = vst [vmem:[%s4949_s30 + $0x558] sm:$0xff] %v1118_v43  ;;  %1121 = vst [vmem:[%s4949_s30 + $0x560] sm:$0xff] %v1120_v44  ;;  %v1128_v48 = vld [vmem:[%s4941_s29 + $0x6880] sm:$0xff]  ;;  %v1130_v49 = vld [vmem:[%s4941_s29 + $0x6918] sm:$0xff] }
  0x6e   : > { %1123 = vst [vmem:[%s4949_s30 + $0x568] sm:$0xff] %v1122_v45  ;;  %1125 = vst [vmem:[%s4949_s30 + $0x570] sm:$0xff] %v1124_v46  ;;  %v1132_v50 = vld [vmem:[%s4941_s29 + $0x69b0] sm:$0xff]  ;;  %v1134_v51 = vld [vmem:[%s4941_s29 + $0x6a48] sm:$0xff] }
  0x6f   : > { %1127 = vst [vmem:[%s4949_s30 + $0x578] sm:$0xff] %v1126_v47  ;;  %1129 = vst [vmem:[%s4949_s30 + $0x580] sm:$0xff] %v1128_v48  ;;  %v1136_v52 = vld [vmem:[%s4941_s29 + $0x6ae0] sm:$0xff]  ;;  %v1138_v53 = vld [vmem:[%s4941_s29 + $0x6b78] sm:$0xff] }
  0x70   : > { %1131 = vst [vmem:[%s4949_s30 + $0x588] sm:$0xff] %v1130_v49  ;;  %1133 = vst [vmem:[%s4949_s30 + $0x590] sm:$0xff] %v1132_v50  ;;  %v1140_v54 = vld [vmem:[%s4941_s29 + $0x6c10] sm:$0xff]  ;;  %v1142_v55 = vld [vmem:[%s4941_s29 + $0x6ca8] sm:$0xff] }
  0x71   : > { %1135 = vst [vmem:[%s4949_s30 + $0x598] sm:$0xff] %v1134_v51  ;;  %1137 = vst [vmem:[%s4949_s30 + $0x5a0] sm:$0xff] %v1136_v52  ;;  %v1144_v56 = vld [vmem:[%s4941_s29 + $0x6d40] sm:$0xff]  ;;  %v1146_v57 = vld [vmem:[%s4941_s29 + $0x6dd8] sm:$0xff] }
  0x72   : > { %1139 = vst [vmem:[%s4949_s30 + $0x5a8] sm:$0xff] %v1138_v53  ;;  %1141 = vst [vmem:[%s4949_s30 + $0x5b0] sm:$0xff] %v1140_v54  ;;  %v1148_v58 = vld [vmem:[%s4941_s29 + $0x6e70] sm:$0xff]  ;;  %v1150_v59 = vld [vmem:[%s4941_s29 + $0x6f08] sm:$0xff] }
  0x73   : > { %1143 = vst [vmem:[%s4949_s30 + $0x5b8] sm:$0xff] %v1142_v55  ;;  %1145 = vst [vmem:[%s4949_s30 + $0x5c0] sm:$0xff] %v1144_v56  ;;  %v1152_v60 = vld [vmem:[%s4941_s29 + $0x6fa0] sm:$0xff]  ;;  %v1154_v61 = vld [vmem:[%s4941_s29 + $0x7038] sm:$0xff] }
  0x74   : > { %1147 = vst [vmem:[%s4949_s30 + $0x5c8] sm:$0xff] %v1146_v57  ;;  %1149 = vst [vmem:[%s4949_s30 + $0x5d0] sm:$0xff] %v1148_v58  ;;  %v1156_v62 = vld [vmem:[%s4941_s29 + $0x70d0] sm:$0xff]  ;;  %v1158_v63 = vld [vmem:[%s4941_s29 + $0x7168] sm:$0xff] }
  0x75   : > { %1151 = vst [vmem:[%s4949_s30 + $0x5d8] sm:$0xff] %v1150_v59  ;;  %1153 = vst [vmem:[%s4949_s30 + $0x5e0] sm:$0xff] %v1152_v60  ;;  %v1160_v0 = vld [vmem:[%s4941_s29 + $0x7200] sm:$0xff]  ;;  %v1162_v1 = vld [vmem:[%s4941_s29 + $0x7298] sm:$0xff] }
  0x76   : > { %1155 = vst [vmem:[%s4949_s30 + $0x5e8] sm:$0xff] %v1154_v61  ;;  %1157 = vst [vmem:[%s4949_s30 + $0x5f0] sm:$0xff] %v1156_v62  ;;  %v1164_v2 = vld [vmem:[%s4941_s29 + $0x7330] sm:$0xff]  ;;  %v1166_v3 = vld [vmem:[%s4941_s29 + $0x73c8] sm:$0xff] }
  0x77   : > { %1159 = vst [vmem:[%s4949_s30 + $0x5f8] sm:$0xff] %v1158_v63  ;;  %1161 = vst [vmem:[%s4949_s30 + $0x600] sm:$0xff] %v1160_v0  ;;  %v1168_v4 = vld [vmem:[%s4941_s29 + $0x7460] sm:$0xff]  ;;  %v1170_v5 = vld [vmem:[%s4941_s29 + $0x74f8] sm:$0xff] }
  0x78   : > { %1163 = vst [vmem:[%s4949_s30 + $0x608] sm:$0xff] %v1162_v1  ;;  %1165 = vst [vmem:[%s4949_s30 + $0x610] sm:$0xff] %v1164_v2  ;;  %v1172_v6 = vld [vmem:[%s4941_s29 + $0x7590] sm:$0xff]  ;;  %v1174_v7 = vld [vmem:[%s4941_s29 + $0x7628] sm:$0xff] }
  0x79   : > { %1167 = vst [vmem:[%s4949_s30 + $0x618] sm:$0xff] %v1166_v3  ;;  %1169 = vst [vmem:[%s4949_s30 + $0x620] sm:$0xff] %v1168_v4  ;;  %v1176_v8 = vld [vmem:[%s4941_s29 + $0x76c0] sm:$0xff]  ;;  %v1178_v9 = vld [vmem:[%s4941_s29 + $0x7758] sm:$0xff] }
  0x7a   : > { %1171 = vst [vmem:[%s4949_s30 + $0x628] sm:$0xff] %v1170_v5  ;;  %1173 = vst [vmem:[%s4949_s30 + $0x630] sm:$0xff] %v1172_v6  ;;  %v1180_v10 = vld [vmem:[%s4941_s29 + $0x77f0] sm:$0xff]  ;;  %v1182_v11 = vld [vmem:[%s4941_s29 + $0x7888] sm:$0xff] }
  0x7b   : > { %1175 = vst [vmem:[%s4949_s30 + $0x638] sm:$0xff] %v1174_v7  ;;  %1177 = vst [vmem:[%s4949_s30 + $0x640] sm:$0xff] %v1176_v8  ;;  %v1184_v12 = vld [vmem:[%s4941_s29 + $0x7920] sm:$0xff]  ;;  %v1186_v13 = vld [vmem:[%s4941_s29 + $0x79b8] sm:$0xff] }
  0x7c   : > { %1179 = vst [vmem:[%s4949_s30 + $0x648] sm:$0xff] %v1178_v9  ;;  %1181 = vst [vmem:[%s4949_s30 + $0x650] sm:$0xff] %v1180_v10  ;;  %v1188_v14 = vld [vmem:[%s4941_s29 + $0x7a50] sm:$0xff]  ;;  %v1190_v15 = vld [vmem:[%s4941_s29 + $0x7ae8] sm:$0xff] }
  0x7d   : > { %1183 = vst [vmem:[%s4949_s30 + $0x658] sm:$0xff] %v1182_v11  ;;  %1185 = vst [vmem:[%s4949_s30 + $0x660] sm:$0xff] %v1184_v12  ;;  %v1192_v16 = vld [vmem:[%s4941_s29 + $0x7b80] sm:$0xff]  ;;  %v1194_v17 = vld [vmem:[%s4941_s29 + $0x7c18] sm:$0xff] }
  0x7e   : > { %1187 = vst [vmem:[%s4949_s30 + $0x668] sm:$0xff] %v1186_v13  ;;  %1189 = vst [vmem:[%s4949_s30 + $0x670] sm:$0xff] %v1188_v14  ;;  %v1196_v18 = vld [vmem:[%s4941_s29 + $0x7cb0] sm:$0xff]  ;;  %v1198_v19 = vld [vmem:[%s4941_s29 + $0x7d48] sm:$0xff] }
  0x7f   : > { %1191 = vst [vmem:[%s4949_s30 + $0x678] sm:$0xff] %v1190_v15  ;;  %1193 = vst [vmem:[%s4949_s30 + $0x680] sm:$0xff] %v1192_v16  ;;  %v1200_v20 = vld [vmem:[%s4941_s29 + $0x7de0] sm:$0xff]  ;;  %v1202_v21 = vld [vmem:[%s4941_s29 + $0x7e78] sm:$0xff] }
  0x80   : > { %1195 = vst [vmem:[%s4949_s30 + $0x688] sm:$0xff] %v1194_v17  ;;  %1197 = vst [vmem:[%s4949_s30 + $0x690] sm:$0xff] %v1196_v18  ;;  %v1204_v22 = vld [vmem:[%s4941_s29 + $0x7f10] sm:$0xff]  ;;  %v1206_v23 = vld [vmem:[%s4941_s29 + $0x7fa8] sm:$0xff] }
  0x81   : > { %1199 = vst [vmem:[%s4949_s30 + $0x698] sm:$0xff] %v1198_v19  ;;  %1201 = vst [vmem:[%s4949_s30 + $0x6a0] sm:$0xff] %v1200_v20  ;;  %v1208_v24 = vld [vmem:[%s4941_s29 + $0x8040] sm:$0xff]  ;;  %v1210_v25 = vld [vmem:[%s4941_s29 + $0x80d8] sm:$0xff] }
  0x82   : > { %1203 = vst [vmem:[%s4949_s30 + $0x6a8] sm:$0xff] %v1202_v21  ;;  %1205 = vst [vmem:[%s4949_s30 + $0x6b0] sm:$0xff] %v1204_v22  ;;  %v1212_v26 = vld [vmem:[%s4941_s29 + $0x8170] sm:$0xff]  ;;  %v1214_v27 = vld [vmem:[%s4941_s29 + $0x8208] sm:$0xff] }
  0x83   : > { %1207 = vst [vmem:[%s4949_s30 + $0x6b8] sm:$0xff] %v1206_v23  ;;  %1209 = vst [vmem:[%s4949_s30 + $0x6c0] sm:$0xff] %v1208_v24  ;;  %v1216_v28 = vld [vmem:[%s4941_s29 + $0x82a0] sm:$0xff]  ;;  %v1218_v29 = vld [vmem:[%s4941_s29 + $0x8338] sm:$0xff] }
  0x84   : > { %1211 = vst [vmem:[%s4949_s30 + $0x6c8] sm:$0xff] %v1210_v25  ;;  %1213 = vst [vmem:[%s4949_s30 + $0x6d0] sm:$0xff] %v1212_v26  ;;  %v1220_v30 = vld [vmem:[%s4941_s29 + $0x83d0] sm:$0xff]  ;;  %v1222_v31 = vld [vmem:[%s4941_s29 + $0x8468] sm:$0xff] }
  0x85   : > { %1215 = vst [vmem:[%s4949_s30 + $0x6d8] sm:$0xff] %v1214_v27  ;;  %1217 = vst [vmem:[%s4949_s30 + $0x6e0] sm:$0xff] %v1216_v28  ;;  %v1224_v32 = vld [vmem:[%s4941_s29 + $0x8500] sm:$0xff]  ;;  %v1226_v33 = vld [vmem:[%s4941_s29 + $0x8598] sm:$0xff] }
  0x86   : > { %1219 = vst [vmem:[%s4949_s30 + $0x6e8] sm:$0xff] %v1218_v29  ;;  %1221 = vst [vmem:[%s4949_s30 + $0x6f0] sm:$0xff] %v1220_v30  ;;  %v1228_v34 = vld [vmem:[%s4941_s29 + $0x8630] sm:$0xff]  ;;  %v1230_v35 = vld [vmem:[%s4941_s29 + $0x86c8] sm:$0xff] }
  0x87   : > { %1223 = vst [vmem:[%s4949_s30 + $0x6f8] sm:$0xff] %v1222_v31  ;;  %1225 = vst [vmem:[%s4949_s30 + $0x700] sm:$0xff] %v1224_v32  ;;  %v1232_v36 = vld [vmem:[%s4941_s29 + $0x8760] sm:$0xff]  ;;  %v1234_v37 = vld [vmem:[%s4941_s29 + $0x87f8] sm:$0xff] }
  0x88   : > { %1227 = vst [vmem:[%s4949_s30 + $0x708] sm:$0xff] %v1226_v33  ;;  %1229 = vst [vmem:[%s4949_s30 + $0x710] sm:$0xff] %v1228_v34  ;;  %v1236_v38 = vld [vmem:[%s4941_s29 + $0x8890] sm:$0xff]  ;;  %v1238_v39 = vld [vmem:[%s4941_s29 + $0x8928] sm:$0xff] }
  0x89   : > { %1231 = vst [vmem:[%s4949_s30 + $0x718] sm:$0xff] %v1230_v35  ;;  %1233 = vst [vmem:[%s4949_s30 + $0x720] sm:$0xff] %v1232_v36  ;;  %v1240_v40 = vld [vmem:[%s4941_s29 + $0x89c0] sm:$0xff]  ;;  %v1242_v41 = vld [vmem:[%s4941_s29 + $0x8a58] sm:$0xff] }
  0x8a   : > { %1235 = vst [vmem:[%s4949_s30 + $0x728] sm:$0xff] %v1234_v37  ;;  %1237 = vst [vmem:[%s4949_s30 + $0x730] sm:$0xff] %v1236_v38  ;;  %v1244_v42 = vld [vmem:[%s4941_s29 + $0x8af0] sm:$0xff]  ;;  %v1246_v43 = vld [vmem:[%s4941_s29 + $0x8b88] sm:$0xff] }
  0x8b   : > { %1239 = vst [vmem:[%s4949_s30 + $0x738] sm:$0xff] %v1238_v39  ;;  %1241 = vst [vmem:[%s4949_s30 + $0x740] sm:$0xff] %v1240_v40  ;;  %v1248_v44 = vld [vmem:[%s4941_s29 + $0x8c20] sm:$0xff]  ;;  %v1250_v45 = vld [vmem:[%s4941_s29 + $0x8cb8] sm:$0xff] }
  0x8c   : > { %1243 = vst [vmem:[%s4949_s30 + $0x748] sm:$0xff] %v1242_v41  ;;  %1245 = vst [vmem:[%s4949_s30 + $0x750] sm:$0xff] %v1244_v42  ;;  %v1252_v46 = vld [vmem:[%s4941_s29 + $0x8d50] sm:$0xff]  ;;  %v1254_v47 = vld [vmem:[%s4941_s29 + $0x8de8] sm:$0xff] }
  0x8d   : > { %1247 = vst [vmem:[%s4949_s30 + $0x758] sm:$0xff] %v1246_v43  ;;  %1249 = vst [vmem:[%s4949_s30 + $0x760] sm:$0xff] %v1248_v44  ;;  %v1256_v48 = vld [vmem:[%s4941_s29 + $0x8e80] sm:$0xff]  ;;  %v1258_v49 = vld [vmem:[%s4941_s29 + $0x8f18] sm:$0xff] }
  0x8e   : > { %1251 = vst [vmem:[%s4949_s30 + $0x768] sm:$0xff] %v1250_v45  ;;  %1253 = vst [vmem:[%s4949_s30 + $0x770] sm:$0xff] %v1252_v46  ;;  %v1260_v50 = vld [vmem:[%s4941_s29 + $0x8fb0] sm:$0xff]  ;;  %v1262_v51 = vld [vmem:[%s4941_s29 + $0x9048] sm:$0xff] }
  0x8f   : > { %1255 = vst [vmem:[%s4949_s30 + $0x778] sm:$0xff] %v1254_v47  ;;  %1257 = vst [vmem:[%s4949_s30 + $0x780] sm:$0xff] %v1256_v48  ;;  %v1264_v52 = vld [vmem:[%s4941_s29 + $0x90e0] sm:$0xff]  ;;  %v1266_v53 = vld [vmem:[%s4941_s29 + $0x9178] sm:$0xff] }
  0x90   : > { %1259 = vst [vmem:[%s4949_s30 + $0x788] sm:$0xff] %v1258_v49  ;;  %1261 = vst [vmem:[%s4949_s30 + $0x790] sm:$0xff] %v1260_v50  ;;  %v1268_v54 = vld [vmem:[%s4941_s29 + $0x9210] sm:$0xff]  ;;  %v1270_v55 = vld [vmem:[%s4941_s29 + $0x92a8] sm:$0xff] }
  0x91   : > { %1263 = vst [vmem:[%s4949_s30 + $0x798] sm:$0xff] %v1262_v51  ;;  %1265 = vst [vmem:[%s4949_s30 + $0x7a0] sm:$0xff] %v1264_v52  ;;  %v1272_v56 = vld [vmem:[%s4941_s29 + $0x9340] sm:$0xff]  ;;  %v1274_v57 = vld [vmem:[%s4941_s29 + $0x93d8] sm:$0xff] }
  0x92   : > { %1267 = vst [vmem:[%s4949_s30 + $0x7a8] sm:$0xff] %v1266_v53  ;;  %1269 = vst [vmem:[%s4949_s30 + $0x7b0] sm:$0xff] %v1268_v54  ;;  %v1276_v58 = vld [vmem:[%s4941_s29 + $0x9470] sm:$0xff]  ;;  %v1278_v59 = vld [vmem:[%s4941_s29 + $0x9508] sm:$0xff] }
  0x93   : > { %1271 = vst [vmem:[%s4949_s30 + $0x7b8] sm:$0xff] %v1270_v55  ;;  %1273 = vst [vmem:[%s4949_s30 + $0x7c0] sm:$0xff] %v1272_v56  ;;  %v1280_v60 = vld [vmem:[%s4941_s29 + $0x95a0] sm:$0xff]  ;;  %v1282_v61 = vld [vmem:[%s4941_s29 + $0x9638] sm:$0xff] }
  0x94   : > { %1275 = vst [vmem:[%s4949_s30 + $0x7c8] sm:$0xff] %v1274_v57  ;;  %1277 = vst [vmem:[%s4949_s30 + $0x7d0] sm:$0xff] %v1276_v58  ;;  %v1284_v62 = vld [vmem:[%s4941_s29 + $0x96d0] sm:$0xff]  ;;  %v1286_v63 = vld [vmem:[%s4941_s29 + $0x9768] sm:$0xff] }
  0x95   : > { %1279 = vst [vmem:[%s4949_s30 + $0x7d8] sm:$0xff] %v1278_v59  ;;  %1281 = vst [vmem:[%s4949_s30 + $0x7e0] sm:$0xff] %v1280_v60  ;;  %v1288_v0 = vld [vmem:[%s4941_s29 + $0x9800] sm:$0xff]  ;;  %v1290_v1 = vld [vmem:[%s4941_s29 + $0x9898] sm:$0xff] }
  0x96   : > { %1283 = vst [vmem:[%s4949_s30 + $0x7e8] sm:$0xff] %v1282_v61  ;;  %1285 = vst [vmem:[%s4949_s30 + $0x7f0] sm:$0xff] %v1284_v62  ;;  %v1292_v2 = vld [vmem:[%s4941_s29 + $0x9930] sm:$0xff]  ;;  %v1294_v3 = vld [vmem:[%s4941_s29 + $0x99c8] sm:$0xff] }
  0x97   : > { %1287 = vst [vmem:[%s4949_s30 + $0x7f8] sm:$0xff] %v1286_v63  ;;  %1289 = vst [vmem:[%s4949_s30 + $0x800] sm:$0xff] %v1288_v0  ;;  %v1296_v4 = vld [vmem:[%s4941_s29 + $0x9a60] sm:$0xff]  ;;  %v1298_v5 = vld [vmem:[%s4941_s29 + $0x9af8] sm:$0xff] }
  0x98   : > { %1291 = vst [vmem:[%s4949_s30 + $0x808] sm:$0xff] %v1290_v1  ;;  %1293 = vst [vmem:[%s4949_s30 + $0x810] sm:$0xff] %v1292_v2  ;;  %v1300_v6 = vld [vmem:[%s4941_s29 + $0x9b90] sm:$0xff]  ;;  %v1302_v7 = vld [vmem:[%s4941_s29 + $0x9c28] sm:$0xff] }
  0x99   : > { %1295 = vst [vmem:[%s4949_s30 + $0x818] sm:$0xff] %v1294_v3  ;;  %1297 = vst [vmem:[%s4949_s30 + $0x820] sm:$0xff] %v1296_v4  ;;  %v1304_v8 = vld [vmem:[%s4941_s29 + $0x9cc0] sm:$0xff]  ;;  %v1306_v9 = vld [vmem:[%s4941_s29 + $0x9d58] sm:$0xff] }
  0x9a   : > { %1299 = vst [vmem:[%s4949_s30 + $0x828] sm:$0xff] %v1298_v5  ;;  %1301 = vst [vmem:[%s4949_s30 + $0x830] sm:$0xff] %v1300_v6  ;;  %v1308_v10 = vld [vmem:[%s4941_s29 + $0x9df0] sm:$0xff]  ;;  %v1310_v11 = vld [vmem:[%s4941_s29 + $0x9e88] sm:$0xff] }
  0x9b   : > { %1303 = vst [vmem:[%s4949_s30 + $0x838] sm:$0xff] %v1302_v7  ;;  %1305 = vst [vmem:[%s4949_s30 + $0x840] sm:$0xff] %v1304_v8  ;;  %v1312_v12 = vld [vmem:[%s4941_s29 + $0x9f20] sm:$0xff]  ;;  %v1314_v13 = vld [vmem:[%s4941_s29 + $0x9fb8] sm:$0xff] }
  0x9c   : > { %1307 = vst [vmem:[%s4949_s30 + $0x848] sm:$0xff] %v1306_v9  ;;  %1309 = vst [vmem:[%s4949_s30 + $0x850] sm:$0xff] %v1308_v10  ;;  %v1316_v14 = vld [vmem:[%s4941_s29 + $0xa050] sm:$0xff]  ;;  %v1318_v15 = vld [vmem:[%s4941_s29 + $0xa0e8] sm:$0xff] }
  0x9d   : > { %1311 = vst [vmem:[%s4949_s30 + $0x858] sm:$0xff] %v1310_v11  ;;  %1313 = vst [vmem:[%s4949_s30 + $0x860] sm:$0xff] %v1312_v12  ;;  %v1320_v16 = vld [vmem:[%s4941_s29 + $0xa180] sm:$0xff]  ;;  %v1322_v17 = vld [vmem:[%s4941_s29 + $0xa218] sm:$0xff] }
  0x9e   : > { %1315 = vst [vmem:[%s4949_s30 + $0x868] sm:$0xff] %v1314_v13  ;;  %1317 = vst [vmem:[%s4949_s30 + $0x870] sm:$0xff] %v1316_v14  ;;  %v1324_v18 = vld [vmem:[%s4941_s29 + $0xa2b0] sm:$0xff]  ;;  %v1326_v19 = vld [vmem:[%s4941_s29 + $0xa348] sm:$0xff] }
  0x9f   : > { %1319 = vst [vmem:[%s4949_s30 + $0x878] sm:$0xff] %v1318_v15  ;;  %1321 = vst [vmem:[%s4949_s30 + $0x880] sm:$0xff] %v1320_v16  ;;  %v1328_v20 = vld [vmem:[%s4941_s29 + $0xa3e0] sm:$0xff]  ;;  %v1330_v21 = vld [vmem:[%s4941_s29 + $0xa478] sm:$0xff] }
  0xa0   : > { %1323 = vst [vmem:[%s4949_s30 + $0x888] sm:$0xff] %v1322_v17  ;;  %1325 = vst [vmem:[%s4949_s30 + $0x890] sm:$0xff] %v1324_v18  ;;  %v1332_v22 = vld [vmem:[%s4941_s29 + $0xa510] sm:$0xff]  ;;  %v1334_v23 = vld [vmem:[%s4941_s29 + $0xa5a8] sm:$0xff] }
  0xa1   : > { %1327 = vst [vmem:[%s4949_s30 + $0x898] sm:$0xff] %v1326_v19  ;;  %1329 = vst [vmem:[%s4949_s30 + $0x8a0] sm:$0xff] %v1328_v20  ;;  %v1336_v24 = vld [vmem:[%s4941_s29 + $0xa640] sm:$0xff]  ;;  %v1338_v25 = vld [vmem:[%s4941_s29 + $0xa6d8] sm:$0xff] }
  0xa2   : > { %1331 = vst [vmem:[%s4949_s30 + $0x8a8] sm:$0xff] %v1330_v21  ;;  %1333 = vst [vmem:[%s4949_s30 + $0x8b0] sm:$0xff] %v1332_v22  ;;  %v1340_v26 = vld [vmem:[%s4941_s29 + $0xa770] sm:$0xff]  ;;  %v1342_v27 = vld [vmem:[%s4941_s29 + $0xa808] sm:$0xff] }
  0xa3   : > { %1335 = vst [vmem:[%s4949_s30 + $0x8b8] sm:$0xff] %v1334_v23  ;;  %1337 = vst [vmem:[%s4949_s30 + $0x8c0] sm:$0xff] %v1336_v24  ;;  %v1344_v28 = vld [vmem:[%s4941_s29 + $0xa8a0] sm:$0xff]  ;;  %v1346_v29 = vld [vmem:[%s4941_s29 + $0xa938] sm:$0xff] }
  0xa4   : > { %1339 = vst [vmem:[%s4949_s30 + $0x8c8] sm:$0xff] %v1338_v25  ;;  %1341 = vst [vmem:[%s4949_s30 + $0x8d0] sm:$0xff] %v1340_v26  ;;  %v1348_v30 = vld [vmem:[%s4941_s29 + $0xa9d0] sm:$0xff]  ;;  %v1350_v31 = vld [vmem:[%s4941_s29 + $0xaa68] sm:$0xff] }
  0xa5   : > { %1343 = vst [vmem:[%s4949_s30 + $0x8d8] sm:$0xff] %v1342_v27  ;;  %1345 = vst [vmem:[%s4949_s30 + $0x8e0] sm:$0xff] %v1344_v28  ;;  %v1352_v32 = vld [vmem:[%s4941_s29 + $0xab00] sm:$0xff]  ;;  %v1354_v33 = vld [vmem:[%s4941_s29 + $0xab98] sm:$0xff] }
  0xa6   : > { %1347 = vst [vmem:[%s4949_s30 + $0x8e8] sm:$0xff] %v1346_v29  ;;  %1349 = vst [vmem:[%s4949_s30 + $0x8f0] sm:$0xff] %v1348_v30  ;;  %v1356_v34 = vld [vmem:[%s4941_s29 + $0xac30] sm:$0xff]  ;;  %v1358_v35 = vld [vmem:[%s4941_s29 + $0xacc8] sm:$0xff] }
  0xa7   : > { %1351 = vst [vmem:[%s4949_s30 + $0x8f8] sm:$0xff] %v1350_v31  ;;  %1353 = vst [vmem:[%s4949_s30 + $0x900] sm:$0xff] %v1352_v32  ;;  %v1360_v36 = vld [vmem:[%s4941_s29 + $0xad60] sm:$0xff]  ;;  %v1362_v37 = vld [vmem:[%s4941_s29 + $0xadf8] sm:$0xff] }
  0xa8   : > { %1355 = vst [vmem:[%s4949_s30 + $0x908] sm:$0xff] %v1354_v33  ;;  %1357 = vst [vmem:[%s4949_s30 + $0x910] sm:$0xff] %v1356_v34  ;;  %v1364_v38 = vld [vmem:[%s4941_s29 + $0xae90] sm:$0xff]  ;;  %v1366_v39 = vld [vmem:[%s4941_s29 + $0xaf28] sm:$0xff] }
  0xa9   : > { %1359 = vst [vmem:[%s4949_s30 + $0x918] sm:$0xff] %v1358_v35  ;;  %1361 = vst [vmem:[%s4949_s30 + $0x920] sm:$0xff] %v1360_v36  ;;  %v1368_v40 = vld [vmem:[%s4941_s29 + $0xafc0] sm:$0xff]  ;;  %v1370_v41 = vld [vmem:[%s4941_s29 + $0xb058] sm:$0xff] }
  0xaa   : > { %1363 = vst [vmem:[%s4949_s30 + $0x928] sm:$0xff] %v1362_v37  ;;  %1365 = vst [vmem:[%s4949_s30 + $0x930] sm:$0xff] %v1364_v38  ;;  %v1372_v42 = vld [vmem:[%s4941_s29 + $0xb0f0] sm:$0xff]  ;;  %v1374_v43 = vld [vmem:[%s4941_s29 + $0xb188] sm:$0xff] }
  0xab   : > { %1367 = vst [vmem:[%s4949_s30 + $0x938] sm:$0xff] %v1366_v39  ;;  %1369 = vst [vmem:[%s4949_s30 + $0x940] sm:$0xff] %v1368_v40  ;;  %v1376_v44 = vld [vmem:[%s4941_s29 + $0xb220] sm:$0xff]  ;;  %v1378_v45 = vld [vmem:[%s4941_s29 + $0xb2b8] sm:$0xff] }
  0xac   : > { %1371 = vst [vmem:[%s4949_s30 + $0x948] sm:$0xff] %v1370_v41  ;;  %1373 = vst [vmem:[%s4949_s30 + $0x950] sm:$0xff] %v1372_v42  ;;  %v1380_v46 = vld [vmem:[%s4941_s29 + $0xb350] sm:$0xff]  ;;  %v1382_v47 = vld [vmem:[%s4941_s29 + $0xb3e8] sm:$0xff] }
  0xad   : > { %1375 = vst [vmem:[%s4949_s30 + $0x958] sm:$0xff] %v1374_v43  ;;  %1377 = vst [vmem:[%s4949_s30 + $0x960] sm:$0xff] %v1376_v44 }
  0xae   : > { %1379 = vst [vmem:[%s4949_s30 + $0x968] sm:$0xff] %v1378_v45  ;;  %1381 = vst [vmem:[%s4949_s30 + $0x970] sm:$0xff] %v1380_v46 }
  0xaf   : > { %1383 = vst [vmem:[%s4949_s30 + $0x978] sm:$0xff] %v1382_v47 }
  0xb0 PF: > { %p3934_p10 = scmp.ge.s32.totalorder %s4863_s15, 1  ;;  %p1396_p11 = scmp.lt.s32.totalorder %s4863_s15, 20 }
  0xb2   : > { %p1397_p12 = pnand %p3934_p10, %p1396_p11 }
  0xb3   : > { %s5556_s4 = sand.u32 (!%p1397_p12), 1, %s4855_s13   ;;  %v1452_v48 = vlaneseq (!%p1397_p12)  ;;  %v1440_v49 = vld [vmem:[%s6025_s0 + $0x10] sm:$0xff] (!%p1397_p12)  ;;  %v4865_v50 = vmov (!%p1397_p12), 1983009808   ;;  %v5567_v53 = vld [vmem:[%s6025_s0] sm:$0xff] (!%p1397_p12)  ;;  %s3936_s28 = sshll.u32 (!%p1397_p12), %s4909_s16, 1 }
  0xb4   : > { %1400 = sbr.rel (%p1397_p12) target bundleno = 764 (0x2fc), region = 66  ;;  %v1450_v51 = vunpack.c.l.s4 (!%p1397_p12), %v4865_v50  ;;  %v1482_v55 = vcombine.high (!%p1397_p12), %v1440_v49, %v1440_v49  ;;  %p1432_p13 = scmp.lt.s32.totalorder (!%p1397_p12), %s3936_s28, 37 }
  0xb5   : > { %s4288_s7 = smul.u32 (!%p1397_p12), 2432, %s5556_s4  ;;  %v5562_v52 = vshrl.u32 (!%p1397_p12), %v1452_v48, 7  ;;  %s3935_s6 = sshll.u32 (!%p1397_p12), %s5556_s4, 2 }
  0xb6   : > { %v1451_v54 = vunpack.c.0.s8 (!%p1397_p12), %v1450_v51  ;;  %s1429_s8 = scalar_lea.vmem (!%p1397_p12), [#allocation3], %s3935_s6  ;;  %s3841_s19 = scalar_lea.sflag (!%p1397_p12), [#allocation4], %s5556_s4 }
  0xb7   : > { %s5569_s10 = scalar_lea.vmem (!%p1397_p12), [#allocation2], %s4288_s7  ;;  %s4250_s7 = sshll.u32 (!%p1397_p12), %s4909_s16, 6 }
  0xb8   : > { %v4330_v56 = vld [vmem:[%s5569_s10 + $0x4] ss:$8 sps:$4 sm:$0xff] (!%p1397_p12)   ;;  %v5574_v58 = vsub.s32 (!%p1397_p12), %v1451_v54, %v5562_v52  ;;  %v4334_v59 = vld [vmem:[%s5569_s10] ss:$8 sps:$4 sm:$0xff] (!%p1397_p12)   ;;  %v4336_v61 = vld [vmem:[%s5569_s10 + $0x14] ss:$8 sps:$4 sm:$0xff] (!%p1397_p12)   ;;  %s5982_s17 = scalar_lea.hbm (!%p1397_p12), %s6028_s3, %s4250_s7 }
  0xb9   : > { %v4332_v57 = vld [vmem:[%s5569_s10 + $0x504] ss:$8 sps:$4 sm:$0xff] (!%p1397_p12)   ;;  %3406 = vmatprep.subr.bf16.mxu1 (!%p1397_p12), %v4330_v56  ;;  %v4335_v60 = vld [vmem:[%s5569_s10 + $0x500] ss:$8 sps:$4 sm:$0xff] (!%p1397_p12)   ;;  %v4338_v0 = vld [vmem:[%s5569_s10 + $0x514] ss:$8 sps:$4 sm:$0xff] (!%p1397_p12)  }
  0xba   : > { %3611 = vmatprep.subr.bf16.mxu0 (!%p1397_p12), %v4332_v57  ;;  %v5581_v62 = vrot.slane (!%p1397_p12), %v5567_v53, %v5574_v58  ;;  %v5584_v63 = vrot.slane (!%p1397_p12), %v1482_v55, %v5574_v58  ;;  %3407 = vmatpush1.bf16.msra.mxu1 (!%p1397_p12), %v4334_v59  ;;  %v4340_v1 = vld [vmem:[%s5569_s10 + $0x10] ss:$8 sps:$4 sm:$0xff] (!%p1397_p12)   ;;  %v4342_v5 = vld [vmem:[%s5569_s10 + $0x24] ss:$8 sps:$4 sm:$0xff] (!%p1397_p12)   ;;  %v4346_v7 = vld [vmem:[%s5569_s10 + $0x20] ss:$8 sps:$4 sm:$0xff] (!%p1397_p12)  }
  0xbb   : > { %3612 = vmatpush1.bf16.msra.mxu0 %v4335_v60  ;;  %3408 = vmatprep.subr.bf16.mxu1 %v4336_v61  ;;  %v4341_v2 = vld [vmem:[%s5569_s10 + $0x510] ss:$8 sps:$4 sm:$0xff]   ;;  %v4344_v6 = vld [vmem:[%s5569_s10 + $0x524] ss:$8 sps:$4 sm:$0xff]   ;;  %v4347_v8 = vld [vmem:[%s5569_s10 + $0x520] ss:$8 sps:$4 sm:$0xff]   ;;  %v1448_v60 = vcombine.high %v5567_v53, %v5567_v53 }
  0xbc   : > { %v1463_v3 = vcombine.high %v5581_v62, %v5581_v62  ;;  %v1498_v4 = vcombine.high %v5584_v63, %v5584_v63  ;;  %3613 = vmatprep.subr.bf16.mxu0 %v4338_v0  ;;  %v4348_v11 = vld [vmem:[%s5569_s10 + $0x34] ss:$8 sps:$4 sm:$0xff]   ;;  %v4352_v13 = vld [vmem:[%s5569_s10 + $0x30] ss:$8 sps:$4 sm:$0xff]   ;;  %v4354_v15 = vld [vmem:[%s5569_s10 + $0x44] ss:$8 sps:$4 sm:$0xff]  }
  0xbd   : > { %v4350_v12 = vld [vmem:[%s5569_s10 + $0x534] ss:$8 sps:$4 sm:$0xff]   ;;  %v4353_v14 = vld [vmem:[%s5569_s10 + $0x530] ss:$8 sps:$4 sm:$0xff]   ;;  %v4356_v16 = vld [vmem:[%s5569_s10 + $0x544] ss:$8 sps:$4 sm:$0xff]  }
  0xbe   : > { %v1552_v9 = vpack.c.bf16 %v1463_v3, %v1463_v3  ;;  %v1562_v10 = vpack.c.bf16 %v1498_v4, %v1498_v4  ;;  %3409 = vmatpush1.bf16.msra.mxu1 %v4340_v1  ;;  %v4358_v17 = vld [vmem:[%s5569_s10 + $0x40] ss:$8 sps:$4 sm:$0xff]   ;;  %v4360_v19 = vld [vmem:[%s5569_s10 + $0x54] ss:$8 sps:$4 sm:$0xff]   ;;  %v4364_v21 = vld [vmem:[%s5569_s10 + $0x50] ss:$8 sps:$4 sm:$0xff]   ;;  %v5655_v4 = vrot.slane %v1448_v60, %v5574_v58 }
  0xbf   : > { %3614 = vmatpush1.bf16.msra.mxu0 %v4341_v2  ;;  %3410 = vmatprep.subr.bf16.mxu1 %v4342_v5  ;;  %v4359_v18 = vld [vmem:[%s5569_s10 + $0x540] ss:$8 sps:$4 sm:$0xff]   ;;  %v4362_v20 = vld [vmem:[%s5569_s10 + $0x554] ss:$8 sps:$4 sm:$0xff]   ;;  %v4365_v22 = vld [vmem:[%s5569_s10 + $0x550] ss:$8 sps:$4 sm:$0xff]  }
  0xc0   : > { %3615 = vmatprep.subr.bf16.mxu0 %v4344_v6  ;;  %3438 = vmatprep.mubr.bf16.mxu1 %v1552_v9  ;;  %v4366_v23 = vld [vmem:[%s5569_s10 + $0x64] ss:$8 sps:$4 sm:$0xff]   ;;  %v4370_v25 = vld [vmem:[%s5569_s10 + $0x60] ss:$8 sps:$4 sm:$0xff]   ;;  %v4372_v27 = vld [vmem:[%s5569_s10 + $0x74] ss:$8 sps:$4 sm:$0xff]   ;;  %v1464_v9 = vcombine.high %v5655_v4, %v5655_v4 }
  0xc1   : > { %3643 = vmatprep.mubr.bf16.mxu0 %v1562_v10  ;;  %v4368_v24 = vld [vmem:[%s5569_s10 + $0x564] ss:$8 sps:$4 sm:$0xff]   ;;  %v4371_v26 = vld [vmem:[%s5569_s10 + $0x560] ss:$8 sps:$4 sm:$0xff]   ;;  %v4374_v28 = vld [vmem:[%s5569_s10 + $0x574] ss:$8 sps:$4 sm:$0xff]  }
  0xc2   : > { %3411 = vmatpush1.bf16.msra.mxu1 %v4346_v7  ;;  %v4376_v29 = vld [vmem:[%s5569_s10 + $0x70] ss:$8 sps:$4 sm:$0xff]   ;;  %v4378_v31 = vld [vmem:[%s5569_s10 + $0x84] ss:$8 sps:$4 sm:$0xff]   ;;  %v4382_v33 = vld [vmem:[%s5569_s10 + $0x80] ss:$8 sps:$4 sm:$0xff]  }
  0xc3   : > { %3616 = vmatpush1.bf16.msra.mxu0 %v4347_v8  ;;  %3412 = vmatprep.subr.bf16.mxu1 %v4348_v11  ;;  %v4377_v30 = vld [vmem:[%s5569_s10 + $0x570] ss:$8 sps:$4 sm:$0xff]   ;;  %v4380_v32 = vld [vmem:[%s5569_s10 + $0x584] ss:$8 sps:$4 sm:$0xff]   ;;  %v4383_v34 = vld [vmem:[%s5569_s10 + $0x580] ss:$8 sps:$4 sm:$0xff]  }
  0xc4   : > { %3617 = vmatprep.subr.bf16.mxu0 %v4350_v12  ;;  %v4384_v35 = vld [vmem:[%s5569_s10 + $0x94] ss:$8 sps:$4 sm:$0xff]   ;;  %v4388_v37 = vld [vmem:[%s5569_s10 + $0x90] ss:$8 sps:$4 sm:$0xff]   ;;  %v4390_v39 = vld [vmem:[%s5569_s10 + $0xa4] ss:$8 sps:$4 sm:$0xff]  }
  0xc5   : > { %v4386_v36 = vld [vmem:[%s5569_s10 + $0x594] ss:$8 sps:$4 sm:$0xff]   ;;  %v4389_v38 = vld [vmem:[%s5569_s10 + $0x590] ss:$8 sps:$4 sm:$0xff]   ;;  %v4392_v40 = vld [vmem:[%s5569_s10 + $0x5a4] ss:$8 sps:$4 sm:$0xff]  }
  0xc6   : > { %3413 = vmatpush1.bf16.msra.mxu1 %v4352_v13  ;;  %v4394_v41 = vld [vmem:[%s5569_s10 + $0xa0] ss:$8 sps:$4 sm:$0xff]   ;;  %v4396_v43 = vld [vmem:[%s5569_s10 + $0xb4] ss:$8 sps:$4 sm:$0xff]   ;;  %v4400_v45 = vld [vmem:[%s5569_s10 + $0xb0] ss:$8 sps:$4 sm:$0xff]   ;;  %v1551_v13 = vpack.c.bf16 %v5581_v62, %v5581_v62 }
  0xc7   : > { %3618 = vmatpush1.bf16.msra.mxu0 %v4353_v14  ;;  %3414 = vmatprep.subr.bf16.mxu1 %v4354_v15  ;;  %v4395_v42 = vld [vmem:[%s5569_s10 + $0x5a0] ss:$8 sps:$4 sm:$0xff]   ;;  %v4398_v44 = vld [vmem:[%s5569_s10 + $0x5b4] ss:$8 sps:$4 sm:$0xff]   ;;  %v4401_v46 = vld [vmem:[%s5569_s10 + $0x5b0] ss:$8 sps:$4 sm:$0xff]   ;;  %v1561_v14 = vpack.c.bf16 %v5584_v63, %v5584_v63 }
  0xc8   : > { %3619 = vmatprep.subr.bf16.mxu0 %v4356_v16  ;;  %v4402_v47 = vld [vmem:[%s5569_s10 + $0xc4] ss:$8 sps:$4 sm:$0xff]   ;;  %v4406_v49 = vld [vmem:[%s5569_s10 + $0xc0] ss:$8 sps:$4 sm:$0xff]   ;;  %v4408_v51 = vld [vmem:[%s5569_s10 + $0xd4] ss:$8 sps:$4 sm:$0xff]  }
  0xc9   : > { %v4404_v48 = vld [vmem:[%s5569_s10 + $0x5c4] ss:$8 sps:$4 sm:$0xff]   ;;  %v4407_v50 = vld [vmem:[%s5569_s10 + $0x5c0] ss:$8 sps:$4 sm:$0xff]   ;;  %v4410_v54 = vld [vmem:[%s5569_s10 + $0x5d4] ss:$8 sps:$4 sm:$0xff]  }
  0xca   : > { %3415 = vmatpush1.bf16.msra.mxu1 %v4358_v17  ;;  %v4412_v55 = vld [vmem:[%s5569_s10 + $0xd0] ss:$8 sps:$4 sm:$0xff]   ;;  %v4414_v57 = vld [vmem:[%s5569_s10 + $0xe4] ss:$8 sps:$4 sm:$0xff]   ;;  %v4418_v0 = vld [vmem:[%s5569_s10 + $0xe0] ss:$8 sps:$4 sm:$0xff]   ;;  %v1554_v17 = vpack.c.bf16 %v1464_v9, %v1464_v9 }
  0xcb   : > { %3620 = vmatpush1.bf16.msra.mxu0 %v4359_v18  ;;  %3416 = vmatprep.subr.bf16.mxu1 %v4360_v19  ;;  %v4413_v56 = vld [vmem:[%s5569_s10 + $0x5d0] ss:$8 sps:$4 sm:$0xff]   ;;  %v4416_v59 = vld [vmem:[%s5569_s10 + $0x5e4] ss:$8 sps:$4 sm:$0xff]   ;;  %v4419_v1 = vld [vmem:[%s5569_s10 + $0x5e0] ss:$8 sps:$4 sm:$0xff]  }
  0xcc   : > { %3621 = vmatprep.subr.bf16.mxu0 %v4362_v20  ;;  %v5648_v61 = vld [vmem:[%s6025_s0 + $0x18] sm:$0xff]  ;;  %v4429_v7 = vld [vmem:[%s5569_s10 + $0x104] ss:$8 sps:$4 sm:$0xff]   ;;  %v4427_v11 = vld [vmem:[%s5569_s10 + $0x100] ss:$8 sps:$4 sm:$0xff]   ;;  %s6036_s28 = smov (!%p1432_p13, %s3936_s28), 37 }
  0xcd   : > { %v4420_v2 = vld [vmem:[%s5569_s10 + $0xf4] ss:$8 sps:$4 sm:$0xff]   ;;  %v5659_v53 = vrot.slane %v5648_v61, %v5574_v58  ;;  %v4424_v5 = vld [vmem:[%s5569_s10 + $0xf0] ss:$8 sps:$4 sm:$0xff]   ;;  %v4433_v8 = vld [vmem:[%s5569_s10 + $0x604] ss:$8 sps:$4 sm:$0xff]   ;;  %s1434_s5 = scalar_lea.vmem %s6027_s2, %s6036_s28 }
  0xce   : > { %3417 = vmatpush1.bf16.msra.mxu1 %v4364_v21  ;;  %v4422_v3 = vld [vmem:[%s5569_s10 + $0x5f4] ss:$8 sps:$4 sm:$0xff]   ;;  %v4425_v6 = vld [vmem:[%s5569_s10 + $0x5f0] ss:$8 sps:$4 sm:$0xff]   ;;  %v4431_v12 = vld [vmem:[%s5569_s10 + $0x600] ss:$8 sps:$4 sm:$0xff]  }
  0xcf   : > { %3622 = vmatpush1.bf16.msra.mxu0 %v4365_v22  ;;  %3418 = vmatprep.subr.bf16.mxu1 %v4366_v23  ;;  %v1514_v10 = vcombine.high %v5659_v53, %v5659_v53  ;;  %v4436_v15 = vld [vmem:[%s5569_s10 + $0x114] ss:$8 sps:$4 sm:$0xff]   ;;  %v4434_v19 = vld [vmem:[%s5569_s10 + $0x110] ss:$8 sps:$4 sm:$0xff]   ;;  %v4442_v63 = vld [vmem:[%s5569_s10 + $0x124] ss:$8 sps:$4 sm:$0xff]  }
  0xd0   : > { %3623 = vmatprep.subr.bf16.mxu0 %v4368_v24  ;;  %v4439_v16 = vld [vmem:[%s5569_s10 + $0x614] ss:$8 sps:$4 sm:$0xff]   ;;  %v4437_v62 = vld [vmem:[%s5569_s10 + $0x610] ss:$8 sps:$4 sm:$0xff]   ;;  %v4445_v20 = vld [vmem:[%s5569_s10 + $0x624] ss:$8 sps:$4 sm:$0xff]  }
  0xd1   : > { %v1564_v18 = vpack.c.bf16 %v1514_v10, %v1514_v10  ;;  %v4440_v21 = vld [vmem:[%s5569_s10 + $0x120] ss:$8 sps:$4 sm:$0xff]   ;;  %v4448_v23 = vld [vmem:[%s5569_s10 + $0x134] ss:$8 sps:$4 sm:$0xff]   ;;  %v4494_v60 = vld [vmem:[%s5569_s10 + $0x1b0] ss:$8 sps:$4 sm:$0xff]  }
  0xd2   : > { %3419 = vmatpush1.bf16.msra.mxu1 %v4370_v25  ;;  %v4443_v22 = vld [vmem:[%s5569_s10 + $0x620] ss:$8 sps:$4 sm:$0xff]   ;;  %v4451_v24 = vld [vmem:[%s5569_s10 + $0x634] ss:$8 sps:$4 sm:$0xff]   ;;  %v4446_v25 = vld [vmem:[%s5569_s10 + $0x130] ss:$8 sps:$4 sm:$0xff]  }
  0xd3   : > { %3624 = vmatpush1.bf16.msra.mxu0 %v4371_v26  ;;  %3420 = vmatprep.subr.bf16.mxu1 %v4372_v27  ;;  %v4449_v26 = vld [vmem:[%s5569_s10 + $0x630] ss:$8 sps:$4 sm:$0xff]   ;;  %v4454_v27 = vld [vmem:[%s5569_s10 + $0x144] ss:$8 sps:$4 sm:$0xff]   ;;  %s3855_s9 = sshll.u32 %s1429_s8, 4  ;;  %s4867_s16 = smov [#allocation3]   ;;  %s5984_s9 = int_to_ptr.vmem [resolvable:$true] %s3855_s9 }
  0xd4   : > { %3625 = vmatprep.subr.bf16.mxu0 %v4374_v28  ;;  %v4457_v28 = vld [vmem:[%s5569_s10 + $0x644] ss:$8 sps:$4 sm:$0xff]   ;;  %v4509_v9 = vld [vmem:[%s5569_s10 + $0x6d0] ss:$8 sps:$4 sm:$0xff]   ;;  %s4801_s20 = scalar_lea.vmem %s5984_s9, 64  ;;  %s4805_s24 = sshll.u32 %s4867_s16, 4  ;;  %s4806_s24 = int_to_ptr.vmem [resolvable:$false] %s4805_s24 }
  0xd5   : > { %v4514_v10 = vld [vmem:[%s5569_s10 + $0x1e4] ss:$8 sps:$4 sm:$0xff]   ;;  %p4802_p0 = scmp.ne.s32.totalorder %s5984_s9, %s4801_s20  ;;  %s4807_s25 = scalar_lea.vmem %s4806_s24, 128 }
  0xd6   : > { %3421 = vmatpush1.bf16.msra.mxu1 %v4376_v29  ;;  %v4452_v29 = vld [vmem:[%s5569_s10 + $0x140] ss:$8 sps:$4 sm:$0xff]   ;;  %p4808_p3 = scmp.lt.s32.totalorder %s5984_s9, %s4806_s24  ;;  %p4809_p4 = scmp.lt.s32.totalorder %s4807_s25, %s4801_s20 }
  0xd7   : > { %3626 = vmatpush1.bf16.msra.mxu0 %v4377_v30  ;;  %3422 = vmatprep.subr.bf16.mxu1 %v4378_v31  ;;  %v4455_v30 = vld [vmem:[%s5569_s10 + $0x640] ss:$8 sps:$4 sm:$0xff]   ;;  %v4460_v31 = vld [vmem:[%s5569_s10 + $0x154] ss:$8 sps:$4 sm:$0xff]   ;;  %p4803_p1 = pnand %p4802_p0, %p4927_p6 }
  0xd8   : > { %3627 = vmatprep.subr.bf16.mxu0 %v4380_v32  ;;  %v4463_v32 = vld [vmem:[%s5569_s10 + $0x654] ss:$8 sps:$4 sm:$0xff]   ;;  %p4810_p5 = por %p4809_p4, %p4808_p3 }
  0xd9   : > { %p4804_p2 = pneg %p4803_p1 }
  0xda   : > { %3423 = vmatpush1.bf16.msra.mxu1 %v4382_v33  ;;  %v4458_v33 = vld [vmem:[%s5569_s10 + $0x150] ss:$8 sps:$4 sm:$0xff]  }
  0xdb   : > { %3628 = vmatpush1.bf16.msra.mxu0 %v4383_v34  ;;  %3424 = vmatprep.subr.bf16.mxu1 %v4384_v35  ;;  %v4461_v34 = vld [vmem:[%s5569_s10 + $0x650] ss:$8 sps:$4 sm:$0xff]   ;;  %v4466_v35 = vld [vmem:[%s5569_s10 + $0x164] ss:$8 sps:$4 sm:$0xff]   ;;  %p4811_p7 = pnand %p4810_p5, %p4804_p2 }
  0xdc   : > { %3629 = vmatprep.subr.bf16.mxu0 %v4386_v36  ;;  %v4469_v36 = vld [vmem:[%s5569_s10 + $0x664] ss:$8 sps:$4 sm:$0xff]  }
  0xde   : > { %3425 = vmatpush1.bf16.msra.mxu1 %v4388_v37  ;;  %v4464_v37 = vld [vmem:[%s5569_s10 + $0x160] ss:$8 sps:$4 sm:$0xff]  }
  0xdf   : > { %3630 = vmatpush1.bf16.msra.mxu0 %v4389_v38  ;;  %3426 = vmatprep.subr.bf16.mxu1 %v4390_v39  ;;  %v4467_v38 = vld [vmem:[%s5569_s10 + $0x660] ss:$8 sps:$4 sm:$0xff]   ;;  %v4472_v39 = vld [vmem:[%s5569_s10 + $0x174] ss:$8 sps:$4 sm:$0xff]  }
  0xe0   : > { %3631 = vmatprep.subr.bf16.mxu0 %v4392_v40  ;;  %v4475_v40 = vld [vmem:[%s5569_s10 + $0x674] ss:$8 sps:$4 sm:$0xff]  }
  0xe2   : > { %3427 = vmatpush1.bf16.msra.mxu1 %v4394_v41  ;;  %v4470_v41 = vld [vmem:[%s5569_s10 + $0x170] ss:$8 sps:$4 sm:$0xff]  }
  0xe3   : > { %3632 = vmatpush1.bf16.msra.mxu0 %v4395_v42  ;;  %3428 = vmatprep.subr.bf16.mxu1 %v4396_v43  ;;  %v4473_v42 = vld [vmem:[%s5569_s10 + $0x670] ss:$8 sps:$4 sm:$0xff]   ;;  %v4478_v43 = vld [vmem:[%s5569_s10 + $0x184] ss:$8 sps:$4 sm:$0xff]  }
  0xe4   : > { %3633 = vmatprep.subr.bf16.mxu0 %v4398_v44  ;;  %v4481_v44 = vld [vmem:[%s5569_s10 + $0x684] ss:$8 sps:$4 sm:$0xff]  }
  0xe6   : > { %3429 = vmatpush1.bf16.msra.mxu1 %v4400_v45  ;;  %v4476_v45 = vld [vmem:[%s5569_s10 + $0x180] ss:$8 sps:$4 sm:$0xff]  }
  0xe7   : > { %3634 = vmatpush1.bf16.msra.mxu0 %v4401_v46  ;;  %3430 = vmatprep.subr.bf16.mxu1 %v4402_v47  ;;  %v4479_v46 = vld [vmem:[%s5569_s10 + $0x680] ss:$8 sps:$4 sm:$0xff]   ;;  %v4484_v47 = vld [vmem:[%s5569_s10 + $0x194] ss:$8 sps:$4 sm:$0xff]  }
  0xe8   : > { %3635 = vmatprep.subr.bf16.mxu0 %v4404_v48  ;;  %v4487_v48 = vld [vmem:[%s5569_s10 + $0x694] ss:$8 sps:$4 sm:$0xff]  }
  0xea   : > { %3431 = vmatpush1.bf16.msra.mxu1 %v4406_v49  ;;  %v4482_v49 = vld [vmem:[%s5569_s10 + $0x190] ss:$8 sps:$4 sm:$0xff]  }
  0xeb   : > { %3636 = vmatpush1.bf16.msra.mxu0 %v4407_v50  ;;  %3432 = vmatprep.subr.bf16.mxu1 %v4408_v51  ;;  %v4485_v50 = vld [vmem:[%s5569_s10 + $0x690] ss:$8 sps:$4 sm:$0xff]   ;;  %v4490_v51 = vld [vmem:[%s5569_s10 + $0x1a4] ss:$8 sps:$4 sm:$0xff]  }
  0xec   : > { %3637 = vmatprep.subr.bf16.mxu0 %v4410_v54  ;;  %v4493_v54 = vld [vmem:[%s5569_s10 + $0x6a4] ss:$8 sps:$4 sm:$0xff]  }
  0xee   : > { %3433 = vmatpush1.bf16.msra.mxu1 %v4412_v55  ;;  %v4488_v55 = vld [vmem:[%s5569_s10 + $0x1a0] ss:$8 sps:$4 sm:$0xff]  }
  0xef   : > { %3638 = vmatpush1.bf16.msra.mxu0 %v4413_v56  ;;  %3434 = vmatprep.subr.bf16.mxu1 %v4414_v57  ;;  %v4491_v56 = vld [vmem:[%s5569_s10 + $0x6a0] ss:$8 sps:$4 sm:$0xff]   ;;  %v4496_v57 = vld [vmem:[%s5569_s10 + $0x1b4] ss:$8 sps:$4 sm:$0xff]  }
  0xf0   : > { %3639 = vmatprep.subr.bf16.mxu0 %v4416_v59  ;;  %v4499_v59 = vld [vmem:[%s5569_s10 + $0x6b4] ss:$8 sps:$4 sm:$0xff]  }
  0xf2   : > { %3435 = vmatpush1.bf16.msra.mxu1 %v4418_v0  ;;  %v4497_v0 = vld [vmem:[%s5569_s10 + $0x6b0] ss:$8 sps:$4 sm:$0xff]  }
  0xf3   : > { %3640 = vmatpush1.bf16.msra.mxu0 %v4419_v1  ;;  %3436 = vmatprep.subr.bf16.mxu1 %v4420_v2  ;;  %v4502_v1 = vld [vmem:[%s5569_s10 + $0x1c4] ss:$8 sps:$4 sm:$0xff]  }
  0xf4   : > { %3641 = vmatprep.subr.bf16.mxu0 %v4422_v3  ;;  %v4505_v2 = vld [vmem:[%s5569_s10 + $0x6c4] ss:$8 sps:$4 sm:$0xff]   ;;  %v4500_v3 = vld [vmem:[%s5569_s10 + $0x1c0] ss:$8 sps:$4 sm:$0xff]  }
  0xf6   : > { %3437 = vmatpush1.bf16.msra.mxu1 %v4424_v5  ;;  %v4503_v5 = vld [vmem:[%s5569_s10 + $0x6c0] ss:$8 sps:$4 sm:$0xff]  }
  0xf7   : > { %3642 = vmatpush1.bf16.msra.mxu0 %v4425_v6  ;;  %3447 = vmatprep.subr.bf16.mxu1 %v4429_v7  ;;  %v4508_v6 = vld [vmem:[%s5569_s10 + $0x1d4] ss:$8 sps:$4 sm:$0xff]  }
  0xf8   : > { %3652 = vmatprep.subr.bf16.mxu0 %v4433_v8  ;;  %v4511_v7 = vld [vmem:[%s5569_s10 + $0x6d4] ss:$8 sps:$4 sm:$0xff]   ;;  %v4506_v8 = vld [vmem:[%s5569_s10 + $0x1d0] ss:$8 sps:$4 sm:$0xff]  }
  0xf9   : > { %3439 = vmatmul.mubr.bf16.vlgmr.msra.gmra.mrb[0].mxu1 %v1551_v13  ;;  %v4512_v13 = vld [vmem:[%s5569_s10 + $0x1e0] ss:$8 sps:$4 sm:$0xff]  }
  0xfa   : > { %3644 = vmatmul.mubr.bf16.vlgmr.msra.gmra.mrb[0].mxu0 %v1561_v14  ;;  %3448 = vmatpush1.bf16.msra.mxu1 %v4427_v11  ;;  %v4517_v11 = vld [vmem:[%s5569_s10 + $0x6e4] ss:$8 sps:$4 sm:$0xff]   ;;  %v4515_v14 = vld [vmem:[%s5569_s10 + $0x6e0] ss:$8 sps:$4 sm:$0xff]  }
  0xfb   : > { %3653 = vmatpush1.bf16.msra.mxu0 %v4431_v12  ;;  %3449 = vmatprep.subr.bf16.mxu1 %v4436_v15  ;;  %v1499_v12 = vcombine.high %v5648_v61, %v5648_v61  ;;  %v4520_v15 = vld [vmem:[%s5569_s10 + $0x1f4] ss:$8 sps:$4 sm:$0xff]   ;;  %v4526_v61 = vld [vmem:[%s5569_s10 + $0x204] ss:$8 sps:$4 sm:$0xff]  }
  0xfc   : > { %3654 = vmatprep.subr.bf16.mxu0 %v4439_v16  ;;  %3479 = vmatprep.mubr.bf16.mxu1 %v1554_v17  ;;  %v4523_v16 = vld [vmem:[%s5569_s10 + $0x6f4] ss:$8 sps:$4 sm:$0xff]  }
  0xfd   : > { %3684 = vmatprep.mubr.bf16.mxu0 %v1564_v18  ;;  %v5736_v17 = vrot.slane %v1499_v12, %v5574_v58  ;;  %v4518_v18 = vld [vmem:[%s5569_s10 + $0x1f0] ss:$8 sps:$4 sm:$0xff]  }
  0xfe   : > { %3450 = vmatpush1.bf16.msra.mxu1 %v4434_v19  ;;  %v4521_v19 = vld [vmem:[%s5569_s10 + $0x6f0] ss:$8 sps:$4 sm:$0xff]  }
  0xff   : > { %3655 = vmatpush1.bf16.msra.mxu0 %v4437_v62  ;;  %3451 = vmatprep.subr.bf16.mxu1 %v4442_v63  ;;  %v4529_v62 = vld [vmem:[%s5569_s10 + $0x704] ss:$8 sps:$4 sm:$0xff]   ;;  %v1515_v63 = vcombine.high %v5736_v17, %v5736_v17  ;;  %v4590_v12 = vld [vmem:[%s5569_s10 + $0x2b0] ss:$8 sps:$4 sm:$0xff]  }
 0x100   : > { %3656 = vmatprep.subr.bf16.mxu0 %v4445_v20  ;;  %v4524_v20 = vld [vmem:[%s5569_s10 + $0x200] ss:$8 sps:$4 sm:$0xff]  }
 0x102   : > { %3452 = vmatpush1.bf16.msra.mxu1 %v4440_v21  ;;  %v4527_v21 = vld [vmem:[%s5569_s10 + $0x700] ss:$8 sps:$4 sm:$0xff]  }
 0x103   : > { %3657 = vmatpush1.bf16.msra.mxu0 %v4443_v22  ;;  %3453 = vmatprep.subr.bf16.mxu1 %v4448_v23  ;;  %v1553_v22 = vpack.c.bf16 %v5655_v4, %v5655_v4  ;;  %v1563_v23 = vpack.c.bf16 %v5659_v53, %v5659_v53  ;;  %v1566_v53 = vpack.c.bf16 %v1515_v63, %v1515_v63  ;;  %v4605_v63 = vld [vmem:[%s5569_s10 + $0x7d0] ss:$8 sps:$4 sm:$0xff]  }
 0x104   : > { %3658 = vmatprep.subr.bf16.mxu0 %v4451_v24  ;;  %v5753_v24 = vld [vmem:[%s6025_s0 + $0x8] sm:$0xff] }
 0x105   : > { %v5759_v4 = vrot.slane %v5753_v24, %v5574_v58 }
 0x106   : > { %3454 = vmatpush1.bf16.msra.mxu1 %v4446_v25  ;;  %v4532_v25 = vld [vmem:[%s5569_s10 + $0x214] ss:$8 sps:$4 sm:$0xff]  }
 0x107   : > { %3659 = vmatpush1.bf16.msra.mxu0 %v4449_v26  ;;  %3455 = vmatprep.subr.bf16.mxu1 %v4454_v27  ;;  %v4535_v26 = vld [vmem:[%s5569_s10 + $0x714] ss:$8 sps:$4 sm:$0xff]   ;;  %v4530_v27 = vld [vmem:[%s5569_s10 + $0x210] ss:$8 sps:$4 sm:$0xff]  }
 0x108   : > { %3660 = vmatprep.subr.bf16.mxu0 %v4457_v28  ;;  %v1480_v28 = vcombine.high %v5759_v4, %v5759_v4 }
 0x10a   : > { %3456 = vmatpush1.bf16.msra.mxu1 %v4452_v29  ;;  %v4533_v29 = vld [vmem:[%s5569_s10 + $0x710] ss:$8 sps:$4 sm:$0xff]  }
 0x10b   : > { %3661 = vmatpush1.bf16.msra.mxu0 %v4455_v30  ;;  %3457 = vmatprep.subr.bf16.mxu1 %v4460_v31  ;;  %v4538_v30 = vld [vmem:[%s5569_s10 + $0x224] ss:$8 sps:$4 sm:$0xff]  }
 0x10c   : > { %3662 = vmatprep.subr.bf16.mxu0 %v4463_v32  ;;  %v4541_v31 = vld [vmem:[%s5569_s10 + $0x724] ss:$8 sps:$4 sm:$0xff]   ;;  %v1556_v32 = vpack.c.bf16 %v1480_v28, %v1480_v28 }
 0x10e   : > { %3458 = vmatpush1.bf16.msra.mxu1 %v4458_v33  ;;  %v4536_v33 = vld [vmem:[%s5569_s10 + $0x220] ss:$8 sps:$4 sm:$0xff]  }
 0x10f   : > { %3663 = vmatpush1.bf16.msra.mxu0 %v4461_v34  ;;  %3459 = vmatprep.subr.bf16.mxu1 %v4466_v35  ;;  %v4539_v34 = vld [vmem:[%s5569_s10 + $0x720] ss:$8 sps:$4 sm:$0xff]   ;;  %v4544_v35 = vld [vmem:[%s5569_s10 + $0x234] ss:$8 sps:$4 sm:$0xff]  }
 0x110   : > { %3664 = vmatprep.subr.bf16.mxu0 %v4469_v36  ;;  %v4547_v36 = vld [vmem:[%s5569_s10 + $0x734] ss:$8 sps:$4 sm:$0xff]  }
 0x112   : > { %3460 = vmatpush1.bf16.msra.mxu1 %v4464_v37  ;;  %v4542_v37 = vld [vmem:[%s5569_s10 + $0x230] ss:$8 sps:$4 sm:$0xff]  }
 0x113   : > { %3665 = vmatpush1.bf16.msra.mxu0 %v4467_v38  ;;  %3461 = vmatprep.subr.bf16.mxu1 %v4472_v39  ;;  %v4545_v38 = vld [vmem:[%s5569_s10 + $0x730] ss:$8 sps:$4 sm:$0xff]   ;;  %v4550_v39 = vld [vmem:[%s5569_s10 + $0x244] ss:$8 sps:$4 sm:$0xff]  }
 0x114   : > { %3666 = vmatprep.subr.bf16.mxu0 %v4475_v40  ;;  %v4553_v40 = vld [vmem:[%s5569_s10 + $0x744] ss:$8 sps:$4 sm:$0xff]  }
 0x116   : > { %3462 = vmatpush1.bf16.msra.mxu1 %v4470_v41  ;;  %v4548_v41 = vld [vmem:[%s5569_s10 + $0x240] ss:$8 sps:$4 sm:$0xff]  }
 0x117   : > { %3667 = vmatpush1.bf16.msra.mxu0 %v4473_v42  ;;  %3463 = vmatprep.subr.bf16.mxu1 %v4478_v43  ;;  %v4551_v42 = vld [vmem:[%s5569_s10 + $0x740] ss:$8 sps:$4 sm:$0xff]   ;;  %v4556_v43 = vld [vmem:[%s5569_s10 + $0x254] ss:$8 sps:$4 sm:$0xff]  }
 0x118   : > { %3668 = vmatprep.subr.bf16.mxu0 %v4481_v44  ;;  %v4559_v44 = vld [vmem:[%s5569_s10 + $0x754] ss:$8 sps:$4 sm:$0xff]  }
 0x11a   : > { %3464 = vmatpush1.bf16.msra.mxu1 %v4476_v45  ;;  %v4554_v45 = vld [vmem:[%s5569_s10 + $0x250] ss:$8 sps:$4 sm:$0xff]  }
 0x11b   : > { %3669 = vmatpush1.bf16.msra.mxu0 %v4479_v46  ;;  %3465 = vmatprep.subr.bf16.mxu1 %v4484_v47  ;;  %v4557_v46 = vld [vmem:[%s5569_s10 + $0x750] ss:$8 sps:$4 sm:$0xff]   ;;  %v4562_v47 = vld [vmem:[%s5569_s10 + $0x264] ss:$8 sps:$4 sm:$0xff]  }
 0x11c   : > { %3670 = vmatprep.subr.bf16.mxu0 %v4487_v48  ;;  %v4565_v48 = vld [vmem:[%s5569_s10 + $0x764] ss:$8 sps:$4 sm:$0xff]  }
 0x11e   : > { %3466 = vmatpush1.bf16.msra.mxu1 %v4482_v49  ;;  %v4560_v49 = vld [vmem:[%s5569_s10 + $0x260] ss:$8 sps:$4 sm:$0xff]  }
 0x11f   : > { %3671 = vmatpush1.bf16.msra.mxu0 %v4485_v50  ;;  %3467 = vmatprep.subr.bf16.mxu1 %v4490_v51  ;;  %v4563_v50 = vld [vmem:[%s5569_s10 + $0x760] ss:$8 sps:$4 sm:$0xff]   ;;  %v4568_v51 = vld [vmem:[%s5569_s10 + $0x274] ss:$8 sps:$4 sm:$0xff]  }
 0x120   : > { %3672 = vmatprep.subr.bf16.mxu0 %v4493_v54  ;;  %v4571_v54 = vld [vmem:[%s5569_s10 + $0x774] ss:$8 sps:$4 sm:$0xff]  }
 0x122   : > { %3468 = vmatpush1.bf16.msra.mxu1 %v4488_v55  ;;  %v4566_v55 = vld [vmem:[%s5569_s10 + $0x270] ss:$8 sps:$4 sm:$0xff]  }
 0x123   : > { %3673 = vmatpush1.bf16.msra.mxu0 %v4491_v56  ;;  %3469 = vmatprep.subr.bf16.mxu1 %v4496_v57  ;;  %v4569_v56 = vld [vmem:[%s5569_s10 + $0x770] ss:$8 sps:$4 sm:$0xff]   ;;  %v4574_v57 = vld [vmem:[%s5569_s10 + $0x284] ss:$8 sps:$4 sm:$0xff]  }
 0x124   : > { %3674 = vmatprep.subr.bf16.mxu0 %v4499_v59  ;;  %v4577_v59 = vld [vmem:[%s5569_s10 + $0x784] ss:$8 sps:$4 sm:$0xff]  }
 0x126   : > { %3470 = vmatpush1.bf16.msra.mxu1 %v4494_v60  ;;  %v4572_v60 = vld [vmem:[%s5569_s10 + $0x280] ss:$8 sps:$4 sm:$0xff]  }
 0x127   : > { %3675 = vmatpush1.bf16.msra.mxu0 %v4497_v0  ;;  %3471 = vmatprep.subr.bf16.mxu1 %v4502_v1  ;;  %v4575_v0 = vld [vmem:[%s5569_s10 + $0x780] ss:$8 sps:$4 sm:$0xff]   ;;  %v4580_v1 = vld [vmem:[%s5569_s10 + $0x294] ss:$8 sps:$4 sm:$0xff]  }
 0x128   : > { %3676 = vmatprep.subr.bf16.mxu0 %v4505_v2  ;;  %v4583_v2 = vld [vmem:[%s5569_s10 + $0x794] ss:$8 sps:$4 sm:$0xff]  }
 0x12a   : > { %3472 = vmatpush1.bf16.msra.mxu1 %v4500_v3  ;;  %v4578_v3 = vld [vmem:[%s5569_s10 + $0x290] ss:$8 sps:$4 sm:$0xff]  }
 0x12b   : > { %3677 = vmatpush1.bf16.msra.mxu0 %v4503_v5  ;;  %3473 = vmatprep.subr.bf16.mxu1 %v4508_v6  ;;  %v4581_v5 = vld [vmem:[%s5569_s10 + $0x790] ss:$8 sps:$4 sm:$0xff]   ;;  %v4586_v6 = vld [vmem:[%s5569_s10 + $0x2a4] ss:$8 sps:$4 sm:$0xff]  }
 0x12c   : > { %3678 = vmatprep.subr.bf16.mxu0 %v4511_v7  ;;  %v4589_v7 = vld [vmem:[%s5569_s10 + $0x7a4] ss:$8 sps:$4 sm:$0xff]  }
 0x12e   : > { %3474 = vmatpush1.bf16.msra.mxu1 %v4506_v8  ;;  %v4584_v8 = vld [vmem:[%s5569_s10 + $0x2a0] ss:$8 sps:$4 sm:$0xff]  }
 0x12f   : > { %3679 = vmatpush1.bf16.msra.mxu0 %v4509_v9  ;;  %3475 = vmatprep.subr.bf16.mxu1 %v4514_v10  ;;  %v4587_v9 = vld [vmem:[%s5569_s10 + $0x7a0] ss:$8 sps:$4 sm:$0xff]   ;;  %v4592_v10 = vld [vmem:[%s5569_s10 + $0x2b4] ss:$8 sps:$4 sm:$0xff]  }
 0x130   : > { %3680 = vmatprep.subr.bf16.mxu0 %v4517_v11  ;;  %v4595_v11 = vld [vmem:[%s5569_s10 + $0x7b4] ss:$8 sps:$4 sm:$0xff]  }
 0x132   : > { %3476 = vmatpush1.bf16.msra.mxu1 %v4512_v13  ;;  %v4593_v13 = vld [vmem:[%s5569_s10 + $0x7b0] ss:$8 sps:$4 sm:$0xff]  }
 0x133   : > { %3681 = vmatpush1.bf16.msra.mxu0 %v4515_v14  ;;  %3477 = vmatprep.subr.bf16.mxu1 %v4520_v15  ;;  %v4598_v14 = vld [vmem:[%s5569_s10 + $0x2c4] ss:$8 sps:$4 sm:$0xff]  }
 0x134   : > { %3682 = vmatprep.subr.bf16.mxu0 %v4523_v16  ;;  %v4601_v15 = vld [vmem:[%s5569_s10 + $0x7c4] ss:$8 sps:$4 sm:$0xff]   ;;  %v4596_v16 = vld [vmem:[%s5569_s10 + $0x2c0] ss:$8 sps:$4 sm:$0xff]  }
 0x136   : > { %3478 = vmatpush1.bf16.msra.mxu1 %v4518_v18  ;;  %v4599_v18 = vld [vmem:[%s5569_s10 + $0x7c0] ss:$8 sps:$4 sm:$0xff]  }
 0x137   : > { %3683 = vmatpush1.bf16.msra.mxu0 %v4521_v19  ;;  %3488 = vmatprep.subr.bf16.mxu1 %v4526_v61  ;;  %v4604_v19 = vld [vmem:[%s5569_s10 + $0x2d4] ss:$8 sps:$4 sm:$0xff]  }
 0x138   : > { %3693 = vmatprep.subr.bf16.mxu0 %v4529_v62  ;;  %v4607_v61 = vld [vmem:[%s5569_s10 + $0x7d4] ss:$8 sps:$4 sm:$0xff]   ;;  %v4602_v62 = vld [vmem:[%s5569_s10 + $0x2d0] ss:$8 sps:$4 sm:$0xff]  }
 0x139   : > { %3480 = vmatmul.mubr.bf16.vlgmr.msra.gmra.mrb[0].mxu1 %v1553_v22  ;;  %v1465_v22 = vcombine.high %v5753_v24, %v5753_v24 }
 0x13a   : > { %3685 = vmatmul.mubr.bf16.vlgmr.msra.gmra.mrb[0].mxu0 %v1563_v23  ;;  %3489 = vmatpush1.bf16.msra.mxu1 %v4524_v20  ;;  %v4610_v20 = vld [vmem:[%s5569_s10 + $0x2e4] ss:$8 sps:$4 sm:$0xff]  }
 0x13b   : > { %3694 = vmatpush1.bf16.msra.mxu0 %v4527_v21  ;;  %3490 = vmatprep.subr.bf16.mxu1 %v4532_v25  ;;  %v4613_v21 = vld [vmem:[%s5569_s10 + $0x7e4] ss:$8 sps:$4 sm:$0xff]   ;;  %v4608_v25 = vld [vmem:[%s5569_s10 + $0x2e0] ss:$8 sps:$4 sm:$0xff]   ;;  %v5827_v28 = vrot.slane %v1465_v22, %v5574_v58  ;;  %v4687_v22 = vld [vmem:[%s5569_s10 + $0x3b0] ss:$8 sps:$4 sm:$0xff]  }
 0x13c   : > { %3695 = vmatprep.subr.bf16.mxu0 %v4535_v26  ;;  %3725 = vmatprep.mubr.bf16.mxu0 %v1566_v53  ;;  %v5820_v23 = vld [vmem:[%s6025_s0 + $0x20] sm:$0x3f]  ;;  %v4616_v53 = vld [vmem:[%s5569_s10 + $0x2f4] ss:$8 sps:$4 sm:$0xff]  }
 0x13d   : > { %3520 = vmatprep.mubr.bf16.mxu1 %v1556_v32  ;;  %v4611_v26 = vld [vmem:[%s5569_s10 + $0x7e0] ss:$8 sps:$4 sm:$0xff]   ;;  %v5831_v24 = vrot.slane %v5820_v23, %v5574_v58  ;;  %v4626_v32 = vld [vmem:[%s5569_s10 + $0x804] ss:$8 sps:$4 sm:$0xff]  }
 0x13e   : > { %3491 = vmatpush1.bf16.msra.mxu1 %v4530_v27  ;;  %v4619_v27 = vld [vmem:[%s5569_s10 + $0x7f4] ss:$8 sps:$4 sm:$0xff]  }
 0x13f   : > { %3696 = vmatpush1.bf16.msra.mxu0 %v4533_v29  ;;  %3492 = vmatprep.subr.bf16.mxu1 %v4538_v30  ;;  %v4614_v29 = vld [vmem:[%s5569_s10 + $0x2f0] ss:$8 sps:$4 sm:$0xff]  }
 0x140   : > { %3697 = vmatprep.subr.bf16.mxu0 %v4541_v31  ;;  %v4617_v30 = vld [vmem:[%s5569_s10 + $0x7f0] ss:$8 sps:$4 sm:$0xff]   ;;  %v4622_v31 = vld [vmem:[%s5569_s10 + $0x304] ss:$8 sps:$4 sm:$0xff]  }
 0x142   : > { %3493 = vmatpush1.bf16.msra.mxu1 %v4536_v33  ;;  %v1481_v33 = vcombine.high %v5827_v28, %v5827_v28 }
 0x143   : > { %3698 = vmatpush1.bf16.msra.mxu0 %v4539_v34  ;;  %3494 = vmatprep.subr.bf16.mxu1 %v4544_v35  ;;  %v1531_v34 = vcombine.high %v5831_v24, %v5831_v24  ;;  %v1555_v35 = vpack.c.bf16 %v5759_v4, %v5759_v4  ;;  %v4630_v4 = vld [vmem:[%s5569_s10 + $0x810] ss:$8 sps:$4 sm:$0xff]  }
 0x144   : > { %3699 = vmatprep.subr.bf16.mxu0 %v4547_v36  ;;  %v1565_v36 = vpack.c.bf16 %v5736_v17, %v5736_v17  ;;  %v4627_v17 = vld [vmem:[%s5569_s10 + $0x310] ss:$8 sps:$4 sm:$0xff]  }
 0x146   : > { %3495 = vmatpush1.bf16.msra.mxu1 %v4542_v37  ;;  %v4620_v37 = vld [vmem:[%s5569_s10 + $0x300] ss:$8 sps:$4 sm:$0xff]  }
 0x147   : > { %3700 = vmatpush1.bf16.msra.mxu0 %v4545_v38  ;;  %3496 = vmatprep.subr.bf16.mxu1 %v4550_v39  ;;  %v4624_v38 = vld [vmem:[%s5569_s10 + $0x800] ss:$8 sps:$4 sm:$0xff]   ;;  %v4629_v39 = vld [vmem:[%s5569_s10 + $0x314] ss:$8 sps:$4 sm:$0xff]  }
 0x148   : > { %3701 = vmatprep.subr.bf16.mxu0 %v4553_v40  ;;  %v4632_v40 = vld [vmem:[%s5569_s10 + $0x814] ss:$8 sps:$4 sm:$0xff]  }
 0x14a   : > { %3497 = vmatpush1.bf16.msra.mxu1 %v4548_v41  ;;  %v1558_v41 = vpack.c.bf16 %v1481_v33, %v1481_v33  ;;  %v4702_v33 = vld [vmem:[%s5569_s10 + $0x8d0] ss:$8 sps:$4 sm:$0xff]  }
 0x14b   : > { %3702 = vmatpush1.bf16.msra.mxu0 %v4551_v42  ;;  %3498 = vmatprep.subr.bf16.mxu1 %v4556_v43  ;;  %v1568_v42 = vpack.c.bf16 %v1531_v34, %v1531_v34  ;;  %v4635_v43 = vld [vmem:[%s5569_s10 + $0x324] ss:$8 sps:$4 sm:$0xff]  }
 0x14c   : > { %3703 = vmatprep.subr.bf16.mxu0 %v4559_v44  ;;  %v4638_v44 = vld [vmem:[%s5569_s10 + $0x824] ss:$8 sps:$4 sm:$0xff]  }
 0x14d   : > { %v4707_v34 = vld [vmem:[%s5569_s10 + $0x3e4] ss:$8 sps:$4 sm:$0xff]  }
 0x14e   : > { %3499 = vmatpush1.bf16.msra.mxu1 %v4554_v45  ;;  %v4633_v45 = vld [vmem:[%s5569_s10 + $0x320] ss:$8 sps:$4 sm:$0xff]  }
 0x14f   : > { %3704 = vmatpush1.bf16.msra.mxu0 %v4557_v46  ;;  %3500 = vmatprep.subr.bf16.mxu1 %v4562_v47  ;;  %v4636_v46 = vld [vmem:[%s5569_s10 + $0x820] ss:$8 sps:$4 sm:$0xff]   ;;  %v4641_v47 = vld [vmem:[%s5569_s10 + $0x334] ss:$8 sps:$4 sm:$0xff]  }
 0x150   : > { %3705 = vmatprep.subr.bf16.mxu0 %v4565_v48  ;;  %v4644_v48 = vld [vmem:[%s5569_s10 + $0x834] ss:$8 sps:$4 sm:$0xff]  }
 0x152   : > { %3501 = vmatpush1.bf16.msra.mxu1 %v4560_v49  ;;  %v4639_v49 = vld [vmem:[%s5569_s10 + $0x330] ss:$8 sps:$4 sm:$0xff]  }
 0x153   : > { %3706 = vmatpush1.bf16.msra.mxu0 %v4563_v50  ;;  %3502 = vmatprep.subr.bf16.mxu1 %v4568_v51  ;;  %v4642_v50 = vld [vmem:[%s5569_s10 + $0x830] ss:$8 sps:$4 sm:$0xff]   ;;  %v4647_v51 = vld [vmem:[%s5569_s10 + $0x344] ss:$8 sps:$4 sm:$0xff]  }
 0x154   : > { %3707 = vmatprep.subr.bf16.mxu0 %v4571_v54  ;;  %v4650_v54 = vld [vmem:[%s5569_s10 + $0x844] ss:$8 sps:$4 sm:$0xff]  }
 0x156   : > { %3503 = vmatpush1.bf16.msra.mxu1 %v4566_v55  ;;  %v4645_v55 = vld [vmem:[%s5569_s10 + $0x340] ss:$8 sps:$4 sm:$0xff]  }
 0x157   : > { %3708 = vmatpush1.bf16.msra.mxu0 %v4569_v56  ;;  %3504 = vmatprep.subr.bf16.mxu1 %v4574_v57  ;;  %v4648_v56 = vld [vmem:[%s5569_s10 + $0x840] ss:$8 sps:$4 sm:$0xff]   ;;  %v4653_v57 = vld [vmem:[%s5569_s10 + $0x354] ss:$8 sps:$4 sm:$0xff]  }
 0x158   : > { %3709 = vmatprep.subr.bf16.mxu0 %v4577_v59  ;;  %v4656_v59 = vld [vmem:[%s5569_s10 + $0x854] ss:$8 sps:$4 sm:$0xff]  }
 0x15a   : > { %3505 = vmatpush1.bf16.msra.mxu1 %v4572_v60  ;;  %v4651_v60 = vld [vmem:[%s5569_s10 + $0x350] ss:$8 sps:$4 sm:$0xff]  }
 0x15b   : > { %3710 = vmatpush1.bf16.msra.mxu0 %v4575_v0  ;;  %3506 = vmatprep.subr.bf16.mxu1 %v4580_v1  ;;  %v4654_v0 = vld [vmem:[%s5569_s10 + $0x850] ss:$8 sps:$4 sm:$0xff]   ;;  %v4659_v1 = vld [vmem:[%s5569_s10 + $0x364] ss:$8 sps:$4 sm:$0xff]  }
 0x15c   : > { %3711 = vmatprep.subr.bf16.mxu0 %v4583_v2  ;;  %v4662_v2 = vld [vmem:[%s5569_s10 + $0x864] ss:$8 sps:$4 sm:$0xff]  }
 0x15e   : > { %3507 = vmatpush1.bf16.msra.mxu1 %v4578_v3  ;;  %v4657_v3 = vld [vmem:[%s5569_s10 + $0x360] ss:$8 sps:$4 sm:$0xff]  }
 0x15f   : > { %3712 = vmatpush1.bf16.msra.mxu0 %v4581_v5  ;;  %3508 = vmatprep.subr.bf16.mxu1 %v4586_v6  ;;  %v4660_v5 = vld [vmem:[%s5569_s10 + $0x860] ss:$8 sps:$4 sm:$0xff]   ;;  %v4665_v6 = vld [vmem:[%s5569_s10 + $0x374] ss:$8 sps:$4 sm:$0xff]  }
 0x160   : > { %3713 = vmatprep.subr.bf16.mxu0 %v4589_v7  ;;  %v4668_v7 = vld [vmem:[%s5569_s10 + $0x874] ss:$8 sps:$4 sm:$0xff]  }
 0x162   : > { %3509 = vmatpush1.bf16.msra.mxu1 %v4584_v8  ;;  %v4663_v8 = vld [vmem:[%s5569_s10 + $0x370] ss:$8 sps:$4 sm:$0xff]  }
 0x163   : > { %3714 = vmatpush1.bf16.msra.mxu0 %v4587_v9  ;;  %3510 = vmatprep.subr.bf16.mxu1 %v4592_v10  ;;  %v4666_v9 = vld [vmem:[%s5569_s10 + $0x870] ss:$8 sps:$4 sm:$0xff]   ;;  %v4671_v10 = vld [vmem:[%s5569_s10 + $0x384] ss:$8 sps:$4 sm:$0xff]  }
 0x164   : > { %3715 = vmatprep.subr.bf16.mxu0 %v4595_v11  ;;  %v4674_v11 = vld [vmem:[%s5569_s10 + $0x884] ss:$8 sps:$4 sm:$0xff]  }
 0x166   : > { %3511 = vmatpush1.bf16.msra.mxu1 %v4590_v12  ;;  %v4669_v12 = vld [vmem:[%s5569_s10 + $0x380] ss:$8 sps:$4 sm:$0xff]  }
 0x167   : > { %3716 = vmatpush1.bf16.msra.mxu0 %v4593_v13  ;;  %3512 = vmatprep.subr.bf16.mxu1 %v4598_v14  ;;  %v4672_v13 = vld [vmem:[%s5569_s10 + $0x880] ss:$8 sps:$4 sm:$0xff]   ;;  %v4677_v14 = vld [vmem:[%s5569_s10 + $0x394] ss:$8 sps:$4 sm:$0xff]  }
 0x168   : > { %3717 = vmatprep.subr.bf16.mxu0 %v4601_v15  ;;  %v4680_v15 = vld [vmem:[%s5569_s10 + $0x894] ss:$8 sps:$4 sm:$0xff]  }
 0x16a   : > { %3513 = vmatpush1.bf16.msra.mxu1 %v4596_v16  ;;  %v4675_v16 = vld [vmem:[%s5569_s10 + $0x390] ss:$8 sps:$4 sm:$0xff]  }
 0x16b   : > { %3718 = vmatpush1.bf16.msra.mxu0 %v4599_v18  ;;  %3514 = vmatprep.subr.bf16.mxu1 %v4604_v19  ;;  %v4678_v18 = vld [vmem:[%s5569_s10 + $0x890] ss:$8 sps:$4 sm:$0xff]   ;;  %v4683_v19 = vld [vmem:[%s5569_s10 + $0x3a4] ss:$8 sps:$4 sm:$0xff]  }
 0x16c   : > { %3719 = vmatprep.subr.bf16.mxu0 %v4607_v61  ;;  %v4686_v61 = vld [vmem:[%s5569_s10 + $0x8a4] ss:$8 sps:$4 sm:$0xff]  }
 0x16e   : > { %3515 = vmatpush1.bf16.msra.mxu1 %v4602_v62  ;;  %v4681_v62 = vld [vmem:[%s5569_s10 + $0x3a0] ss:$8 sps:$4 sm:$0xff]  }
 0x16f   : > { %3720 = vmatpush1.bf16.msra.mxu0 %v4605_v63  ;;  %3516 = vmatprep.subr.bf16.mxu1 %v4610_v20  ;;  %v4684_v63 = vld [vmem:[%s5569_s10 + $0x8a0] ss:$8 sps:$4 sm:$0xff]   ;;  %v4689_v20 = vld [vmem:[%s5569_s10 + $0x3b4] ss:$8 sps:$4 sm:$0xff]  }
 0x170   : > { %3721 = vmatprep.subr.bf16.mxu0 %v4613_v21  ;;  %v4692_v21 = vld [vmem:[%s5569_s10 + $0x8b4] ss:$8 sps:$4 sm:$0xff]  }
 0x172   : > { %3517 = vmatpush1.bf16.msra.mxu1 %v4608_v25  ;;  %v4690_v25 = vld [vmem:[%s5569_s10 + $0x8b0] ss:$8 sps:$4 sm:$0xff]  }
 0x173   : > { %3722 = vmatpush1.bf16.msra.mxu0 %v4611_v26  ;;  %3518 = vmatprep.subr.bf16.mxu1 %v4616_v53  ;;  %v4695_v26 = vld [vmem:[%s5569_s10 + $0x3c4] ss:$8 sps:$4 sm:$0xff]  }
 0x174   : > { %3723 = vmatprep.subr.bf16.mxu0 %v4619_v27  ;;  %v4698_v53 = vld [vmem:[%s5569_s10 + $0x8c4] ss:$8 sps:$4 sm:$0xff]   ;;  %v4693_v27 = vld [vmem:[%s5569_s10 + $0x3c0] ss:$8 sps:$4 sm:$0xff]  }
 0x176   : > { %3519 = vmatpush1.bf16.msra.mxu1 %v4614_v29  ;;  %v4696_v29 = vld [vmem:[%s5569_s10 + $0x8c0] ss:$8 sps:$4 sm:$0xff]  }
 0x177   : > { %3724 = vmatpush1.bf16.msra.mxu0 %v4617_v30  ;;  %3529 = vmatprep.subr.bf16.mxu1 %v4622_v31  ;;  %v4701_v30 = vld [vmem:[%s5569_s10 + $0x3d4] ss:$8 sps:$4 sm:$0xff]  }
 0x178   : > { %3734 = vmatprep.subr.bf16.mxu0 %v4626_v32  ;;  %v4704_v31 = vld [vmem:[%s5569_s10 + $0x8d4] ss:$8 sps:$4 sm:$0xff]   ;;  %v4699_v32 = vld [vmem:[%s5569_s10 + $0x3d0] ss:$8 sps:$4 sm:$0xff]  }
 0x179   : > { %3521 = vmatmul.mubr.bf16.vlgmr.msra.gmra.mrb[0].mxu1 %v1555_v35  ;;  %v4710_v35 = vld [vmem:[%s5569_s10 + $0x8e4] ss:$8 sps:$4 sm:$0xff]  }
 0x17a   : > { %3726 = vmatmul.mubr.bf16.vlgmr.msra.gmra.mrb[0].mxu0 %v1565_v36  ;;  %3530 = vmatpush1.bf16.msra.mxu1 %v4620_v37  ;;  %v4705_v36 = vld [vmem:[%s5569_s10 + $0x3e0] ss:$8 sps:$4 sm:$0xff]  }
 0x17b   : > { %3735 = vmatpush1.bf16.msra.mxu0 %v4624_v38  ;;  %3531 = vmatprep.subr.bf16.mxu1 %v4629_v39  ;;  %v4708_v37 = vld [vmem:[%s5569_s10 + $0x8e0] ss:$8 sps:$4 sm:$0xff]   ;;  %v4713_v38 = vld [vmem:[%s5569_s10 + $0x3f4] ss:$8 sps:$4 sm:$0xff]  }
 0x17c   : > { %3736 = vmatprep.subr.bf16.mxu0 %v4632_v40  ;;  %3561 = vmatprep.mubr.bf16.mxu1 %v1558_v41  ;;  %v4716_v39 = vld [vmem:[%s5569_s10 + $0x8f4] ss:$8 sps:$4 sm:$0xff]   ;;  %v4711_v41 = vld [vmem:[%s5569_s10 + $0x3f0] ss:$8 sps:$4 sm:$0xff]  }
 0x17d   : > { %3766 = vmatprep.mubr.bf16.mxu0 %v1568_v42  ;;  %v5908_v40 = vld.sshfl [vmem:[%s6025_s0 + $0x10] sm:$0xff pattern:$0x76325410] }
 0x17e   : > { %3532 = vmatpush1.bf16.msra.mxu1 %v4627_v17  ;;  %v4714_v42 = vld [vmem:[%s5569_s10 + $0x8f0] ss:$8 sps:$4 sm:$0xff]   ;;  %v4720_v17 = vld [vmem:[%s5569_s10 + $0x404] ss:$8 sps:$4 sm:$0xff]  }
 0x17f   : > { %3737 = vmatpush1.bf16.msra.mxu0 %v4630_v4  ;;  %3533 = vmatprep.subr.bf16.mxu1 %v4635_v43  ;;  %v4724_v4 = vld [vmem:[%s5569_s10 + $0x904] ss:$8 sps:$4 sm:$0xff]   ;;  %v1497_v43 = vcombine.high %v5908_v40, %v5908_v40 }
 0x180   : > { %3738 = vmatprep.subr.bf16.mxu0 %v4638_v44  ;;  %v1557_v44 = vpack.c.bf16 %v5827_v28, %v5827_v28  ;;  %v4725_v28 = vld [vmem:[%s5569_s10 + $0x410] ss:$8 sps:$4 sm:$0xff]  }
 0x182   : > { %3534 = vmatpush1.bf16.msra.mxu1 %v4633_v45  ;;  %v1567_v45 = vpack.c.bf16 %v5831_v24, %v5831_v24  ;;  %v4728_v24 = vld [vmem:[%s5569_s10 + $0x910] ss:$8 sps:$4 sm:$0xff]  }
 0x183   : > { %3739 = vmatpush1.bf16.msra.mxu0 %v4636_v46  ;;  %3535 = vmatprep.subr.bf16.mxu1 %v4641_v47  ;;  %v4718_v46 = vld [vmem:[%s5569_s10 + $0x400] ss:$8 sps:$4 sm:$0xff]  }
 0x184   : > { %3740 = vmatprep.subr.bf16.mxu0 %v4644_v48  ;;  %v4722_v47 = vld [vmem:[%s5569_s10 + $0x900] ss:$8 sps:$4 sm:$0xff]   ;;  %v4727_v48 = vld [vmem:[%s5569_s10 + $0x414] ss:$8 sps:$4 sm:$0xff]  }
 0x186   : > { %3536 = vmatpush1.bf16.msra.mxu1 %v4639_v49  ;;  %v4730_v49 = vld [vmem:[%s5569_s10 + $0x914] ss:$8 sps:$4 sm:$0xff]  }
 0x187   : > { %3741 = vmatpush1.bf16.msra.mxu0 %v4642_v50  ;;  %3537 = vmatprep.subr.bf16.mxu1 %v4647_v51  ;;  %v1560_v50 = vpack.c.bf16 %v1497_v43, %v1497_v43  ;;  %v4733_v51 = vld [vmem:[%s5569_s10 + $0x424] ss:$8 sps:$4 sm:$0xff]  }
 0x188   : > { %3742 = vmatprep.subr.bf16.mxu0 %v4650_v54  ;;  %v4736_v54 = vld [vmem:[%s5569_s10 + $0x924] ss:$8 sps:$4 sm:$0xff]  }
 0x18a   : > { %3538 = vmatpush1.bf16.msra.mxu1 %v4645_v55  ;;  %v4866_v55 = vmov 0  }
 0x18b   : > { %3743 = vmatpush1.bf16.msra.mxu0 %v4648_v56  ;;  %3539 = vmatprep.subr.bf16.mxu1 %v4653_v57  ;;  %v4731_v56 = vld [vmem:[%s5569_s10 + $0x420] ss:$8 sps:$4 sm:$0xff]  }
 0x18c   : > { %3744 = vmatprep.subr.bf16.mxu0 %v4656_v59  ;;  %v4734_v57 = vld [vmem:[%s5569_s10 + $0x920] ss:$8 sps:$4 sm:$0xff]   ;;  %v4739_v59 = vld [vmem:[%s5569_s10 + $0x434] ss:$8 sps:$4 sm:$0xff]  }
 0x18e   : > { %3540 = vmatpush1.bf16.msra.mxu1 %v4651_v60  ;;  %v4742_v60 = vld [vmem:[%s5569_s10 + $0x934] ss:$8 sps:$4 sm:$0xff]  }
 0x18f   : > { %3745 = vmatpush1.bf16.msra.mxu0 %v4654_v0  ;;  %3541 = vmatprep.subr.bf16.mxu1 %v4659_v1  ;;  %v4737_v0 = vld [vmem:[%s5569_s10 + $0x430] ss:$8 sps:$4 sm:$0xff]  }
 0x190   : > { %3746 = vmatprep.subr.bf16.mxu0 %v4662_v2  ;;  %v4740_v1 = vld [vmem:[%s5569_s10 + $0x930] ss:$8 sps:$4 sm:$0xff]   ;;  %v4745_v2 = vld [vmem:[%s5569_s10 + $0x444] ss:$8 sps:$4 sm:$0xff]  }
 0x192   : > { %3542 = vmatpush1.bf16.msra.mxu1 %v4657_v3  ;;  %v4748_v3 = vld [vmem:[%s5569_s10 + $0x944] ss:$8 sps:$4 sm:$0xff]  }
 0x193   : > { %3747 = vmatpush1.bf16.msra.mxu0 %v4660_v5  ;;  %3543 = vmatprep.subr.bf16.mxu1 %v4665_v6  ;;  %v4743_v5 = vld [vmem:[%s5569_s10 + $0x440] ss:$8 sps:$4 sm:$0xff]  }
 0x194   : > { %3748 = vmatprep.subr.bf16.mxu0 %v4668_v7  ;;  %v4746_v6 = vld [vmem:[%s5569_s10 + $0x940] ss:$8 sps:$4 sm:$0xff]   ;;  %v4751_v7 = vld [vmem:[%s5569_s10 + $0x454] ss:$8 sps:$4 sm:$0xff]  }
 0x196   : > { %3544 = vmatpush1.bf16.msra.mxu1 %v4663_v8  ;;  %v4754_v8 = vld [vmem:[%s5569_s10 + $0x954] ss:$8 sps:$4 sm:$0xff]  }
 0x197   : > { %3749 = vmatpush1.bf16.msra.mxu0 %v4666_v9  ;;  %3545 = vmatprep.subr.bf16.mxu1 %v4671_v10  ;;  %v4749_v9 = vld [vmem:[%s5569_s10 + $0x450] ss:$8 sps:$4 sm:$0xff]  }
 0x198   : > { %3750 = vmatprep.subr.bf16.mxu0 %v4674_v11  ;;  %v4752_v10 = vld [vmem:[%s5569_s10 + $0x950] ss:$8 sps:$4 sm:$0xff]   ;;  %v4757_v11 = vld [vmem:[%s5569_s10 + $0x464] ss:$8 sps:$4 sm:$0xff]  }
 0x19a   : > { %3546 = vmatpush1.bf16.msra.mxu1 %v4669_v12  ;;  %v4760_v12 = vld [vmem:[%s5569_s10 + $0x964] ss:$8 sps:$4 sm:$0xff]  }
 0x19b   : > { %3751 = vmatpush1.bf16.msra.mxu0 %v4672_v13  ;;  %3547 = vmatprep.subr.bf16.mxu1 %v4677_v14  ;;  %v1516_v13 = vcombine.high %v5820_v23, %v5820_v23  ;;  %v4755_v14 = vld [vmem:[%s5569_s10 + $0x460] ss:$8 sps:$4 sm:$0xff]   ;;  %v4769_v23 = vld [vmem:[%s5569_s10 + $0x484] ss:$8 sps:$4 sm:$0xff]  }
 0x19c   : > { %3752 = vmatprep.subr.bf16.mxu0 %v4680_v15  ;;  %v4758_v15 = vld [vmem:[%s5569_s10 + $0x960] ss:$8 sps:$4 sm:$0xff]  }
 0x19e   : > { %3548 = vmatpush1.bf16.msra.mxu1 %v4675_v16  ;;  %v4763_v16 = vld [vmem:[%s5569_s10 + $0x474] ss:$8 sps:$4 sm:$0xff]  }
 0x19f   : > { %3753 = vmatpush1.bf16.msra.mxu0 %v4678_v18  ;;  %3549 = vmatprep.subr.bf16.mxu1 %v4683_v19  ;;  %v4766_v18 = vld [vmem:[%s5569_s10 + $0x974] ss:$8 sps:$4 sm:$0xff]   ;;  %v1530_v19 = vrot.slane %v1516_v13, %v5574_v58 }
 0x1a0   : > { %3754 = vmatprep.subr.bf16.mxu0 %v4686_v61  ;;  %v4761_v61 = vld [vmem:[%s5569_s10 + $0x470] ss:$8 sps:$4 sm:$0xff]   ;;  %v4772_v58 = vld [vmem:[%s5569_s10 + $0x494] ss:$8 sps:$4 sm:$0xff]  }
 0x1a2   : > { %3550 = vmatpush1.bf16.msra.mxu1 %v4681_v62  ;;  %v4764_v62 = vld [vmem:[%s5569_s10 + $0x970] ss:$8 sps:$4 sm:$0xff]  }
 0x1a3   : > { %3755 = vmatpush1.bf16.msra.mxu0 %v4684_v63  ;;  %3551 = vmatprep.subr.bf16.mxu1 %v4689_v20  ;;  %v1569_v63 = vpack.c.bf16 %v1530_v19, %v1530_v19  ;;  %v4767_v20 = vld [vmem:[%s5569_s10 + $0x480] ss:$8 sps:$4 sm:$0xff]  }
 0x1a4   : > { %3756 = vmatprep.subr.bf16.mxu0 %v4692_v21  ;;  %v4770_v21 = vld [vmem:[%s5569_s10 + $0x490] ss:$8 sps:$4 sm:$0xff]  }
 0x1a6   : > { %3552 = vmatpush1.bf16.msra.mxu1 %v4687_v22  ;;  %v4775_v22 = vld [vmem:[%s5569_s10 + $0x4a4] ss:$8 sps:$4 sm:$0xff]  }
 0x1a7   : > { %3757 = vmatpush1.bf16.msra.mxu0 %v4690_v25  ;;  %3553 = vmatprep.subr.bf16.mxu1 %v4695_v26  ;;  %v4773_v25 = vld [vmem:[%s5569_s10 + $0x4a0] ss:$8 sps:$4 sm:$0xff]   ;;  %v4778_v26 = vld [vmem:[%s5569_s10 + $0x4b4] ss:$8 sps:$4 sm:$0xff]  }
 0x1a8   : > { %3758 = vmatprep.subr.bf16.mxu0 %v4698_v53  ;;  %v4776_v53 = vld [vmem:[%s5569_s10 + $0x4b0] ss:$8 sps:$4 sm:$0xff]  }
 0x1aa   : > { %3554 = vmatpush1.bf16.msra.mxu1 %v4693_v27  ;;  %v4781_v27 = vld [vmem:[%s5569_s10 + $0x4c4] ss:$8 sps:$4 sm:$0xff]  }
 0x1ab   : > { %3759 = vmatpush1.bf16.msra.mxu0 %v4696_v29  ;;  %3555 = vmatprep.subr.bf16.mxu1 %v4701_v30  ;;  %v4779_v29 = vld [vmem:[%s5569_s10 + $0x4c0] ss:$8 sps:$4 sm:$0xff]   ;;  %v4784_v30 = vld [vmem:[%s5569_s10 + $0x4d4] ss:$8 sps:$4 sm:$0xff]  }
 0x1ac   : > { %3760 = vmatprep.subr.bf16.mxu0 %v4704_v31  ;;  %v4782_v31 = vld [vmem:[%s5569_s10 + $0x4d0] ss:$8 sps:$4 sm:$0xff]  }
 0x1ae   : > { %3556 = vmatpush1.bf16.msra.mxu1 %v4699_v32  ;;  %v4787_v32 = vld [vmem:[%s5569_s10 + $0x4e4] ss:$8 sps:$4 sm:$0xff]  }
 0x1af   : > { %3761 = vmatpush1.bf16.msra.mxu0 %v4702_v33  ;;  %3557 = vmatprep.subr.bf16.mxu1 %v4707_v34  ;;  %v4785_v33 = vld [vmem:[%s5569_s10 + $0x4e0] ss:$8 sps:$4 sm:$0xff]   ;;  %v4790_v34 = vld [vmem:[%s5569_s10 + $0x4f4] ss:$8 sps:$4 sm:$0xff]  }
 0x1b0   : > { %3762 = vmatprep.subr.bf16.mxu0 %v4710_v35  ;;  %v4788_v35 = vld [vmem:[%s5569_s10 + $0x4f0] ss:$8 sps:$4 sm:$0xff]  }
 0x1b2   : > { %3558 = vmatpush1.bf16.msra.mxu1 %v4705_v36  ;;  %v1559_v36 = vpack.c.bf16 %v5908_v40, %v5908_v40 }
 0x1b3   : > { %3763 = vmatpush1.bf16.msra.mxu0 %v4708_v37  ;;  %3559 = vmatprep.subr.bf16.mxu1 %v4713_v38 }
 0x1b4   : > { %3764 = vmatprep.subr.bf16.mxu0 %v4716_v39 }
 0x1b6   : > { %3560 = vmatpush1.bf16.msra.mxu1 %v4711_v41 }
 0x1b7   : > { %3765 = vmatpush1.bf16.msra.mxu0 %v4714_v42  ;;  %3570 = vmatprep.subr.bf16.mxu1 %v4720_v17  ;;  %v1878_v42 = vsub.s32 0, %v5562_v52  ;;  %v1874_v17 = vld [vmem:[%s1434_s5] sm:$0x3] }
 0x1b8   : > { %3775 = vmatprep.subr.bf16.mxu0 %v4724_v4  ;;  %v1882_v4 = vsub.s32 1, %v5562_v52 }
 0x1b9   : > { %3562 = vmatmul.mubr.bf16.vlgmr.msra.gmra.mrb[0].mxu1 %v1557_v44  ;;  %v1879_v43 = vrot.slane %v1874_v17, %v1878_v42 }
 0x1ba   : > { %3767 = vmatmul.mubr.bf16.vlgmr.msra.gmra.mrb[0].mxu0 %v1567_v45  ;;  %3571 = vmatpush1.bf16.msra.mxu1 %v4718_v46  ;;  %v1883_v40 = vrot.slane %v1874_v17, %v1882_v4 }
 0x1bb   : > { %3776 = vmatpush1.bf16.msra.mxu0 %v4722_v47  ;;  %3572 = vmatprep.subr.bf16.mxu1 %v4727_v48 }
 0x1bc   : > { %3777 = vmatprep.subr.bf16.mxu0 %v4730_v49  ;;  %3807 = vmatprep.mubr.bf16.mxu0 %v4866_v55 }
 0x1bd   : > { %3602 = vmatprep.mubr.bf16.mxu1 %v1560_v50 }
 0x1be   : > { %3573 = vmatpush1.bf16.msra.mxu1 %v4725_v28 }
 0x1bf   : > { %3778 = vmatpush1.bf16.msra.mxu0 %v4728_v24  ;;  %3574 = vmatprep.subr.bf16.mxu1 %v4733_v51 }
 0x1c0   : > { %3779 = vmatprep.subr.bf16.mxu0 %v4736_v54 }
 0x1c2   : > { %3575 = vmatpush1.bf16.msra.mxu1 %v4731_v56 }
 0x1c3   : > { %3780 = vmatpush1.bf16.msra.mxu0 %v4734_v57  ;;  %3576 = vmatprep.subr.bf16.mxu1 %v4739_v59 }
 0x1c4   : > { %3781 = vmatprep.subr.bf16.mxu0 %v4742_v60 }
 0x1c6   : > { %3577 = vmatpush1.bf16.msra.mxu1 %v4737_v0 }
 0x1c7   : > { %3782 = vmatpush1.bf16.msra.mxu0 %v4740_v1  ;;  %3578 = vmatprep.subr.bf16.mxu1 %v4745_v2 }
 0x1c8   : > { %3783 = vmatprep.subr.bf16.mxu0 %v4748_v3 }
 0x1ca   : > { %3579 = vmatpush1.bf16.msra.mxu1 %v4743_v5 }
 0x1cb   : > { %3784 = vmatpush1.bf16.msra.mxu0 %v4746_v6  ;;  %3580 = vmatprep.subr.bf16.mxu1 %v4751_v7 }
 0x1cc   : > { %3785 = vmatprep.subr.bf16.mxu0 %v4754_v8 }
 0x1ce   : > { %3581 = vmatpush1.bf16.msra.mxu1 %v4749_v9 }
 0x1cf   : > { %3786 = vmatpush1.bf16.msra.mxu0 %v4752_v10  ;;  %3582 = vmatprep.subr.bf16.mxu1 %v4757_v11 }
 0x1d0   : > { %3787 = vmatprep.subr.bf16.mxu0 %v4760_v12 }
 0x1d2   : > { %3583 = vmatpush1.bf16.msra.mxu1 %v4755_v14 }
 0x1d3   : > { %3788 = vmatpush1.bf16.msra.mxu0 %v4758_v15  ;;  %3584 = vmatprep.subr.bf16.mxu1 %v4763_v16 }
 0x1d4   : > { %3789 = vmatprep.subr.bf16.mxu0 %v4766_v18 }
 0x1d6   : > { %3585 = vmatpush1.bf16.msra.mxu1 %v4761_v61 }
 0x1d7   : > { %3790 = vmatpush1.bf16.msra.mxu0 %v4764_v62  ;;  %3586 = vmatprep.subr.bf16.mxu1 %v4769_v23 }
 0x1da   : > { %3808 = vmatmul.mubr.bf16.vlgmr.msra.gmra.mrb[0].mxu0 %v1569_v63  ;;  %3587 = vmatpush1.bf16.msra.mxu1 %v4767_v20 }
 0x1db   : > { %3588 = vmatprep.subr.bf16.mxu1 %v4772_v58 }
 0x1de   : > { %3589 = vmatpush1.bf16.msra.mxu1 %v4770_v21 }
 0x1df   : > { %3590 = vmatprep.subr.bf16.mxu1 %v4775_v22 }
 0x1e2   : > { %3591 = vmatpush1.bf16.msra.mxu1 %v4773_v25 }
 0x1e3   : > { %3592 = vmatprep.subr.bf16.mxu1 %v4778_v26 }
 0x1e6   : > { %3593 = vmatpush1.bf16.msra.mxu1 %v4776_v53 }
 0x1e7   : > { %3594 = vmatprep.subr.bf16.mxu1 %v4781_v27 }
 0x1ea   : > { %3595 = vmatpush1.bf16.msra.mxu1 %v4779_v29 }
 0x1eb   : > { %3596 = vmatprep.subr.bf16.mxu1 %v4784_v30 }
 0x1ee   : > { %3597 = vmatpush1.bf16.msra.mxu1 %v4782_v31 }
 0x1ef   : > { %3598 = vmatprep.subr.bf16.mxu1 %v4787_v32 }
 0x1f2   : > { %3599 = vmatpush1.bf16.msra.mxu1 %v4785_v33 }
 0x1f3   : > { %3600 = vmatprep.subr.bf16.mxu1 %v4790_v34 }
 0x1f6   : > { %3601 = vmatpush1.bf16.msra.mxu1 %v4788_v35 }
 0x1f9   : > { %3603 = vmatmul.mubr.bf16.vlgmr.msra.gmra.mrb[0].mxu1 %v1559_v36 }
 0x2ad   : > { %v3809_v37 = vpop.f32.mrb[0].mxu0 }
 0x2ae   : > { %v3811_v38 = vpop.f32.mrb[1].mxu0 }
 0x2af   : > { %v3813_v39 = vpop.f32.mrb[2].mxu0 }
 0x2b0   : > { %v3814_v41 = vpop.f32.mrb[3].mxu0 }
 0x2cc   : > { %v3604_v44 = vpop.f32.mrb[0].mxu1 }
 0x2cd   : > { %v4251_v45 = vadd.f32 %v3604_v44, %v1879_v43  ;;  %v3606_v46 = vpop.f32.mrb[1].mxu1 }
 0x2ce   : > { %v4253_v47 = vadd.f32 %v3606_v46, %v1883_v40  ;;  %v3608_v48 = vpop.f32.mrb[2].mxu1 }
 0x2cf   : > { %v4252_v49 = vadd.f32 %v4251_v45, %v3809_v37  ;;  %v3609_v50 = vpop.f32.mrb[3].mxu1 }
 0x2d0   : > { %v4254_v28 = vadd.f32 %v4253_v47, %v3811_v38 }
 0x2d1   : > { %v4241_v24 = vmul.f32 -1.442695, %v4252_v49 }
 0x2d2   : > { %v4242_v51 = vmul.f32 -1.442695, %v4254_v28 }
 0x2d3   : > { %4791 = vpow2.f32 %v4241_v24 }
 0x2d4   : > { %4793 = vpow2.f32 %v4242_v51 }
 0x2dd   : > { %v4792_v54 = vpop.eup %4791 }
 0x2de   : > { %v4794_v55 = vpop.eup %4793  ;;  %v3822_v52 = vadd.f32 1.0, %v4792_v54 }
 0x2df   : > { %v3823_v56 = vadd.f32 1.0, %v4794_v55 }
 0x2e0   : > { %4795 = vrcp.f32 %v3822_v52 }
 0x2e1   : > { %4797 = vrcp.f32 %v3823_v56 }
 0x2ea   : > { %v4796_v57 = vpop.eup %4795 }
 0x2eb   : > { %v4798_v59 = vpop.eup %4797 }
 0x2ec   : > { %v3830_v60 = vcombine.low %v4796_v57, %v4798_v59 }
 0x2ee   : > { %4243 = vst.sshfl [vmem:[%s1429_s8] sm:$0x33 pattern:$0x76325410] %v3830_v60 }
 0x2ef   : > { %4814 = shalt.err (!%p4811_p7)
}
 0x2f0   : > { %s4815_s4 = scalar_lea.hbm %s5982_s17, 64  ;;  %s4819_s28 = scalar_lea.hbm %s6028_s3, 1216 }
 0x2f1   : > { %p4816_p9 = scmp.ne.s32.totalorder %s5982_s17, %s4815_s4  ;;  %p4820_p12 = scmp.lt.u32.totalorder %s5982_s17, %s6028_s3 }
 0x2f2   : > { %p4821_p13 = scmp.lt.u32.totalorder %s4819_s28, %s4815_s4  ;;  %p4823_p1 = scmp.lt.u32.totalorder %s4815_s4, %s5982_s17 }
 0x2f3   : > { %p4817_p10 = pnand %p4816_p9, %p4927_p6 }
 0x2f4   : > { %p4822_p0 = por %p4821_p13, %p4820_p12 }
 0x2f5   : > { %p4818_p11 = pneg %p4817_p10 }
 0x2f6   : > { %p4824_p2 = por %p4823_p1, %p4822_p0 }
 0x2f8   : > { %p4825_p3 = pnand %p4824_p2, %p4818_p11 }
 0x2fa   : > { %4828 = shalt.err (!%p4825_p3)
}
 0x2fb   : > { %4289 = dma.vmem_to_hbm [thread:$0]  (%p4927_p6), %s5984_s9, 64, %s5982_s17, %s3841_s19  }
 0x2fc PF: > { %p4295_p4 = scmp.ge.s32.totalorder %s4863_s15, 2  ;;  %s3867_s5 = sand.u32 1, %s4851_s12  }
 0x2fd   : > { %s3868_s6 = scalar_lea.sflag [#allocation4], %s3867_s5 }
 0x2fe   : > { %p4292_p5 = pnand %p4295_p4, %p4931_p8 }
 0x300   : > { %4846 = dma.done.wait (!%p4292_p5), %s3868_s6, 64  }
 0x301   : > { %4848 = vsyncadd (!%p4292_p5), %s3868_s6, 4294967232  ;;  %p13_p7 = scmp.ge.s32.totalorder %s4913_s18, 21   ;;  %s6031_s12 = smov %s4855_s13 }
 0x302   : > { %s6032_s13 = smov %s4859_s14  ;;  %s6033_s14 = smov %s4925_s21 }
 0x303   : > { %s6034_s15 = smov %s4913_s18  ;;  %15 = sbr.rel (!%p13_p7) target bundleno = 3 (0x3), region = 113 }
 0x30a   :  { %3873 = vsyncpa [#allocation4], 1 }
 0x30b   :  { %3875 = vsyncpa [#allocation4 + $0x1], 1 }

// kernel: network_forward.6
= control target key start
LH: loop header
LB: loop body
LE: loop exit
PB: predicated region body
PF: predicated region fallthrough
CT: control target
= control target key end

     0   :  { %10 = vsyncpa [#allocation3], 0  ;;  %s15085_s18 = smov [#allocation2]   ;;  %s16158_s0 = inlined_call_operand.vmem [shape: f32[2,512], index: 0, kind: input, shape index: {}]   ;;  %s16159_s1 = inlined_call_operand.vmem [shape: bf16[512,1024], index: 1, kind: input, shape index: {}]   ;;  %s16160_s2 = inlined_call_operand.vmem [shape: f32[1,1024], index: 2, kind: input, shape index: {}]   ;;  %s16161_s3 = inlined_call_operand.hbm [shape: bf16[1024,2432], index: 3, kind: input, shape index: {}]   ;;  %s16162_s4 = inlined_call_operand.vmem [shape: f32[1,2432], index: 4, kind: input, shape index: {}]   ;;  %s16163_s5 = inlined_call_operand.vmem [shape: f32[2,2432], index: 5, kind: output, shape index: {}]  }
   0x1   :  { %s22_s19 = sshll.u32 %s15085_s18, 4  ;;  %s15061_s22 = scalar_lea.hbm %s16161_s3, 155648  ;;  %s23_s19 = int_to_ptr.vmem [resolvable:$true] %s22_s19 }
   0x2   :  { %p15062_p0 = scmp.ne.s32.totalorder %s16161_s3, %s15061_s22  ;;  %p15065_p1 = scmp.lt.u32.totalorder %s15061_s22, %s16161_s3 }
   0x4   :  { %p15067_p2 = pnand %p15065_p1, %p15062_p0 }
   0x6   :  { %15070 = shalt.err (!%p15067_p2)
}
   0x7   :  { %s15071_s27 = scalar_lea.vmem %s23_s19, 155648  ;;  %p15076_p4 = scmp.lt.s32.totalorder %s23_s19, %s23_s19 }
   0x8   :  { %p15072_p3 = scmp.ne.s32.totalorder %s23_s19, %s15071_s27  ;;  %p15077_p5 = scmp.lt.s32.totalorder %s15071_s27, %s15071_s27 }
   0xa   :  { %p15078_p6 = por %p15077_p5, %p15076_p4 }
   0xc   :  { %p15079_p7 = pnand %p15078_p6, %p15072_p3 }
   0xe   :  { %15082 = shalt.err (!%p15079_p7)
}
   0xf   :  { %s15086_s28 = smov 1216   ;;  %s15087_s29 = smov 76  }
  0x10   :  { %28 = dma.hbm_to_vmem [thread:$0]  %s16161_s3, 155648, %s23_s19, [#allocation3], %s15086_s28, %s15086_s28, %s15087_s29  }
  0x11   :  { %15083 = dma.done.wait [#allocation3], 155648  }
  0x12   :  { %15084 = vsyncadd [#allocation3], 4294811648  ;;  %v62_v0 = vld [vmem:[%s16159_s1] sm:$0xff]  ;;  %v15088_v32 = vmov 1983009808   ;;  %v41_v34 = vlaneseq }
  0x13   :  { %v66_v1 = vld [vmem:[%s16159_s1 + $0x20] sm:$0xff]  ;;  %v39_v33 = vunpack.c.l.s4 %v15088_v32 }
  0x14   :  { %v190_v2 = vld [vmem:[%s16159_s1 + $0x400] sm:$0xff]  ;;  %v11418_v3 = vcombine.high %v62_v0, %v66_v1  ;;  %v11417_v5 = vcombine.low %v62_v0, %v66_v1  ;;  %v15197_v44 = vshrl.u32 %v41_v34, 7 }
  0x15   :  { %v194_v4 = vld [vmem:[%s16159_s1 + $0x420] sm:$0xff]  ;;  %v40_v43 = vunpack.c.0.s8 %v39_v33 }
  0x16   :  { %v70_v6 = vld [vmem:[%s16159_s1 + $0x40] sm:$0xff]  ;;  %v11546_v8 = vcombine.high %v190_v2, %v194_v4  ;;  %v11545_v9 = vcombine.low %v190_v2, %v194_v4  ;;  %1640 = vmatprep.subr.bf16.mxu1 %v11418_v3 }
  0x17   :  { %v74_v7 = vld [vmem:[%s16159_s1 + $0x60] sm:$0xff]  ;;  %1641 = vmatpush1.bf16.msra.mxu1 %v11417_v5  ;;  %v15212_v53 = vsub.s32 %v40_v43, %v15197_v44 }
  0x18   :  { %v11426_v10 = vcombine.high %v70_v6, %v74_v7  ;;  %v198_v11 = vld [vmem:[%s16159_s1 + $0x440] sm:$0xff]  ;;  %1681 = vmatprep.subr.bf16.mxu0 %v11546_v8  ;;  %v11425_v18 = vcombine.low %v70_v6, %v74_v7 }
  0x19   :  { %v202_v12 = vld [vmem:[%s16159_s1 + $0x460] sm:$0xff]  ;;  %1682 = vmatpush1.bf16.msra.mxu0 %v11545_v9 }
  0x1a   :  { %v78_v13 = vld [vmem:[%s16159_s1 + $0x80] sm:$0xff]  ;;  %v11554_v14 = vcombine.high %v198_v11, %v202_v12  ;;  %1642 = vmatprep.subr.bf16.mxu1 %v11426_v10  ;;  %v11553_v19 = vcombine.low %v198_v11, %v202_v12 }
  0x1b   :  { %v82_v15 = vld [vmem:[%s16159_s1 + $0xa0] sm:$0xff]  ;;  %1643 = vmatpush1.bf16.msra.mxu1 %v11425_v18 }
  0x1c   :  { %v206_v16 = vld [vmem:[%s16159_s1 + $0x480] sm:$0xff]  ;;  %v11434_v20 = vcombine.high %v78_v13, %v82_v15  ;;  %1683 = vmatprep.subr.bf16.mxu0 %v11554_v14  ;;  %v11433_v26 = vcombine.low %v78_v13, %v82_v15 }
  0x1d   :  { %v210_v17 = vld [vmem:[%s16159_s1 + $0x4a0] sm:$0xff]  ;;  %1684 = vmatpush1.bf16.msra.mxu0 %v11553_v19 }
  0x1e   :  { %v11562_v21 = vcombine.high %v206_v16, %v210_v17  ;;  %v86_v22 = vld [vmem:[%s16159_s1 + $0xc0] sm:$0xff]  ;;  %1644 = vmatprep.subr.bf16.mxu1 %v11434_v20  ;;  %v11561_v27 = vcombine.low %v206_v16, %v210_v17 }
  0x1f   :  { %v90_v23 = vld [vmem:[%s16159_s1 + $0xe0] sm:$0xff]  ;;  %1645 = vmatpush1.bf16.msra.mxu1 %v11433_v26 }
  0x20   :  { %v214_v24 = vld [vmem:[%s16159_s1 + $0x4c0] sm:$0xff]  ;;  %v11442_v28 = vcombine.high %v86_v22, %v90_v23  ;;  %1685 = vmatprep.subr.bf16.mxu0 %v11562_v21  ;;  %v11441_v37 = vcombine.low %v86_v22, %v90_v23 }
  0x21   :  { %v218_v25 = vld [vmem:[%s16159_s1 + $0x4e0] sm:$0xff]  ;;  %1686 = vmatpush1.bf16.msra.mxu0 %v11561_v27 }
  0x22   :  { %v11570_v29 = vcombine.high %v214_v24, %v218_v25  ;;  %v94_v30 = vld [vmem:[%s16159_s1 + $0x100] sm:$0xff]  ;;  %1646 = vmatprep.subr.bf16.mxu1 %v11442_v28  ;;  %v11569_v38 = vcombine.low %v214_v24, %v218_v25 }
  0x23   :  { %v98_v31 = vld [vmem:[%s16159_s1 + $0x120] sm:$0xff]  ;;  %1647 = vmatpush1.bf16.msra.mxu1 %v11441_v37 }
  0x24   :  { %v222_v35 = vld [vmem:[%s16159_s1 + $0x500] sm:$0xff]  ;;  %v11450_v39 = vcombine.high %v94_v30, %v98_v31  ;;  %1687 = vmatprep.subr.bf16.mxu0 %v11570_v29  ;;  %v11449_v47 = vcombine.low %v94_v30, %v98_v31 }
  0x25   :  { %v226_v36 = vld [vmem:[%s16159_s1 + $0x520] sm:$0xff]  ;;  %1688 = vmatpush1.bf16.msra.mxu0 %v11569_v38 }
  0x26   :  { %v11578_v40 = vcombine.high %v222_v35, %v226_v36  ;;  %v102_v41 = vld [vmem:[%s16159_s1 + $0x140] sm:$0xff]  ;;  %1648 = vmatprep.subr.bf16.mxu1 %v11450_v39  ;;  %v11577_v48 = vcombine.low %v222_v35, %v226_v36 }
  0x27   :  { %v106_v42 = vld [vmem:[%s16159_s1 + $0x160] sm:$0xff]  ;;  %1649 = vmatpush1.bf16.msra.mxu1 %v11449_v47 }
  0x28   :  { %v230_v45 = vld [vmem:[%s16159_s1 + $0x540] sm:$0xff]  ;;  %v11458_v49 = vcombine.high %v102_v41, %v106_v42  ;;  %1689 = vmatprep.subr.bf16.mxu0 %v11578_v40  ;;  %v11457_v56 = vcombine.low %v102_v41, %v106_v42 }
  0x29   :  { %v234_v46 = vld [vmem:[%s16159_s1 + $0x560] sm:$0xff]  ;;  %1690 = vmatpush1.bf16.msra.mxu0 %v11577_v48 }
  0x2a   :  { %v11586_v50 = vcombine.high %v230_v45, %v234_v46  ;;  %v110_v51 = vld [vmem:[%s16159_s1 + $0x180] sm:$0xff]  ;;  %1650 = vmatprep.subr.bf16.mxu1 %v11458_v49  ;;  %v11585_v57 = vcombine.low %v230_v45, %v234_v46 }
  0x2b   :  { %v114_v52 = vld [vmem:[%s16159_s1 + $0x1a0] sm:$0xff]  ;;  %1651 = vmatpush1.bf16.msra.mxu1 %v11457_v56 }
  0x2c   :  { %v238_v54 = vld [vmem:[%s16159_s1 + $0x580] sm:$0xff]  ;;  %v11466_v58 = vcombine.high %v110_v51, %v114_v52  ;;  %1691 = vmatprep.subr.bf16.mxu0 %v11586_v50  ;;  %v11465_v3 = vcombine.low %v110_v51, %v114_v52 }
  0x2d   :  { %v242_v55 = vld [vmem:[%s16159_s1 + $0x5a0] sm:$0xff]  ;;  %1692 = vmatpush1.bf16.msra.mxu0 %v11585_v57 }
  0x2e   :  { %v35_v59 = vld [vmem:[%s16158_s0] sm:$0xff]  ;;  %v11594_v60 = vcombine.high %v238_v54, %v242_v55  ;;  %1652 = vmatprep.subr.bf16.mxu1 %v11466_v58  ;;  %v11593_v6 = vcombine.low %v238_v54, %v242_v55 }
  0x2f   :  { %v118_v61 = vld [vmem:[%s16159_s1 + $0x1c0] sm:$0xff]  ;;  %v15230_v63 = vrot.slane %v35_v59, %v15212_v53  ;;  %v37_v0 = vcombine.high %v35_v59, %v35_v59  ;;  %1653 = vmatpush1.bf16.msra.mxu1 %v11465_v3 }
  0x30   :  { %v122_v62 = vld [vmem:[%s16159_s1 + $0x1e0] sm:$0xff]  ;;  %1693 = vmatprep.subr.bf16.mxu0 %v11594_v60 }
  0x31   :  { %v246_v1 = vld [vmem:[%s16159_s1 + $0x5c0] sm:$0xff]  ;;  %v52_v4 = vcombine.high %v15230_v63, %v15230_v63  ;;  %v15241_v5 = vrot.slane %v37_v0, %v15212_v53  ;;  %v11474_v7 = vcombine.high %v118_v61, %v122_v62  ;;  %v11473_v15 = vcombine.low %v118_v61, %v122_v62  ;;  %1694 = vmatpush1.bf16.msra.mxu0 %v11593_v6 }
  0x32   :  { %v250_v2 = vld [vmem:[%s16159_s1 + $0x5e0] sm:$0xff] }
  0x33   :  { %v11602_v8 = vcombine.high %v246_v1, %v250_v2  ;;  %v126_v9 = vld [vmem:[%s16159_s1 + $0x200] sm:$0xff]  ;;  %v15249_v11 = vpack.c.bf16 %v52_v4, %v52_v4  ;;  %v53_v12 = vcombine.high %v15241_v5, %v15241_v5  ;;  %1654 = vmatprep.subr.bf16.mxu1 %v11474_v7  ;;  %v11601_v17 = vcombine.low %v246_v1, %v250_v2 }
  0x34   :  { %v130_v10 = vld [vmem:[%s16159_s1 + $0x220] sm:$0xff]  ;;  %1655 = vmatpush1.bf16.msra.mxu1 %v11473_v15 }
  0x35   :  { %v254_v13 = vld [vmem:[%s16159_s1 + $0x600] sm:$0xff]  ;;  %1672 = vmatprep.mubr.bf16.mxu1 %v15249_v11  ;;  %v15260_v16 = vpack.c.bf16 %v53_v12, %v53_v12  ;;  %v11482_v18 = vcombine.high %v126_v9, %v130_v10  ;;  %1695 = vmatprep.subr.bf16.mxu0 %v11602_v8  ;;  %v11481_v24 = vcombine.low %v126_v9, %v130_v10 }
  0x36   :  { %v258_v14 = vld [vmem:[%s16159_s1 + $0x620] sm:$0xff]  ;;  %1696 = vmatpush1.bf16.msra.mxu0 %v11601_v17 }
  0x37   :  { %v11610_v19 = vcombine.high %v254_v13, %v258_v14  ;;  %v134_v20 = vld [vmem:[%s16159_s1 + $0x240] sm:$0xff]  ;;  %1713 = vmatprep.mubr.bf16.mxu0 %v15260_v16  ;;  %1656 = vmatprep.subr.bf16.mxu1 %v11482_v18  ;;  %v11609_v25 = vcombine.low %v254_v13, %v258_v14  ;;  %v63_v18 = vld [vmem:[%s16159_s1 + $0x8] sm:$0xff] }
  0x38   :  { %v138_v21 = vld [vmem:[%s16159_s1 + $0x260] sm:$0xff]  ;;  %1657 = vmatpush1.bf16.msra.mxu1 %v11481_v24 }
  0x39   :  { %v262_v22 = vld [vmem:[%s16159_s1 + $0x640] sm:$0xff]  ;;  %v11490_v26 = vcombine.high %v134_v20, %v138_v21  ;;  %1697 = vmatprep.subr.bf16.mxu0 %v11610_v19  ;;  %v11489_v32 = vcombine.low %v134_v20, %v138_v21  ;;  %v67_v19 = vld [vmem:[%s16159_s1 + $0x28] sm:$0xff]  ;;  %v64_v20 = vld [vmem:[%s16159_s1 + $0x10] sm:$0xff] }
  0x3a   :  { %v266_v23 = vld [vmem:[%s16159_s1 + $0x660] sm:$0xff]  ;;  %1698 = vmatpush1.bf16.msra.mxu0 %v11609_v25  ;;  %v68_v21 = vld [vmem:[%s16159_s1 + $0x30] sm:$0xff]  ;;  %v11420_v24 = vcombine.high %v63_v18, %v67_v19 }
  0x3b   :  { %v11618_v27 = vcombine.high %v262_v22, %v266_v23  ;;  %v142_v28 = vld [vmem:[%s16159_s1 + $0x280] sm:$0xff]  ;;  %1658 = vmatprep.subr.bf16.mxu1 %v11490_v26  ;;  %v11617_v33 = vcombine.low %v262_v22, %v266_v23  ;;  %v11422_v25 = vcombine.high %v64_v20, %v68_v21  ;;  %v71_v26 = vld [vmem:[%s16159_s1 + $0x48] sm:$0xff] }
  0x3c   :  { %v146_v29 = vld [vmem:[%s16159_s1 + $0x2a0] sm:$0xff]  ;;  %1659 = vmatpush1.bf16.msra.mxu1 %v11489_v32  ;;  %v15377_v32 = vpack.c.bf16 %v15241_v5, %v15241_v5  ;;  %v84_v5 = vld [vmem:[%s16159_s1 + $0xb0] sm:$0xff] }
  0x3d   :  { %v270_v30 = vld [vmem:[%s16159_s1 + $0x680] sm:$0xff]  ;;  %v11498_v34 = vcombine.high %v142_v28, %v146_v29  ;;  %1699 = vmatprep.subr.bf16.mxu0 %v11618_v27  ;;  %v11497_v40 = vcombine.low %v142_v28, %v146_v29  ;;  %v75_v27 = vld [vmem:[%s16159_s1 + $0x68] sm:$0xff]  ;;  %v15367_v28 = vpack.c.bf16 %v15230_v63, %v15230_v63  ;;  %v72_v29 = vld [vmem:[%s16159_s1 + $0x50] sm:$0xff] }
  0x3e   :  { %v274_v31 = vld [vmem:[%s16159_s1 + $0x6a0] sm:$0xff]  ;;  %1700 = vmatpush1.bf16.msra.mxu0 %v11617_v33  ;;  %v79_v33 = vld [vmem:[%s16159_s1 + $0x88] sm:$0xff] }
  0x3f   :  { %v11626_v35 = vcombine.high %v270_v30, %v274_v31  ;;  %v150_v36 = vld [vmem:[%s16159_s1 + $0x2c0] sm:$0xff]  ;;  %1660 = vmatprep.subr.bf16.mxu1 %v11498_v34  ;;  %v11625_v41 = vcombine.low %v270_v30, %v274_v31  ;;  %v76_v30 = vld [vmem:[%s16159_s1 + $0x70] sm:$0xff]  ;;  %v11419_v31 = vcombine.low %v63_v18, %v67_v19  ;;  %v83_v63 = vld [vmem:[%s16159_s1 + $0xa8] sm:$0xff]  ;;  %v11421_v34 = vcombine.low %v64_v20, %v68_v21 }
  0x40   :  { %v154_v37 = vld [vmem:[%s16159_s1 + $0x2e0] sm:$0xff]  ;;  %1661 = vmatpush1.bf16.msra.mxu1 %v11497_v40  ;;  %v91_v40 = vld [vmem:[%s16159_s1 + $0xe8] sm:$0xff]  ;;  %v124_v18 = vld [vmem:[%s16159_s1 + $0x1f0] sm:$0xff] }
  0x41   :  { %v278_v38 = vld [vmem:[%s16159_s1 + $0x6c0] sm:$0xff]  ;;  %v11506_v42 = vcombine.high %v150_v36, %v154_v37  ;;  %1701 = vmatprep.subr.bf16.mxu0 %v11626_v35  ;;  %v11505_v49 = vcombine.low %v150_v36, %v154_v37  ;;  %v11428_v35 = vcombine.high %v71_v26, %v75_v27  ;;  %v80_v36 = vld [vmem:[%s16159_s1 + $0x90] sm:$0xff]  ;;  %v11430_v37 = vcombine.high %v72_v29, %v76_v30  ;;  %v127_v21 = vld [vmem:[%s16159_s1 + $0x208] sm:$0xff] }
  0x42   :  { %v282_v39 = vld [vmem:[%s16159_s1 + $0x6e0] sm:$0xff]  ;;  %1702 = vmatpush1.bf16.msra.mxu0 %v11625_v41  ;;  %v11429_v41 = vcombine.low %v72_v29, %v76_v30  ;;  %v135_v30 = vld [vmem:[%s16159_s1 + $0x248] sm:$0xff] }
  0x43   :  { %v11634_v43 = vcombine.high %v278_v38, %v282_v39  ;;  %v158_v45 = vld [vmem:[%s16159_s1 + $0x300] sm:$0xff]  ;;  %1662 = vmatprep.subr.bf16.mxu1 %v11506_v42  ;;  %v11633_v50 = vcombine.low %v278_v38, %v282_v39  ;;  %v11427_v38 = vcombine.low %v71_v26, %v75_v27  ;;  %v87_v39 = vld [vmem:[%s16159_s1 + $0xc8] sm:$0xff]  ;;  %v11436_v42 = vcombine.high %v79_v33, %v83_v63  ;;  %v132_v26 = vld [vmem:[%s16159_s1 + $0x230] sm:$0xff] }
  0x44   :  { %v162_v46 = vld [vmem:[%s16159_s1 + $0x320] sm:$0xff]  ;;  %1663 = vmatpush1.bf16.msra.mxu1 %v11505_v49  ;;  %v99_v49 = vld [vmem:[%s16159_s1 + $0x128] sm:$0xff] }
  0x45   :  { %v286_v47 = vld [vmem:[%s16159_s1 + $0x700] sm:$0xff]  ;;  %v11514_v51 = vcombine.high %v158_v45, %v162_v46  ;;  %1703 = vmatprep.subr.bf16.mxu0 %v11634_v43  ;;  %v11513_v58 = vcombine.low %v158_v45, %v162_v46  ;;  %v88_v43 = vld [vmem:[%s16159_s1 + $0xd0] sm:$0xff]  ;;  %v11438_v46 = vcombine.high %v80_v36, %v84_v5 }
  0x46   :  { %v290_v48 = vld [vmem:[%s16159_s1 + $0x720] sm:$0xff]  ;;  %1704 = vmatpush1.bf16.msra.mxu0 %v11633_v50  ;;  %v92_v45 = vld [vmem:[%s16159_s1 + $0xf0] sm:$0xff]  ;;  %v11437_v50 = vcombine.low %v80_v36, %v84_v5 }
  0x47   :  { %v11642_v52 = vcombine.high %v286_v47, %v290_v48  ;;  %v166_v54 = vld [vmem:[%s16159_s1 + $0x340] sm:$0xff]  ;;  %1664 = vmatprep.subr.bf16.mxu1 %v11514_v51  ;;  %v11641_v59 = vcombine.low %v286_v47, %v290_v48  ;;  %v11435_v47 = vcombine.low %v79_v33, %v83_v63  ;;  %v95_v48 = vld [vmem:[%s16159_s1 + $0x108] sm:$0xff]  ;;  %v11444_v51 = vcombine.high %v87_v39, %v91_v40 }
  0x48   :  { %v170_v55 = vld [vmem:[%s16159_s1 + $0x360] sm:$0xff]  ;;  %1665 = vmatpush1.bf16.msra.mxu1 %v11513_v58  ;;  %v107_v58 = vld [vmem:[%s16159_s1 + $0x168] sm:$0xff] }
  0x49   :  { %v294_v56 = vld [vmem:[%s16159_s1 + $0x740] sm:$0xff]  ;;  %v11522_v60 = vcombine.high %v166_v54, %v170_v55  ;;  %1705 = vmatprep.subr.bf16.mxu0 %v11642_v52  ;;  %v11521_v3 = vcombine.low %v166_v54, %v170_v55  ;;  %v96_v52 = vld [vmem:[%s16159_s1 + $0x110] sm:$0xff]  ;;  %v11446_v55 = vcombine.high %v88_v43, %v92_v45 }
  0x4a   :  { %v298_v57 = vld [vmem:[%s16159_s1 + $0x760] sm:$0xff]  ;;  %1706 = vmatpush1.bf16.msra.mxu0 %v11641_v59  ;;  %v100_v54 = vld [vmem:[%s16159_s1 + $0x130] sm:$0xff]  ;;  %v11445_v59 = vcombine.low %v88_v43, %v92_v45 }
  0x4b   :  { %v11650_v61 = vcombine.high %v294_v56, %v298_v57  ;;  %v174_v62 = vld [vmem:[%s16159_s1 + $0x380] sm:$0xff]  ;;  %1666 = vmatprep.subr.bf16.mxu1 %v11522_v60  ;;  %v11649_v4 = vcombine.low %v294_v56, %v298_v57  ;;  %v11443_v56 = vcombine.low %v87_v39, %v91_v40  ;;  %v103_v57 = vld [vmem:[%s16159_s1 + $0x148] sm:$0xff]  ;;  %v11452_v60 = vcombine.high %v95_v48, %v99_v49 }
  0x4c   :  { %v178_v0 = vld [vmem:[%s16159_s1 + $0x3a0] sm:$0xff]  ;;  %1667 = vmatpush1.bf16.msra.mxu1 %v11521_v3  ;;  %v115_v3 = vld [vmem:[%s16159_s1 + $0x1a8] sm:$0xff] }
  0x4d   :  { %v302_v1 = vld [vmem:[%s16159_s1 + $0x780] sm:$0xff]  ;;  %v11530_v6 = vcombine.high %v174_v62, %v178_v0  ;;  %1707 = vmatprep.subr.bf16.mxu0 %v11650_v61  ;;  %v11529_v13 = vcombine.low %v174_v62, %v178_v0  ;;  %v104_v61 = vld [vmem:[%s16159_s1 + $0x150] sm:$0xff]  ;;  %v11454_v0 = vcombine.high %v96_v52, %v100_v54 }
  0x4e   :  { %v306_v2 = vld [vmem:[%s16159_s1 + $0x7a0] sm:$0xff]  ;;  %1708 = vmatpush1.bf16.msra.mxu0 %v11649_v4  ;;  %v108_v62 = vld [vmem:[%s16159_s1 + $0x170] sm:$0xff]  ;;  %v11453_v4 = vcombine.low %v96_v52, %v100_v54 }
  0x4f   :  { %v11658_v7 = vcombine.high %v302_v1, %v306_v2  ;;  %v182_v8 = vld [vmem:[%s16159_s1 + $0x3c0] sm:$0xff]  ;;  %1668 = vmatprep.subr.bf16.mxu1 %v11530_v6  ;;  %v11657_v14 = vcombine.low %v302_v1, %v306_v2  ;;  %v11451_v1 = vcombine.low %v95_v48, %v99_v49  ;;  %v111_v2 = vld [vmem:[%s16159_s1 + $0x188] sm:$0xff]  ;;  %v11460_v6 = vcombine.high %v103_v57, %v107_v58 }
  0x50   :  { %v186_v9 = vld [vmem:[%s16159_s1 + $0x3e0] sm:$0xff]  ;;  %1669 = vmatpush1.bf16.msra.mxu1 %v11529_v13  ;;  %v123_v13 = vld [vmem:[%s16159_s1 + $0x1e8] sm:$0xff]  ;;  %v11467_v20 = vcombine.low %v111_v2, %v115_v3 }
  0x51   :  { %v310_v10 = vld [vmem:[%s16159_s1 + $0x7c0] sm:$0xff]  ;;  %v11538_v15 = vcombine.high %v182_v8, %v186_v9  ;;  %1709 = vmatprep.subr.bf16.mxu0 %v11658_v7  ;;  %v11537_v22 = vcombine.low %v182_v8, %v186_v9  ;;  %v112_v7 = vld [vmem:[%s16159_s1 + $0x190] sm:$0xff]  ;;  %v11462_v9 = vcombine.high %v104_v61, %v108_v62 }
  0x52   :  { %v314_v12 = vld [vmem:[%s16159_s1 + $0x7e0] sm:$0xff]  ;;  %1710 = vmatpush1.bf16.msra.mxu0 %v11657_v14  ;;  %v116_v8 = vld [vmem:[%s16159_s1 + $0x1b0] sm:$0xff]  ;;  %v11461_v14 = vcombine.low %v104_v61, %v108_v62 }
  0x53   :  { %v11666_v17 = vcombine.high %v310_v10, %v314_v12  ;;  %1670 = vmatprep.subr.bf16.mxu1 %v11538_v15  ;;  %v11665_v23 = vcombine.low %v310_v10, %v314_v12  ;;  %v11459_v10 = vcombine.low %v103_v57, %v107_v58  ;;  %v119_v12 = vld [vmem:[%s16159_s1 + $0x1c8] sm:$0xff]  ;;  %v11468_v15 = vcombine.high %v111_v2, %v115_v3 }
  0x54   :  { %1671 = vmatpush1.bf16.msra.mxu1 %v11537_v22  ;;  %v11470_v19 = vcombine.high %v112_v7, %v116_v8  ;;  %v131_v22 = vld [vmem:[%s16159_s1 + $0x228] sm:$0xff]  ;;  %v11475_v29 = vcombine.low %v119_v12, %v123_v13 }
  0x55   :  { %1711 = vmatprep.subr.bf16.mxu0 %v11666_v17  ;;  %1722 = vmatprep.subr.bf16.mxu1 %v11420_v24  ;;  %v120_v17 = vld [vmem:[%s16159_s1 + $0x1d0] sm:$0xff]  ;;  %v11476_v24 = vcombine.high %v119_v12, %v123_v13  ;;  %v11484_v63 = vcombine.high %v127_v21, %v131_v22  ;;  %v11483_v5 = vcombine.low %v127_v21, %v131_v22 }
  0x56   :  { %1712 = vmatpush1.bf16.msra.mxu0 %v11665_v23  ;;  %v11469_v23 = vcombine.low %v112_v7, %v116_v8  ;;  %v11478_v27 = vcombine.high %v120_v17, %v124_v18  ;;  %v11477_v33 = vcombine.low %v120_v17, %v124_v18 }
  0x57   :  { %1804 = vmatprep.subr.bf16.mxu0 %v11422_v25  ;;  %1673 = vmatmul.mubr.bf16.vlgmr.msra.gmra.mrb[0].mxu1 %v15367_v28  ;;  %v128_v25 = vld [vmem:[%s16159_s1 + $0x210] sm:$0xff] }
  0x58   :  { %1723 = vmatpush1.bf16.msra.mxu1 %v11419_v31  ;;  %1754 = vmatprep.mubr.bf16.mxu1 %v15249_v11  ;;  %v139_v31 = vld [vmem:[%s16159_s1 + $0x268] sm:$0xff]  ;;  %v11486_v36 = vcombine.high %v128_v25, %v132_v26  ;;  %v11485_v39 = vcombine.low %v128_v25, %v132_v26 }
  0x59   :  { %1714 = vmatmul.mubr.bf16.vlgmr.msra.gmra.mrb[0].mxu0 %v15377_v32  ;;  %1724 = vmatprep.subr.bf16.mxu1 %v11428_v35  ;;  %v140_v35 = vld [vmem:[%s16159_s1 + $0x270] sm:$0xff]  ;;  %v11492_v40 = vcombine.high %v135_v30, %v139_v31  ;;  %v11491_v45 = vcombine.low %v135_v30, %v139_v31 }
  0x5a   :  { %1805 = vmatpush1.bf16.msra.mxu0 %v11421_v34  ;;  %1836 = vmatprep.mubr.bf16.mxu0 %v15249_v11  ;;  %v136_v34 = vld [vmem:[%s16159_s1 + $0x250] sm:$0xff] }
  0x5b   :  { %1806 = vmatprep.subr.bf16.mxu0 %v11430_v37  ;;  %v143_v37 = vld [vmem:[%s16159_s1 + $0x288] sm:$0xff]  ;;  %v11494_v43 = vcombine.high %v136_v34, %v140_v35  ;;  %v11493_v48 = vcombine.low %v136_v34, %v140_v35 }
  0x5c   :  { %1725 = vmatpush1.bf16.msra.mxu1 %v11427_v38  ;;  %v147_v38 = vld [vmem:[%s16159_s1 + $0x2a8] sm:$0xff] }
  0x5d   :  { %1726 = vmatprep.subr.bf16.mxu1 %v11436_v42  ;;  %v148_v42 = vld [vmem:[%s16159_s1 + $0x2b0] sm:$0xff]  ;;  %v11500_v49 = vcombine.high %v143_v37, %v147_v38  ;;  %v11499_v54 = vcombine.low %v143_v37, %v147_v38 }
  0x5e   :  { %1807 = vmatpush1.bf16.msra.mxu0 %v11429_v41  ;;  %v144_v41 = vld [vmem:[%s16159_s1 + $0x290] sm:$0xff] }
  0x5f   :  { %1808 = vmatprep.subr.bf16.mxu0 %v11438_v46  ;;  %v151_v46 = vld [vmem:[%s16159_s1 + $0x2c8] sm:$0xff]  ;;  %v11502_v52 = vcombine.high %v144_v41, %v148_v42  ;;  %v11501_v57 = vcombine.low %v144_v41, %v148_v42 }
  0x60   :  { %1727 = vmatpush1.bf16.msra.mxu1 %v11435_v47  ;;  %v155_v47 = vld [vmem:[%s16159_s1 + $0x2e8] sm:$0xff] }
  0x61   :  { %1728 = vmatprep.subr.bf16.mxu1 %v11444_v51  ;;  %v156_v51 = vld [vmem:[%s16159_s1 + $0x2f0] sm:$0xff]  ;;  %v11508_v58 = vcombine.high %v151_v46, %v155_v47  ;;  %v11507_v62 = vcombine.low %v151_v46, %v155_v47 }
  0x62   :  { %1809 = vmatpush1.bf16.msra.mxu0 %v11437_v50  ;;  %v152_v50 = vld [vmem:[%s16159_s1 + $0x2d0] sm:$0xff] }
  0x63   :  { %1810 = vmatprep.subr.bf16.mxu0 %v11446_v55  ;;  %v159_v55 = vld [vmem:[%s16159_s1 + $0x308] sm:$0xff]  ;;  %v11510_v61 = vcombine.high %v152_v50, %v156_v51  ;;  %v11509_v2 = vcombine.low %v152_v50, %v156_v51 }
  0x64   :  { %1729 = vmatpush1.bf16.msra.mxu1 %v11443_v56  ;;  %v163_v56 = vld [vmem:[%s16159_s1 + $0x328] sm:$0xff] }
  0x65   :  { %1730 = vmatprep.subr.bf16.mxu1 %v11452_v60  ;;  %v164_v60 = vld [vmem:[%s16159_s1 + $0x330] sm:$0xff]  ;;  %v11516_v3 = vcombine.high %v159_v55, %v163_v56  ;;  %v11515_v8 = vcombine.low %v159_v55, %v163_v56 }
  0x66   :  { %1811 = vmatpush1.bf16.msra.mxu0 %v11445_v59  ;;  %v160_v59 = vld [vmem:[%s16159_s1 + $0x310] sm:$0xff] }
  0x67   :  { %1812 = vmatprep.subr.bf16.mxu0 %v11454_v0  ;;  %v167_v0 = vld [vmem:[%s16159_s1 + $0x348] sm:$0xff]  ;;  %v11518_v7 = vcombine.high %v160_v59, %v164_v60  ;;  %v11517_v12 = vcombine.low %v160_v59, %v164_v60 }
  0x68   :  { %1731 = vmatpush1.bf16.msra.mxu1 %v11451_v1  ;;  %v171_v1 = vld [vmem:[%s16159_s1 + $0x368] sm:$0xff] }
  0x69   :  { %1732 = vmatprep.subr.bf16.mxu1 %v11460_v6  ;;  %v172_v6 = vld [vmem:[%s16159_s1 + $0x370] sm:$0xff]  ;;  %v11524_v13 = vcombine.high %v167_v0, %v171_v1  ;;  %v11523_v18 = vcombine.low %v167_v0, %v171_v1 }
  0x6a   :  { %1813 = vmatpush1.bf16.msra.mxu0 %v11453_v4  ;;  %v168_v4 = vld [vmem:[%s16159_s1 + $0x350] sm:$0xff] }
  0x6b   :  { %1814 = vmatprep.subr.bf16.mxu0 %v11462_v9  ;;  %v175_v9 = vld [vmem:[%s16159_s1 + $0x388] sm:$0xff]  ;;  %v11526_v17 = vcombine.high %v168_v4, %v172_v6  ;;  %v11525_v21 = vcombine.low %v168_v4, %v172_v6 }
  0x6c   :  { %1733 = vmatpush1.bf16.msra.mxu1 %v11459_v10  ;;  %v179_v10 = vld [vmem:[%s16159_s1 + $0x3a8] sm:$0xff] }
  0x6d   :  { %1734 = vmatprep.subr.bf16.mxu1 %v11468_v15  ;;  %v180_v15 = vld [vmem:[%s16159_s1 + $0x3b0] sm:$0xff]  ;;  %v11532_v22 = vcombine.high %v175_v9, %v179_v10  ;;  %v11531_v26 = vcombine.low %v175_v9, %v179_v10 }
  0x6e   :  { %1815 = vmatpush1.bf16.msra.mxu0 %v11461_v14  ;;  %v176_v14 = vld [vmem:[%s16159_s1 + $0x390] sm:$0xff] }
  0x6f   :  { %1816 = vmatprep.subr.bf16.mxu0 %v11470_v19  ;;  %v183_v19 = vld [vmem:[%s16159_s1 + $0x3c8] sm:$0xff]  ;;  %v11534_v25 = vcombine.high %v176_v14, %v180_v15  ;;  %v11533_v30 = vcombine.low %v176_v14, %v180_v15 }
  0x70   :  { %1735 = vmatpush1.bf16.msra.mxu1 %v11467_v20  ;;  %v187_v20 = vld [vmem:[%s16159_s1 + $0x3e8] sm:$0xff] }
  0x71   :  { %1736 = vmatprep.subr.bf16.mxu1 %v11476_v24  ;;  %v188_v24 = vld [vmem:[%s16159_s1 + $0x3f0] sm:$0xff]  ;;  %v11540_v31 = vcombine.high %v183_v19, %v187_v20  ;;  %v11539_v35 = vcombine.low %v183_v19, %v187_v20 }
  0x72   :  { %1817 = vmatpush1.bf16.msra.mxu0 %v11469_v23  ;;  %v184_v23 = vld [vmem:[%s16159_s1 + $0x3d0] sm:$0xff] }
  0x73   :  { %1818 = vmatprep.subr.bf16.mxu0 %v11478_v27  ;;  %v191_v27 = vld [vmem:[%s16159_s1 + $0x408] sm:$0xff]  ;;  %v11542_v34 = vcombine.high %v184_v23, %v188_v24  ;;  %v11541_v37 = vcombine.low %v184_v23, %v188_v24 }
  0x74   :  { %1737 = vmatpush1.bf16.msra.mxu1 %v11475_v29  ;;  %v195_v29 = vld [vmem:[%s16159_s1 + $0x428] sm:$0xff] }
  0x75   :  { %1738 = vmatprep.subr.bf16.mxu1 %v11484_v63  ;;  %v196_v63 = vld [vmem:[%s16159_s1 + $0x430] sm:$0xff]  ;;  %v11548_v38 = vcombine.high %v191_v27, %v195_v29  ;;  %v11547_v42 = vcombine.low %v191_v27, %v195_v29 }
  0x76   :  { %1819 = vmatpush1.bf16.msra.mxu0 %v11477_v33  ;;  %v192_v33 = vld [vmem:[%s16159_s1 + $0x410] sm:$0xff] }
  0x77   :  { %1820 = vmatprep.subr.bf16.mxu0 %v11486_v36  ;;  %v199_v36 = vld [vmem:[%s16159_s1 + $0x448] sm:$0xff]  ;;  %v11550_v41 = vcombine.high %v192_v33, %v196_v63  ;;  %v11549_v46 = vcombine.low %v192_v33, %v196_v63 }
  0x78   :  { %1739 = vmatpush1.bf16.msra.mxu1 %v11483_v5  ;;  %v203_v5 = vld [vmem:[%s16159_s1 + $0x468] sm:$0xff] }
  0x79   :  { %1740 = vmatprep.subr.bf16.mxu1 %v11492_v40  ;;  %v204_v40 = vld [vmem:[%s16159_s1 + $0x470] sm:$0xff]  ;;  %v11556_v47 = vcombine.high %v199_v36, %v203_v5  ;;  %v11555_v51 = vcombine.low %v199_v36, %v203_v5  ;;  %v259_v5 = vld [vmem:[%s16159_s1 + $0x628] sm:$0xff] }
  0x7a   :  { %1821 = vmatpush1.bf16.msra.mxu0 %v11485_v39  ;;  %v200_v39 = vld [vmem:[%s16159_s1 + $0x450] sm:$0xff] }
  0x7b   :  { %1822 = vmatprep.subr.bf16.mxu0 %v11494_v43  ;;  %v207_v43 = vld [vmem:[%s16159_s1 + $0x488] sm:$0xff]  ;;  %v11558_v50 = vcombine.high %v200_v39, %v204_v40  ;;  %v11557_v55 = vcombine.low %v200_v39, %v204_v40 }
  0x7c   :  { %1741 = vmatpush1.bf16.msra.mxu1 %v11491_v45  ;;  %v211_v45 = vld [vmem:[%s16159_s1 + $0x4a8] sm:$0xff] }
  0x7d   :  { %1742 = vmatprep.subr.bf16.mxu1 %v11500_v49  ;;  %v212_v49 = vld [vmem:[%s16159_s1 + $0x4b0] sm:$0xff]  ;;  %v11564_v56 = vcombine.high %v207_v43, %v211_v45  ;;  %v11563_v60 = vcombine.low %v207_v43, %v211_v45  ;;  %v267_v45 = vld [vmem:[%s16159_s1 + $0x668] sm:$0xff] }
  0x7e   :  { %1823 = vmatpush1.bf16.msra.mxu0 %v11493_v48  ;;  %v208_v48 = vld [vmem:[%s16159_s1 + $0x490] sm:$0xff] }
  0x7f   :  { %1824 = vmatprep.subr.bf16.mxu0 %v11502_v52  ;;  %v215_v52 = vld [vmem:[%s16159_s1 + $0x4c8] sm:$0xff]  ;;  %v11566_v59 = vcombine.high %v208_v48, %v212_v49  ;;  %v11565_v0 = vcombine.low %v208_v48, %v212_v49 }
  0x80   :  { %1743 = vmatpush1.bf16.msra.mxu1 %v11499_v54  ;;  %v219_v54 = vld [vmem:[%s16159_s1 + $0x4e8] sm:$0xff] }
  0x81   :  { %1744 = vmatprep.subr.bf16.mxu1 %v11508_v58  ;;  %v220_v58 = vld [vmem:[%s16159_s1 + $0x4f0] sm:$0xff]  ;;  %v11572_v1 = vcombine.high %v215_v52, %v219_v54  ;;  %v11571_v6 = vcombine.low %v215_v52, %v219_v54  ;;  %v275_v54 = vld [vmem:[%s16159_s1 + $0x6a8] sm:$0xff] }
  0x82   :  { %1825 = vmatpush1.bf16.msra.mxu0 %v11501_v57  ;;  %v216_v57 = vld [vmem:[%s16159_s1 + $0x4d0] sm:$0xff] }
  0x83   :  { %1826 = vmatprep.subr.bf16.mxu0 %v11510_v61  ;;  %v223_v61 = vld [vmem:[%s16159_s1 + $0x508] sm:$0xff]  ;;  %v11574_v4 = vcombine.high %v216_v57, %v220_v58  ;;  %v11573_v9 = vcombine.low %v216_v57, %v220_v58 }
  0x84   :  { %1745 = vmatpush1.bf16.msra.mxu1 %v11507_v62  ;;  %v227_v62 = vld [vmem:[%s16159_s1 + $0x528] sm:$0xff] }
  0x85   :  { %1746 = vmatprep.subr.bf16.mxu1 %v11516_v3  ;;  %v228_v3 = vld [vmem:[%s16159_s1 + $0x530] sm:$0xff]  ;;  %v11580_v10 = vcombine.high %v223_v61, %v227_v62  ;;  %v11579_v15 = vcombine.low %v223_v61, %v227_v62  ;;  %v283_v62 = vld [vmem:[%s16159_s1 + $0x6e8] sm:$0xff] }
  0x86   :  { %1827 = vmatpush1.bf16.msra.mxu0 %v11509_v2  ;;  %v224_v2 = vld [vmem:[%s16159_s1 + $0x510] sm:$0xff] }
  0x87   :  { %1828 = vmatprep.subr.bf16.mxu0 %v11518_v7  ;;  %v231_v7 = vld [vmem:[%s16159_s1 + $0x548] sm:$0xff]  ;;  %v11582_v14 = vcombine.high %v224_v2, %v228_v3  ;;  %v11581_v19 = vcombine.low %v224_v2, %v228_v3 }
  0x88   :  { %1747 = vmatpush1.bf16.msra.mxu1 %v11515_v8  ;;  %v235_v8 = vld [vmem:[%s16159_s1 + $0x568] sm:$0xff] }
  0x89   :  { %1748 = vmatprep.subr.bf16.mxu1 %v11524_v13  ;;  %v236_v13 = vld [vmem:[%s16159_s1 + $0x570] sm:$0xff]  ;;  %v11588_v20 = vcombine.high %v231_v7, %v235_v8  ;;  %v11587_v24 = vcombine.low %v231_v7, %v235_v8  ;;  %v291_v8 = vld [vmem:[%s16159_s1 + $0x728] sm:$0xff] }
  0x8a   :  { %1829 = vmatpush1.bf16.msra.mxu0 %v11517_v12  ;;  %v232_v12 = vld [vmem:[%s16159_s1 + $0x550] sm:$0xff] }
  0x8b   :  { %1830 = vmatprep.subr.bf16.mxu0 %v11526_v17  ;;  %v239_v17 = vld [vmem:[%s16159_s1 + $0x588] sm:$0xff]  ;;  %v11590_v23 = vcombine.high %v232_v12, %v236_v13  ;;  %v11589_v27 = vcombine.low %v232_v12, %v236_v13 }
  0x8c   :  { %1749 = vmatpush1.bf16.msra.mxu1 %v11523_v18  ;;  %v243_v18 = vld [vmem:[%s16159_s1 + $0x5a8] sm:$0xff] }
  0x8d   :  { %1750 = vmatprep.subr.bf16.mxu1 %v11532_v22  ;;  %v244_v22 = vld [vmem:[%s16159_s1 + $0x5b0] sm:$0xff]  ;;  %v11596_v29 = vcombine.high %v239_v17, %v243_v18  ;;  %v11595_v63 = vcombine.low %v239_v17, %v243_v18  ;;  %v299_v18 = vld [vmem:[%s16159_s1 + $0x768] sm:$0xff] }
  0x8e   :  { %1831 = vmatpush1.bf16.msra.mxu0 %v11525_v21  ;;  %v240_v21 = vld [vmem:[%s16159_s1 + $0x590] sm:$0xff] }
  0x8f   :  { %1832 = vmatprep.subr.bf16.mxu0 %v11534_v25  ;;  %v247_v25 = vld [vmem:[%s16159_s1 + $0x5c8] sm:$0xff]  ;;  %v11598_v33 = vcombine.high %v240_v21, %v244_v22 }
  0x90   :  { %1751 = vmatpush1.bf16.msra.mxu1 %v11531_v26  ;;  %v251_v26 = vld [vmem:[%s16159_s1 + $0x5e8] sm:$0xff] }
  0x91   :  { %1752 = vmatprep.subr.bf16.mxu1 %v11540_v31  ;;  %v252_v31 = vld [vmem:[%s16159_s1 + $0x5f0] sm:$0xff]  ;;  %v11604_v36 = vcombine.high %v247_v25, %v251_v26  ;;  %v11603_v40 = vcombine.low %v247_v25, %v251_v26  ;;  %v307_v26 = vld [vmem:[%s16159_s1 + $0x7a8] sm:$0xff] }
  0x92   :  { %1833 = vmatpush1.bf16.msra.mxu0 %v11533_v30  ;;  %v248_v30 = vld [vmem:[%s16159_s1 + $0x5d0] sm:$0xff] }
  0x93   :  { %1834 = vmatprep.subr.bf16.mxu0 %v11542_v34  ;;  %v255_v34 = vld [vmem:[%s16159_s1 + $0x608] sm:$0xff]  ;;  %v11606_v39 = vcombine.high %v248_v30, %v252_v31 }
  0x94   :  { %1753 = vmatpush1.bf16.msra.mxu1 %v11539_v35  ;;  %v11597_v35 = vcombine.low %v240_v21, %v244_v22  ;;  %v11612_v43 = vcombine.high %v255_v34, %v259_v5  ;;  %v11611_v49 = vcombine.low %v255_v34, %v259_v5  ;;  %v316_v5 = vld [vmem:[%s16159_s1 + $0x7f0] sm:$0xff] }
  0x95   :  { %1763 = vmatprep.subr.bf16.mxu1 %v11548_v38  ;;  %v260_v38 = vld [vmem:[%s16159_s1 + $0x630] sm:$0xff] }
  0x96   :  { %1835 = vmatpush1.bf16.msra.mxu0 %v11541_v37  ;;  %v256_v37 = vld [vmem:[%s16159_s1 + $0x610] sm:$0xff] }
  0x97   :  { %1845 = vmatprep.subr.bf16.mxu0 %v11550_v41  ;;  %1755 = vmatmul.mubr.bf16.vlgmr.msra.gmra.mrb[4].mxu1 %v15367_v28  ;;  %v263_v41 = vld [vmem:[%s16159_s1 + $0x648] sm:$0xff]  ;;  %v11614_v48 = vcombine.high %v256_v37, %v260_v38 }
  0x98   :  { %1764 = vmatpush1.bf16.msra.mxu1 %v11547_v42  ;;  %1795 = vmatprep.mubr.bf16.mxu1 %v15260_v16  ;;  %v11605_v42 = vcombine.low %v248_v30, %v252_v31  ;;  %v11620_v52 = vcombine.high %v263_v41, %v267_v45  ;;  %v11619_v58 = vcombine.low %v263_v41, %v267_v45  ;;  %v65_v41 = vld [vmem:[%s16159_s1 + $0x18] sm:$0xff] }
  0x99   :  { %1837 = vmatmul.mubr.bf16.vlgmr.msra.gmra.mrb[4].mxu0 %v15367_v28  ;;  %1765 = vmatprep.subr.bf16.mxu1 %v11556_v47  ;;  %v268_v47 = vld [vmem:[%s16159_s1 + $0x670] sm:$0xff] }
  0x9a   :  { %1846 = vmatpush1.bf16.msra.mxu0 %v11549_v46  ;;  %1877 = vmatprep.mubr.bf16.mxu0 %v15260_v16  ;;  %v264_v46 = vld [vmem:[%s16159_s1 + $0x650] sm:$0xff] }
  0x9b   :  { %1847 = vmatprep.subr.bf16.mxu0 %v11558_v50  ;;  %v271_v50 = vld [vmem:[%s16159_s1 + $0x688] sm:$0xff]  ;;  %v11622_v57 = vcombine.high %v264_v46, %v268_v47 }
  0x9c   :  { %1766 = vmatpush1.bf16.msra.mxu1 %v11555_v51  ;;  %v11613_v51 = vcombine.low %v256_v37, %v260_v38  ;;  %v11628_v61 = vcombine.high %v271_v50, %v275_v54  ;;  %v11627_v3 = vcombine.low %v271_v50, %v275_v54  ;;  %v81_v54 = vld [vmem:[%s16159_s1 + $0x98] sm:$0xff] }
  0x9d   :  { %1767 = vmatprep.subr.bf16.mxu1 %v11564_v56  ;;  %v276_v56 = vld [vmem:[%s16159_s1 + $0x6b0] sm:$0xff] }
  0x9e   :  { %1848 = vmatpush1.bf16.msra.mxu0 %v11557_v55  ;;  %v272_v55 = vld [vmem:[%s16159_s1 + $0x690] sm:$0xff] }
  0x9f   :  { %1849 = vmatprep.subr.bf16.mxu0 %v11566_v59  ;;  %v279_v59 = vld [vmem:[%s16159_s1 + $0x6c8] sm:$0xff]  ;;  %v11630_v2 = vcombine.high %v272_v55, %v276_v56 }
  0xa0   :  { %1768 = vmatpush1.bf16.msra.mxu1 %v11563_v60  ;;  %v11621_v60 = vcombine.low %v264_v46, %v268_v47  ;;  %v11636_v7 = vcombine.high %v279_v59, %v283_v62  ;;  %v11635_v13 = vcombine.low %v279_v59, %v283_v62  ;;  %v73_v46 = vld [vmem:[%s16159_s1 + $0x58] sm:$0xff]  ;;  %v13165_v62 = vld [vmem:[#allocation2 + $0x134] ss:$76 sps:$4 sm:$0xff]  }
  0xa1   :  { %1769 = vmatprep.subr.bf16.mxu1 %v11572_v1  ;;  %v284_v1 = vld [vmem:[%s16159_s1 + $0x6f0] sm:$0xff]  ;;  %v77_v47 = vld [vmem:[%s16159_s1 + $0x78] sm:$0xff] }
  0xa2   :  { %1850 = vmatpush1.bf16.msra.mxu0 %v11565_v0  ;;  %v280_v0 = vld [vmem:[%s16159_s1 + $0x6d0] sm:$0xff]  ;;  %v89_v59 = vld [vmem:[%s16159_s1 + $0xd8] sm:$0xff] }
  0xa3   :  { %1851 = vmatprep.subr.bf16.mxu0 %v11574_v4  ;;  %v287_v4 = vld [vmem:[%s16159_s1 + $0x708] sm:$0xff]  ;;  %v11638_v12 = vcombine.high %v280_v0, %v284_v1 }
  0xa4   :  { %1770 = vmatpush1.bf16.msra.mxu1 %v11571_v6  ;;  %v11629_v6 = vcombine.low %v272_v55, %v276_v56  ;;  %v11644_v17 = vcombine.high %v287_v4, %v291_v8  ;;  %v11643_v22 = vcombine.low %v287_v4, %v291_v8  ;;  %v85_v55 = vld [vmem:[%s16159_s1 + $0xb8] sm:$0xff]  ;;  %v11432_v56 = vcombine.high %v73_v46, %v77_v47 }
  0xa5   :  { %1771 = vmatprep.subr.bf16.mxu1 %v11580_v10  ;;  %v292_v10 = vld [vmem:[%s16159_s1 + $0x730] sm:$0xff] }
  0xa6   :  { %1852 = vmatpush1.bf16.msra.mxu0 %v11573_v9  ;;  %v288_v9 = vld [vmem:[%s16159_s1 + $0x710] sm:$0xff] }
  0xa7   :  { %1853 = vmatprep.subr.bf16.mxu0 %v11582_v14  ;;  %v295_v14 = vld [vmem:[%s16159_s1 + $0x748] sm:$0xff]  ;;  %v11646_v21 = vcombine.high %v288_v9, %v292_v10  ;;  %v13163_v4 = vld [vmem:[#allocation2 + $0x130] ss:$76 sps:$4 sm:$0xff]  }
  0xa8   :  { %1772 = vmatpush1.bf16.msra.mxu1 %v11579_v15  ;;  %v11637_v15 = vcombine.low %v280_v0, %v284_v1  ;;  %v11652_v25 = vcombine.high %v295_v14, %v299_v18  ;;  %v11651_v31 = vcombine.low %v295_v14, %v299_v18  ;;  %v11440_v0 = vcombine.high %v81_v54, %v85_v55  ;;  %v13169_v18 = vld [vmem:[#allocation2 + $0x260] ss:$76 sps:$4 sm:$0xff]  }
  0xa9   :  { %1773 = vmatprep.subr.bf16.mxu1 %v11588_v20  ;;  %v300_v20 = vld [vmem:[%s16159_s1 + $0x770] sm:$0xff]  ;;  %v11439_v1 = vcombine.low %v81_v54, %v85_v55  ;;  %v161_v54 = vld [vmem:[%s16159_s1 + $0x318] sm:$0xff] }
  0xaa   :  { %1854 = vmatpush1.bf16.msra.mxu0 %v11581_v19  ;;  %v296_v19 = vld [vmem:[%s16159_s1 + $0x750] sm:$0xff]  ;;  %v165_v55 = vld [vmem:[%s16159_s1 + $0x338] sm:$0xff] }
  0xab   :  { %1855 = vmatprep.subr.bf16.mxu0 %v11590_v23  ;;  %v303_v23 = vld [vmem:[%s16159_s1 + $0x788] sm:$0xff]  ;;  %v11654_v30 = vcombine.high %v296_v19, %v300_v20 }
  0xac   :  { %1774 = vmatpush1.bf16.msra.mxu1 %v11587_v24  ;;  %v11645_v24 = vcombine.low %v288_v9, %v292_v10  ;;  %v11660_v34 = vcombine.high %v303_v23, %v307_v26  ;;  %v11659_v38 = vcombine.low %v303_v23, %v307_v26  ;;  %v109_v9 = vld [vmem:[%s16159_s1 + $0x178] sm:$0xff]  ;;  %v13166_v10 = vld [vmem:[#allocation2 + $0x1c8] ss:$76 sps:$4 sm:$0xff]  }
  0xad   :  { %1775 = vmatprep.subr.bf16.mxu1 %v11596_v29  ;;  %v308_v29 = vld [vmem:[%s16159_s1 + $0x7b0] sm:$0xff]  ;;  %v125_v23 = vld [vmem:[%s16159_s1 + $0x1f8] sm:$0xff] }
  0xae   :  { %1856 = vmatpush1.bf16.msra.mxu0 %v11589_v27  ;;  %v304_v27 = vld [vmem:[%s16159_s1 + $0x790] sm:$0xff] }
  0xaf   :  { %1857 = vmatprep.subr.bf16.mxu0 %v11598_v33  ;;  %v311_v33 = vld [vmem:[%s16159_s1 + $0x7c8] sm:$0xff]  ;;  %v11662_v37 = vcombine.high %v304_v27, %v308_v29 }
  0xb0   :  { %1776 = vmatpush1.bf16.msra.mxu1 %v11595_v63  ;;  %v11653_v63 = vcombine.low %v296_v19, %v300_v20  ;;  %v13174_v19 = vld [vmem:[#allocation2 + $0x2fc] ss:$76 sps:$4 sm:$0xff]  }
  0xb1   :  { %1777 = vmatprep.subr.bf16.mxu1 %v11604_v36  ;;  %v312_v36 = vld [vmem:[%s16159_s1 + $0x7d0] sm:$0xff] }
  0xb2   :  { %1858 = vmatpush1.bf16.msra.mxu0 %v11597_v35  ;;  %v315_v35 = vld [vmem:[%s16159_s1 + $0x7e8] sm:$0xff] }
  0xb3   :  { %1859 = vmatprep.subr.bf16.mxu0 %v11606_v39  ;;  %v11661_v39 = vcombine.low %v304_v27, %v308_v29  ;;  %v11667_v45 = vcombine.low %v311_v33, %v315_v35  ;;  %v129_v29 = vld [vmem:[%s16159_s1 + $0x218] sm:$0xff] }
  0xb4   :  { %1778 = vmatpush1.bf16.msra.mxu1 %v11603_v40  ;;  %v11668_v40 = vcombine.high %v311_v33, %v315_v35  ;;  %v13180_v33 = vld [vmem:[#allocation2 + $0x42c] ss:$76 sps:$4 sm:$0xff]  }
  0xb5   :  { %1779 = vmatprep.subr.bf16.mxu1 %v11612_v43  ;;  %v11670_v43 = vcombine.high %v312_v36, %v316_v5  ;;  %v137_v35 = vld [vmem:[%s16159_s1 + $0x258] sm:$0xff] }
  0xb6   :  { %1860 = vmatpush1.bf16.msra.mxu0 %v11605_v42  ;;  %v69_v42 = vld [vmem:[%s16159_s1 + $0x38] sm:$0xff] }
  0xb7   :  { %1861 = vmatprep.subr.bf16.mxu0 %v11614_v48  ;;  %v13159_v48 = vld [vmem:[#allocation2 + $0x4] ss:$76 sps:$4 sm:$0xff]   ;;  %v11424_v50 = vcombine.high %v65_v41, %v69_v42 }
  0xb8   :  { %1780 = vmatpush1.bf16.msra.mxu1 %v11611_v49  ;;  %v11669_v49 = vcombine.low %v312_v36, %v316_v5  ;;  %v141_v36 = vld [vmem:[%s16159_s1 + $0x278] sm:$0xff]  ;;  %v13178_v5 = vld [vmem:[#allocation2 + $0x428] ss:$76 sps:$4 sm:$0xff]  }
  0xb9   :  { %1781 = vmatprep.subr.bf16.mxu1 %v11620_v52  ;;  %v11423_v52 = vcombine.low %v65_v41, %v69_v42  ;;  %v149_v41 = vld [vmem:[%s16159_s1 + $0x2b8] sm:$0xff]  ;;  %v13181_v42 = vld [vmem:[#allocation2 + $0x4c0] ss:$76 sps:$4 sm:$0xff]  }
  0xba   :  { %1862 = vmatpush1.bf16.msra.mxu0 %v11613_v51  ;;  %v13157_v51 = vld [vmem:[#allocation2] ss:$76 sps:$4 sm:$0xff]  }
  0xbb   :  { %1863 = vmatprep.subr.bf16.mxu0 %v11622_v57  ;;  %v13162_v57 = vld [vmem:[#allocation2 + $0x9c] ss:$76 sps:$4 sm:$0xff]  }
  0xbc   :  { %1782 = vmatpush1.bf16.msra.mxu1 %v11619_v58  ;;  %v11431_v58 = vcombine.low %v73_v46, %v77_v47  ;;  %v11495_v46 = vcombine.low %v137_v35, %v141_v36  ;;  %v153_v47 = vld [vmem:[%s16159_s1 + $0x2d8] sm:$0xff] }
  0xbd   :  { %1783 = vmatprep.subr.bf16.mxu1 %v11628_v61  ;;  %v13160_v61 = vld [vmem:[#allocation2 + $0x98] ss:$76 sps:$4 sm:$0xff]  }
  0xbe   :  { %1864 = vmatpush1.bf16.msra.mxu0 %v11621_v60  ;;  %v93_v60 = vld [vmem:[%s16159_s1 + $0xf8] sm:$0xff] }
  0xbf   :  { %1865 = vmatprep.subr.bf16.mxu0 %v11630_v2  ;;  %v97_v2 = vld [vmem:[%s16159_s1 + $0x118] sm:$0xff]  ;;  %v11447_v8 = vcombine.low %v89_v59, %v93_v60 }
  0xc0   :  { %1784 = vmatpush1.bf16.msra.mxu1 %v11627_v3  ;;  %v101_v3 = vld [vmem:[%s16159_s1 + $0x138] sm:$0xff] }
  0xc1   :  { %1785 = vmatprep.subr.bf16.mxu1 %v11636_v7  ;;  %v11448_v7 = vcombine.high %v89_v59, %v93_v60  ;;  %v11455_v14 = vcombine.low %v97_v2, %v101_v3  ;;  %v169_v60 = vld [vmem:[%s16159_s1 + $0x358] sm:$0xff] }
  0xc2   :  { %1866 = vmatpush1.bf16.msra.mxu0 %v11629_v6  ;;  %v13168_v6 = vld [vmem:[#allocation2 + $0x1cc] ss:$76 sps:$4 sm:$0xff]  }
  0xc3   :  { %1867 = vmatprep.subr.bf16.mxu0 %v11638_v12  ;;  %v13171_v12 = vld [vmem:[#allocation2 + $0x264] ss:$76 sps:$4 sm:$0xff]  }
  0xc4   :  { %1786 = vmatpush1.bf16.msra.mxu1 %v11635_v13  ;;  %v11456_v13 = vcombine.high %v97_v2, %v101_v3  ;;  %v11519_v2 = vcombine.low %v161_v54, %v165_v55  ;;  %v177_v3 = vld [vmem:[%s16159_s1 + $0x398] sm:$0xff] }
  0xc5   :  { %1787 = vmatprep.subr.bf16.mxu1 %v11644_v17  ;;  %v117_v17 = vld [vmem:[%s16159_s1 + $0x1b8] sm:$0xff] }
  0xc6   :  { %1868 = vmatpush1.bf16.msra.mxu0 %v11637_v15  ;;  %v113_v15 = vld [vmem:[%s16159_s1 + $0x198] sm:$0xff] }
  0xc7   :  { %1869 = vmatprep.subr.bf16.mxu0 %v11646_v21  ;;  %v11472_v26 = vcombine.high %v113_v15, %v117_v17  ;;  %v11471_v27 = vcombine.low %v113_v15, %v117_v17  ;;  %v193_v17 = vld [vmem:[%s16159_s1 + $0x418] sm:$0xff] }
  0xc8   :  { %1788 = vmatpush1.bf16.msra.mxu1 %v11643_v22  ;;  %v121_v22 = vld [vmem:[%s16159_s1 + $0x1d8] sm:$0xff] }
  0xc9   :  { %1789 = vmatprep.subr.bf16.mxu1 %v11652_v25  ;;  %v13177_v25 = vld [vmem:[#allocation2 + $0x394] ss:$76 sps:$4 sm:$0xff]  }
  0xca   :  { %1870 = vmatpush1.bf16.msra.mxu0 %v11645_v24  ;;  %v13172_v24 = vld [vmem:[#allocation2 + $0x2f8] ss:$76 sps:$4 sm:$0xff]  }
  0xcb   :  { %1871 = vmatprep.subr.bf16.mxu0 %v11654_v30  ;;  %v133_v30 = vld [vmem:[%s16159_s1 + $0x238] sm:$0xff] }
  0xcc   :  { %1790 = vmatpush1.bf16.msra.mxu1 %v11651_v31  ;;  %v13175_v31 = vld [vmem:[#allocation2 + $0x390] ss:$76 sps:$4 sm:$0xff]  }
  0xcd   :  { %1791 = vmatprep.subr.bf16.mxu1 %v11660_v34  ;;  %v11479_v34 = vcombine.low %v121_v22, %v125_v23 }
  0xce   :  { %1872 = vmatpush1.bf16.msra.mxu0 %v11653_v63  ;;  %v11480_v63 = vcombine.high %v121_v22, %v125_v23  ;;  %v201_v23 = vld [vmem:[%s16159_s1 + $0x458] sm:$0xff] }
  0xcf   :  { %1873 = vmatprep.subr.bf16.mxu0 %v11662_v37  ;;  %v13183_v37 = vld [vmem:[#allocation2 + $0x4c4] ss:$76 sps:$4 sm:$0xff]  }
  0xd0   :  { %1792 = vmatpush1.bf16.msra.mxu1 %v11659_v38  ;;  %v11488_v38 = vcombine.high %v129_v29, %v133_v30 }
  0xd1   :  { %1793 = vmatprep.subr.bf16.mxu1 %v11668_v40  ;;  %v145_v40 = vld [vmem:[%s16159_s1 + $0x298] sm:$0xff] }
  0xd2   :  { %1874 = vmatpush1.bf16.msra.mxu0 %v11661_v39  ;;  %v11487_v39 = vcombine.low %v129_v29, %v133_v30  ;;  %v209_v30 = vld [vmem:[%s16159_s1 + $0x498] sm:$0xff] }
  0xd3   :  { %1875 = vmatprep.subr.bf16.mxu0 %v11670_v43  ;;  %v13186_v43 = vld [vmem:[#allocation2 + $0x55c] ss:$76 sps:$4 sm:$0xff]  }
  0xd4   :  { %1794 = vmatpush1.bf16.msra.mxu1 %v11667_v45  ;;  %v11496_v45 = vcombine.high %v137_v35, %v141_v36  ;;  %v221_v36 = vld [vmem:[%s16159_s1 + $0x4f8] sm:$0xff] }
  0xd5   :  { %1886 = vmatprep.subr.bf16.mxu1 %v11424_v50  ;;  %v13189_v50 = vld [vmem:[#allocation2 + $0x5f4] ss:$76 sps:$4 sm:$0xff]  }
  0xd6   :  { %1876 = vmatpush1.bf16.msra.mxu0 %v11669_v49  ;;  %v13184_v49 = vld [vmem:[#allocation2 + $0x558] ss:$76 sps:$4 sm:$0xff]  }
  0xd7   :  { %9549 = vmatprep.subr.bf16.mxu0 %v13159_v48  ;;  %1796 = vmatmul.mubr.bf16.vlgmr.msra.gmra.mrb[4].mxu1 %v15377_v32  ;;  %v157_v48 = vld [vmem:[%s16159_s1 + $0x2f8] sm:$0xff] }
  0xd8   :  { %1887 = vmatpush1.bf16.msra.mxu1 %v11423_v52  ;;  %1918 = vmatprep.mubr.bf16.mxu1 %v15249_v11  ;;  %v105_v11 = vld [vmem:[%s16159_s1 + $0x158] sm:$0xff]  ;;  %v11503_v52 = vcombine.low %v145_v40, %v149_v41  ;;  %v11511_v59 = vcombine.low %v153_v47, %v157_v48 }
  0xd9   :  { %1878 = vmatmul.mubr.bf16.vlgmr.msra.gmra.mrb[4].mxu0 %v15377_v32  ;;  %1888 = vmatprep.subr.bf16.mxu1 %v11432_v56  ;;  %v11464_v20 = vcombine.high %v105_v11, %v109_v9  ;;  %v11463_v21 = vcombine.low %v105_v11, %v109_v9  ;;  %v13187_v56 = vld [vmem:[#allocation2 + $0x5f0] ss:$76 sps:$4 sm:$0xff]  }
  0xda   :  { %9550 = vmatpush1.bf16.msra.mxu0 %v13157_v51  ;;  %v11504_v51 = vcombine.high %v145_v40, %v149_v41  ;;  %v185_v9 = vld [vmem:[%s16159_s1 + $0x3d8] sm:$0xff] }
  0xdb   :  { %9551 = vmatprep.subr.bf16.mxu0 %v13162_v57  ;;  %v13192_v57 = vld [vmem:[#allocation2 + $0x68c] ss:$76 sps:$4 sm:$0xff]  }
  0xdc   :  { %1889 = vmatpush1.bf16.msra.mxu1 %v11431_v58  ;;  %v11512_v58 = vcombine.high %v153_v47, %v157_v48  ;;  %v237_v41 = vld [vmem:[%s16159_s1 + $0x578] sm:$0xff] }
  0xdd   :  { %1890 = vmatprep.subr.bf16.mxu1 %v11440_v0  ;;  %v13195_v0 = vld [vmem:[#allocation2 + $0x724] ss:$76 sps:$4 sm:$0xff]   ;;  %v241_v47 = vld [vmem:[%s16159_s1 + $0x598] sm:$0xff] }
  0xde   :  { %9552 = vmatpush1.bf16.msra.mxu0 %v13160_v61  ;;  %v173_v61 = vld [vmem:[%s16159_s1 + $0x378] sm:$0xff] }
  0xdf   :  { %9553 = vmatprep.subr.bf16.mxu0 %v13165_v62  ;;  %v13190_v62 = vld [vmem:[#allocation2 + $0x688] ss:$76 sps:$4 sm:$0xff]   ;;  %v11527_v11 = vcombine.low %v169_v60, %v173_v61 }
  0xe0   :  { %1891 = vmatpush1.bf16.msra.mxu1 %v11439_v1  ;;  %v11520_v1 = vcombine.high %v161_v54, %v165_v55  ;;  %v249_v55 = vld [vmem:[%s16159_s1 + $0x5d8] sm:$0xff] }
  0xe1   :  { %1892 = vmatprep.subr.bf16.mxu1 %v11448_v7  ;;  %v13198_v7 = vld [vmem:[#allocation2 + $0x7bc] ss:$76 sps:$4 sm:$0xff]  }
  0xe2   :  { %9554 = vmatpush1.bf16.msra.mxu0 %v13163_v4  ;;  %v181_v4 = vld [vmem:[%s16159_s1 + $0x3b8] sm:$0xff] }
  0xe3   :  { %9555 = vmatprep.subr.bf16.mxu0 %v13168_v6  ;;  %v13193_v6 = vld [vmem:[#allocation2 + $0x720] ss:$76 sps:$4 sm:$0xff]   ;;  %v11535_v15 = vcombine.low %v177_v3, %v181_v4 }
  0xe4   :  { %1893 = vmatpush1.bf16.msra.mxu1 %v11447_v8  ;;  %v11528_v8 = vcombine.high %v169_v60, %v173_v61 }
  0xe5   :  { %1894 = vmatprep.subr.bf16.mxu1 %v11456_v13  ;;  %v11536_v13 = vcombine.high %v177_v3, %v181_v4 }
  0xe6   :  { %9556 = vmatpush1.bf16.msra.mxu0 %v13166_v10  ;;  %v189_v10 = vld [vmem:[%s16159_s1 + $0x3f8] sm:$0xff] }
  0xe7   :  { %9557 = vmatprep.subr.bf16.mxu0 %v13171_v12  ;;  %v13196_v12 = vld [vmem:[#allocation2 + $0x7b8] ss:$76 sps:$4 sm:$0xff]   ;;  %v11543_v22 = vcombine.low %v185_v9, %v189_v10 }
  0xe8   :  { %1895 = vmatpush1.bf16.msra.mxu1 %v11455_v14  ;;  %v13201_v14 = vld [vmem:[#allocation2 + $0x854] ss:$76 sps:$4 sm:$0xff]  }
  0xe9   :  { %1896 = vmatprep.subr.bf16.mxu1 %v11464_v20  ;;  %v11544_v20 = vcombine.high %v185_v9, %v189_v10 }
  0xea   :  { %9558 = vmatpush1.bf16.msra.mxu0 %v13169_v18  ;;  %v197_v18 = vld [vmem:[%s16159_s1 + $0x438] sm:$0xff] }
  0xeb   :  { %9559 = vmatprep.subr.bf16.mxu0 %v13174_v19  ;;  %v13199_v19 = vld [vmem:[#allocation2 + $0x850] ss:$76 sps:$4 sm:$0xff]   ;;  %v11551_v29 = vcombine.low %v193_v17, %v197_v18 }
  0xec   :  { %1897 = vmatpush1.bf16.msra.mxu1 %v11463_v21  ;;  %v13204_v21 = vld [vmem:[#allocation2 + $0x8ec] ss:$76 sps:$4 sm:$0xff]  }
  0xed   :  { %1898 = vmatprep.subr.bf16.mxu1 %v11472_v26  ;;  %v11552_v26 = vcombine.high %v193_v17, %v197_v18  ;;  %v269_v17 = vld [vmem:[%s16159_s1 + $0x678] sm:$0xff] }
  0xee   :  { %9560 = vmatpush1.bf16.msra.mxu0 %v13172_v24  ;;  %v205_v24 = vld [vmem:[%s16159_s1 + $0x478] sm:$0xff] }
  0xef   :  { %9561 = vmatprep.subr.bf16.mxu0 %v13177_v25  ;;  %v13202_v25 = vld [vmem:[#allocation2 + $0x8e8] ss:$76 sps:$4 sm:$0xff]  }
  0xf0   :  { %1899 = vmatpush1.bf16.msra.mxu1 %v11471_v27  ;;  %v13246_v27 = vld [vmem:[#allocation2 + $0x984] ss:$76 sps:$4 sm:$0xff]  }
  0xf1   :  { %1900 = vmatprep.subr.bf16.mxu1 %v11480_v63  ;;  %v11559_v63 = vcombine.low %v201_v23, %v205_v24 }
  0xf2   :  { %9562 = vmatpush1.bf16.msra.mxu0 %v13175_v31  ;;  %v11560_v31 = vcombine.high %v201_v23, %v205_v24  ;;  %v281_v23 = vld [vmem:[%s16159_s1 + $0x6d8] sm:$0xff] }
  0xf3   :  { %9563 = vmatprep.subr.bf16.mxu0 %v13180_v33  ;;  %v213_v33 = vld [vmem:[%s16159_s1 + $0x4b8] sm:$0xff] }
  0xf4   :  { %1901 = vmatpush1.bf16.msra.mxu1 %v11479_v34  ;;  %v217_v34 = vld [vmem:[%s16159_s1 + $0x4d8] sm:$0xff]  ;;  %v11568_v35 = vcombine.high %v209_v30, %v213_v33 }
  0xf5   :  { %1902 = vmatprep.subr.bf16.mxu1 %v11488_v38  ;;  %v229_v38 = vld [vmem:[%s16159_s1 + $0x538] sm:$0xff] }
  0xf6   :  { %9564 = vmatpush1.bf16.msra.mxu0 %v13178_v5  ;;  %v11567_v5 = vcombine.low %v209_v30, %v213_v33 }
  0xf7   :  { %9565 = vmatprep.subr.bf16.mxu0 %v13183_v37  ;;  %v11576_v37 = vcombine.high %v217_v34, %v221_v36 }
  0xf8   :  { %1903 = vmatpush1.bf16.msra.mxu1 %v11487_v39  ;;  %v233_v39 = vld [vmem:[%s16159_s1 + $0x558] sm:$0xff] }
  0xf9   :  { %1904 = vmatprep.subr.bf16.mxu1 %v11496_v45  ;;  %v318_v45 = vld [vmem:[%s16160_s2] sm:$0xff]  ;;  %v11592_v48 = vcombine.high %v233_v39, %v237_v41 }
  0xfa   :  { %9566 = vmatpush1.bf16.msra.mxu0 %v13181_v42  ;;  %v15885_v42 = vsub.s32 0, %v15197_v44 }
  0xfb   :  { %9567 = vmatprep.subr.bf16.mxu0 %v13186_v43 }
  0xfc   :  { %1905 = vmatpush1.bf16.msra.mxu1 %v11495_v46  ;;  %v15891_v46 = vsub.s32 1, %v15197_v44 }
  0xfd   :  { %1906 = vmatprep.subr.bf16.mxu1 %v11504_v51 }
  0xfe   :  { %9568 = vmatpush1.bf16.msra.mxu0 %v13184_v49  ;;  %v245_v49 = vld [vmem:[%s16159_s1 + $0x5b8] sm:$0xff]  ;;  %v327_v51 = vrot.slane %v318_v45, %v15891_v46 }
  0xff   :  { %9569 = vmatprep.subr.bf16.mxu0 %v13189_v50  ;;  %v323_v50 = vrot.slane %v318_v45, %v15885_v42  ;;  %v11600_v54 = vcombine.high %v241_v47, %v245_v49  ;;  %v317_v45 = vld [vmem:[%s16159_s1 + $0x7f8] sm:$0xff] }
 0x100   :  { %1907 = vmatpush1.bf16.msra.mxu1 %v11503_v52  ;;  %v11591_v52 = vcombine.low %v233_v39, %v237_v41  ;;  %v309_v39 = vld [vmem:[%s16159_s1 + $0x7b8] sm:$0xff] }
 0x101   :  { %1908 = vmatprep.subr.bf16.mxu1 %v11512_v58 }
 0x102   :  { %9570 = vmatpush1.bf16.msra.mxu0 %v13187_v56 }
 0x103   :  { %9571 = vmatprep.subr.bf16.mxu0 %v13192_v57  ;;  %v253_v57 = vld [vmem:[%s16159_s1 + $0x5f8] sm:$0xff] }
 0x104   :  { %1909 = vmatpush1.bf16.msra.mxu1 %v11511_v59 }
 0x105   :  { %1910 = vmatprep.subr.bf16.mxu1 %v11520_v1  ;;  %v11599_v1 = vcombine.low %v241_v47, %v245_v49 }
 0x106   :  { %9572 = vmatpush1.bf16.msra.mxu0 %v13190_v62 }
 0x107   :  { %9573 = vmatprep.subr.bf16.mxu0 %v13195_v0 }
 0x108   :  { %1911 = vmatpush1.bf16.msra.mxu1 %v11519_v2  ;;  %v257_v2 = vld [vmem:[%s16159_s1 + $0x618] sm:$0xff] }
 0x109   :  { %1912 = vmatprep.subr.bf16.mxu1 %v11528_v8 }
 0x10a   :  { %9574 = vmatpush1.bf16.msra.mxu0 %v13193_v6  ;;  %v11608_v6 = vcombine.high %v249_v55, %v253_v57 }
 0x10b   :  { %9575 = vmatprep.subr.bf16.mxu0 %v13198_v7 }
 0x10c   :  { %1913 = vmatpush1.bf16.msra.mxu1 %v11527_v11  ;;  %v261_v11 = vld [vmem:[%s16159_s1 + $0x638] sm:$0xff] }
 0x10d   :  { %1914 = vmatprep.subr.bf16.mxu1 %v11536_v13  ;;  %v11607_v13 = vcombine.low %v249_v55, %v253_v57  ;;  %v11615_v18 = vcombine.low %v257_v2, %v261_v11  ;;  %v13258_v57 = vld [vmem:[#allocation2 + $0xab4] ss:$76 sps:$4 sm:$0xff]  }
 0x10e   :  { %9576 = vmatpush1.bf16.msra.mxu0 %v13196_v12 }
 0x10f   :  { %9577 = vmatprep.subr.bf16.mxu0 %v13201_v14  ;;  %v265_v14 = vld [vmem:[%s16159_s1 + $0x658] sm:$0xff] }
 0x110   :  { %1915 = vmatpush1.bf16.msra.mxu1 %v11535_v15  ;;  %v11616_v15 = vcombine.high %v257_v2, %v261_v11  ;;  %v13270_v2 = vld [vmem:[#allocation2 + $0xbe4] ss:$76 sps:$4 sm:$0xff]   ;;  %v13216_v11 = vld [vmem:[#allocation2 + $0x1d4] ss:$76 sps:$4 sm:$0xff]  }
 0x111   :  { %1916 = vmatprep.subr.bf16.mxu1 %v11544_v20  ;;  %v11624_v20 = vcombine.high %v265_v14, %v269_v17 }
 0x112   :  { %9578 = vmatpush1.bf16.msra.mxu0 %v13199_v19  ;;  %v273_v19 = vld [vmem:[%s16159_s1 + $0x698] sm:$0xff] }
 0x113   :  { %9579 = vmatprep.subr.bf16.mxu0 %v13204_v21  ;;  %v277_v21 = vld [vmem:[%s16159_s1 + $0x6b8] sm:$0xff] }
 0x114   :  { %1917 = vmatpush1.bf16.msra.mxu1 %v11543_v22  ;;  %v11623_v22 = vcombine.low %v265_v14, %v269_v17  ;;  %v11632_v24 = vcombine.high %v273_v19, %v277_v21  ;;  %v11631_v30 = vcombine.low %v273_v19, %v277_v21  ;;  %v13288_v14 = vld [vmem:[#allocation2 + $0xdac] ss:$76 sps:$4 sm:$0xff]   ;;  %v13222_v17 = vld [vmem:[#allocation2 + $0x304] ss:$76 sps:$4 sm:$0xff]   ;;  %v13225_v21 = vld [vmem:[#allocation2 + $0x39c] ss:$76 sps:$4 sm:$0xff]  }
 0x115   :  { %1927 = vmatprep.subr.bf16.mxu1 %v11552_v26  ;;  %v13294_v19 = vld [vmem:[#allocation2 + $0xe44] ss:$76 sps:$4 sm:$0xff]  }
 0x116   :  { %9580 = vmatpush1.bf16.msra.mxu0 %v13202_v25  ;;  %v285_v25 = vld [vmem:[%s16159_s1 + $0x6f8] sm:$0xff] }
 0x117   :  { %9590 = vmatprep.subr.bf16.mxu0 %v13246_v27  ;;  %1919 = vmatmul.mubr.bf16.vlgmr.msra.gmra.mrb[8].mxu1 %v15367_v28  ;;  %v225_v28 = vld [vmem:[%s16159_s1 + $0x518] sm:$0xff] }
 0x118   :  { %1928 = vmatpush1.bf16.msra.mxu1 %v11551_v29  ;;  %1959 = vmatprep.mubr.bf16.mxu1 %v15260_v16  ;;  %v11575_v16 = vcombine.low %v217_v34, %v221_v36  ;;  %v11584_v40 = vcombine.high %v225_v28, %v229_v38  ;;  %v11583_v43 = vcombine.low %v225_v28, %v229_v38  ;;  %v293_v34 = vld [vmem:[%s16159_s1 + $0x738] sm:$0xff] }
 0x119   :  { %1929 = vmatprep.subr.bf16.mxu1 %v11560_v31  ;;  %v289_v31 = vld [vmem:[%s16159_s1 + $0x718] sm:$0xff] }
 0x11a   :  { %v297_v36 = vld [vmem:[%s16159_s1 + $0x758] sm:$0xff] }
 0x11b   :  { %v301_v28 = vld [vmem:[%s16159_s1 + $0x778] sm:$0xff] }
 0x11c   :  { %1930 = vmatpush1.bf16.msra.mxu1 %v11559_v63  ;;  %v11640_v63 = vcombine.high %v281_v23, %v285_v25  ;;  %v305_v38 = vld [vmem:[%s16159_s1 + $0x798] sm:$0xff]  ;;  %v11655_v41 = vcombine.low %v297_v36, %v301_v28 }
 0x11d   :  { %1931 = vmatprep.subr.bf16.mxu1 %v11568_v35  ;;  %v11639_v35 = vcombine.low %v281_v23, %v285_v25  ;;  %v11664_v49 = vcombine.high %v305_v38, %v309_v39  ;;  %v13300_v23 = vld [vmem:[#allocation2 + $0xedc] ss:$76 sps:$4 sm:$0xff]   ;;  %v13228_v25 = vld [vmem:[#allocation2 + $0x434] ss:$76 sps:$4 sm:$0xff]  }
 0x120   :  { %1932 = vmatpush1.bf16.msra.mxu1 %v11567_v5  ;;  %v11648_v5 = vcombine.high %v289_v31, %v293_v34 }
 0x121   :  { %1933 = vmatprep.subr.bf16.mxu1 %v11576_v37  ;;  %v11647_v37 = vcombine.low %v289_v31, %v293_v34  ;;  %v13304_v31 = vld [vmem:[#allocation2 + $0xf70] ss:$76 sps:$4 sm:$0xff]  }
 0x122   :  { %v13234_v34 = vld [vmem:[#allocation2 + $0x564] ss:$76 sps:$4 sm:$0xff]  }
 0x124   :  { %1934 = vmatpush1.bf16.msra.mxu1 %v11575_v16  ;;  %v11656_v16 = vcombine.high %v297_v36, %v301_v28  ;;  %v13318_v36 = vld [vmem:[#allocation2 + $0x10a4] ss:$76 sps:$4 sm:$0xff]   ;;  %v13237_v28 = vld [vmem:[#allocation2 + $0x5fc] ss:$76 sps:$4 sm:$0xff]  }
 0x125   :  { %1935 = vmatprep.subr.bf16.mxu1 %v11584_v40 }
 0x128   :  { %1936 = vmatpush1.bf16.msra.mxu1 %v11583_v43  ;;  %v313_v43 = vld [vmem:[%s16159_s1 + $0x7d8] sm:$0xff] }
 0x129   :  { %1937 = vmatprep.subr.bf16.mxu1 %v11592_v48  ;;  %v11672_v55 = vcombine.high %v313_v43, %v317_v45 }
 0x12a   :  { %v1674_v56 = vpop.f32.mrb[0].mxu1 }
 0x12b   :  { %v1675_v58 = vadd.f32 %v1674_v56, %v323_v50  ;;  %v1676_v59 = vpop.f32.mrb[1].mxu1  ;;  %v13250_v56 = vld [vmem:[#allocation2 + $0xa18] ss:$76 sps:$4 sm:$0xff]  }
 0x12c   :  { %v1715_v60 = vpop.f32.mrb[0].mxu0  ;;  %v1677_v61 = vadd.f32 %v1676_v59, %v327_v51  ;;  %v1678_v62 = vpop.f32.mrb[2].mxu1  ;;  %1938 = vmatpush1.bf16.msra.mxu1 %v11591_v52  ;;  %v13244_v51 = vld [vmem:[#allocation2 + $0x980] ss:$76 sps:$4 sm:$0xff]   ;;  %v13252_v52 = vld [vmem:[#allocation2 + $0xa1c] ss:$76 sps:$4 sm:$0xff]  }
 0x12d   :  { %v1717_v0 = vpop.f32.mrb[1].mxu0  ;;  %v1716_v3 = vadd.f32 %v1715_v60, %v1675_v58  ;;  %v1679_v4 = vpop.f32.mrb[3].mxu1  ;;  %1939 = vmatprep.subr.bf16.mxu1 %v11600_v54  ;;  %v11663_v54 = vcombine.low %v305_v38, %v309_v39  ;;  %v11671_v58 = vcombine.low %v313_v43, %v317_v45  ;;  %v13207_v59 = vld [vmem:[#allocation2 + $0xc] ss:$76 sps:$4 sm:$0xff]   ;;  %v13256_v60 = vld [vmem:[#allocation2 + $0xab0] ss:$76 sps:$4 sm:$0xff]  }
 0x12e   :  { %v1719_v7 = vpop.f32.mrb[2].mxu0  ;;  %v1718_v8 = vadd.f32 %v1717_v0, %v1677_v61  ;;  %v13264_v61 = vld [vmem:[#allocation2 + $0xb4c] ss:$76 sps:$4 sm:$0xff]   ;;  %v13205_v62 = vld [vmem:[#allocation2 + $0x8] ss:$76 sps:$4 sm:$0xff]  }
 0x12f   :  { %v1720_v9 = vpop.f32.mrb[3].mxu0  ;;  %v11673_v10 = vmul.f32 -1.442695, %v1716_v3  ;;  %v13210_v0 = vld [vmem:[#allocation2 + $0xa4] ss:$76 sps:$4 sm:$0xff]  }
 0x130   :  { %v11674_v12 = vmul.f32 -1.442695, %v1718_v8  ;;  %1940 = vmatpush1.bf16.msra.mxu1 %v11599_v1  ;;  %v13262_v1 = vld [vmem:[#allocation2 + $0xb48] ss:$76 sps:$4 sm:$0xff]   ;;  %v13208_v3 = vld [vmem:[#allocation2 + $0xa0] ss:$76 sps:$4 sm:$0xff]  }
 0x131   :  { %14949 = vpow2.f32 %v11673_v10  ;;  %1941 = vmatprep.subr.bf16.mxu1 %v11608_v6  ;;  %v13213_v4 = vld [vmem:[#allocation2 + $0x13c] ss:$76 sps:$4 sm:$0xff]   ;;  %v13268_v6 = vld [vmem:[#allocation2 + $0xbe0] ss:$76 sps:$4 sm:$0xff]   ;;  %v13211_v8 = vld [vmem:[#allocation2 + $0x138] ss:$76 sps:$4 sm:$0xff]  }
 0x132   :  { %14951 = vpow2.f32 %v11674_v12  ;;  %v13276_v7 = vld [vmem:[#allocation2 + $0xc7c] ss:$76 sps:$4 sm:$0xff]   ;;  %v13274_v9 = vld [vmem:[#allocation2 + $0xc78] ss:$76 sps:$4 sm:$0xff]   ;;  %v13240_v39 = vld [vmem:[#allocation2 + $0x694] ss:$76 sps:$4 sm:$0xff]  }
 0x133   :  { %v13214_v10 = vld [vmem:[#allocation2 + $0x1d0] ss:$76 sps:$4 sm:$0xff]   ;;  %v13219_v12 = vld [vmem:[#allocation2 + $0x26c] ss:$76 sps:$4 sm:$0xff]  }
 0x134   :  { %1942 = vmatpush1.bf16.msra.mxu1 %v11607_v13  ;;  %v13280_v13 = vld [vmem:[#allocation2 + $0xd10] ss:$76 sps:$4 sm:$0xff]   ;;  %v13243_v45 = vld [vmem:[#allocation2 + $0x72c] ss:$76 sps:$4 sm:$0xff]  }
 0x135   :  { %1943 = vmatprep.subr.bf16.mxu1 %v11616_v15  ;;  %v13217_v15 = vld [vmem:[#allocation2 + $0x268] ss:$76 sps:$4 sm:$0xff]   ;;  %v13238_v43 = vld [vmem:[#allocation2 + $0x690] ss:$76 sps:$4 sm:$0xff]  }
 0x136   :  { %v13324_v38 = vld [vmem:[#allocation2 + $0x113c] ss:$76 sps:$4 sm:$0xff]  }
 0x138   :  { %1944 = vmatpush1.bf16.msra.mxu1 %v11615_v18  ;;  %v13286_v18 = vld [vmem:[#allocation2 + $0xda8] ss:$76 sps:$4 sm:$0xff]  }
 0x139   :  { %1945 = vmatprep.subr.bf16.mxu1 %v11624_v20  ;;  %v13220_v20 = vld [vmem:[#allocation2 + $0x300] ss:$76 sps:$4 sm:$0xff]  }
 0x13b   :  { %v14950_v26 = vpop.eup %14949 }
 0x13c   :  { %v14952_v27 = vpop.eup %14951  ;;  %v1992_v29 = vadd.f32 1.0, %v14950_v26  ;;  %1946 = vmatpush1.bf16.msra.mxu1 %v11623_v22  ;;  %v13292_v22 = vld [vmem:[#allocation2 + $0xe40] ss:$76 sps:$4 sm:$0xff]   ;;  %v13298_v26 = vld [vmem:[#allocation2 + $0xed8] ss:$76 sps:$4 sm:$0xff]  }
 0x13d   :  { %v1993_v33 = vadd.f32 1.0, %v14952_v27  ;;  %1947 = vmatprep.subr.bf16.mxu1 %v11632_v24  ;;  %v13223_v24 = vld [vmem:[#allocation2 + $0x398] ss:$76 sps:$4 sm:$0xff]   ;;  %v13306_v27 = vld [vmem:[#allocation2 + $0xf74] ss:$76 sps:$4 sm:$0xff]  }
 0x13e   :  { %14953 = vrcp.f32 %v1992_v29  ;;  %v13226_v29 = vld [vmem:[#allocation2 + $0x430] ss:$76 sps:$4 sm:$0xff]  }
 0x13f   :  { %14955 = vrcp.f32 %v1993_v33  ;;  %v13312_v33 = vld [vmem:[#allocation2 + $0x100c] ss:$76 sps:$4 sm:$0xff]  }
 0x140   :  { %1948 = vmatpush1.bf16.msra.mxu1 %v11631_v30  ;;  %v13231_v30 = vld [vmem:[#allocation2 + $0x4cc] ss:$76 sps:$4 sm:$0xff]  }
 0x141   :  { %1949 = vmatprep.subr.bf16.mxu1 %v11640_v63  ;;  %v13229_v63 = vld [vmem:[#allocation2 + $0x4c8] ss:$76 sps:$4 sm:$0xff]  }
 0x144   :  { %1950 = vmatpush1.bf16.msra.mxu1 %v11639_v35  ;;  %v13310_v35 = vld [vmem:[#allocation2 + $0x1008] ss:$76 sps:$4 sm:$0xff]  }
 0x145   :  { %1951 = vmatprep.subr.bf16.mxu1 %v11648_v5  ;;  %v13232_v5 = vld [vmem:[#allocation2 + $0x560] ss:$76 sps:$4 sm:$0xff]  }
 0x148   :  { %v14954_v40 = vpop.eup %14953  ;;  %1952 = vmatpush1.bf16.msra.mxu1 %v11647_v37  ;;  %v13316_v37 = vld [vmem:[#allocation2 + $0x10a0] ss:$76 sps:$4 sm:$0xff]  }
 0x149   :  { %v14956_v47 = vpop.eup %14955  ;;  %v15955_v48 = vpack.c.bf16 %v14954_v40, %v14954_v40  ;;  %1953 = vmatprep.subr.bf16.mxu1 %v11656_v16  ;;  %v13235_v16 = vld [vmem:[#allocation2 + $0x5f8] ss:$76 sps:$4 sm:$0xff]  }
 0x14a   :  { %v15957_v50 = vpack.c.bf16 %v14956_v47, %v14956_v47  ;;  %v13322_v40 = vld [vmem:[#allocation2 + $0x1138] ss:$76 sps:$4 sm:$0xff]   ;;  %v13328_v47 = vld [vmem:[#allocation2 + $0x11d0] ss:$76 sps:$4 sm:$0xff]  }
 0x14c   :  { %1954 = vmatpush1.bf16.msra.mxu1 %v11655_v41  ;;  %9581 = vmatprep.mubr.bf16.mxu0 %v15957_v50  ;;  %v13330_v41 = vld [vmem:[#allocation2 + $0x11d4] ss:$76 sps:$4 sm:$0xff]  }
 0x14d   :  { %9582 = vmatmul.mubr.bf16.vlgmr.msra.gmra.mrb[8].mxu0 %v15955_v48  ;;  %1955 = vmatprep.subr.bf16.mxu1 %v11664_v49  ;;  %v13336_v49 = vld [vmem:[#allocation2 + $0x126c] ss:$76 sps:$4 sm:$0xff]  }
 0x14e   :  { %9591 = vmatpush1.bf16.msra.mxu0 %v13244_v51  ;;  %v13241_v51 = vld [vmem:[#allocation2 + $0x728] ss:$76 sps:$4 sm:$0xff]  }
 0x14f   :  { %9592 = vmatprep.subr.bf16.mxu0 %v13252_v52  ;;  %v13249_v52 = vld [vmem:[#allocation2 + $0x7c4] ss:$76 sps:$4 sm:$0xff]  }
 0x150   :  { %1956 = vmatpush1.bf16.msra.mxu1 %v11663_v54  ;;  %v13334_v54 = vld [vmem:[#allocation2 + $0x1268] ss:$76 sps:$4 sm:$0xff]  }
 0x151   :  { %1957 = vmatprep.subr.bf16.mxu1 %v11672_v55  ;;  %v13247_v55 = vld [vmem:[#allocation2 + $0x7c0] ss:$76 sps:$4 sm:$0xff]  }
 0x152   :  { %9593 = vmatpush1.bf16.msra.mxu0 %v13250_v56  ;;  %v13342_v56 = vld [vmem:[#allocation2 + $0x1304] ss:$76 sps:$4 sm:$0xff]  }
 0x153   :  { %9594 = vmatprep.subr.bf16.mxu0 %v13258_v57  ;;  %v13255_v57 = vld [vmem:[#allocation2 + $0x85c] ss:$76 sps:$4 sm:$0xff]  }
 0x154   :  { %1958 = vmatpush1.bf16.msra.mxu1 %v11671_v58  ;;  %v13253_v58 = vld [vmem:[#allocation2 + $0x858] ss:$76 sps:$4 sm:$0xff]  }
 0x155   :  { %9713 = vmatprep.subr.bf16.mxu1 %v13207_v59  ;;  %v13261_v59 = vld [vmem:[#allocation2 + $0x8f4] ss:$76 sps:$4 sm:$0xff]  }
 0x156   :  { %9595 = vmatpush1.bf16.msra.mxu0 %v13256_v60  ;;  %v13259_v60 = vld [vmem:[#allocation2 + $0x8f0] ss:$76 sps:$4 sm:$0xff]  }
 0x157   :  { %1960 = vmatmul.mubr.bf16.vlgmr.msra.gmra.mrb[8].mxu1 %v15377_v32  ;;  %9596 = vmatprep.subr.bf16.mxu0 %v13264_v61  ;;  %v13282_v32 = vld [vmem:[#allocation2 + $0xd14] ss:$76 sps:$4 sm:$0xff]   ;;  %v13267_v61 = vld [vmem:[#allocation2 + $0x98c] ss:$76 sps:$4 sm:$0xff]  }
 0x158   :  { %9714 = vmatpush1.bf16.msra.mxu1 %v13205_v62  ;;  %9745 = vmatprep.mubr.bf16.mxu1 %v15957_v50  ;;  %v13265_v62 = vld [vmem:[#allocation2 + $0x988] ss:$76 sps:$4 sm:$0xff]  }
 0x159   :  { %9715 = vmatprep.subr.bf16.mxu1 %v13210_v0  ;;  %v13273_v0 = vld [vmem:[#allocation2 + $0xa24] ss:$76 sps:$4 sm:$0xff]  }
 0x15a   :  { %9597 = vmatpush1.bf16.msra.mxu0 %v13262_v1  ;;  %v13271_v1 = vld [vmem:[#allocation2 + $0xa20] ss:$76 sps:$4 sm:$0xff]  }
 0x15b   :  { %9598 = vmatprep.subr.bf16.mxu0 %v13270_v2  ;;  %v13279_v2 = vld [vmem:[#allocation2 + $0xabc] ss:$76 sps:$4 sm:$0xff]  }
 0x15c   :  { %9716 = vmatpush1.bf16.msra.mxu1 %v13208_v3  ;;  %v13277_v3 = vld [vmem:[#allocation2 + $0xab8] ss:$76 sps:$4 sm:$0xff]  }
 0x15d   :  { %9717 = vmatprep.subr.bf16.mxu1 %v13213_v4  ;;  %v13285_v4 = vld [vmem:[#allocation2 + $0xb54] ss:$76 sps:$4 sm:$0xff]  }
 0x15e   :  { %9599 = vmatpush1.bf16.msra.mxu0 %v13268_v6  ;;  %v13283_v6 = vld [vmem:[#allocation2 + $0xb50] ss:$76 sps:$4 sm:$0xff]  }
 0x15f   :  { %9600 = vmatprep.subr.bf16.mxu0 %v13276_v7  ;;  %v13291_v7 = vld [vmem:[#allocation2 + $0xbec] ss:$76 sps:$4 sm:$0xff]  }
 0x160   :  { %9718 = vmatpush1.bf16.msra.mxu1 %v13211_v8  ;;  %v15965_v8 = vsub.s32 2, %v15197_v44 }
 0x161   :  { %9719 = vmatprep.subr.bf16.mxu1 %v13216_v11  ;;  %v13289_v11 = vld [vmem:[#allocation2 + $0xbe8] ss:$76 sps:$4 sm:$0xff]  }
 0x162   :  { %9601 = vmatpush1.bf16.msra.mxu0 %v13274_v9  ;;  %v15968_v9 = vsub.s32 3, %v15197_v44 }
 0x163   :  { %9602 = vmatprep.subr.bf16.mxu0 %v13282_v32  ;;  %v15971_v32 = vsub.s32 5, %v15197_v44 }
 0x164   :  { %9720 = vmatpush1.bf16.msra.mxu1 %v13214_v10  ;;  %v13297_v10 = vld [vmem:[#allocation2 + $0xc84] ss:$76 sps:$4 sm:$0xff]  }
 0x165   :  { %9721 = vmatprep.subr.bf16.mxu1 %v13219_v12  ;;  %v15976_v12 = vld [vmem:[%s16160_s2] sm:$0xff] }
 0x166   :  { %9603 = vmatpush1.bf16.msra.mxu0 %v13280_v13  ;;  %v331_v13 = vrot.slane %v15976_v12, %v15965_v8 }
 0x167   :  { %9604 = vmatprep.subr.bf16.mxu0 %v13288_v14  ;;  %v13295_v14 = vld [vmem:[#allocation2 + $0xc80] ss:$76 sps:$4 sm:$0xff]  }
 0x168   :  { %9722 = vmatpush1.bf16.msra.mxu1 %v13217_v15  ;;  %v335_v15 = vrot.slane %v15976_v12, %v15968_v9 }
 0x169   :  { %9723 = vmatprep.subr.bf16.mxu1 %v13222_v17  ;;  %v13303_v17 = vld [vmem:[#allocation2 + $0xd1c] ss:$76 sps:$4 sm:$0xff]  }
 0x16a   :  { %9605 = vmatpush1.bf16.msra.mxu0 %v13286_v18  ;;  %v343_v18 = vrot.slane %v15976_v12, %v15971_v32 }
 0x16b   :  { %9606 = vmatprep.subr.bf16.mxu0 %v13294_v19 }
 0x16c   :  { %9724 = vmatpush1.bf16.msra.mxu1 %v13220_v20 }
 0x16d   :  { %9725 = vmatprep.subr.bf16.mxu1 %v13225_v21 }
 0x16e   :  { %9607 = vmatpush1.bf16.msra.mxu0 %v13292_v22 }
 0x16f   :  { %9608 = vmatprep.subr.bf16.mxu0 %v13300_v23  ;;  %v13301_v23 = vld [vmem:[#allocation2 + $0xd18] ss:$76 sps:$4 sm:$0xff]  }
 0x170   :  { %9726 = vmatpush1.bf16.msra.mxu1 %v13223_v24 }
 0x171   :  { %9727 = vmatprep.subr.bf16.mxu1 %v13228_v25 }
 0x172   :  { %9609 = vmatpush1.bf16.msra.mxu0 %v13298_v26 }
 0x173   :  { %9610 = vmatprep.subr.bf16.mxu0 %v13306_v27  ;;  %v13309_v27 = vld [vmem:[#allocation2 + $0xdb4] ss:$76 sps:$4 sm:$0xff]  }
 0x174   :  { %9728 = vmatpush1.bf16.msra.mxu1 %v13226_v29 }
 0x175   :  { %9729 = vmatprep.subr.bf16.mxu1 %v13231_v30 }
 0x176   :  { %9611 = vmatpush1.bf16.msra.mxu0 %v13304_v31 }
 0x177   :  { %9612 = vmatprep.subr.bf16.mxu0 %v13312_v33 }
 0x178   :  { %9730 = vmatpush1.bf16.msra.mxu1 %v13229_v63 }
 0x179   :  { %9731 = vmatprep.subr.bf16.mxu1 %v13234_v34 }
 0x17a   :  { %9613 = vmatpush1.bf16.msra.mxu0 %v13310_v35 }
 0x17b   :  { %9614 = vmatprep.subr.bf16.mxu0 %v13318_v36  ;;  %v13307_v36 = vld [vmem:[#allocation2 + $0xdb0] ss:$76 sps:$4 sm:$0xff]  }
 0x17c   :  { %9732 = vmatpush1.bf16.msra.mxu1 %v13232_v5  ;;  %v13315_v5 = vld [vmem:[#allocation2 + $0xe4c] ss:$76 sps:$4 sm:$0xff]  }
 0x17d   :  { %9733 = vmatprep.subr.bf16.mxu1 %v13237_v28  ;;  %v13313_v28 = vld [vmem:[#allocation2 + $0xe48] ss:$76 sps:$4 sm:$0xff]  }
 0x17e   :  { %9615 = vmatpush1.bf16.msra.mxu0 %v13316_v37  ;;  %v13321_v37 = vld [vmem:[#allocation2 + $0xee4] ss:$76 sps:$4 sm:$0xff]  }
 0x17f   :  { %9616 = vmatprep.subr.bf16.mxu0 %v13324_v38  ;;  %v13319_v38 = vld [vmem:[#allocation2 + $0xee0] ss:$76 sps:$4 sm:$0xff]  }
 0x180   :  { %9734 = vmatpush1.bf16.msra.mxu1 %v13235_v16  ;;  %v13327_v16 = vld [vmem:[#allocation2 + $0xf7c] ss:$76 sps:$4 sm:$0xff]  }
 0x181   :  { %9735 = vmatprep.subr.bf16.mxu1 %v13240_v39 }
 0x182   :  { %9617 = vmatpush1.bf16.msra.mxu0 %v13322_v40 }
 0x183   :  { %9618 = vmatprep.subr.bf16.mxu0 %v13330_v41 }
 0x184   :  { %9736 = vmatpush1.bf16.msra.mxu1 %v13238_v43  ;;  %v13325_v43 = vld [vmem:[#allocation2 + $0xf78] ss:$76 sps:$4 sm:$0xff]  }
 0x185   :  { %9737 = vmatprep.subr.bf16.mxu1 %v13243_v45 }
 0x186   :  { %9619 = vmatpush1.bf16.msra.mxu0 %v13328_v47 }
 0x187   :  { %9620 = vmatprep.subr.bf16.mxu0 %v13336_v49  ;;  %v13333_v49 = vld [vmem:[#allocation2 + $0x1014] ss:$76 sps:$4 sm:$0xff]  }
 0x188   :  { %9738 = vmatpush1.bf16.msra.mxu1 %v13241_v51 }
 0x189   :  { %9739 = vmatprep.subr.bf16.mxu1 %v13249_v52  ;;  %v13331_v52 = vld [vmem:[#allocation2 + $0x1010] ss:$76 sps:$4 sm:$0xff]  }
 0x18a   :  { %9621 = vmatpush1.bf16.msra.mxu0 %v13334_v54  ;;  %v13339_v54 = vld [vmem:[#allocation2 + $0x10ac] ss:$76 sps:$4 sm:$0xff]  }
 0x18b   :  { %9631 = vmatprep.subr.bf16.mxu0 %v13342_v56  ;;  %v13345_v56 = vld [vmem:[#allocation2 + $0x1144] ss:$76 sps:$4 sm:$0xff]  }
 0x18c   :  { %9740 = vmatpush1.bf16.msra.mxu1 %v13247_v55  ;;  %v13337_v55 = vld [vmem:[#allocation2 + $0x10a8] ss:$76 sps:$4 sm:$0xff]  }
 0x18d   :  { %9741 = vmatprep.subr.bf16.mxu1 %v13255_v57 }
 0x190   :  { %9742 = vmatpush1.bf16.msra.mxu1 %v13253_v58  ;;  %v13340_v58 = vld [vmem:[#allocation2 + $0x1300] ss:$76 sps:$4 sm:$0xff]  }
 0x191   :  { %9743 = vmatprep.subr.bf16.mxu1 %v13261_v59 }
 0x194   :  { %9744 = vmatpush1.bf16.msra.mxu1 %v13259_v60  ;;  %v13343_v60 = vld [vmem:[#allocation2 + $0x1140] ss:$76 sps:$4 sm:$0xff]  }
 0x195   :  { %9754 = vmatprep.subr.bf16.mxu1 %v13267_v61 }
 0x197   :  { %9746 = vmatmul.mubr.bf16.vlgmr.msra.gmra.mrb[12].mxu1 %v15955_v48 }
 0x198   :  { %9755 = vmatpush1.bf16.msra.mxu1 %v13265_v62 }
 0x199   :  { %9756 = vmatprep.subr.bf16.mxu1 %v13273_v0 }
 0x19c   :  { %9757 = vmatpush1.bf16.msra.mxu1 %v13271_v1  ;;  %v13348_v1 = vld [vmem:[#allocation2 + $0x139c] ss:$76 sps:$4 sm:$0xff]  }
 0x19d   :  { %9758 = vmatprep.subr.bf16.mxu1 %v13279_v2  ;;  %v13351_v2 = vld [vmem:[#allocation2 + $0x11dc] ss:$76 sps:$4 sm:$0xff]  }
 0x1a0   :  { %9759 = vmatpush1.bf16.msra.mxu1 %v13277_v3 }
 0x1a1   :  { %9760 = vmatprep.subr.bf16.mxu1 %v13285_v4  ;;  %v13349_v4 = vld [vmem:[#allocation2 + $0x11d8] ss:$76 sps:$4 sm:$0xff]  }
 0x1a4   :  { %9761 = vmatpush1.bf16.msra.mxu1 %v13283_v6  ;;  %v13346_v6 = vld [vmem:[#allocation2 + $0x1398] ss:$76 sps:$4 sm:$0xff]  }
 0x1a5   :  { %9762 = vmatprep.subr.bf16.mxu1 %v13291_v7  ;;  %v13357_v7 = vld [vmem:[#allocation2 + $0x1274] ss:$76 sps:$4 sm:$0xff]  }
 0x1a8   :  { %9763 = vmatpush1.bf16.msra.mxu1 %v13289_v11  ;;  %v13354_v11 = vld [vmem:[#allocation2 + $0x1434] ss:$76 sps:$4 sm:$0xff]  }
 0x1a9   :  { %9764 = vmatprep.subr.bf16.mxu1 %v13297_v10  ;;  %v13355_v10 = vld [vmem:[#allocation2 + $0x1270] ss:$76 sps:$4 sm:$0xff]  }
 0x1aa   :  { %v1797_v19 = vpop.f32.mrb[4].mxu1 }
 0x1ab   :  { %v13008_v20 = vadd.f32 %v1797_v19, %v331_v13  ;;  %v1799_v22 = vpop.f32.mrb[5].mxu1  ;;  %v13352_v13 = vld [vmem:[#allocation2 + $0x1430] ss:$76 sps:$4 sm:$0xff]  }
 0x1ac   :  { %v15984_v21 = vpop.f32.mrb[4].mxu0  ;;  %v13009_v24 = vadd.f32 %v1799_v22, %v335_v15  ;;  %v1801_v26 = vpop.f32.mrb[6].mxu1  ;;  %9765 = vmatpush1.bf16.msra.mxu1 %v13295_v14  ;;  %v13363_v14 = vld [vmem:[#allocation2 + $0x130c] ss:$76 sps:$4 sm:$0xff]   ;;  %v13366_v19 = vld [vmem:[#allocation2 + $0x1564] ss:$76 sps:$4 sm:$0xff]  }
 0x1ad   :  { %v1881_v25 = vpop.f32.mrb[5].mxu0  ;;  %v11675_v29 = vmul.f32 -1.442695, %v13008_v20  ;;  %v1802_v33 = vpop.f32.mrb[7].mxu1  ;;  %9766 = vmatprep.subr.bf16.mxu1 %v13303_v17  ;;  %v13360_v15 = vld [vmem:[#allocation2 + $0x14cc] ss:$76 sps:$4 sm:$0xff]  }
 0x1ae   :  { %v13011_v30 = vadd.f32 %v1881_v25, %v343_v18  ;;  %v1883_v31 = vpop.f32.mrb[6].mxu0  ;;  %v11676_v63 = vmul.f32 -1.442695, %v13009_v24  ;;  %v13361_v17 = vld [vmem:[#allocation2 + $0x1308] ss:$76 sps:$4 sm:$0xff]  }
 0x1af   :  { %v1884_v34 = vpop.f32.mrb[7].mxu0  ;;  %14957 = vpow2.f32 %v11675_v29  ;;  %v13358_v18 = vld [vmem:[#allocation2 + $0x14c8] ss:$76 sps:$4 sm:$0xff]   ;;  %v13369_v20 = vld [vmem:[#allocation2 + $0x13a4] ss:$76 sps:$4 sm:$0xff]  }
 0x1b0   :  { %v11678_v35 = vmul.f32 -1.442695, %v13011_v30  ;;  %9767 = vmatpush1.bf16.msra.mxu1 %v13301_v23  ;;  %14959 = vpow2.f32 %v11676_v63  ;;  %v13364_v22 = vld [vmem:[#allocation2 + $0x1560] ss:$76 sps:$4 sm:$0xff]   ;;  %v13372_v24 = vld [vmem:[#allocation2 + $0x15fc] ss:$76 sps:$4 sm:$0xff]  }
 0x1b1   :  { %9768 = vmatprep.subr.bf16.mxu1 %v13309_v27  ;;  %v13367_v23 = vld [vmem:[#allocation2 + $0x13a0] ss:$76 sps:$4 sm:$0xff]   ;;  %v13375_v25 = vld [vmem:[#allocation2 + $0x143c] ss:$76 sps:$4 sm:$0xff]   ;;  %v13370_v26 = vld [vmem:[#allocation2 + $0x15f8] ss:$76 sps:$4 sm:$0xff]  }
 0x1b2   :  { %14961 = vpow2.f32 %v11678_v35  ;;  %v15999_v27 = vsub.s32 4, %v15197_v44  ;;  %v13373_v29 = vld [vmem:[#allocation2 + $0x1438] ss:$76 sps:$4 sm:$0xff]   ;;  %v13378_v30 = vld [vmem:[#allocation2 + $0x1694] ss:$76 sps:$4 sm:$0xff]  }
 0x1b3   :  { %v13381_v31 = vld [vmem:[#allocation2 + $0x14d4] ss:$76 sps:$4 sm:$0xff]   ;;  %v13376_v33 = vld [vmem:[#allocation2 + $0x1690] ss:$76 sps:$4 sm:$0xff]   ;;  %v13384_v35 = vld [vmem:[#allocation2 + $0x172c] ss:$76 sps:$4 sm:$0xff]  }
 0x1b4   :  { %9769 = vmatpush1.bf16.msra.mxu1 %v13307_v36  ;;  %v339_v63 = vrot.slane %v15976_v12, %v15999_v27  ;;  %v13379_v34 = vld [vmem:[#allocation2 + $0x14d0] ss:$76 sps:$4 sm:$0xff]   ;;  %v13387_v36 = vld [vmem:[#allocation2 + $0x156c] ss:$76 sps:$4 sm:$0xff]  }
 0x1b5   :  { %9770 = vmatprep.subr.bf16.mxu1 %v13315_v5  ;;  %v13382_v5 = vld [vmem:[#allocation2 + $0x1728] ss:$76 sps:$4 sm:$0xff]   ;;  %v13391_v12 = vld [vmem:[#allocation2 + $0x1600] ss:$76 sps:$4 sm:$0xff]  }
 0x1b8   :  { %9771 = vmatpush1.bf16.msra.mxu1 %v13313_v28  ;;  %v13010_v28 = vadd.f32 %v15984_v21, %v339_v63  ;;  %v13397_v21 = vld [vmem:[#allocation2 + $0x1698] ss:$76 sps:$4 sm:$0xff]  }
 0x1b9   :  { %v14958_v39 = vpop.eup %14957  ;;  %9772 = vmatprep.subr.bf16.mxu1 %v13321_v37  ;;  %v13385_v37 = vld [vmem:[#allocation2 + $0x1568] ss:$76 sps:$4 sm:$0xff]   ;;  %v13445_v63 = vld [vmem:[#allocation2 + $0x1b58] ss:$76 sps:$4 sm:$0xff]  }
 0x1ba   :  { %v1994_v40 = vadd.f32 1.0, %v14958_v39  ;;  %v14960_v41 = vpop.eup %14959  ;;  %v13388_v39 = vld [vmem:[#allocation2 + $0x17c0] ss:$76 sps:$4 sm:$0xff]  }
 0x1bb   :  { %v1995_v47 = vadd.f32 1.0, %v14960_v41  ;;  %v13396_v41 = vld [vmem:[#allocation2 + $0x185c] ss:$76 sps:$4 sm:$0xff]  }
 0x1bc   :  { %v14962_v45 = vpop.eup %14961  ;;  %9773 = vmatpush1.bf16.msra.mxu1 %v13319_v38  ;;  %14963 = vrcp.f32 %v1994_v40  ;;  %v13390_v38 = vld [vmem:[#allocation2 + $0x17c4] ss:$76 sps:$4 sm:$0xff]   ;;  %v11677_v40 = vmul.f32 -1.442695, %v13010_v28  ;;  %v13456_v28 = vld [vmem:[#allocation2 + $0x1e4c] ss:$76 sps:$4 sm:$0xff]  }
 0x1bd   :  { %v1997_v51 = vadd.f32 1.0, %v14962_v45  ;;  %9774 = vmatprep.subr.bf16.mxu1 %v13327_v16  ;;  %14965 = vrcp.f32 %v1995_v47  ;;  %v13393_v16 = vld [vmem:[#allocation2 + $0x1604] ss:$76 sps:$4 sm:$0xff]   ;;  %v13402_v47 = vld [vmem:[#allocation2 + $0x18f4] ss:$76 sps:$4 sm:$0xff]  }
 0x1be   :  { %v13394_v45 = vld [vmem:[#allocation2 + $0x1858] ss:$76 sps:$4 sm:$0xff]  }
 0x1bf   :  { %14967 = vrcp.f32 %v1997_v51  ;;  %v13400_v51 = vld [vmem:[#allocation2 + $0x18f0] ss:$76 sps:$4 sm:$0xff]  }
 0x1c0   :  { %9775 = vmatpush1.bf16.msra.mxu1 %v13325_v43  ;;  %v13399_v43 = vld [vmem:[#allocation2 + $0x169c] ss:$76 sps:$4 sm:$0xff]   ;;  %14969 = vpow2.f32 %v11677_v40  ;;  %v13465_v40 = vld [vmem:[#allocation2 + $0x1d24] ss:$76 sps:$4 sm:$0xff]  }
 0x1c1   :  { %9776 = vmatprep.subr.bf16.mxu1 %v13333_v49  ;;  %v13405_v49 = vld [vmem:[#allocation2 + $0x1734] ss:$76 sps:$4 sm:$0xff]  }
 0x1c4   :  { %9777 = vmatpush1.bf16.msra.mxu1 %v13331_v52  ;;  %v13403_v52 = vld [vmem:[#allocation2 + $0x1730] ss:$76 sps:$4 sm:$0xff]  }
 0x1c5   :  { %9778 = vmatprep.subr.bf16.mxu1 %v13339_v54  ;;  %v13408_v54 = vld [vmem:[#allocation2 + $0x198c] ss:$76 sps:$4 sm:$0xff]  }
 0x1c6   :  { %v14964_v57 = vpop.eup %14963 }
 0x1c7   :  { %v14966_v59 = vpop.eup %14965  ;;  %v15988_v0 = vpack.c.bf16 %v14964_v57, %v14964_v57  ;;  %v13409_v57 = vld [vmem:[#allocation2 + $0x17c8] ss:$76 sps:$4 sm:$0xff]  }
 0x1c8   :  { %9779 = vmatpush1.bf16.msra.mxu1 %v13337_v55  ;;  %v15986_v62 = vpack.c.bf16 %v14966_v59, %v14966_v59  ;;  %v13411_v55 = vld [vmem:[#allocation2 + $0x17cc] ss:$76 sps:$4 sm:$0xff]   ;;  %v13417_v59 = vld [vmem:[#allocation2 + $0x1864] ss:$76 sps:$4 sm:$0xff]  }
 0x1c9   :  { %v14968_v61 = vpop.eup %14967  ;;  %9780 = vmatprep.subr.bf16.mxu1 %v13345_v56  ;;  %v13406_v56 = vld [vmem:[#allocation2 + $0x1988] ss:$76 sps:$4 sm:$0xff]  }
 0x1ca   :  { %v15990_v3 = vpack.c.bf16 %v14968_v61, %v14968_v61  ;;  %9622 = vmatprep.mubr.bf16.mxu0 %v15986_v62  ;;  %9786 = vmatprep.mubr.bf16.mxu1 %v15986_v62  ;;  %v13412_v61 = vld [vmem:[#allocation2 + $0x1a20] ss:$76 sps:$4 sm:$0xff]  }
 0x1cb   :  { %9623 = vmatmul.mubr.bf16.vlgmr.msra.gmra.mrb[8].mxu0 %v15988_v0 }
 0x1cc   :  { %9781 = vmatpush1.bf16.msra.mxu1 %v13343_v60  ;;  %9632 = vmatpush1.bf16.msra.mxu0 %v13340_v58  ;;  %v13414_v58 = vld [vmem:[#allocation2 + $0x1a24] ss:$76 sps:$4 sm:$0xff]   ;;  %v14970_v60 = vpop.eup %14969 }
 0x1cd   :  { %9663 = vmatprep.mubr.bf16.mxu0 %v15990_v3  ;;  %9633 = vmatprep.subr.bf16.mxu0 %v13348_v1  ;;  %v13415_v1 = vld [vmem:[#allocation2 + $0x1860] ss:$76 sps:$4 sm:$0xff]  }
 0x1ce   :  { %9782 = vmatprep.subr.bf16.mxu1 %v13351_v2  ;;  %v1996_v2 = vadd.f32 1.0, %v14970_v60  ;;  %v16012_v60 = vsub.s32 7, %v15197_v44 }
 0x1d0   :  { %9783 = vmatpush1.bf16.msra.mxu1 %v13349_v4  ;;  %9634 = vmatpush1.bf16.msra.mxu0 %v13346_v6  ;;  %v13420_v4 = vld [vmem:[#allocation2 + $0x1abc] ss:$76 sps:$4 sm:$0xff]   ;;  %14971 = vrcp.f32 %v1996_v2  ;;  %v15058_v2 = vld [vmem:[%s16160_s2] sm:$0xff] }
 0x1d1   :  { %9784 = vmatprep.subr.bf16.mxu1 %v13357_v7  ;;  %9635 = vmatprep.subr.bf16.mxu0 %v13354_v11  ;;  %v13423_v6 = vld [vmem:[#allocation2 + $0x18fc] ss:$76 sps:$4 sm:$0xff]   ;;  %v13418_v7 = vld [vmem:[#allocation2 + $0x1ab8] ss:$76 sps:$4 sm:$0xff]  }
 0x1d2   :  { %v13421_v11 = vld [vmem:[#allocation2 + $0x18f8] ss:$76 sps:$4 sm:$0xff]  }
 0x1d4   :  { %9785 = vmatpush1.bf16.msra.mxu1 %v13355_v10  ;;  %9636 = vmatpush1.bf16.msra.mxu0 %v13352_v13  ;;  %v13426_v10 = vld [vmem:[#allocation2 + $0x1b54] ss:$76 sps:$4 sm:$0xff]  }
 0x1d5   :  { %9795 = vmatprep.subr.bf16.mxu1 %v13363_v14  ;;  %9637 = vmatprep.subr.bf16.mxu0 %v13360_v15  ;;  %v13429_v13 = vld [vmem:[#allocation2 + $0x1994] ss:$76 sps:$4 sm:$0xff]   ;;  %v13424_v14 = vld [vmem:[#allocation2 + $0x1b50] ss:$76 sps:$4 sm:$0xff]  }
 0x1d6   :  { %v13427_v15 = vld [vmem:[#allocation2 + $0x1990] ss:$76 sps:$4 sm:$0xff]  }
 0x1d7   :  { %9787 = vmatmul.mubr.bf16.vlgmr.msra.gmra.mrb[12].mxu1 %v15988_v0 }
 0x1d8   :  { %9796 = vmatpush1.bf16.msra.mxu1 %v13361_v17  ;;  %9827 = vmatprep.mubr.bf16.mxu1 %v15990_v3  ;;  %v13432_v17 = vld [vmem:[#allocation2 + $0x1bec] ss:$76 sps:$4 sm:$0xff]  }
 0x1d9   :  { %9638 = vmatpush1.bf16.msra.mxu0 %v13358_v18  ;;  %9797 = vmatprep.subr.bf16.mxu1 %v13369_v20  ;;  %v13435_v18 = vld [vmem:[#allocation2 + $0x1a2c] ss:$76 sps:$4 sm:$0xff]   ;;  %v13433_v20 = vld [vmem:[#allocation2 + $0x1a28] ss:$76 sps:$4 sm:$0xff]  }
 0x1da   :  { %9639 = vmatprep.subr.bf16.mxu0 %v13366_v19  ;;  %v13430_v19 = vld [vmem:[#allocation2 + $0x1be8] ss:$76 sps:$4 sm:$0xff]  }
 0x1dc   :  { %9798 = vmatpush1.bf16.msra.mxu1 %v13367_v23  ;;  %v13441_v23 = vld [vmem:[#allocation2 + $0x1ac4] ss:$76 sps:$4 sm:$0xff]  }
 0x1dd   :  { %9640 = vmatpush1.bf16.msra.mxu0 %v13364_v22  ;;  %9799 = vmatprep.subr.bf16.mxu1 %v13375_v25  ;;  %v13438_v22 = vld [vmem:[#allocation2 + $0x1c84] ss:$76 sps:$4 sm:$0xff]   ;;  %v13436_v25 = vld [vmem:[#allocation2 + $0x1c80] ss:$76 sps:$4 sm:$0xff]  }
 0x1de   :  { %9641 = vmatprep.subr.bf16.mxu0 %v13372_v24  ;;  %v14972_v24 = vpop.eup %14971 }
 0x1e0   :  { %9800 = vmatpush1.bf16.msra.mxu1 %v13373_v29  ;;  %v13447_v29 = vld [vmem:[#allocation2 + $0x1b5c] ss:$76 sps:$4 sm:$0xff]  }
 0x1e1   :  { %9642 = vmatpush1.bf16.msra.mxu0 %v13370_v26  ;;  %9801 = vmatprep.subr.bf16.mxu1 %v13381_v31  ;;  %v13439_v26 = vld [vmem:[#allocation2 + $0x1ac0] ss:$76 sps:$4 sm:$0xff]   ;;  %v13444_v31 = vld [vmem:[#allocation2 + $0x1d1c] ss:$76 sps:$4 sm:$0xff]  }
 0x1e2   :  { %9643 = vmatprep.subr.bf16.mxu0 %v13378_v30  ;;  %v16004_v30 = vpack.c.bf16 %v14972_v24, %v14972_v24  ;;  %v13501_v24 = vld [vmem:[#allocation2 + $0x20b4] ss:$76 sps:$4 sm:$0xff]  }
 0x1e4   :  { %9802 = vmatpush1.bf16.msra.mxu1 %v13379_v34  ;;  %v13450_v34 = vld [vmem:[#allocation2 + $0x1db4] ss:$76 sps:$4 sm:$0xff]  }
 0x1e5   :  { %9644 = vmatpush1.bf16.msra.mxu0 %v13376_v33  ;;  %9803 = vmatprep.subr.bf16.mxu1 %v13387_v36  ;;  %v13442_v33 = vld [vmem:[#allocation2 + $0x1d18] ss:$76 sps:$4 sm:$0xff]   ;;  %v13448_v36 = vld [vmem:[#allocation2 + $0x1db0] ss:$76 sps:$4 sm:$0xff]  }
 0x1e6   :  { %9645 = vmatprep.subr.bf16.mxu0 %v13384_v35  ;;  %v13453_v35 = vld [vmem:[#allocation2 + $0x1bf4] ss:$76 sps:$4 sm:$0xff]  }
 0x1e8   :  { %9804 = vmatpush1.bf16.msra.mxu1 %v13385_v37  ;;  %v13459_v37 = vld [vmem:[#allocation2 + $0x1c8c] ss:$76 sps:$4 sm:$0xff]  }
 0x1e9   :  { %9646 = vmatpush1.bf16.msra.mxu0 %v13382_v5  ;;  %9805 = vmatprep.subr.bf16.mxu1 %v13393_v16  ;;  %v13451_v5 = vld [vmem:[#allocation2 + $0x1bf0] ss:$76 sps:$4 sm:$0xff]   ;;  %v13457_v16 = vld [vmem:[#allocation2 + $0x1c88] ss:$76 sps:$4 sm:$0xff]  }
 0x1ea   :  { %9647 = vmatprep.subr.bf16.mxu0 %v13390_v38  ;;  %v13454_v38 = vld [vmem:[#allocation2 + $0x1e48] ss:$76 sps:$4 sm:$0xff]  }
 0x1ec   :  { %9806 = vmatpush1.bf16.msra.mxu1 %v13391_v12  ;;  %v13460_v12 = vld [vmem:[#allocation2 + $0x1ee0] ss:$76 sps:$4 sm:$0xff]  }
 0x1ed   :  { %9648 = vmatpush1.bf16.msra.mxu0 %v13388_v39  ;;  %9807 = vmatprep.subr.bf16.mxu1 %v13399_v43  ;;  %v13462_v39 = vld [vmem:[#allocation2 + $0x1ee4] ss:$76 sps:$4 sm:$0xff]   ;;  %v13468_v43 = vld [vmem:[#allocation2 + $0x1f7c] ss:$76 sps:$4 sm:$0xff]  }
 0x1ee   :  { %9649 = vmatprep.subr.bf16.mxu0 %v13396_v41  ;;  %v13463_v41 = vld [vmem:[#allocation2 + $0x1d20] ss:$76 sps:$4 sm:$0xff]  }
 0x1f0   :  { %9808 = vmatpush1.bf16.msra.mxu1 %v13397_v21  ;;  %v13466_v21 = vld [vmem:[#allocation2 + $0x1f78] ss:$76 sps:$4 sm:$0xff]  }
 0x1f1   :  { %9650 = vmatpush1.bf16.msra.mxu0 %v13394_v45  ;;  %9809 = vmatprep.subr.bf16.mxu1 %v13405_v49  ;;  %v13471_v45 = vld [vmem:[#allocation2 + $0x1dbc] ss:$76 sps:$4 sm:$0xff]   ;;  %v13474_v49 = vld [vmem:[#allocation2 + $0x2014] ss:$76 sps:$4 sm:$0xff]  }
 0x1f2   :  { %9651 = vmatprep.subr.bf16.mxu0 %v13402_v47  ;;  %v13469_v47 = vld [vmem:[#allocation2 + $0x1db8] ss:$76 sps:$4 sm:$0xff]  }
 0x1f4   :  { %9810 = vmatpush1.bf16.msra.mxu1 %v13403_v52  ;;  %v13472_v52 = vld [vmem:[#allocation2 + $0x2010] ss:$76 sps:$4 sm:$0xff]  }
 0x1f5   :  { %9652 = vmatpush1.bf16.msra.mxu0 %v13400_v51  ;;  %9811 = vmatprep.subr.bf16.mxu1 %v13411_v55  ;;  %v13477_v51 = vld [vmem:[#allocation2 + $0x1e54] ss:$76 sps:$4 sm:$0xff]   ;;  %v13480_v55 = vld [vmem:[#allocation2 + $0x20ac] ss:$76 sps:$4 sm:$0xff]  }
 0x1f6   :  { %9653 = vmatprep.subr.bf16.mxu0 %v13408_v54  ;;  %v13475_v54 = vld [vmem:[#allocation2 + $0x1e50] ss:$76 sps:$4 sm:$0xff]  }
 0x1f8   :  { %9812 = vmatpush1.bf16.msra.mxu1 %v13409_v57  ;;  %v13478_v57 = vld [vmem:[#allocation2 + $0x20a8] ss:$76 sps:$4 sm:$0xff]  }
 0x1f9   :  { %9654 = vmatpush1.bf16.msra.mxu0 %v13406_v56  ;;  %9813 = vmatprep.subr.bf16.mxu1 %v13417_v59  ;;  %v13483_v56 = vld [vmem:[#allocation2 + $0x1eec] ss:$76 sps:$4 sm:$0xff]   ;;  %v13481_v59 = vld [vmem:[#allocation2 + $0x1ee8] ss:$76 sps:$4 sm:$0xff]  }
 0x1fa   :  { %9655 = vmatprep.subr.bf16.mxu0 %v13414_v58  ;;  %v16009_v58 = vsub.s32 6, %v15197_v44  ;;  %v13492_v44 = vld [vmem:[#allocation2 + $0x21dc] ss:$76 sps:$4 sm:$0xff]  }
 0x1fc   :  { %9814 = vmatpush1.bf16.msra.mxu1 %v13415_v1  ;;  %v13489_v1 = vld [vmem:[#allocation2 + $0x1f84] ss:$76 sps:$4 sm:$0xff]  }
 0x1fd   :  { %9656 = vmatpush1.bf16.msra.mxu0 %v13412_v61  ;;  %9815 = vmatprep.subr.bf16.mxu1 %v13423_v6  ;;  %v13486_v61 = vld [vmem:[#allocation2 + $0x2144] ss:$76 sps:$4 sm:$0xff]   ;;  %v13484_v6 = vld [vmem:[#allocation2 + $0x2140] ss:$76 sps:$4 sm:$0xff]  }
 0x1fe   :  { %9657 = vmatprep.subr.bf16.mxu0 %v13420_v4  ;;  %v347_v4 = vrot.slane %v15058_v2, %v16009_v58 }
 0x200   :  { %9816 = vmatpush1.bf16.msra.mxu1 %v13421_v11  ;;  %v13487_v11 = vld [vmem:[#allocation2 + $0x1f80] ss:$76 sps:$4 sm:$0xff]  }
 0x201   :  { %9658 = vmatpush1.bf16.msra.mxu0 %v13418_v7  ;;  %9817 = vmatprep.subr.bf16.mxu1 %v13429_v13  ;;  %v351_v7 = vrot.slane %v15058_v2, %v16012_v60  ;;  %v13532_v2 = vld [vmem:[#allocation2 + $0x10] ss:$76 sps:$4 sm:$0xff]  }
 0x202   :  { %9659 = vmatprep.subr.bf16.mxu0 %v13426_v10  ;;  %v13495_v10 = vld [vmem:[#allocation2 + $0x201c] ss:$76 sps:$4 sm:$0xff]  }
 0x204   :  { %9818 = vmatpush1.bf16.msra.mxu1 %v13427_v15 }
 0x205   :  { %9660 = vmatpush1.bf16.msra.mxu0 %v13424_v14  ;;  %9819 = vmatprep.subr.bf16.mxu1 %v13435_v18 }
 0x206   :  { %9661 = vmatprep.subr.bf16.mxu0 %v13432_v17  ;;  %v13490_v17 = vld [vmem:[#allocation2 + $0x21d8] ss:$76 sps:$4 sm:$0xff]  }
 0x208   :  { %9820 = vmatpush1.bf16.msra.mxu1 %v13433_v20  ;;  %v13493_v20 = vld [vmem:[#allocation2 + $0x2018] ss:$76 sps:$4 sm:$0xff]  }
 0x209   :  { %9662 = vmatpush1.bf16.msra.mxu0 %v13430_v19  ;;  %9821 = vmatprep.subr.bf16.mxu1 %v13441_v23 }
 0x20a   :  { %9672 = vmatprep.subr.bf16.mxu0 %v13438_v22 }
 0x20c   :  { %9664 = vmatmul.mubr.bf16.vlgmr.msra.gmra.mrb[8].mxu0 %v16004_v30  ;;  %9822 = vmatpush1.bf16.msra.mxu1 %v13439_v26  ;;  %v13498_v26 = vld [vmem:[#allocation2 + $0x2274] ss:$76 sps:$4 sm:$0xff]  }
 0x20d   :  { %9673 = vmatpush1.bf16.msra.mxu0 %v13436_v25  ;;  %9823 = vmatprep.subr.bf16.mxu1 %v13447_v29  ;;  %v13496_v29 = vld [vmem:[#allocation2 + $0x2270] ss:$76 sps:$4 sm:$0xff]  }
 0x20e   :  { %9674 = vmatprep.subr.bf16.mxu0 %v13444_v31  ;;  %v13499_v31 = vld [vmem:[#allocation2 + $0x20b0] ss:$76 sps:$4 sm:$0xff]  }
 0x210   :  { %9824 = vmatpush1.bf16.msra.mxu1 %v13445_v63  ;;  %v13507_v63 = vld [vmem:[#allocation2 + $0x214c] ss:$76 sps:$4 sm:$0xff]  }
 0x211   :  { %9675 = vmatpush1.bf16.msra.mxu0 %v13442_v33  ;;  %9825 = vmatprep.subr.bf16.mxu1 %v13453_v35  ;;  %v13504_v33 = vld [vmem:[#allocation2 + $0x230c] ss:$76 sps:$4 sm:$0xff]   ;;  %v13505_v35 = vld [vmem:[#allocation2 + $0x2148] ss:$76 sps:$4 sm:$0xff]  }
 0x212   :  { %9676 = vmatprep.subr.bf16.mxu0 %v13450_v34  ;;  %v13502_v34 = vld [vmem:[#allocation2 + $0x2308] ss:$76 sps:$4 sm:$0xff]  }
 0x214   :  { %9826 = vmatpush1.bf16.msra.mxu1 %v13451_v5  ;;  %v13513_v5 = vld [vmem:[#allocation2 + $0x21e4] ss:$76 sps:$4 sm:$0xff]  }
 0x215   :  { %9677 = vmatpush1.bf16.msra.mxu0 %v13448_v36  ;;  %9836 = vmatprep.subr.bf16.mxu1 %v13459_v37  ;;  %v13510_v36 = vld [vmem:[#allocation2 + $0x23a4] ss:$76 sps:$4 sm:$0xff]   ;;  %v13511_v37 = vld [vmem:[#allocation2 + $0x21e0] ss:$76 sps:$4 sm:$0xff]  }
 0x216   :  { %9678 = vmatprep.subr.bf16.mxu0 %v13456_v28  ;;  %v13508_v28 = vld [vmem:[#allocation2 + $0x23a0] ss:$76 sps:$4 sm:$0xff]  }
 0x217   :  { %9828 = vmatmul.mubr.bf16.vlgmr.msra.gmra.mrb[12].mxu1 %v16004_v30 }
 0x218   :  { %9837 = vmatpush1.bf16.msra.mxu1 %v13457_v16  ;;  %v13516_v16 = vld [vmem:[#allocation2 + $0x243c] ss:$76 sps:$4 sm:$0xff]  }
 0x219   :  { %9679 = vmatpush1.bf16.msra.mxu0 %v13454_v38  ;;  %9838 = vmatprep.subr.bf16.mxu1 %v13465_v40 }
 0x21a   :  { %9680 = vmatprep.subr.bf16.mxu0 %v13462_v39  ;;  %v13519_v39 = vld [vmem:[#allocation2 + $0x227c] ss:$76 sps:$4 sm:$0xff]  }
 0x21c   :  { %9839 = vmatpush1.bf16.msra.mxu1 %v13463_v41 }
 0x21d   :  { %9681 = vmatpush1.bf16.msra.mxu0 %v13460_v12  ;;  %9840 = vmatprep.subr.bf16.mxu1 %v13471_v45  ;;  %v13517_v45 = vld [vmem:[#allocation2 + $0x2278] ss:$76 sps:$4 sm:$0xff]  }
 0x21e   :  { %9682 = vmatprep.subr.bf16.mxu0 %v13468_v43  ;;  %v13514_v43 = vld [vmem:[#allocation2 + $0x2438] ss:$76 sps:$4 sm:$0xff]  }
 0x220   :  { %9841 = vmatpush1.bf16.msra.mxu1 %v13469_v47  ;;  %v13525_v47 = vld [vmem:[#allocation2 + $0x2314] ss:$76 sps:$4 sm:$0xff]  }
 0x221   :  { %9683 = vmatpush1.bf16.msra.mxu0 %v13466_v21  ;;  %9842 = vmatprep.subr.bf16.mxu1 %v13477_v51  ;;  %v13522_v21 = vld [vmem:[#allocation2 + $0x24d4] ss:$76 sps:$4 sm:$0xff]   ;;  %v13523_v51 = vld [vmem:[#allocation2 + $0x2310] ss:$76 sps:$4 sm:$0xff]  }
 0x222   :  { %9684 = vmatprep.subr.bf16.mxu0 %v13474_v49  ;;  %v13520_v49 = vld [vmem:[#allocation2 + $0x24d0] ss:$76 sps:$4 sm:$0xff]  }
 0x224   :  { %9843 = vmatpush1.bf16.msra.mxu1 %v13475_v54  ;;  %v13531_v54 = vld [vmem:[#allocation2 + $0x23ac] ss:$76 sps:$4 sm:$0xff]  }
 0x225   :  { %9685 = vmatpush1.bf16.msra.mxu0 %v13472_v52  ;;  %9844 = vmatprep.subr.bf16.mxu1 %v13483_v56  ;;  %v13528_v52 = vld [vmem:[#allocation2 + $0x256c] ss:$76 sps:$4 sm:$0xff]   ;;  %v13529_v56 = vld [vmem:[#allocation2 + $0x23a8] ss:$76 sps:$4 sm:$0xff]  }
 0x226   :  { %9686 = vmatprep.subr.bf16.mxu0 %v13480_v55  ;;  %v13526_v55 = vld [vmem:[#allocation2 + $0x2568] ss:$76 sps:$4 sm:$0xff]  }
 0x228   :  { %9845 = vmatpush1.bf16.msra.mxu1 %v13481_v59  ;;  %v13537_v59 = vld [vmem:[#allocation2 + $0x2444] ss:$76 sps:$4 sm:$0xff]  }
 0x229   :  { %9687 = vmatpush1.bf16.msra.mxu0 %v13478_v57  ;;  %9846 = vmatprep.subr.bf16.mxu1 %v13489_v1  ;;  %v13534_v57 = vld [vmem:[#allocation2 + $0x14] ss:$76 sps:$4 sm:$0xff]  }
 0x22a   :  { %v1961_v13 = vpop.f32.mrb[8].mxu1  ;;  %9688 = vmatprep.subr.bf16.mxu0 %v13486_v61 }
 0x22b   :  { %v13012_v14 = vadd.f32 %v1961_v13, %v347_v4  ;;  %v1963_v15 = vpop.f32.mrb[9].mxu1  ;;  %v13535_v4 = vld [vmem:[#allocation2 + $0x2440] ss:$76 sps:$4 sm:$0xff]   ;;  %v13541_v13 = vld [vmem:[#allocation2 + $0x24d8] ss:$76 sps:$4 sm:$0xff]  }
 0x22c   :  { %v13013_v18 = vadd.f32 %v1963_v15, %v351_v7  ;;  %v1965_v19 = vpop.f32.mrb[10].mxu1  ;;  %9847 = vmatpush1.bf16.msra.mxu1 %v13487_v11  ;;  %v13540_v7 = vld [vmem:[#allocation2 + $0xac] ss:$76 sps:$4 sm:$0xff]   ;;  %v13549_v15 = vld [vmem:[#allocation2 + $0x2574] ss:$76 sps:$4 sm:$0xff]  }
 0x22d   :  { %v11679_v22 = vmul.f32 -1.442695, %v13012_v14  ;;  %9689 = vmatpush1.bf16.msra.mxu0 %v13484_v6  ;;  %v1966_v23 = vpop.f32.mrb[11].mxu1  ;;  %9848 = vmatprep.subr.bf16.mxu1 %v13495_v10  ;;  %v13538_v10 = vld [vmem:[#allocation2 + $0xa8] ss:$76 sps:$4 sm:$0xff]  }
 0x22e   :  { %v11680_v25 = vmul.f32 -1.442695, %v13013_v18  ;;  %9690 = vmatprep.subr.bf16.mxu0 %v13492_v44  ;;  %v13543_v44 = vld [vmem:[#allocation2 + $0x24dc] ss:$76 sps:$4 sm:$0xff]   ;;  %v13546_v14 = vld [vmem:[#allocation2 + $0x144] ss:$76 sps:$4 sm:$0xff]  }
 0x22f   :  { %14973 = vpow2.f32 %v11679_v22  ;;  %v13547_v18 = vld [vmem:[#allocation2 + $0x2570] ss:$76 sps:$4 sm:$0xff]   ;;  %v13550_v22 = vld [vmem:[#allocation2 + $0x1d8] ss:$76 sps:$4 sm:$0xff]  }
 0x230   :  { %14975 = vpow2.f32 %v11680_v25  ;;  %9849 = vmatpush1.bf16.msra.mxu1 %v13493_v20  ;;  %v13552_v19 = vld [vmem:[#allocation2 + $0x1dc] ss:$76 sps:$4 sm:$0xff]   ;;  %v13553_v23 = vld [vmem:[#allocation2 + $0x18] ss:$76 sps:$4 sm:$0xff]   ;;  %v13561_v25 = vld [vmem:[#allocation2 + $0xb4] ss:$76 sps:$4 sm:$0xff]  }
 0x231   :  { %9691 = vmatpush1.bf16.msra.mxu0 %v13490_v17  ;;  %9850 = vmatprep.subr.bf16.mxu1 %v13501_v24  ;;  %v13544_v17 = vld [vmem:[#allocation2 + $0x140] ss:$76 sps:$4 sm:$0xff]   ;;  %v13555_v20 = vld [vmem:[#allocation2 + $0x1c] ss:$76 sps:$4 sm:$0xff]  }
 0x232   :  { %9692 = vmatprep.subr.bf16.mxu0 %v13498_v26  ;;  %v13558_v24 = vld [vmem:[#allocation2 + $0x274] ss:$76 sps:$4 sm:$0xff]   ;;  %v13556_v26 = vld [vmem:[#allocation2 + $0x270] ss:$76 sps:$4 sm:$0xff]  }
 0x234   :  { %9851 = vmatpush1.bf16.msra.mxu1 %v13499_v31  ;;  %v13564_v31 = vld [vmem:[#allocation2 + $0x30c] ss:$76 sps:$4 sm:$0xff]  }
 0x235   :  { %9693 = vmatpush1.bf16.msra.mxu0 %v13496_v29  ;;  %9852 = vmatprep.subr.bf16.mxu1 %v13507_v63  ;;  %v13559_v29 = vld [vmem:[#allocation2 + $0xb0] ss:$76 sps:$4 sm:$0xff]   ;;  %v13562_v63 = vld [vmem:[#allocation2 + $0x308] ss:$76 sps:$4 sm:$0xff]  }
 0x236   :  { %9694 = vmatprep.subr.bf16.mxu0 %v13504_v33  ;;  %v13567_v33 = vld [vmem:[#allocation2 + $0x14c] ss:$76 sps:$4 sm:$0xff]  }
 0x238   :  { %9853 = vmatpush1.bf16.msra.mxu1 %v13505_v35  ;;  %v13570_v35 = vld [vmem:[#allocation2 + $0x3a4] ss:$76 sps:$4 sm:$0xff]  }
 0x239   :  { %v14974_v38 = vpop.eup %14973  ;;  %9695 = vmatpush1.bf16.msra.mxu0 %v13502_v34  ;;  %9854 = vmatprep.subr.bf16.mxu1 %v13513_v5  ;;  %v13565_v34 = vld [vmem:[#allocation2 + $0x148] ss:$76 sps:$4 sm:$0xff]   ;;  %v13568_v5 = vld [vmem:[#allocation2 + $0x3a0] ss:$76 sps:$4 sm:$0xff]  }
 0x23a   :  { %v14976_v40 = vpop.eup %14975  ;;  %v1998_v12 = vadd.f32 1.0, %v14974_v38  ;;  %9696 = vmatprep.subr.bf16.mxu0 %v13510_v36  ;;  %v13573_v36 = vld [vmem:[#allocation2 + $0x1e4] ss:$76 sps:$4 sm:$0xff]   ;;  %v13579_v38 = vld [vmem:[#allocation2 + $0x27c] ss:$76 sps:$4 sm:$0xff]  }
 0x23b   :  { %v1999_v41 = vadd.f32 1.0, %v14976_v40  ;;  %v13582_v40 = vld [vmem:[#allocation2 + $0x4d4] ss:$76 sps:$4 sm:$0xff]  }
 0x23c   :  { %14977 = vrcp.f32 %v1998_v12  ;;  %9855 = vmatpush1.bf16.msra.mxu1 %v13511_v37  ;;  %v13576_v37 = vld [vmem:[#allocation2 + $0x43c] ss:$76 sps:$4 sm:$0xff]   ;;  %v13585_v12 = vld [vmem:[#allocation2 + $0x314] ss:$76 sps:$4 sm:$0xff]  }
 0x23d   :  { %14979 = vrcp.f32 %v1999_v41  ;;  %9697 = vmatpush1.bf16.msra.mxu0 %v13508_v28  ;;  %9856 = vmatprep.subr.bf16.mxu1 %v13519_v39  ;;  %v13571_v28 = vld [vmem:[#allocation2 + $0x1e0] ss:$76 sps:$4 sm:$0xff]   ;;  %v13577_v39 = vld [vmem:[#allocation2 + $0x278] ss:$76 sps:$4 sm:$0xff]   ;;  %v13580_v41 = vld [vmem:[#allocation2 + $0x4d0] ss:$76 sps:$4 sm:$0xff]  }
 0x23e   :  { %9698 = vmatprep.subr.bf16.mxu0 %v13516_v16  ;;  %v13574_v16 = vld [vmem:[#allocation2 + $0x438] ss:$76 sps:$4 sm:$0xff]  }
 0x240   :  { %9857 = vmatpush1.bf16.msra.mxu1 %v13517_v45  ;;  %v13588_v45 = vld [vmem:[#allocation2 + $0x56c] ss:$76 sps:$4 sm:$0xff]  }
 0x241   :  { %9699 = vmatpush1.bf16.msra.mxu0 %v13514_v43  ;;  %9858 = vmatprep.subr.bf16.mxu1 %v13525_v47  ;;  %v13583_v43 = vld [vmem:[#allocation2 + $0x310] ss:$76 sps:$4 sm:$0xff]   ;;  %v13586_v47 = vld [vmem:[#allocation2 + $0x568] ss:$76 sps:$4 sm:$0xff]  }
 0x242   :  { %9700 = vmatprep.subr.bf16.mxu0 %v13522_v21  ;;  %v13591_v21 = vld [vmem:[#allocation2 + $0x3ac] ss:$76 sps:$4 sm:$0xff]  }
 0x244   :  { %9859 = vmatpush1.bf16.msra.mxu1 %v13523_v51  ;;  %v13594_v51 = vld [vmem:[#allocation2 + $0x604] ss:$76 sps:$4 sm:$0xff]  }
 0x245   :  { %9701 = vmatpush1.bf16.msra.mxu0 %v13520_v49  ;;  %9860 = vmatprep.subr.bf16.mxu1 %v13531_v54  ;;  %v13589_v49 = vld [vmem:[#allocation2 + $0x3a8] ss:$76 sps:$4 sm:$0xff]   ;;  %v13592_v54 = vld [vmem:[#allocation2 + $0x600] ss:$76 sps:$4 sm:$0xff]  }
 0x246   :  { %v14978_v61 = vpop.eup %14977  ;;  %9702 = vmatprep.subr.bf16.mxu0 %v13528_v52  ;;  %v13597_v52 = vld [vmem:[#allocation2 + $0x444] ss:$76 sps:$4 sm:$0xff]  }
 0x247   :  { %v14980_v1 = vpop.eup %14979  ;;  %v16021_v11 = vpack.c.bf16 %v14978_v61, %v14978_v61  ;;  %v13601_v61 = vld [vmem:[#allocation2 + $0x4d8] ss:$76 sps:$4 sm:$0xff]  }
 0x248   :  { %v16019_v6 = vpack.c.bf16 %v14980_v1, %v14980_v1  ;;  %9861 = vmatpush1.bf16.msra.mxu1 %v13529_v56  ;;  %v13600_v56 = vld [vmem:[#allocation2 + $0x69c] ss:$76 sps:$4 sm:$0xff]   ;;  %v13606_v1 = vld [vmem:[#allocation2 + $0x734] ss:$76 sps:$4 sm:$0xff]  }
 0x249   :  { %9703 = vmatpush1.bf16.msra.mxu0 %v13526_v55  ;;  %9862 = vmatprep.subr.bf16.mxu1 %v13537_v59  ;;  %v13595_v55 = vld [vmem:[#allocation2 + $0x440] ss:$76 sps:$4 sm:$0xff]   ;;  %v13598_v59 = vld [vmem:[#allocation2 + $0x698] ss:$76 sps:$4 sm:$0xff]  }
 0x24a   :  { %9704 = vmatprep.mubr.bf16.mxu0 %v16019_v6  ;;  %9868 = vmatprep.mubr.bf16.mxu1 %v16019_v6 }
 0x24b   :  { %9877 = vmatprep.subr.bf16.mxu0 %v13534_v57  ;;  %v13603_v57 = vld [vmem:[#allocation2 + $0x4dc] ss:$76 sps:$4 sm:$0xff]  }
 0x24c   :  { %9705 = vmatmul.mubr.bf16.vlgmr.msra.gmra.mrb[8].mxu0 %v16021_v11  ;;  %9863 = vmatpush1.bf16.msra.mxu1 %v13535_v4  ;;  %v13604_v4 = vld [vmem:[#allocation2 + $0x730] ss:$76 sps:$4 sm:$0xff]  }
 0x24d   :  { %9878 = vmatpush1.bf16.msra.mxu0 %v13532_v2  ;;  %9909 = vmatprep.mubr.bf16.mxu0 %v15957_v50  ;;  %v13609_v2 = vld [vmem:[#allocation2 + $0x574] ss:$76 sps:$4 sm:$0xff]  }
 0x24e   :  { %9879 = vmatprep.subr.bf16.mxu0 %v13540_v7  ;;  %9864 = vmatprep.subr.bf16.mxu1 %v13543_v44  ;;  %v13607_v7 = vld [vmem:[#allocation2 + $0x570] ss:$76 sps:$4 sm:$0xff]   ;;  %v13612_v44 = vld [vmem:[#allocation2 + $0x7cc] ss:$76 sps:$4 sm:$0xff]  }
 0x250   :  { %9865 = vmatpush1.bf16.msra.mxu1 %v13541_v13  ;;  %v13610_v13 = vld [vmem:[#allocation2 + $0x7c8] ss:$76 sps:$4 sm:$0xff]  }
 0x251   :  { %9880 = vmatpush1.bf16.msra.mxu0 %v13538_v10  ;;  %9866 = vmatprep.subr.bf16.mxu1 %v13549_v15  ;;  %v13615_v10 = vld [vmem:[#allocation2 + $0x60c] ss:$76 sps:$4 sm:$0xff]   ;;  %v13618_v15 = vld [vmem:[#allocation2 + $0x864] ss:$76 sps:$4 sm:$0xff]  }
 0x252   :  { %9881 = vmatprep.subr.bf16.mxu0 %v13546_v14  ;;  %v13613_v14 = vld [vmem:[#allocation2 + $0x608] ss:$76 sps:$4 sm:$0xff]  }
 0x254   :  { %9867 = vmatpush1.bf16.msra.mxu1 %v13547_v18  ;;  %v13616_v18 = vld [vmem:[#allocation2 + $0x860] ss:$76 sps:$4 sm:$0xff]  }
 0x255   :  { %9882 = vmatpush1.bf16.msra.mxu0 %v13544_v17  ;;  %10041 = vmatprep.subr.bf16.mxu1 %v13555_v20  ;;  %v13621_v17 = vld [vmem:[#allocation2 + $0x6a4] ss:$76 sps:$4 sm:$0xff]   ;;  %v13624_v20 = vld [vmem:[#allocation2 + $0x8fc] ss:$76 sps:$4 sm:$0xff]  }
 0x256   :  { %9883 = vmatprep.subr.bf16.mxu0 %v13552_v19  ;;  %v13619_v19 = vld [vmem:[#allocation2 + $0x6a0] ss:$76 sps:$4 sm:$0xff]  }
 0x257   :  { %9869 = vmatmul.mubr.bf16.vlgmr.msra.gmra.mrb[12].mxu1 %v16021_v11 }
 0x258   :  { %10042 = vmatpush1.bf16.msra.mxu1 %v13553_v23  ;;  %10073 = vmatprep.mubr.bf16.mxu1 %v15957_v50  ;;  %v13622_v23 = vld [vmem:[#allocation2 + $0x8f8] ss:$76 sps:$4 sm:$0xff]  }
 0x259   :  { %9884 = vmatpush1.bf16.msra.mxu0 %v13550_v22  ;;  %10043 = vmatprep.subr.bf16.mxu1 %v13561_v25  ;;  %v13627_v22 = vld [vmem:[#allocation2 + $0x73c] ss:$76 sps:$4 sm:$0xff]   ;;  %v13630_v25 = vld [vmem:[#allocation2 + $0x994] ss:$76 sps:$4 sm:$0xff]  }
 0x25a   :  { %9885 = vmatprep.subr.bf16.mxu0 %v13558_v24  ;;  %v13625_v24 = vld [vmem:[#allocation2 + $0x738] ss:$76 sps:$4 sm:$0xff]  }
 0x25c   :  { %10044 = vmatpush1.bf16.msra.mxu1 %v13559_v29  ;;  %v13628_v29 = vld [vmem:[#allocation2 + $0x990] ss:$76 sps:$4 sm:$0xff]  }
 0x25d   :  { %9886 = vmatpush1.bf16.msra.mxu0 %v13556_v26  ;;  %10045 = vmatprep.subr.bf16.mxu1 %v13567_v33  ;;  %v13633_v26 = vld [vmem:[#allocation2 + $0x7d4] ss:$76 sps:$4 sm:$0xff]   ;;  %v13636_v33 = vld [vmem:[#allocation2 + $0xa2c] ss:$76 sps:$4 sm:$0xff]  }
 0x25e   :  { %9887 = vmatprep.subr.bf16.mxu0 %v13564_v31  ;;  %v13631_v31 = vld [vmem:[#allocation2 + $0x7d0] ss:$76 sps:$4 sm:$0xff]  }
 0x260   :  { %10046 = vmatpush1.bf16.msra.mxu1 %v13565_v34  ;;  %v13634_v34 = vld [vmem:[#allocation2 + $0xa28] ss:$76 sps:$4 sm:$0xff]  }
 0x261   :  { %9888 = vmatpush1.bf16.msra.mxu0 %v13562_v63  ;;  %10047 = vmatprep.subr.bf16.mxu1 %v13573_v36  ;;  %v13639_v63 = vld [vmem:[#allocation2 + $0x86c] ss:$76 sps:$4 sm:$0xff]   ;;  %v13642_v36 = vld [vmem:[#allocation2 + $0xac4] ss:$76 sps:$4 sm:$0xff]  }
 0x262   :  { %9889 = vmatprep.subr.bf16.mxu0 %v13570_v35  ;;  %v13637_v35 = vld [vmem:[#allocation2 + $0x868] ss:$76 sps:$4 sm:$0xff]  }
 0x264   :  { %10048 = vmatpush1.bf16.msra.mxu1 %v13571_v28  ;;  %v13640_v28 = vld [vmem:[#allocation2 + $0xac0] ss:$76 sps:$4 sm:$0xff]  }
 0x265   :  { %9890 = vmatpush1.bf16.msra.mxu0 %v13568_v5  ;;  %10049 = vmatprep.subr.bf16.mxu1 %v13579_v38  ;;  %v13645_v5 = vld [vmem:[#allocation2 + $0x904] ss:$76 sps:$4 sm:$0xff]   ;;  %v13648_v38 = vld [vmem:[#allocation2 + $0xb5c] ss:$76 sps:$4 sm:$0xff]  }
 0x266   :  { %9891 = vmatprep.subr.bf16.mxu0 %v13576_v37  ;;  %v13643_v37 = vld [vmem:[#allocation2 + $0x900] ss:$76 sps:$4 sm:$0xff]  }
 0x268   :  { %10050 = vmatpush1.bf16.msra.mxu1 %v13577_v39  ;;  %v13646_v39 = vld [vmem:[#allocation2 + $0xb58] ss:$76 sps:$4 sm:$0xff]  }
 0x269   :  { %9892 = vmatpush1.bf16.msra.mxu0 %v13574_v16  ;;  %10051 = vmatprep.subr.bf16.mxu1 %v13585_v12  ;;  %v13651_v16 = vld [vmem:[#allocation2 + $0x99c] ss:$76 sps:$4 sm:$0xff]   ;;  %v13654_v12 = vld [vmem:[#allocation2 + $0xbf4] ss:$76 sps:$4 sm:$0xff]  }
 0x26a   :  { %9893 = vmatprep.subr.bf16.mxu0 %v13582_v40  ;;  %v13649_v40 = vld [vmem:[#allocation2 + $0x998] ss:$76 sps:$4 sm:$0xff]  }
 0x26c   :  { %10052 = vmatpush1.bf16.msra.mxu1 %v13583_v43  ;;  %v13652_v43 = vld [vmem:[#allocation2 + $0xbf0] ss:$76 sps:$4 sm:$0xff]  }
 0x26d   :  { %9894 = vmatpush1.bf16.msra.mxu0 %v13580_v41  ;;  %10053 = vmatprep.subr.bf16.mxu1 %v13591_v21  ;;  %v13657_v41 = vld [vmem:[#allocation2 + $0xa34] ss:$76 sps:$4 sm:$0xff]   ;;  %v13660_v21 = vld [vmem:[#allocation2 + $0xc8c] ss:$76 sps:$4 sm:$0xff]  }
 0x26e   :  { %9895 = vmatprep.subr.bf16.mxu0 %v13588_v45  ;;  %v13655_v45 = vld [vmem:[#allocation2 + $0xa30] ss:$76 sps:$4 sm:$0xff]  }
 0x270   :  { %10054 = vmatpush1.bf16.msra.mxu1 %v13589_v49  ;;  %v13658_v49 = vld [vmem:[#allocation2 + $0xc88] ss:$76 sps:$4 sm:$0xff]  }
 0x271   :  { %9896 = vmatpush1.bf16.msra.mxu0 %v13586_v47  ;;  %10055 = vmatprep.subr.bf16.mxu1 %v13597_v52  ;;  %v13663_v47 = vld [vmem:[#allocation2 + $0xacc] ss:$76 sps:$4 sm:$0xff]   ;;  %v13669_v52 = vld [vmem:[#allocation2 + $0xb64] ss:$76 sps:$4 sm:$0xff]  }
 0x272   :  { %9897 = vmatprep.subr.bf16.mxu0 %v13594_v51  ;;  %v13661_v51 = vld [vmem:[#allocation2 + $0xac8] ss:$76 sps:$4 sm:$0xff]  }
 0x274   :  { %10056 = vmatpush1.bf16.msra.mxu1 %v13595_v55  ;;  %v13664_v55 = vld [vmem:[#allocation2 + $0xd20] ss:$76 sps:$4 sm:$0xff]  }
 0x275   :  { %9898 = vmatpush1.bf16.msra.mxu0 %v13592_v54  ;;  %10057 = vmatprep.subr.bf16.mxu1 %v13603_v57  ;;  %v13666_v54 = vld [vmem:[#allocation2 + $0xd24] ss:$76 sps:$4 sm:$0xff]   ;;  %v13675_v57 = vld [vmem:[#allocation2 + $0xbfc] ss:$76 sps:$4 sm:$0xff]  }
 0x276   :  { %9899 = vmatprep.subr.bf16.mxu0 %v13600_v56  ;;  %v13667_v56 = vld [vmem:[#allocation2 + $0xb60] ss:$76 sps:$4 sm:$0xff]  }
 0x278   :  { %10058 = vmatpush1.bf16.msra.mxu1 %v13601_v61  ;;  %v13670_v61 = vld [vmem:[#allocation2 + $0xdb8] ss:$76 sps:$4 sm:$0xff]  }
 0x279   :  { %9900 = vmatpush1.bf16.msra.mxu0 %v13598_v59  ;;  %10059 = vmatprep.subr.bf16.mxu1 %v13609_v2  ;;  %v13672_v59 = vld [vmem:[#allocation2 + $0xdbc] ss:$76 sps:$4 sm:$0xff]   ;;  %v13681_v2 = vld [vmem:[#allocation2 + $0xc94] ss:$76 sps:$4 sm:$0xff]  }
 0x27a   :  { %9901 = vmatprep.subr.bf16.mxu0 %v13606_v1  ;;  %v13673_v1 = vld [vmem:[#allocation2 + $0xbf8] ss:$76 sps:$4 sm:$0xff]  }
 0x27c   :  { %10060 = vmatpush1.bf16.msra.mxu1 %v13607_v7  ;;  %v13676_v7 = vld [vmem:[#allocation2 + $0xe50] ss:$76 sps:$4 sm:$0xff]  }
 0x27d   :  { %9902 = vmatpush1.bf16.msra.mxu0 %v13604_v4  ;;  %10061 = vmatprep.subr.bf16.mxu1 %v13615_v10  ;;  %v13678_v4 = vld [vmem:[#allocation2 + $0xe54] ss:$76 sps:$4 sm:$0xff]   ;;  %v13687_v10 = vld [vmem:[#allocation2 + $0xd2c] ss:$76 sps:$4 sm:$0xff]  }
 0x27e   :  { %9903 = vmatprep.subr.bf16.mxu0 %v13612_v44  ;;  %v13679_v44 = vld [vmem:[#allocation2 + $0xc90] ss:$76 sps:$4 sm:$0xff]  }
 0x280   :  { %10062 = vmatpush1.bf16.msra.mxu1 %v13613_v14  ;;  %v13682_v14 = vld [vmem:[#allocation2 + $0xee8] ss:$76 sps:$4 sm:$0xff]  }
 0x281   :  { %9904 = vmatpush1.bf16.msra.mxu0 %v13610_v13  ;;  %10063 = vmatprep.subr.bf16.mxu1 %v13621_v17  ;;  %v13684_v13 = vld [vmem:[#allocation2 + $0xeec] ss:$76 sps:$4 sm:$0xff]   ;;  %v13693_v17 = vld [vmem:[#allocation2 + $0xdc4] ss:$76 sps:$4 sm:$0xff]  }
 0x282   :  { %9905 = vmatprep.subr.bf16.mxu0 %v13618_v15  ;;  %v13685_v15 = vld [vmem:[#allocation2 + $0xd28] ss:$76 sps:$4 sm:$0xff]  }
 0x284   :  { %10064 = vmatpush1.bf16.msra.mxu1 %v13619_v19  ;;  %v13688_v19 = vld [vmem:[#allocation2 + $0xf80] ss:$76 sps:$4 sm:$0xff]  }
 0x285   :  { %9906 = vmatpush1.bf16.msra.mxu0 %v13616_v18  ;;  %10065 = vmatprep.subr.bf16.mxu1 %v13627_v22  ;;  %v13690_v18 = vld [vmem:[#allocation2 + $0xf84] ss:$76 sps:$4 sm:$0xff]   ;;  %v13699_v22 = vld [vmem:[#allocation2 + $0xe5c] ss:$76 sps:$4 sm:$0xff]  }
 0x286   :  { %9907 = vmatprep.subr.bf16.mxu0 %v13624_v20  ;;  %v13691_v20 = vld [vmem:[#allocation2 + $0xdc0] ss:$76 sps:$4 sm:$0xff]  }
 0x288   :  { %10066 = vmatpush1.bf16.msra.mxu1 %v13625_v24  ;;  %v13694_v24 = vld [vmem:[#allocation2 + $0x1018] ss:$76 sps:$4 sm:$0xff]  }
 0x289   :  { %9908 = vmatpush1.bf16.msra.mxu0 %v13622_v23  ;;  %10067 = vmatprep.subr.bf16.mxu1 %v13633_v26  ;;  %v13696_v23 = vld [vmem:[#allocation2 + $0x101c] ss:$76 sps:$4 sm:$0xff]   ;;  %v13705_v26 = vld [vmem:[#allocation2 + $0xef4] ss:$76 sps:$4 sm:$0xff]  }
 0x28a   :  { %9918 = vmatprep.subr.bf16.mxu0 %v13630_v25  ;;  %v13697_v25 = vld [vmem:[#allocation2 + $0xe58] ss:$76 sps:$4 sm:$0xff]  }
 0x28c   :  { %9910 = vmatmul.mubr.bf16.vlgmr.msra.gmra.mrb[12].mxu0 %v15955_v48  ;;  %10068 = vmatpush1.bf16.msra.mxu1 %v13631_v31  ;;  %v13700_v31 = vld [vmem:[#allocation2 + $0x10b0] ss:$76 sps:$4 sm:$0xff]  }
 0x28d   :  { %9919 = vmatpush1.bf16.msra.mxu0 %v13628_v29  ;;  %9950 = vmatprep.mubr.bf16.mxu0 %v15986_v62  ;;  %v13702_v29 = vld [vmem:[#allocation2 + $0x10b4] ss:$76 sps:$4 sm:$0xff]  }
 0x28e   :  { %9920 = vmatprep.subr.bf16.mxu0 %v13636_v33  ;;  %10069 = vmatprep.subr.bf16.mxu1 %v13639_v63  ;;  %v13703_v33 = vld [vmem:[#allocation2 + $0xef0] ss:$76 sps:$4 sm:$0xff]   ;;  %v13711_v63 = vld [vmem:[#allocation2 + $0xf8c] ss:$76 sps:$4 sm:$0xff]  }
 0x290   :  { %10070 = vmatpush1.bf16.msra.mxu1 %v13637_v35  ;;  %v13709_v35 = vld [vmem:[#allocation2 + $0xf88] ss:$76 sps:$4 sm:$0xff]  }
 0x291   :  { %9921 = vmatpush1.bf16.msra.mxu0 %v13634_v34  ;;  %10071 = vmatprep.subr.bf16.mxu1 %v13645_v5  ;;  %v13708_v34 = vld [vmem:[#allocation2 + $0x114c] ss:$76 sps:$4 sm:$0xff]   ;;  %v13717_v5 = vld [vmem:[#allocation2 + $0x1024] ss:$76 sps:$4 sm:$0xff]  }
 0x292   :  { %9922 = vmatprep.subr.bf16.mxu0 %v13642_v36  ;;  %v13706_v36 = vld [vmem:[#allocation2 + $0x1148] ss:$76 sps:$4 sm:$0xff]  }
 0x294   :  { %10072 = vmatpush1.bf16.msra.mxu1 %v13643_v37  ;;  %v13715_v37 = vld [vmem:[#allocation2 + $0x1020] ss:$76 sps:$4 sm:$0xff]  }
 0x295   :  { %9923 = vmatpush1.bf16.msra.mxu0 %v13640_v28  ;;  %10082 = vmatprep.subr.bf16.mxu1 %v13651_v16  ;;  %v13714_v28 = vld [vmem:[#allocation2 + $0x11e4] ss:$76 sps:$4 sm:$0xff]   ;;  %v13723_v16 = vld [vmem:[#allocation2 + $0x10bc] ss:$76 sps:$4 sm:$0xff]  }
 0x296   :  { %9924 = vmatprep.subr.bf16.mxu0 %v13648_v38  ;;  %v13712_v38 = vld [vmem:[#allocation2 + $0x11e0] ss:$76 sps:$4 sm:$0xff]  }
 0x297   :  { %10074 = vmatmul.mubr.bf16.vlgmr.msra.gmra.mrb[16].mxu1 %v15955_v48 }
 0x298   :  { %10083 = vmatpush1.bf16.msra.mxu1 %v13649_v40  ;;  %10114 = vmatprep.mubr.bf16.mxu1 %v15986_v62  ;;  %v13721_v40 = vld [vmem:[#allocation2 + $0x10b8] ss:$76 sps:$4 sm:$0xff]  }
 0x299   :  { %9925 = vmatpush1.bf16.msra.mxu0 %v13646_v39  ;;  %10084 = vmatprep.subr.bf16.mxu1 %v13657_v41  ;;  %v13720_v39 = vld [vmem:[#allocation2 + $0x127c] ss:$76 sps:$4 sm:$0xff]   ;;  %v13729_v41 = vld [vmem:[#allocation2 + $0x1154] ss:$76 sps:$4 sm:$0xff]  }
 0x29a   :  { %9926 = vmatprep.subr.bf16.mxu0 %v13654_v12  ;;  %v13718_v12 = vld [vmem:[#allocation2 + $0x1278] ss:$76 sps:$4 sm:$0xff]  }
 0x29c   :  { %10085 = vmatpush1.bf16.msra.mxu1 %v13655_v45  ;;  %v13727_v45 = vld [vmem:[#allocation2 + $0x1150] ss:$76 sps:$4 sm:$0xff]  }
 0x29d   :  { %9927 = vmatpush1.bf16.msra.mxu0 %v13652_v43  ;;  %10086 = vmatprep.subr.bf16.mxu1 %v13663_v47  ;;  %v13726_v43 = vld [vmem:[#allocation2 + $0x1314] ss:$76 sps:$4 sm:$0xff]   ;;  %v13732_v47 = vld [vmem:[#allocation2 + $0x13ac] ss:$76 sps:$4 sm:$0xff]  }
 0x29e   :  { %9928 = vmatprep.subr.bf16.mxu0 %v13660_v21  ;;  %v13724_v21 = vld [vmem:[#allocation2 + $0x1310] ss:$76 sps:$4 sm:$0xff]  }
 0x2a0   :  { %10087 = vmatpush1.bf16.msra.mxu1 %v13661_v51  ;;  %v13733_v51 = vld [vmem:[#allocation2 + $0x11e8] ss:$76 sps:$4 sm:$0xff]  }
 0x2a1   :  { %9929 = vmatpush1.bf16.msra.mxu0 %v13658_v49  ;;  %10088 = vmatprep.subr.bf16.mxu1 %v13669_v52  ;;  %v13735_v49 = vld [vmem:[#allocation2 + $0x11ec] ss:$76 sps:$4 sm:$0xff]   ;;  %v13730_v52 = vld [vmem:[#allocation2 + $0x13a8] ss:$76 sps:$4 sm:$0xff]  }
 0x2a2   :  { %9930 = vmatprep.subr.bf16.mxu0 %v13666_v54  ;;  %v13741_v54 = vld [vmem:[#allocation2 + $0x1284] ss:$76 sps:$4 sm:$0xff]  }
 0x2a4   :  { %10089 = vmatpush1.bf16.msra.mxu1 %v13667_v56  ;;  %v13739_v56 = vld [vmem:[#allocation2 + $0x1280] ss:$76 sps:$4 sm:$0xff]  }
 0x2a5   :  { %9931 = vmatpush1.bf16.msra.mxu0 %v13664_v55  ;;  %10090 = vmatprep.subr.bf16.mxu1 %v13675_v57  ;;  %v13738_v55 = vld [vmem:[#allocation2 + $0x1444] ss:$76 sps:$4 sm:$0xff]   ;;  %v13736_v57 = vld [vmem:[#allocation2 + $0x1440] ss:$76 sps:$4 sm:$0xff]  }
 0x2a6   :  { %9932 = vmatprep.subr.bf16.mxu0 %v13672_v59  ;;  %v13747_v59 = vld [vmem:[#allocation2 + $0x131c] ss:$76 sps:$4 sm:$0xff]  }
 0x2a8   :  { %10091 = vmatpush1.bf16.msra.mxu1 %v13673_v1  ;;  %v13745_v1 = vld [vmem:[#allocation2 + $0x1318] ss:$76 sps:$4 sm:$0xff]  }
 0x2a9   :  { %9933 = vmatpush1.bf16.msra.mxu0 %v13670_v61  ;;  %10092 = vmatprep.subr.bf16.mxu1 %v13681_v2  ;;  %v13744_v61 = vld [vmem:[#allocation2 + $0x14dc] ss:$76 sps:$4 sm:$0xff]   ;;  %v13742_v2 = vld [vmem:[#allocation2 + $0x14d8] ss:$76 sps:$4 sm:$0xff]  }
 0x2aa   :  { %9934 = vmatprep.subr.bf16.mxu0 %v13678_v4  ;;  %v13753_v4 = vld [vmem:[#allocation2 + $0x13b4] ss:$76 sps:$4 sm:$0xff]  }
 0x2ac   :  { %10093 = vmatpush1.bf16.msra.mxu1 %v13679_v44  ;;  %v13751_v44 = vld [vmem:[#allocation2 + $0x13b0] ss:$76 sps:$4 sm:$0xff]  }
 0x2ad   :  { %9935 = vmatpush1.bf16.msra.mxu0 %v13676_v7  ;;  %10094 = vmatprep.subr.bf16.mxu1 %v13687_v10  ;;  %v13750_v7 = vld [vmem:[#allocation2 + $0x1574] ss:$76 sps:$4 sm:$0xff]   ;;  %v13748_v10 = vld [vmem:[#allocation2 + $0x1570] ss:$76 sps:$4 sm:$0xff]  }
 0x2ae   :  { %9936 = vmatprep.subr.bf16.mxu0 %v13684_v13  ;;  %v13759_v13 = vld [vmem:[#allocation2 + $0x144c] ss:$76 sps:$4 sm:$0xff]  }
 0x2b0   :  { %10095 = vmatpush1.bf16.msra.mxu1 %v13685_v15  ;;  %v13757_v15 = vld [vmem:[#allocation2 + $0x1448] ss:$76 sps:$4 sm:$0xff]  }
 0x2b1   :  { %9937 = vmatpush1.bf16.msra.mxu0 %v13682_v14  ;;  %10096 = vmatprep.subr.bf16.mxu1 %v13693_v17  ;;  %v13756_v14 = vld [vmem:[#allocation2 + $0x160c] ss:$76 sps:$4 sm:$0xff]   ;;  %v13754_v17 = vld [vmem:[#allocation2 + $0x1608] ss:$76 sps:$4 sm:$0xff]  }
 0x2b2   :  { %9938 = vmatprep.subr.bf16.mxu0 %v13690_v18  ;;  %v13765_v18 = vld [vmem:[#allocation2 + $0x14e4] ss:$76 sps:$4 sm:$0xff]  }
 0x2b4   :  { %10097 = vmatpush1.bf16.msra.mxu1 %v13691_v20  ;;  %v13763_v20 = vld [vmem:[#allocation2 + $0x14e0] ss:$76 sps:$4 sm:$0xff]  }
 0x2b5   :  { %9939 = vmatpush1.bf16.msra.mxu0 %v13688_v19  ;;  %10098 = vmatprep.subr.bf16.mxu1 %v13699_v22  ;;  %v13762_v19 = vld [vmem:[#allocation2 + $0x16a4] ss:$76 sps:$4 sm:$0xff]   ;;  %v13760_v22 = vld [vmem:[#allocation2 + $0x16a0] ss:$76 sps:$4 sm:$0xff]  }
 0x2b6   :  { %9940 = vmatprep.subr.bf16.mxu0 %v13696_v23  ;;  %v13771_v23 = vld [vmem:[#allocation2 + $0x157c] ss:$76 sps:$4 sm:$0xff]  }
 0x2b8   :  { %10099 = vmatpush1.bf16.msra.mxu1 %v13697_v25  ;;  %v13769_v25 = vld [vmem:[#allocation2 + $0x1578] ss:$76 sps:$4 sm:$0xff]  }
 0x2b9   :  { %9941 = vmatpush1.bf16.msra.mxu0 %v13694_v24  ;;  %10100 = vmatprep.subr.bf16.mxu1 %v13705_v26  ;;  %v13768_v24 = vld [vmem:[#allocation2 + $0x173c] ss:$76 sps:$4 sm:$0xff]   ;;  %v13766_v26 = vld [vmem:[#allocation2 + $0x1738] ss:$76 sps:$4 sm:$0xff]  }
 0x2ba   :  { %9942 = vmatprep.subr.bf16.mxu0 %v13702_v29  ;;  %v13777_v29 = vld [vmem:[#allocation2 + $0x1614] ss:$76 sps:$4 sm:$0xff]  }
 0x2bc   :  { %10101 = vmatpush1.bf16.msra.mxu1 %v13703_v33  ;;  %v13775_v33 = vld [vmem:[#allocation2 + $0x1610] ss:$76 sps:$4 sm:$0xff]  }
 0x2bd   :  { %9943 = vmatpush1.bf16.msra.mxu0 %v13700_v31  ;;  %10102 = vmatprep.subr.bf16.mxu1 %v13711_v63  ;;  %v13774_v31 = vld [vmem:[#allocation2 + $0x17d4] ss:$76 sps:$4 sm:$0xff]   ;;  %v13772_v63 = vld [vmem:[#allocation2 + $0x17d0] ss:$76 sps:$4 sm:$0xff]  }
 0x2be   :  { %9944 = vmatprep.subr.bf16.mxu0 %v13708_v34  ;;  %v13783_v34 = vld [vmem:[#allocation2 + $0x16ac] ss:$76 sps:$4 sm:$0xff]  }
 0x2c0   :  { %10103 = vmatpush1.bf16.msra.mxu1 %v13709_v35  ;;  %v13780_v35 = vld [vmem:[#allocation2 + $0x186c] ss:$76 sps:$4 sm:$0xff]  }
 0x2c1   :  { %9945 = vmatpush1.bf16.msra.mxu0 %v13706_v36  ;;  %10104 = vmatprep.subr.bf16.mxu1 %v13717_v5  ;;  %v13781_v36 = vld [vmem:[#allocation2 + $0x16a8] ss:$76 sps:$4 sm:$0xff]  }
 0x2c2   :  { %9946 = vmatprep.subr.bf16.mxu0 %v13714_v28  ;;  %v13778_v5 = vld [vmem:[#allocation2 + $0x1868] ss:$76 sps:$4 sm:$0xff]   ;;  %v13789_v28 = vld [vmem:[#allocation2 + $0x1744] ss:$76 sps:$4 sm:$0xff]  }
 0x2c4   :  { %10105 = vmatpush1.bf16.msra.mxu1 %v13715_v37  ;;  %v13786_v37 = vld [vmem:[#allocation2 + $0x1904] ss:$76 sps:$4 sm:$0xff]  }
 0x2c5   :  { %9947 = vmatpush1.bf16.msra.mxu0 %v13712_v38  ;;  %10106 = vmatprep.subr.bf16.mxu1 %v13723_v16  ;;  %v13787_v38 = vld [vmem:[#allocation2 + $0x1740] ss:$76 sps:$4 sm:$0xff]  }
 0x2c6   :  { %9948 = vmatprep.subr.bf16.mxu0 %v13720_v39  ;;  %v13784_v16 = vld [vmem:[#allocation2 + $0x1900] ss:$76 sps:$4 sm:$0xff]   ;;  %v13795_v39 = vld [vmem:[#allocation2 + $0x17dc] ss:$76 sps:$4 sm:$0xff]  }
 0x2c8   :  { %10107 = vmatpush1.bf16.msra.mxu1 %v13721_v40  ;;  %v13792_v40 = vld [vmem:[#allocation2 + $0x199c] ss:$76 sps:$4 sm:$0xff]  }
 0x2c9   :  { %9949 = vmatpush1.bf16.msra.mxu0 %v13718_v12  ;;  %10108 = vmatprep.subr.bf16.mxu1 %v13729_v41  ;;  %v13793_v12 = vld [vmem:[#allocation2 + $0x17d8] ss:$76 sps:$4 sm:$0xff]  }
 0x2ca   :  { %9959 = vmatprep.subr.bf16.mxu0 %v13726_v43  ;;  %v13790_v41 = vld [vmem:[#allocation2 + $0x1998] ss:$76 sps:$4 sm:$0xff]   ;;  %v13801_v43 = vld [vmem:[#allocation2 + $0x1874] ss:$76 sps:$4 sm:$0xff]  }
 0x2cc   :  { %9951 = vmatmul.mubr.bf16.vlgmr.msra.gmra.mrb[12].mxu0 %v15988_v0  ;;  %10109 = vmatpush1.bf16.msra.mxu1 %v13727_v45  ;;  %v13798_v45 = vld [vmem:[#allocation2 + $0x1a34] ss:$76 sps:$4 sm:$0xff]  }
 0x2cd   :  { %9960 = vmatpush1.bf16.msra.mxu0 %v13724_v21  ;;  %9991 = vmatprep.mubr.bf16.mxu0 %v15990_v3  ;;  %v13799_v21 = vld [vmem:[#allocation2 + $0x1870] ss:$76 sps:$4 sm:$0xff]  }
 0x2ce   :  { %9961 = vmatprep.subr.bf16.mxu0 %v13732_v47  ;;  %10110 = vmatprep.subr.bf16.mxu1 %v13735_v49  ;;  %v13796_v47 = vld [vmem:[#allocation2 + $0x1a30] ss:$76 sps:$4 sm:$0xff]   ;;  %v13807_v49 = vld [vmem:[#allocation2 + $0x190c] ss:$76 sps:$4 sm:$0xff]  }
 0x2d0   :  { %10111 = vmatpush1.bf16.msra.mxu1 %v13733_v51  ;;  %v13804_v51 = vld [vmem:[#allocation2 + $0x1acc] ss:$76 sps:$4 sm:$0xff]  }
 0x2d1   :  { %9962 = vmatpush1.bf16.msra.mxu0 %v13730_v52  ;;  %10112 = vmatprep.subr.bf16.mxu1 %v13741_v54  ;;  %v13805_v52 = vld [vmem:[#allocation2 + $0x1908] ss:$76 sps:$4 sm:$0xff]  }
 0x2d2   :  { %9963 = vmatprep.subr.bf16.mxu0 %v13738_v55  ;;  %v13802_v54 = vld [vmem:[#allocation2 + $0x1ac8] ss:$76 sps:$4 sm:$0xff]   ;;  %v13813_v55 = vld [vmem:[#allocation2 + $0x19a4] ss:$76 sps:$4 sm:$0xff]  }
 0x2d4   :  { %10113 = vmatpush1.bf16.msra.mxu1 %v13739_v56  ;;  %v13810_v56 = vld [vmem:[#allocation2 + $0x1b64] ss:$76 sps:$4 sm:$0xff]  }
 0x2d5   :  { %9964 = vmatpush1.bf16.msra.mxu0 %v13736_v57  ;;  %10123 = vmatprep.subr.bf16.mxu1 %v13747_v59  ;;  %v13811_v57 = vld [vmem:[#allocation2 + $0x19a0] ss:$76 sps:$4 sm:$0xff]  }
 0x2d6   :  { %9965 = vmatprep.subr.bf16.mxu0 %v13744_v61  ;;  %v13808_v59 = vld [vmem:[#allocation2 + $0x1b60] ss:$76 sps:$4 sm:$0xff]   ;;  %v13819_v61 = vld [vmem:[#allocation2 + $0x1a3c] ss:$76 sps:$4 sm:$0xff]  }
 0x2d7   :  { %10115 = vmatmul.mubr.bf16.vlgmr.msra.gmra.mrb[16].mxu1 %v15988_v0 }
 0x2d8   :  { %10124 = vmatpush1.bf16.msra.mxu1 %v13745_v1  ;;  %10155 = vmatprep.mubr.bf16.mxu1 %v15990_v3  ;;  %v13816_v1 = vld [vmem:[#allocation2 + $0x1bfc] ss:$76 sps:$4 sm:$0xff]  }
 0x2d9   :  { %9966 = vmatpush1.bf16.msra.mxu0 %v13742_v2  ;;  %10125 = vmatprep.subr.bf16.mxu1 %v13753_v4  ;;  %v13817_v2 = vld [vmem:[#allocation2 + $0x1a38] ss:$76 sps:$4 sm:$0xff]  }
 0x2da   :  { %9967 = vmatprep.subr.bf16.mxu0 %v13750_v7  ;;  %v13814_v4 = vld [vmem:[#allocation2 + $0x1bf8] ss:$76 sps:$4 sm:$0xff]   ;;  %v13825_v7 = vld [vmem:[#allocation2 + $0x1ad4] ss:$76 sps:$4 sm:$0xff]  }
 0x2dc   :  { %10126 = vmatpush1.bf16.msra.mxu1 %v13751_v44  ;;  %v13822_v44 = vld [vmem:[#allocation2 + $0x1c94] ss:$76 sps:$4 sm:$0xff]  }
 0x2dd   :  { %9968 = vmatpush1.bf16.msra.mxu0 %v13748_v10  ;;  %10127 = vmatprep.subr.bf16.mxu1 %v13759_v13  ;;  %v13823_v10 = vld [vmem:[#allocation2 + $0x1ad0] ss:$76 sps:$4 sm:$0xff]  }
 0x2de   :  { %9969 = vmatprep.subr.bf16.mxu0 %v13756_v14  ;;  %v13820_v13 = vld [vmem:[#allocation2 + $0x1c90] ss:$76 sps:$4 sm:$0xff]   ;;  %v13828_v14 = vld [vmem:[#allocation2 + $0x1d2c] ss:$76 sps:$4 sm:$0xff]  }
 0x2e0   :  { %10128 = vmatpush1.bf16.msra.mxu1 %v13757_v15  ;;  %v13831_v15 = vld [vmem:[#allocation2 + $0x1b6c] ss:$76 sps:$4 sm:$0xff]  }
 0x2e1   :  { %9970 = vmatpush1.bf16.msra.mxu0 %v13754_v17  ;;  %10129 = vmatprep.subr.bf16.mxu1 %v13765_v18  ;;  %v13829_v17 = vld [vmem:[#allocation2 + $0x1b68] ss:$76 sps:$4 sm:$0xff]  }
 0x2e2   :  { %9971 = vmatprep.subr.bf16.mxu0 %v13762_v19  ;;  %v13826_v18 = vld [vmem:[#allocation2 + $0x1d28] ss:$76 sps:$4 sm:$0xff]   ;;  %v13837_v19 = vld [vmem:[#allocation2 + $0x1c04] ss:$76 sps:$4 sm:$0xff]  }
 0x2e4   :  { %10130 = vmatpush1.bf16.msra.mxu1 %v13763_v20  ;;  %v13834_v20 = vld [vmem:[#allocation2 + $0x1dc4] ss:$76 sps:$4 sm:$0xff]  }
 0x2e5   :  { %9972 = vmatpush1.bf16.msra.mxu0 %v13760_v22  ;;  %10131 = vmatprep.subr.bf16.mxu1 %v13771_v23  ;;  %v13835_v22 = vld [vmem:[#allocation2 + $0x1c00] ss:$76 sps:$4 sm:$0xff]  }
 0x2e6   :  { %9973 = vmatprep.subr.bf16.mxu0 %v13768_v24  ;;  %v13832_v23 = vld [vmem:[#allocation2 + $0x1dc0] ss:$76 sps:$4 sm:$0xff]   ;;  %v13843_v24 = vld [vmem:[#allocation2 + $0x1c9c] ss:$76 sps:$4 sm:$0xff]  }
 0x2e8   :  { %10132 = vmatpush1.bf16.msra.mxu1 %v13769_v25  ;;  %v13840_v25 = vld [vmem:[#allocation2 + $0x1e5c] ss:$76 sps:$4 sm:$0xff]  }
 0x2e9   :  { %9974 = vmatpush1.bf16.msra.mxu0 %v13766_v26  ;;  %10133 = vmatprep.subr.bf16.mxu1 %v13777_v29  ;;  %v13841_v26 = vld [vmem:[#allocation2 + $0x1c98] ss:$76 sps:$4 sm:$0xff]  }
 0x2ea   :  { %9975 = vmatprep.subr.bf16.mxu0 %v13774_v31  ;;  %v13838_v29 = vld [vmem:[#allocation2 + $0x1e58] ss:$76 sps:$4 sm:$0xff]   ;;  %v13849_v31 = vld [vmem:[#allocation2 + $0x1d34] ss:$76 sps:$4 sm:$0xff]  }
 0x2ec   :  { %10134 = vmatpush1.bf16.msra.mxu1 %v13775_v33  ;;  %v13846_v33 = vld [vmem:[#allocation2 + $0x1ef4] ss:$76 sps:$4 sm:$0xff]  }
 0x2ed   :  { %9976 = vmatpush1.bf16.msra.mxu0 %v13772_v63  ;;  %10135 = vmatprep.subr.bf16.mxu1 %v13783_v34  ;;  %v13847_v63 = vld [vmem:[#allocation2 + $0x1d30] ss:$76 sps:$4 sm:$0xff]  }
 0x2ee   :  { %9977 = vmatprep.subr.bf16.mxu0 %v13780_v35  ;;  %v13844_v34 = vld [vmem:[#allocation2 + $0x1ef0] ss:$76 sps:$4 sm:$0xff]   ;;  %v3304_v35 = vld [vmem:[%s16162_s4] sm:$0xff] }
 0x2f0   :  { %10136 = vmatpush1.bf16.msra.mxu1 %v13781_v36  ;;  %v13855_v36 = vld [vmem:[#allocation2 + $0x1dcc] ss:$76 sps:$4 sm:$0xff]  }
 0x2f1   :  { %9978 = vmatpush1.bf16.msra.mxu0 %v13778_v5  ;;  %10137 = vmatprep.subr.bf16.mxu1 %v13789_v28  ;;  %v13852_v5 = vld [vmem:[#allocation2 + $0x1f8c] ss:$76 sps:$4 sm:$0xff]   ;;  %v3313_v28 = vrot.slane %v3304_v35, %v15885_v42 }
 0x2f2   :  { %9979 = vmatprep.subr.bf16.mxu0 %v13786_v37  ;;  %v13853_v37 = vld [vmem:[#allocation2 + $0x1dc8] ss:$76 sps:$4 sm:$0xff]  }
 0x2f4   :  { %10138 = vmatpush1.bf16.msra.mxu1 %v13787_v38  ;;  %v13850_v38 = vld [vmem:[#allocation2 + $0x1f88] ss:$76 sps:$4 sm:$0xff]  }
 0x2f5   :  { %9980 = vmatpush1.bf16.msra.mxu0 %v13784_v16  ;;  %10139 = vmatprep.subr.bf16.mxu1 %v13795_v39  ;;  %v3317_v16 = vrot.slane %v3304_v35, %v15891_v46  ;;  %v13861_v39 = vld [vmem:[#allocation2 + $0x1e64] ss:$76 sps:$4 sm:$0xff]  }
 0x2f6   :  { %9981 = vmatprep.subr.bf16.mxu0 %v13792_v40  ;;  %v13858_v40 = vld [vmem:[#allocation2 + $0x2024] ss:$76 sps:$4 sm:$0xff]  }
 0x2f8   :  { %10140 = vmatpush1.bf16.msra.mxu1 %v13793_v12 }
 0x2f9   :  { %9982 = vmatpush1.bf16.msra.mxu0 %v13790_v41  ;;  %10141 = vmatprep.subr.bf16.mxu1 %v13801_v43 }
 0x2fa   :  { %9983 = vmatprep.subr.bf16.mxu0 %v13798_v45  ;;  %v13859_v45 = vld [vmem:[#allocation2 + $0x1e60] ss:$76 sps:$4 sm:$0xff]  }
 0x2fc   :  { %10142 = vmatpush1.bf16.msra.mxu1 %v13799_v21 }
 0x2fd   :  { %9984 = vmatpush1.bf16.msra.mxu0 %v13796_v47  ;;  %10143 = vmatprep.subr.bf16.mxu1 %v13807_v49  ;;  %v13856_v49 = vld [vmem:[#allocation2 + $0x2020] ss:$76 sps:$4 sm:$0xff]  }
 0x2fe   :  { %9985 = vmatprep.subr.bf16.mxu0 %v13804_v51  ;;  %v13867_v51 = vld [vmem:[#allocation2 + $0x1efc] ss:$76 sps:$4 sm:$0xff]  }
 0x300   :  { %10144 = vmatpush1.bf16.msra.mxu1 %v13805_v52 }
 0x301   :  { %9986 = vmatpush1.bf16.msra.mxu0 %v13802_v54  ;;  %10145 = vmatprep.subr.bf16.mxu1 %v13813_v55  ;;  %v13864_v55 = vld [vmem:[#allocation2 + $0x20bc] ss:$76 sps:$4 sm:$0xff]  }
 0x302   :  { %9987 = vmatprep.subr.bf16.mxu0 %v13810_v56 }
 0x304   :  { %10146 = vmatpush1.bf16.msra.mxu1 %v13811_v57  ;;  %v13865_v57 = vld [vmem:[#allocation2 + $0x1ef8] ss:$76 sps:$4 sm:$0xff]  }
 0x305   :  { %9988 = vmatpush1.bf16.msra.mxu0 %v13808_v59  ;;  %10147 = vmatprep.subr.bf16.mxu1 %v13819_v61  ;;  %v13862_v59 = vld [vmem:[#allocation2 + $0x20b8] ss:$76 sps:$4 sm:$0xff]   ;;  %v13873_v61 = vld [vmem:[#allocation2 + $0x1f94] ss:$76 sps:$4 sm:$0xff]  }
 0x306   :  { %9989 = vmatprep.subr.bf16.mxu0 %v13816_v1  ;;  %v13870_v1 = vld [vmem:[#allocation2 + $0x2154] ss:$76 sps:$4 sm:$0xff]  }
 0x308   :  { %10148 = vmatpush1.bf16.msra.mxu1 %v13817_v2  ;;  %v3321_v2 = vrot.slane %v3304_v35, %v15965_v8 }
 0x309   :  { %9990 = vmatpush1.bf16.msra.mxu0 %v13814_v4  ;;  %10149 = vmatprep.subr.bf16.mxu1 %v13825_v7  ;;  %v3325_v4 = vrot.slane %v3304_v35, %v15968_v9  ;;  %v13871_v7 = vld [vmem:[#allocation2 + $0x1f90] ss:$76 sps:$4 sm:$0xff]   ;;  %v13883_v35 = vld [vmem:[#allocation2 + $0x20c0] ss:$76 sps:$4 sm:$0xff]  }
 0x30a   :  { %10000 = vmatprep.subr.bf16.mxu0 %v13822_v44  ;;  %v13868_v44 = vld [vmem:[#allocation2 + $0x2150] ss:$76 sps:$4 sm:$0xff]  }
 0x30c   :  { %9992 = vmatmul.mubr.bf16.vlgmr.msra.gmra.mrb[12].mxu0 %v16004_v30  ;;  %10150 = vmatpush1.bf16.msra.mxu1 %v13823_v10  ;;  %v13879_v10 = vld [vmem:[#allocation2 + $0x202c] ss:$76 sps:$4 sm:$0xff]  }
 0x30d   :  { %10001 = vmatpush1.bf16.msra.mxu0 %v13820_v13  ;;  %10032 = vmatprep.mubr.bf16.mxu0 %v16019_v6 }
 0x30e   :  { %10002 = vmatprep.subr.bf16.mxu0 %v13828_v14  ;;  %10151 = vmatprep.subr.bf16.mxu1 %v13831_v15  ;;  %v13876_v14 = vld [vmem:[#allocation2 + $0x21ec] ss:$76 sps:$4 sm:$0xff]  }
 0x310   :  { %10152 = vmatpush1.bf16.msra.mxu1 %v13829_v17 }
 0x311   :  { %10003 = vmatpush1.bf16.msra.mxu0 %v13826_v18  ;;  %10153 = vmatprep.subr.bf16.mxu1 %v13837_v19 }
 0x312   :  { %10004 = vmatprep.subr.bf16.mxu0 %v13834_v20  ;;  %v13874_v20 = vld [vmem:[#allocation2 + $0x21e8] ss:$76 sps:$4 sm:$0xff]  }
 0x314   :  { %10154 = vmatpush1.bf16.msra.mxu1 %v13835_v22  ;;  %v13877_v22 = vld [vmem:[#allocation2 + $0x2028] ss:$76 sps:$4 sm:$0xff]  }
 0x315   :  { %10005 = vmatpush1.bf16.msra.mxu0 %v13832_v23  ;;  %10164 = vmatprep.subr.bf16.mxu1 %v13843_v24 }
 0x316   :  { %10006 = vmatprep.subr.bf16.mxu0 %v13840_v25  ;;  %v13885_v25 = vld [vmem:[#allocation2 + $0x20c4] ss:$76 sps:$4 sm:$0xff]  }
 0x317   :  { %10156 = vmatmul.mubr.bf16.vlgmr.msra.gmra.mrb[16].mxu1 %v16004_v30 }
 0x318   :  { %10165 = vmatpush1.bf16.msra.mxu1 %v13841_v26  ;;  %10196 = vmatprep.mubr.bf16.mxu1 %v16019_v6 }
 0x319   :  { %10007 = vmatpush1.bf16.msra.mxu0 %v13838_v29  ;;  %10166 = vmatprep.subr.bf16.mxu1 %v13849_v31  ;;  %v13882_v31 = vld [vmem:[#allocation2 + $0x2284] ss:$76 sps:$4 sm:$0xff]  }
 0x31a   :  { %10008 = vmatprep.subr.bf16.mxu0 %v13846_v33 }
 0x31c   :  { %10167 = vmatpush1.bf16.msra.mxu1 %v13847_v63 }
 0x31d   :  { %10009 = vmatpush1.bf16.msra.mxu0 %v13844_v34  ;;  %10168 = vmatprep.subr.bf16.mxu1 %v13855_v36  ;;  %v13880_v36 = vld [vmem:[#allocation2 + $0x2280] ss:$76 sps:$4 sm:$0xff]  }
 0x31e   :  { %10010 = vmatprep.subr.bf16.mxu0 %v13852_v5  ;;  %v13891_v5 = vld [vmem:[#allocation2 + $0x215c] ss:$76 sps:$4 sm:$0xff]  }
 0x31f   :  { %v9706_v12 = vpop.f32.mrb[8].mxu0 }
 0x320   :  { %v13014_v41 = vadd.f32 %v9706_v12, %v3313_v28  ;;  %v9708_v43 = vpop.f32.mrb[9].mxu0  ;;  %10169 = vmatpush1.bf16.msra.mxu1 %v13853_v37  ;;  %v13888_v28 = vld [vmem:[#allocation2 + $0x231c] ss:$76 sps:$4 sm:$0xff]   ;;  %v13889_v37 = vld [vmem:[#allocation2 + $0x2158] ss:$76 sps:$4 sm:$0xff]  }
 0x321   :  { %v13015_v21 = vadd.f32 %v9708_v43, %v3317_v16  ;;  %10011 = vmatpush1.bf16.msra.mxu0 %v13850_v38  ;;  %v9710_v47 = vpop.f32.mrb[10].mxu0  ;;  %10170 = vmatprep.subr.bf16.mxu1 %v13861_v39  ;;  %v13886_v38 = vld [vmem:[#allocation2 + $0x2318] ss:$76 sps:$4 sm:$0xff]   ;;  %v13897_v16 = vld [vmem:[#allocation2 + $0x21f4] ss:$76 sps:$4 sm:$0xff]  }
 0x322   :  { %v12897_v52 = vmul.f32 -1.442695, %v13014_v41  ;;  %v9711_v54 = vpop.f32.mrb[11].mxu0  ;;  %10012 = vmatprep.subr.bf16.mxu0 %v13858_v40  ;;  %v13894_v39 = vld [vmem:[#allocation2 + $0x23b4] ss:$76 sps:$4 sm:$0xff]  }
 0x323   :  { %v12898_v56 = vmul.f32 -1.442695, %v13015_v21  ;;  %v13895_v40 = vld [vmem:[#allocation2 + $0x21f0] ss:$76 sps:$4 sm:$0xff]   ;;  %v13903_v43 = vld [vmem:[#allocation2 + $0x228c] ss:$76 sps:$4 sm:$0xff]  }
 0x324   :  { %14981 = vpow2.f32 %v12897_v52  ;;  %10171 = vmatpush1.bf16.msra.mxu1 %v13859_v45  ;;  %v13892_v41 = vld [vmem:[#allocation2 + $0x23b0] ss:$76 sps:$4 sm:$0xff]   ;;  %v13900_v47 = vld [vmem:[#allocation2 + $0x244c] ss:$76 sps:$4 sm:$0xff]   ;;  %v13901_v54 = vld [vmem:[#allocation2 + $0x2288] ss:$76 sps:$4 sm:$0xff]  }
 0x325   :  { %14983 = vpow2.f32 %v12898_v56  ;;  %10013 = vmatpush1.bf16.msra.mxu0 %v13856_v49  ;;  %10172 = vmatprep.subr.bf16.mxu1 %v13867_v51  ;;  %v13898_v56 = vld [vmem:[#allocation2 + $0x2448] ss:$76 sps:$4 sm:$0xff]  }
 0x326   :  { %10014 = vmatprep.subr.bf16.mxu0 %v13864_v55 }
 0x328   :  { %10173 = vmatpush1.bf16.msra.mxu1 %v13865_v57  ;;  %v13909_v57 = vld [vmem:[#allocation2 + $0x2324] ss:$76 sps:$4 sm:$0xff]  }
 0x329   :  { %10015 = vmatpush1.bf16.msra.mxu0 %v13862_v59  ;;  %10174 = vmatprep.subr.bf16.mxu1 %v13873_v61  ;;  %v13906_v59 = vld [vmem:[#allocation2 + $0x24e4] ss:$76 sps:$4 sm:$0xff]   ;;  %v13907_v61 = vld [vmem:[#allocation2 + $0x2320] ss:$76 sps:$4 sm:$0xff]  }
 0x32a   :  { %v9870_v13 = vpop.f32.mrb[12].mxu1  ;;  %10016 = vmatprep.subr.bf16.mxu0 %v13870_v1  ;;  %v13904_v1 = vld [vmem:[#allocation2 + $0x24e0] ss:$76 sps:$4 sm:$0xff]  }
 0x32b   :  { %v13016_v15 = vadd.f32 %v9870_v13, %v3321_v2  ;;  %v9872_v17 = vpop.f32.mrb[13].mxu1  ;;  %v13915_v2 = vld [vmem:[#allocation2 + $0x23bc] ss:$76 sps:$4 sm:$0xff]  }
 0x32c   :  { %v13017_v18 = vadd.f32 %v9872_v17, %v3325_v4  ;;  %v9874_v19 = vpop.f32.mrb[14].mxu1  ;;  %10175 = vmatpush1.bf16.msra.mxu1 %v13871_v7  ;;  %v13912_v4 = vld [vmem:[#allocation2 + $0x257c] ss:$76 sps:$4 sm:$0xff]   ;;  %v13913_v7 = vld [vmem:[#allocation2 + $0x23b8] ss:$76 sps:$4 sm:$0xff]  }
 0x32d   :  { %v12899_v23 = vmul.f32 -1.442695, %v13016_v15  ;;  %10017 = vmatpush1.bf16.msra.mxu0 %v13868_v44  ;;  %v9875_v24 = vpop.f32.mrb[15].mxu1  ;;  %10176 = vmatprep.subr.bf16.mxu1 %v13879_v10  ;;  %v13910_v44 = vld [vmem:[#allocation2 + $0x2578] ss:$76 sps:$4 sm:$0xff]  }
 0x32e   :  { %v14982_v26 = vpop.eup %14981  ;;  %v12900_v29 = vmul.f32 -1.442695, %v13017_v18  ;;  %10018 = vmatprep.subr.bf16.mxu0 %v13876_v14  ;;  %v13921_v10 = vld [vmem:[#allocation2 + $0x2454] ss:$76 sps:$4 sm:$0xff]   ;;  %v13918_v14 = vld [vmem:[#allocation2 + $0x24] ss:$76 sps:$4 sm:$0xff]  }
 0x32f   :  { %v14984_v33 = vpop.eup %14983  ;;  %v11242_v63 = vadd.f32 1.0, %v14982_v26  ;;  %14985 = vpow2.f32 %v12899_v23  ;;  %v13919_v18 = vld [vmem:[#allocation2 + $0x2450] ss:$76 sps:$4 sm:$0xff]   ;;  %v13916_v19 = vld [vmem:[#allocation2 + $0x20] ss:$76 sps:$4 sm:$0xff]  }
 0x330   :  { %v11243_v34 = vadd.f32 1.0, %v14984_v33  ;;  %14987 = vpow2.f32 %v12900_v29  ;;  %10177 = vmatpush1.bf16.msra.mxu1 %v13877_v22  ;;  %v13924_v23 = vld [vmem:[#allocation2 + $0xbc] ss:$76 sps:$4 sm:$0xff]   ;;  %v13927_v24 = vld [vmem:[#allocation2 + $0x24ec] ss:$76 sps:$4 sm:$0xff]  }
 0x331   :  { %14989 = vrcp.f32 %v11242_v63  ;;  %10019 = vmatpush1.bf16.msra.mxu0 %v13874_v20  ;;  %10178 = vmatprep.subr.bf16.mxu1 %v13885_v25  ;;  %v13925_v26 = vld [vmem:[#allocation2 + $0x24e8] ss:$76 sps:$4 sm:$0xff]   ;;  %v13922_v29 = vld [vmem:[#allocation2 + $0xb8] ss:$76 sps:$4 sm:$0xff]   ;;  %v13931_v63 = vld [vmem:[#allocation2 + $0x2580] ss:$76 sps:$4 sm:$0xff]  }
 0x332   :  { %14991 = vrcp.f32 %v11243_v34  ;;  %10020 = vmatprep.subr.bf16.mxu0 %v13882_v31  ;;  %v13933_v31 = vld [vmem:[#allocation2 + $0x2584] ss:$76 sps:$4 sm:$0xff]   ;;  %v13930_v33 = vld [vmem:[#allocation2 + $0x154] ss:$76 sps:$4 sm:$0xff]  }
 0x333   :  { %v13928_v34 = vld [vmem:[#allocation2 + $0x150] ss:$76 sps:$4 sm:$0xff]  }
 0x334   :  { %10179 = vmatpush1.bf16.msra.mxu1 %v13883_v35  ;;  %v13939_v35 = vld [vmem:[#allocation2 + $0x2c] ss:$76 sps:$4 sm:$0xff]  }
 0x335   :  { %10021 = vmatpush1.bf16.msra.mxu0 %v13880_v36  ;;  %10180 = vmatprep.subr.bf16.mxu1 %v13891_v5  ;;  %v13936_v36 = vld [vmem:[#allocation2 + $0x1ec] ss:$76 sps:$4 sm:$0xff]   ;;  %v13937_v5 = vld [vmem:[#allocation2 + $0x28] ss:$76 sps:$4 sm:$0xff]  }
 0x336   :  { %10022 = vmatprep.subr.bf16.mxu0 %v13888_v28  ;;  %v13934_v28 = vld [vmem:[#allocation2 + $0x1e8] ss:$76 sps:$4 sm:$0xff]  }
 0x338   :  { %10181 = vmatpush1.bf16.msra.mxu1 %v13889_v37  ;;  %v13945_v37 = vld [vmem:[#allocation2 + $0xc4] ss:$76 sps:$4 sm:$0xff]  }
 0x339   :  { %v14986_v12 = vpop.eup %14985  ;;  %10023 = vmatpush1.bf16.msra.mxu0 %v13886_v38  ;;  %10182 = vmatprep.subr.bf16.mxu1 %v13897_v16  ;;  %v13942_v38 = vld [vmem:[#allocation2 + $0x284] ss:$76 sps:$4 sm:$0xff]   ;;  %v13943_v16 = vld [vmem:[#allocation2 + $0xc0] ss:$76 sps:$4 sm:$0xff]  }
 0x33a   :  { %v14988_v45 = vpop.eup %14987  ;;  %v11244_v21 = vadd.f32 1.0, %v14986_v12  ;;  %10024 = vmatprep.subr.bf16.mxu0 %v13894_v39  ;;  %v13940_v39 = vld [vmem:[#allocation2 + $0x280] ss:$76 sps:$4 sm:$0xff]   ;;  %v13948_v12 = vld [vmem:[#allocation2 + $0x31c] ss:$76 sps:$4 sm:$0xff]  }
 0x33b   :  { %v14990_v49 = vpop.eup %14989  ;;  %v11245_v51 = vadd.f32 1.0, %v14988_v45  ;;  %v13957_v45 = vld [vmem:[#allocation2 + $0x1f4] ss:$76 sps:$4 sm:$0xff]  }
 0x33c   :  { %v14992_v52 = vpop.eup %14991  ;;  %14993 = vrcp.f32 %v11244_v21  ;;  %10183 = vmatpush1.bf16.msra.mxu1 %v13895_v40  ;;  %v13951_v40 = vld [vmem:[#allocation2 + $0x15c] ss:$76 sps:$4 sm:$0xff]   ;;  %v13954_v21 = vld [vmem:[#allocation2 + $0x3b4] ss:$76 sps:$4 sm:$0xff]  }
 0x33d   :  { %v11318_v55 = vcombine.low %v14990_v49, %v14992_v52  ;;  %14995 = vrcp.f32 %v11245_v51  ;;  %10025 = vmatpush1.bf16.msra.mxu0 %v13892_v41  ;;  %10184 = vmatprep.subr.bf16.mxu1 %v13903_v43  ;;  %v13949_v41 = vld [vmem:[#allocation2 + $0x158] ss:$76 sps:$4 sm:$0xff]   ;;  %v13952_v49 = vld [vmem:[#allocation2 + $0x3b0] ss:$76 sps:$4 sm:$0xff]  }
 0x33e   :  { %10026 = vmatprep.subr.bf16.mxu0 %v13900_v47  ;;  %v13946_v43 = vld [vmem:[#allocation2 + $0x318] ss:$76 sps:$4 sm:$0xff]   ;;  %v13955_v47 = vld [vmem:[#allocation2 + $0x1f0] ss:$76 sps:$4 sm:$0xff]  }
 0x33f   :  { %v11326_v20 = vrot.slane %v11318_v55, %v15212_v53  ;;  %v13963_v51 = vld [vmem:[#allocation2 + $0x28c] ss:$76 sps:$4 sm:$0xff]   ;;  %v13958_v55 = vld [vmem:[#allocation2 + $0x448] ss:$76 sps:$4 sm:$0xff]  }
 0x340   :  { %10185 = vmatpush1.bf16.msra.mxu1 %v13901_v54  ;;  %v13960_v52 = vld [vmem:[#allocation2 + $0x44c] ss:$76 sps:$4 sm:$0xff]   ;;  %v13961_v54 = vld [vmem:[#allocation2 + $0x288] ss:$76 sps:$4 sm:$0xff]  }
 0x341   :  { %10027 = vmatpush1.bf16.msra.mxu0 %v13898_v56  ;;  %10186 = vmatprep.subr.bf16.mxu1 %v13909_v57  ;;  %v13969_v56 = vld [vmem:[#allocation2 + $0x324] ss:$76 sps:$4 sm:$0xff]  }
 0x342   :  { %10028 = vmatprep.subr.bf16.mxu0 %v13906_v59  ;;  %v13966_v57 = vld [vmem:[#allocation2 + $0x4e4] ss:$76 sps:$4 sm:$0xff]   ;;  %v13967_v59 = vld [vmem:[#allocation2 + $0x320] ss:$76 sps:$4 sm:$0xff]  }
 0x344   :  { %10187 = vmatpush1.bf16.msra.mxu1 %v13907_v61  ;;  %v13964_v61 = vld [vmem:[#allocation2 + $0x4e0] ss:$76 sps:$4 sm:$0xff]  }
 0x345   :  { %10029 = vmatpush1.bf16.msra.mxu0 %v13904_v1  ;;  %10188 = vmatprep.subr.bf16.mxu1 %v13915_v2  ;;  %v13975_v1 = vld [vmem:[#allocation2 + $0x3bc] ss:$76 sps:$4 sm:$0xff]  }
 0x346   :  { %v14994_v13 = vpop.eup %14993  ;;  %10030 = vmatprep.subr.bf16.mxu0 %v13912_v4  ;;  %v13972_v2 = vld [vmem:[#allocation2 + $0x57c] ss:$76 sps:$4 sm:$0xff]   ;;  %v13973_v4 = vld [vmem:[#allocation2 + $0x3b8] ss:$76 sps:$4 sm:$0xff]  }
 0x347   :  { %v14996_v15 = vpop.eup %14995 }
 0x348   :  { %v11319_v17 = vcombine.low %v14994_v13, %v14996_v15  ;;  %10189 = vmatpush1.bf16.msra.mxu1 %v13913_v7  ;;  %v13970_v7 = vld [vmem:[#allocation2 + $0x578] ss:$76 sps:$4 sm:$0xff]   ;;  %v13979_v13 = vld [vmem:[#allocation2 + $0x450] ss:$76 sps:$4 sm:$0xff]  }
 0x349   :  { %10031 = vmatpush1.bf16.msra.mxu0 %v13910_v44  ;;  %10190 = vmatprep.subr.bf16.mxu1 %v13921_v10  ;;  %v13981_v44 = vld [vmem:[#allocation2 + $0x454] ss:$76 sps:$4 sm:$0xff]   ;;  %v13987_v15 = vld [vmem:[#allocation2 + $0x4ec] ss:$76 sps:$4 sm:$0xff]  }
 0x34a   :  { %v11333_v22 = vrot.slane %v11319_v17, %v15212_v53  ;;  %10205 = vmatprep.subr.bf16.mxu0 %v13918_v14  ;;  %v13978_v10 = vld [vmem:[#allocation2 + $0x614] ss:$76 sps:$4 sm:$0xff]   ;;  %v13976_v14 = vld [vmem:[#allocation2 + $0x610] ss:$76 sps:$4 sm:$0xff]   ;;  %v13984_v17 = vld [vmem:[#allocation2 + $0x6ac] ss:$76 sps:$4 sm:$0xff]  }
 0x34c   :  { %v11334_v25 = vcombine.low %v11326_v20, %v11333_v22  ;;  %10033 = vmatmul.mubr.bf16.vlgmr.msra.gmra.mrb[12].mxu0 %v16021_v11  ;;  %10191 = vmatpush1.bf16.msra.mxu1 %v13919_v18  ;;  %v13985_v18 = vld [vmem:[#allocation2 + $0x4e8] ss:$76 sps:$4 sm:$0xff]   ;;  %v13993_v20 = vld [vmem:[#allocation2 + $0x584] ss:$76 sps:$4 sm:$0xff]  }
 0x34d   :  { %10206 = vmatpush1.bf16.msra.mxu0 %v13916_v19  ;;  %10237 = vmatprep.mubr.bf16.mxu0 %v15957_v50  ;;  %v13982_v19 = vld [vmem:[#allocation2 + $0x6a8] ss:$76 sps:$4 sm:$0xff]   ;;  %v13990_v22 = vld [vmem:[#allocation2 + $0x744] ss:$76 sps:$4 sm:$0xff]  }
 0x34e   :  { %11407 = vst [vmem:[%s16163_s5] sm:$0xff] %v11334_v25  ;;  %10207 = vmatprep.subr.bf16.mxu0 %v13924_v23  ;;  %10192 = vmatprep.subr.bf16.mxu1 %v13927_v24  ;;  %v13991_v23 = vld [vmem:[#allocation2 + $0x580] ss:$76 sps:$4 sm:$0xff]   ;;  %v13999_v25 = vld [vmem:[#allocation2 + $0x61c] ss:$76 sps:$4 sm:$0xff]  }
 0x34f   :  { %v13988_v24 = vld [vmem:[#allocation2 + $0x740] ss:$76 sps:$4 sm:$0xff]  }
 0x350   :  { %10193 = vmatpush1.bf16.msra.mxu1 %v13925_v26  ;;  %v13996_v26 = vld [vmem:[#allocation2 + $0x7dc] ss:$76 sps:$4 sm:$0xff]  }
 0x351   :  { %10208 = vmatpush1.bf16.msra.mxu0 %v13922_v29  ;;  %10194 = vmatprep.subr.bf16.mxu1 %v13933_v31  ;;  %v13997_v29 = vld [vmem:[#allocation2 + $0x618] ss:$76 sps:$4 sm:$0xff]  }
 0x352   :  { %10209 = vmatprep.subr.bf16.mxu0 %v13930_v33  ;;  %v13994_v31 = vld [vmem:[#allocation2 + $0x7d8] ss:$76 sps:$4 sm:$0xff]   ;;  %v14005_v33 = vld [vmem:[#allocation2 + $0x6b4] ss:$76 sps:$4 sm:$0xff]  }
 0x354   :  { %10195 = vmatpush1.bf16.msra.mxu1 %v13931_v63  ;;  %v14002_v63 = vld [vmem:[#allocation2 + $0x874] ss:$76 sps:$4 sm:$0xff]  }
 0x355   :  { %10210 = vmatpush1.bf16.msra.mxu0 %v13928_v34  ;;  %10369 = vmatprep.subr.bf16.mxu1 %v13939_v35  ;;  %v14003_v34 = vld [vmem:[#allocation2 + $0x6b0] ss:$76 sps:$4 sm:$0xff]  }
 0x356   :  { %10211 = vmatprep.subr.bf16.mxu0 %v13936_v36  ;;  %v14000_v35 = vld [vmem:[#allocation2 + $0x870] ss:$76 sps:$4 sm:$0xff]   ;;  %v14011_v36 = vld [vmem:[#allocation2 + $0x74c] ss:$76 sps:$4 sm:$0xff]  }
 0x357   :  { %10197 = vmatmul.mubr.bf16.vlgmr.msra.gmra.mrb[16].mxu1 %v16021_v11 }
 0x358   :  { %10370 = vmatpush1.bf16.msra.mxu1 %v13937_v5  ;;  %10401 = vmatprep.mubr.bf16.mxu1 %v15957_v50  ;;  %v14008_v5 = vld [vmem:[#allocation2 + $0x90c] ss:$76 sps:$4 sm:$0xff]  }
 0x359   :  { %10212 = vmatpush1.bf16.msra.mxu0 %v13934_v28  ;;  %10371 = vmatprep.subr.bf16.mxu1 %v13945_v37  ;;  %v14009_v28 = vld [vmem:[#allocation2 + $0x748] ss:$76 sps:$4 sm:$0xff]  }
 0x35a   :  { %10213 = vmatprep.subr.bf16.mxu0 %v13942_v38  ;;  %v14006_v37 = vld [vmem:[#allocation2 + $0x908] ss:$76 sps:$4 sm:$0xff]   ;;  %v14017_v38 = vld [vmem:[#allocation2 + $0x7e4] ss:$76 sps:$4 sm:$0xff]  }
 0x35c   :  { %10372 = vmatpush1.bf16.msra.mxu1 %v13943_v16  ;;  %v14014_v16 = vld [vmem:[#allocation2 + $0x9a4] ss:$76 sps:$4 sm:$0xff]  }
 0x35d   :  { %10214 = vmatpush1.bf16.msra.mxu0 %v13940_v39  ;;  %10373 = vmatprep.subr.bf16.mxu1 %v13951_v40  ;;  %v14015_v39 = vld [vmem:[#allocation2 + $0x7e0] ss:$76 sps:$4 sm:$0xff]  }
 0x35e   :  { %10215 = vmatprep.subr.bf16.mxu0 %v13948_v12  ;;  %v14012_v40 = vld [vmem:[#allocation2 + $0x9a0] ss:$76 sps:$4 sm:$0xff]   ;;  %v14020_v12 = vld [vmem:[#allocation2 + $0xa3c] ss:$76 sps:$4 sm:$0xff]  }
 0x360   :  { %10374 = vmatpush1.bf16.msra.mxu1 %v13949_v41  ;;  %v14023_v41 = vld [vmem:[#allocation2 + $0x87c] ss:$76 sps:$4 sm:$0xff]  }
 0x361   :  { %10216 = vmatpush1.bf16.msra.mxu0 %v13946_v43  ;;  %10375 = vmatprep.subr.bf16.mxu1 %v13957_v45  ;;  %v14021_v43 = vld [vmem:[#allocation2 + $0x878] ss:$76 sps:$4 sm:$0xff]  }
 0x362   :  { %10217 = vmatprep.subr.bf16.mxu0 %v13954_v21  ;;  %v14018_v45 = vld [vmem:[#allocation2 + $0xa38] ss:$76 sps:$4 sm:$0xff]   ;;  %v14029_v21 = vld [vmem:[#allocation2 + $0x914] ss:$76 sps:$4 sm:$0xff]  }
 0x364   :  { %10376 = vmatpush1.bf16.msra.mxu1 %v13955_v47  ;;  %v14026_v47 = vld [vmem:[#allocation2 + $0xad4] ss:$76 sps:$4 sm:$0xff]  }
 0x365   :  { %10218 = vmatpush1.bf16.msra.mxu0 %v13952_v49  ;;  %10377 = vmatprep.subr.bf16.mxu1 %v13963_v51  ;;  %v14027_v49 = vld [vmem:[#allocation2 + $0x910] ss:$76 sps:$4 sm:$0xff]  }
 0x366   :  { %10219 = vmatprep.subr.bf16.mxu0 %v13960_v52  ;;  %v14024_v51 = vld [vmem:[#allocation2 + $0xad0] ss:$76 sps:$4 sm:$0xff]   ;;  %v14035_v52 = vld [vmem:[#allocation2 + $0x9ac] ss:$76 sps:$4 sm:$0xff]  }
 0x368   :  { %10378 = vmatpush1.bf16.msra.mxu1 %v13961_v54  ;;  %v14032_v54 = vld [vmem:[#allocation2 + $0xb6c] ss:$76 sps:$4 sm:$0xff]  }
 0x369   :  { %10220 = vmatpush1.bf16.msra.mxu0 %v13958_v55  ;;  %10379 = vmatprep.subr.bf16.mxu1 %v13969_v56  ;;  %v14033_v55 = vld [vmem:[#allocation2 + $0x9a8] ss:$76 sps:$4 sm:$0xff]  }
 0x36a   :  { %10221 = vmatprep.subr.bf16.mxu0 %v13966_v57  ;;  %v14030_v56 = vld [vmem:[#allocation2 + $0xb68] ss:$76 sps:$4 sm:$0xff]   ;;  %v14041_v57 = vld [vmem:[#allocation2 + $0xa44] ss:$76 sps:$4 sm:$0xff]  }
 0x36c   :  { %10380 = vmatpush1.bf16.msra.mxu1 %v13967_v59  ;;  %v14038_v59 = vld [vmem:[#allocation2 + $0xc04] ss:$76 sps:$4 sm:$0xff]  }
 0x36d   :  { %10222 = vmatpush1.bf16.msra.mxu0 %v13964_v61  ;;  %10381 = vmatprep.subr.bf16.mxu1 %v13975_v1  ;;  %v14039_v61 = vld [vmem:[#allocation2 + $0xa40] ss:$76 sps:$4 sm:$0xff]  }
 0x36e   :  { %10223 = vmatprep.subr.bf16.mxu0 %v13972_v2  ;;  %v14036_v1 = vld [vmem:[#allocation2 + $0xc00] ss:$76 sps:$4 sm:$0xff]   ;;  %v14047_v2 = vld [vmem:[#allocation2 + $0xadc] ss:$76 sps:$4 sm:$0xff]  }
 0x370   :  { %10382 = vmatpush1.bf16.msra.mxu1 %v13973_v4  ;;  %v14044_v4 = vld [vmem:[#allocation2 + $0xc9c] ss:$76 sps:$4 sm:$0xff]  }
 0x371   :  { %10224 = vmatpush1.bf16.msra.mxu0 %v13970_v7  ;;  %10383 = vmatprep.subr.bf16.mxu1 %v13981_v44  ;;  %v14045_v7 = vld [vmem:[#allocation2 + $0xad8] ss:$76 sps:$4 sm:$0xff]  }
 0x372   :  { %10225 = vmatprep.subr.bf16.mxu0 %v13978_v10  ;;  %v14042_v44 = vld [vmem:[#allocation2 + $0xc98] ss:$76 sps:$4 sm:$0xff]   ;;  %v14053_v10 = vld [vmem:[#allocation2 + $0xb74] ss:$76 sps:$4 sm:$0xff]  }
 0x374   :  { %10384 = vmatpush1.bf16.msra.mxu1 %v13979_v13  ;;  %v14050_v13 = vld [vmem:[#allocation2 + $0xd34] ss:$76 sps:$4 sm:$0xff]  }
 0x375   :  { %10226 = vmatpush1.bf16.msra.mxu0 %v13976_v14  ;;  %10385 = vmatprep.subr.bf16.mxu1 %v13987_v15  ;;  %v14051_v14 = vld [vmem:[#allocation2 + $0xb70] ss:$76 sps:$4 sm:$0xff]  }
 0x376   :  { %10227 = vmatprep.subr.bf16.mxu0 %v13984_v17  ;;  %v14048_v15 = vld [vmem:[#allocation2 + $0xd30] ss:$76 sps:$4 sm:$0xff]   ;;  %v14059_v17 = vld [vmem:[#allocation2 + $0xc0c] ss:$76 sps:$4 sm:$0xff]  }
 0x378   :  { %10386 = vmatpush1.bf16.msra.mxu1 %v13985_v18  ;;  %v14056_v18 = vld [vmem:[#allocation2 + $0xdcc] ss:$76 sps:$4 sm:$0xff]  }
 0x379   :  { %10228 = vmatpush1.bf16.msra.mxu0 %v13982_v19  ;;  %10387 = vmatprep.subr.bf16.mxu1 %v13993_v20  ;;  %v14057_v19 = vld [vmem:[#allocation2 + $0xc08] ss:$76 sps:$4 sm:$0xff]  }
 0x37a   :  { %10229 = vmatprep.subr.bf16.mxu0 %v13990_v22  ;;  %v14054_v20 = vld [vmem:[#allocation2 + $0xdc8] ss:$76 sps:$4 sm:$0xff]   ;;  %v14065_v22 = vld [vmem:[#allocation2 + $0xca4] ss:$76 sps:$4 sm:$0xff]  }
 0x37c   :  { %10388 = vmatpush1.bf16.msra.mxu1 %v13991_v23  ;;  %v14062_v23 = vld [vmem:[#allocation2 + $0xe64] ss:$76 sps:$4 sm:$0xff]  }
 0x37d   :  { %10230 = vmatpush1.bf16.msra.mxu0 %v13988_v24  ;;  %10389 = vmatprep.subr.bf16.mxu1 %v13999_v25  ;;  %v14063_v24 = vld [vmem:[#allocation2 + $0xca0] ss:$76 sps:$4 sm:$0xff]  }
 0x37e   :  { %10231 = vmatprep.subr.bf16.mxu0 %v13996_v26  ;;  %v14060_v25 = vld [vmem:[#allocation2 + $0xe60] ss:$76 sps:$4 sm:$0xff]   ;;  %v14071_v26 = vld [vmem:[#allocation2 + $0xd3c] ss:$76 sps:$4 sm:$0xff]  }
 0x380   :  { %10390 = vmatpush1.bf16.msra.mxu1 %v13997_v29  ;;  %v14068_v29 = vld [vmem:[#allocation2 + $0xefc] ss:$76 sps:$4 sm:$0xff]  }
 0x381   :  { %10232 = vmatpush1.bf16.msra.mxu0 %v13994_v31  ;;  %10391 = vmatprep.subr.bf16.mxu1 %v14005_v33  ;;  %v14069_v31 = vld [vmem:[#allocation2 + $0xd38] ss:$76 sps:$4 sm:$0xff]  }
 0x382   :  { %10233 = vmatprep.subr.bf16.mxu0 %v14002_v63  ;;  %v14066_v33 = vld [vmem:[#allocation2 + $0xef8] ss:$76 sps:$4 sm:$0xff]   ;;  %v14077_v63 = vld [vmem:[#allocation2 + $0xdd4] ss:$76 sps:$4 sm:$0xff]  }
 0x384   :  { %10392 = vmatpush1.bf16.msra.mxu1 %v14003_v34  ;;  %v14074_v34 = vld [vmem:[#allocation2 + $0xf94] ss:$76 sps:$4 sm:$0xff]  }
 0x385   :  { %10234 = vmatpush1.bf16.msra.mxu0 %v14000_v35  ;;  %10393 = vmatprep.subr.bf16.mxu1 %v14011_v36  ;;  %v14075_v35 = vld [vmem:[#allocation2 + $0xdd0] ss:$76 sps:$4 sm:$0xff]  }
 0x386   :  { %10235 = vmatprep.subr.bf16.mxu0 %v14008_v5  ;;  %v14072_v36 = vld [vmem:[#allocation2 + $0xf90] ss:$76 sps:$4 sm:$0xff]   ;;  %v14083_v5 = vld [vmem:[#allocation2 + $0xe6c] ss:$76 sps:$4 sm:$0xff]  }
 0x388   :  { %10394 = vmatpush1.bf16.msra.mxu1 %v14009_v28  ;;  %v14080_v28 = vld [vmem:[#allocation2 + $0x102c] ss:$76 sps:$4 sm:$0xff]  }
 0x389   :  { %10236 = vmatpush1.bf16.msra.mxu0 %v14006_v37  ;;  %10395 = vmatprep.subr.bf16.mxu1 %v14017_v38  ;;  %v14081_v37 = vld [vmem:[#allocation2 + $0xe68] ss:$76 sps:$4 sm:$0xff]  }
 0x38a   :  { %10246 = vmatprep.subr.bf16.mxu0 %v14014_v16  ;;  %v14078_v38 = vld [vmem:[#allocation2 + $0x1028] ss:$76 sps:$4 sm:$0xff]   ;;  %v14089_v16 = vld [vmem:[#allocation2 + $0xf04] ss:$76 sps:$4 sm:$0xff]  }
 0x38c   :  { %10238 = vmatmul.mubr.bf16.vlgmr.msra.gmra.mrb[16].mxu0 %v15955_v48  ;;  %10396 = vmatpush1.bf16.msra.mxu1 %v14015_v39  ;;  %v14086_v39 = vld [vmem:[#allocation2 + $0x10c4] ss:$76 sps:$4 sm:$0xff]  }
 0x38d   :  { %10247 = vmatpush1.bf16.msra.mxu0 %v14012_v40  ;;  %10278 = vmatprep.mubr.bf16.mxu0 %v15986_v62  ;;  %v14087_v40 = vld [vmem:[#allocation2 + $0xf00] ss:$76 sps:$4 sm:$0xff]  }
 0x38e   :  { %10248 = vmatprep.subr.bf16.mxu0 %v14020_v12  ;;  %10397 = vmatprep.subr.bf16.mxu1 %v14023_v41  ;;  %v14084_v12 = vld [vmem:[#allocation2 + $0x10c0] ss:$76 sps:$4 sm:$0xff]   ;;  %v14095_v41 = vld [vmem:[#allocation2 + $0xf9c] ss:$76 sps:$4 sm:$0xff]  }
 0x390   :  { %10398 = vmatpush1.bf16.msra.mxu1 %v14021_v43  ;;  %v14092_v43 = vld [vmem:[#allocation2 + $0x115c] ss:$76 sps:$4 sm:$0xff]  }
 0x391   :  { %10249 = vmatpush1.bf16.msra.mxu0 %v14018_v45  ;;  %10399 = vmatprep.subr.bf16.mxu1 %v14029_v21  ;;  %v14093_v45 = vld [vmem:[#allocation2 + $0xf98] ss:$76 sps:$4 sm:$0xff]  }
 0x392   :  { %10250 = vmatprep.subr.bf16.mxu0 %v14026_v47  ;;  %v14090_v21 = vld [vmem:[#allocation2 + $0x1158] ss:$76 sps:$4 sm:$0xff]   ;;  %v14101_v47 = vld [vmem:[#allocation2 + $0x1034] ss:$76 sps:$4 sm:$0xff]  }
 0x394   :  { %10400 = vmatpush1.bf16.msra.mxu1 %v14027_v49  ;;  %v14098_v49 = vld [vmem:[#allocation2 + $0x11f4] ss:$76 sps:$4 sm:$0xff]  }
 0x395   :  { %10251 = vmatpush1.bf16.msra.mxu0 %v14024_v51  ;;  %10410 = vmatprep.subr.bf16.mxu1 %v14035_v52  ;;  %v14099_v51 = vld [vmem:[#allocation2 + $0x1030] ss:$76 sps:$4 sm:$0xff]  }
 0x396   :  { %10252 = vmatprep.subr.bf16.mxu0 %v14032_v54  ;;  %v14096_v52 = vld [vmem:[#allocation2 + $0x11f0] ss:$76 sps:$4 sm:$0xff]   ;;  %v14107_v54 = vld [vmem:[#allocation2 + $0x10cc] ss:$76 sps:$4 sm:$0xff]  }
 0x397   :  { %10402 = vmatmul.mubr.bf16.vlgmr.msra.gmra.mrb[20].mxu1 %v15955_v48 }
 0x398   :  { %10411 = vmatpush1.bf16.msra.mxu1 %v14033_v55  ;;  %10442 = vmatprep.mubr.bf16.mxu1 %v15986_v62  ;;  %v14104_v55 = vld [vmem:[#allocation2 + $0x128c] ss:$76 sps:$4 sm:$0xff]  }
 0x399   :  { %10253 = vmatpush1.bf16.msra.mxu0 %v14030_v56  ;;  %10412 = vmatprep.subr.bf16.mxu1 %v14041_v57  ;;  %v14105_v56 = vld [vmem:[#allocation2 + $0x10c8] ss:$76 sps:$4 sm:$0xff]  }
 0x39a   :  { %10254 = vmatprep.subr.bf16.mxu0 %v14038_v59  ;;  %v14102_v57 = vld [vmem:[#allocation2 + $0x1288] ss:$76 sps:$4 sm:$0xff]   ;;  %v14113_v59 = vld [vmem:[#allocation2 + $0x1164] ss:$76 sps:$4 sm:$0xff]  }
 0x39c   :  { %10413 = vmatpush1.bf16.msra.mxu1 %v14039_v61  ;;  %v14110_v61 = vld [vmem:[#allocation2 + $0x1324] ss:$76 sps:$4 sm:$0xff]  }
 0x39d   :  { %10255 = vmatpush1.bf16.msra.mxu0 %v14036_v1  ;;  %10414 = vmatprep.subr.bf16.mxu1 %v14047_v2  ;;  %v14111_v1 = vld [vmem:[#allocation2 + $0x1160] ss:$76 sps:$4 sm:$0xff]  }
 0x39e   :  { %10256 = vmatprep.subr.bf16.mxu0 %v14044_v4  ;;  %v14108_v2 = vld [vmem:[#allocation2 + $0x1320] ss:$76 sps:$4 sm:$0xff]   ;;  %v14116_v4 = vld [vmem:[#allocation2 + $0x13bc] ss:$76 sps:$4 sm:$0xff]  }
 0x3a0   :  { %10415 = vmatpush1.bf16.msra.mxu1 %v14045_v7  ;;  %v14119_v7 = vld [vmem:[#allocation2 + $0x11fc] ss:$76 sps:$4 sm:$0xff]  }
 0x3a1   :  { %10257 = vmatpush1.bf16.msra.mxu0 %v14042_v44  ;;  %10416 = vmatprep.subr.bf16.mxu1 %v14053_v10  ;;  %v14117_v44 = vld [vmem:[#allocation2 + $0x11f8] ss:$76 sps:$4 sm:$0xff]  }
 0x3a2   :  { %10258 = vmatprep.subr.bf16.mxu0 %v14050_v13  ;;  %v14114_v10 = vld [vmem:[#allocation2 + $0x13b8] ss:$76 sps:$4 sm:$0xff]   ;;  %v14125_v13 = vld [vmem:[#allocation2 + $0x1294] ss:$76 sps:$4 sm:$0xff]  }
 0x3a4   :  { %10417 = vmatpush1.bf16.msra.mxu1 %v14051_v14  ;;  %v14122_v14 = vld [vmem:[#allocation2 + $0x1454] ss:$76 sps:$4 sm:$0xff]  }
 0x3a5   :  { %10259 = vmatpush1.bf16.msra.mxu0 %v14048_v15  ;;  %10418 = vmatprep.subr.bf16.mxu1 %v14059_v17  ;;  %v14123_v15 = vld [vmem:[#allocation2 + $0x1290] ss:$76 sps:$4 sm:$0xff]  }
 0x3a6   :  { %10260 = vmatprep.subr.bf16.mxu0 %v14056_v18  ;;  %v14120_v17 = vld [vmem:[#allocation2 + $0x1450] ss:$76 sps:$4 sm:$0xff]   ;;  %v14131_v18 = vld [vmem:[#allocation2 + $0x132c] ss:$76 sps:$4 sm:$0xff]  }
 0x3a8   :  { %10419 = vmatpush1.bf16.msra.mxu1 %v14057_v19  ;;  %v14128_v19 = vld [vmem:[#allocation2 + $0x14ec] ss:$76 sps:$4 sm:$0xff]  }
 0x3a9   :  { %10261 = vmatpush1.bf16.msra.mxu0 %v14054_v20  ;;  %10420 = vmatprep.subr.bf16.mxu1 %v14065_v22  ;;  %v14129_v20 = vld [vmem:[#allocation2 + $0x1328] ss:$76 sps:$4 sm:$0xff]  }
 0x3aa   :  { %10262 = vmatprep.subr.bf16.mxu0 %v14062_v23  ;;  %v14126_v22 = vld [vmem:[#allocation2 + $0x14e8] ss:$76 sps:$4 sm:$0xff]   ;;  %v14137_v23 = vld [vmem:[#allocation2 + $0x13c4] ss:$76 sps:$4 sm:$0xff]  }
 0x3ac   :  { %10421 = vmatpush1.bf16.msra.mxu1 %v14063_v24  ;;  %v14134_v24 = vld [vmem:[#allocation2 + $0x1584] ss:$76 sps:$4 sm:$0xff]  }
 0x3ad   :  { %10263 = vmatpush1.bf16.msra.mxu0 %v14060_v25  ;;  %10422 = vmatprep.subr.bf16.mxu1 %v14071_v26  ;;  %v14135_v25 = vld [vmem:[#allocation2 + $0x13c0] ss:$76 sps:$4 sm:$0xff]  }
 0x3ae   :  { %10264 = vmatprep.subr.bf16.mxu0 %v14068_v29  ;;  %v14132_v26 = vld [vmem:[#allocation2 + $0x1580] ss:$76 sps:$4 sm:$0xff]   ;;  %v14143_v29 = vld [vmem:[#allocation2 + $0x145c] ss:$76 sps:$4 sm:$0xff]  }
 0x3b0   :  { %10423 = vmatpush1.bf16.msra.mxu1 %v14069_v31  ;;  %v14140_v31 = vld [vmem:[#allocation2 + $0x161c] ss:$76 sps:$4 sm:$0xff]  }
 0x3b1   :  { %10265 = vmatpush1.bf16.msra.mxu0 %v14066_v33  ;;  %10424 = vmatprep.subr.bf16.mxu1 %v14077_v63  ;;  %v14141_v33 = vld [vmem:[#allocation2 + $0x1458] ss:$76 sps:$4 sm:$0xff]  }
 0x3b2   :  { %10266 = vmatprep.subr.bf16.mxu0 %v14074_v34  ;;  %v14138_v63 = vld [vmem:[#allocation2 + $0x1618] ss:$76 sps:$4 sm:$0xff]   ;;  %v14149_v34 = vld [vmem:[#allocation2 + $0x14f4] ss:$76 sps:$4 sm:$0xff]  }
 0x3b4   :  { %10425 = vmatpush1.bf16.msra.mxu1 %v14075_v35  ;;  %v14146_v35 = vld [vmem:[#allocation2 + $0x16b4] ss:$76 sps:$4 sm:$0xff]  }
 0x3b5   :  { %10267 = vmatpush1.bf16.msra.mxu0 %v14072_v36  ;;  %10426 = vmatprep.subr.bf16.mxu1 %v14083_v5  ;;  %v14147_v36 = vld [vmem:[#allocation2 + $0x14f0] ss:$76 sps:$4 sm:$0xff]  }
 0x3b6   :  { %10268 = vmatprep.subr.bf16.mxu0 %v14080_v28  ;;  %v14144_v5 = vld [vmem:[#allocation2 + $0x16b0] ss:$76 sps:$4 sm:$0xff]   ;;  %v14155_v28 = vld [vmem:[#allocation2 + $0x158c] ss:$76 sps:$4 sm:$0xff]  }
 0x3b8   :  { %10427 = vmatpush1.bf16.msra.mxu1 %v14081_v37  ;;  %v14152_v37 = vld [vmem:[#allocation2 + $0x174c] ss:$76 sps:$4 sm:$0xff]  }
 0x3b9   :  { %10269 = vmatpush1.bf16.msra.mxu0 %v14078_v38  ;;  %10428 = vmatprep.subr.bf16.mxu1 %v14089_v16  ;;  %v14153_v38 = vld [vmem:[#allocation2 + $0x1588] ss:$76 sps:$4 sm:$0xff]  }
 0x3ba   :  { %10270 = vmatprep.subr.bf16.mxu0 %v14086_v39  ;;  %v14150_v16 = vld [vmem:[#allocation2 + $0x1748] ss:$76 sps:$4 sm:$0xff]   ;;  %v14161_v39 = vld [vmem:[#allocation2 + $0x1624] ss:$76 sps:$4 sm:$0xff]  }
 0x3bc   :  { %10429 = vmatpush1.bf16.msra.mxu1 %v14087_v40  ;;  %v14158_v40 = vld [vmem:[#allocation2 + $0x17e4] ss:$76 sps:$4 sm:$0xff]  }
 0x3bd   :  { %10271 = vmatpush1.bf16.msra.mxu0 %v14084_v12  ;;  %10430 = vmatprep.subr.bf16.mxu1 %v14095_v41  ;;  %v14159_v12 = vld [vmem:[#allocation2 + $0x1620] ss:$76 sps:$4 sm:$0xff]  }
 0x3be   :  { %10272 = vmatprep.subr.bf16.mxu0 %v14092_v43  ;;  %v14156_v41 = vld [vmem:[#allocation2 + $0x17e0] ss:$76 sps:$4 sm:$0xff]   ;;  %v14167_v43 = vld [vmem:[#allocation2 + $0x16bc] ss:$76 sps:$4 sm:$0xff]  }
 0x3c0   :  { %10431 = vmatpush1.bf16.msra.mxu1 %v14093_v45  ;;  %v14164_v45 = vld [vmem:[#allocation2 + $0x187c] ss:$76 sps:$4 sm:$0xff]  }
 0x3c1   :  { %10273 = vmatpush1.bf16.msra.mxu0 %v14090_v21  ;;  %10432 = vmatprep.subr.bf16.mxu1 %v14101_v47  ;;  %v14165_v21 = vld [vmem:[#allocation2 + $0x16b8] ss:$76 sps:$4 sm:$0xff]  }
 0x3c2   :  { %10274 = vmatprep.subr.bf16.mxu0 %v14098_v49  ;;  %v14162_v47 = vld [vmem:[#allocation2 + $0x1878] ss:$76 sps:$4 sm:$0xff]   ;;  %v14173_v49 = vld [vmem:[#allocation2 + $0x1754] ss:$76 sps:$4 sm:$0xff]  }
 0x3c4   :  { %10433 = vmatpush1.bf16.msra.mxu1 %v14099_v51  ;;  %v14170_v51 = vld [vmem:[#allocation2 + $0x1914] ss:$76 sps:$4 sm:$0xff]  }
 0x3c5   :  { %10275 = vmatpush1.bf16.msra.mxu0 %v14096_v52  ;;  %10434 = vmatprep.subr.bf16.mxu1 %v14107_v54  ;;  %v14171_v52 = vld [vmem:[#allocation2 + $0x1750] ss:$76 sps:$4 sm:$0xff]  }
 0x3c6   :  { %10276 = vmatprep.subr.bf16.mxu0 %v14104_v55  ;;  %v14168_v54 = vld [vmem:[#allocation2 + $0x1910] ss:$76 sps:$4 sm:$0xff]   ;;  %v14179_v55 = vld [vmem:[#allocation2 + $0x17ec] ss:$76 sps:$4 sm:$0xff]  }
 0x3c8   :  { %10435 = vmatpush1.bf16.msra.mxu1 %v14105_v56  ;;  %v14176_v56 = vld [vmem:[#allocation2 + $0x19ac] ss:$76 sps:$4 sm:$0xff]  }
 0x3c9   :  { %10277 = vmatpush1.bf16.msra.mxu0 %v14102_v57  ;;  %10436 = vmatprep.subr.bf16.mxu1 %v14113_v59  ;;  %v14177_v57 = vld [vmem:[#allocation2 + $0x17e8] ss:$76 sps:$4 sm:$0xff]  }
 0x3ca   :  { %10287 = vmatprep.subr.bf16.mxu0 %v14110_v61  ;;  %v14174_v59 = vld [vmem:[#allocation2 + $0x19a8] ss:$76 sps:$4 sm:$0xff]   ;;  %v14185_v61 = vld [vmem:[#allocation2 + $0x1884] ss:$76 sps:$4 sm:$0xff]  }
 0x3cc   :  { %10279 = vmatmul.mubr.bf16.vlgmr.msra.gmra.mrb[16].mxu0 %v15988_v0  ;;  %10437 = vmatpush1.bf16.msra.mxu1 %v14111_v1  ;;  %v14182_v1 = vld [vmem:[#allocation2 + $0x1a44] ss:$76 sps:$4 sm:$0xff]  }
 0x3cd   :  { %10288 = vmatpush1.bf16.msra.mxu0 %v14108_v2  ;;  %10319 = vmatprep.mubr.bf16.mxu0 %v15990_v3  ;;  %v14183_v2 = vld [vmem:[#allocation2 + $0x1880] ss:$76 sps:$4 sm:$0xff]  }
 0x3ce   :  { %10289 = vmatprep.subr.bf16.mxu0 %v14116_v4  ;;  %10438 = vmatprep.subr.bf16.mxu1 %v14119_v7  ;;  %v14180_v4 = vld [vmem:[#allocation2 + $0x1a40] ss:$76 sps:$4 sm:$0xff]   ;;  %v14191_v7 = vld [vmem:[#allocation2 + $0x191c] ss:$76 sps:$4 sm:$0xff]  }
 0x3d0   :  { %10439 = vmatpush1.bf16.msra.mxu1 %v14117_v44  ;;  %v14188_v44 = vld [vmem:[#allocation2 + $0x1adc] ss:$76 sps:$4 sm:$0xff]  }
 0x3d1   :  { %10290 = vmatpush1.bf16.msra.mxu0 %v14114_v10  ;;  %10440 = vmatprep.subr.bf16.mxu1 %v14125_v13  ;;  %v14189_v10 = vld [vmem:[#allocation2 + $0x1918] ss:$76 sps:$4 sm:$0xff]  }
 0x3d2   :  { %10291 = vmatprep.subr.bf16.mxu0 %v14122_v14  ;;  %v14186_v13 = vld [vmem:[#allocation2 + $0x1ad8] ss:$76 sps:$4 sm:$0xff]   ;;  %v14197_v14 = vld [vmem:[#allocation2 + $0x19b4] ss:$76 sps:$4 sm:$0xff]  }
 0x3d4   :  { %10441 = vmatpush1.bf16.msra.mxu1 %v14123_v15  ;;  %v14194_v15 = vld [vmem:[#allocation2 + $0x1b74] ss:$76 sps:$4 sm:$0xff]  }
 0x3d5   :  { %10292 = vmatpush1.bf16.msra.mxu0 %v14120_v17  ;;  %10451 = vmatprep.subr.bf16.mxu1 %v14131_v18  ;;  %v14195_v17 = vld [vmem:[#allocation2 + $0x19b0] ss:$76 sps:$4 sm:$0xff]  }
 0x3d6   :  { %10293 = vmatprep.subr.bf16.mxu0 %v14128_v19  ;;  %v14192_v18 = vld [vmem:[#allocation2 + $0x1b70] ss:$76 sps:$4 sm:$0xff]   ;;  %v14203_v19 = vld [vmem:[#allocation2 + $0x1a4c] ss:$76 sps:$4 sm:$0xff]  }
 0x3d7   :  { %10443 = vmatmul.mubr.bf16.vlgmr.msra.gmra.mrb[20].mxu1 %v15988_v0 }
 0x3d8   :  { %10452 = vmatpush1.bf16.msra.mxu1 %v14129_v20  ;;  %10483 = vmatprep.mubr.bf16.mxu1 %v15990_v3  ;;  %v14200_v20 = vld [vmem:[#allocation2 + $0x1c0c] ss:$76 sps:$4 sm:$0xff]  }
 0x3d9   :  { %10294 = vmatpush1.bf16.msra.mxu0 %v14126_v22  ;;  %10453 = vmatprep.subr.bf16.mxu1 %v14137_v23  ;;  %v14201_v22 = vld [vmem:[#allocation2 + $0x1a48] ss:$76 sps:$4 sm:$0xff]  }
 0x3da   :  { %10295 = vmatprep.subr.bf16.mxu0 %v14134_v24  ;;  %v14198_v23 = vld [vmem:[#allocation2 + $0x1c08] ss:$76 sps:$4 sm:$0xff]   ;;  %v14209_v24 = vld [vmem:[#allocation2 + $0x1ae4] ss:$76 sps:$4 sm:$0xff]  }
 0x3dc   :  { %10454 = vmatpush1.bf16.msra.mxu1 %v14135_v25  ;;  %v14206_v25 = vld [vmem:[#allocation2 + $0x1ca4] ss:$76 sps:$4 sm:$0xff]  }
 0x3dd   :  { %10296 = vmatpush1.bf16.msra.mxu0 %v14132_v26  ;;  %10455 = vmatprep.subr.bf16.mxu1 %v14143_v29  ;;  %v14207_v26 = vld [vmem:[#allocation2 + $0x1ae0] ss:$76 sps:$4 sm:$0xff]  }
 0x3de   :  { %10297 = vmatprep.subr.bf16.mxu0 %v14140_v31  ;;  %v14204_v29 = vld [vmem:[#allocation2 + $0x1ca0] ss:$76 sps:$4 sm:$0xff]   ;;  %v14212_v31 = vld [vmem:[#allocation2 + $0x1d3c] ss:$76 sps:$4 sm:$0xff]  }
 0x3e0   :  { %10456 = vmatpush1.bf16.msra.mxu1 %v14141_v33  ;;  %v14215_v33 = vld [vmem:[#allocation2 + $0x1b7c] ss:$76 sps:$4 sm:$0xff]  }
 0x3e1   :  { %10298 = vmatpush1.bf16.msra.mxu0 %v14138_v63  ;;  %10457 = vmatprep.subr.bf16.mxu1 %v14149_v34  ;;  %v14213_v63 = vld [vmem:[#allocation2 + $0x1b78] ss:$76 sps:$4 sm:$0xff]  }
 0x3e2   :  { %10299 = vmatprep.subr.bf16.mxu0 %v14146_v35  ;;  %v14210_v34 = vld [vmem:[#allocation2 + $0x1d38] ss:$76 sps:$4 sm:$0xff]   ;;  %v14221_v35 = vld [vmem:[#allocation2 + $0x1c14] ss:$76 sps:$4 sm:$0xff]  }
 0x3e4   :  { %10458 = vmatpush1.bf16.msra.mxu1 %v14147_v36  ;;  %v14218_v36 = vld [vmem:[#allocation2 + $0x1dd4] ss:$76 sps:$4 sm:$0xff]  }
 0x3e5   :  { %10300 = vmatpush1.bf16.msra.mxu0 %v14144_v5  ;;  %10459 = vmatprep.subr.bf16.mxu1 %v14155_v28  ;;  %v14219_v5 = vld [vmem:[#allocation2 + $0x1c10] ss:$76 sps:$4 sm:$0xff]  }
 0x3e6   :  { %10301 = vmatprep.subr.bf16.mxu0 %v14152_v37  ;;  %v14216_v28 = vld [vmem:[#allocation2 + $0x1dd0] ss:$76 sps:$4 sm:$0xff]   ;;  %v14227_v37 = vld [vmem:[#allocation2 + $0x1cac] ss:$76 sps:$4 sm:$0xff]  }
 0x3e8   :  { %10460 = vmatpush1.bf16.msra.mxu1 %v14153_v38  ;;  %v14224_v38 = vld [vmem:[#allocation2 + $0x1e6c] ss:$76 sps:$4 sm:$0xff]  }
 0x3e9   :  { %10302 = vmatpush1.bf16.msra.mxu0 %v14150_v16  ;;  %10461 = vmatprep.subr.bf16.mxu1 %v14161_v39  ;;  %v14225_v16 = vld [vmem:[#allocation2 + $0x1ca8] ss:$76 sps:$4 sm:$0xff]  }
 0x3ea   :  { %10303 = vmatprep.subr.bf16.mxu0 %v14158_v40  ;;  %v14222_v39 = vld [vmem:[#allocation2 + $0x1e68] ss:$76 sps:$4 sm:$0xff]   ;;  %v14233_v40 = vld [vmem:[#allocation2 + $0x1d44] ss:$76 sps:$4 sm:$0xff]  }
 0x3ec   :  { %10462 = vmatpush1.bf16.msra.mxu1 %v14159_v12  ;;  %v14230_v12 = vld [vmem:[#allocation2 + $0x1f04] ss:$76 sps:$4 sm:$0xff]  }
 0x3ed   :  { %10304 = vmatpush1.bf16.msra.mxu0 %v14156_v41  ;;  %10463 = vmatprep.subr.bf16.mxu1 %v14167_v43  ;;  %v14231_v41 = vld [vmem:[#allocation2 + $0x1d40] ss:$76 sps:$4 sm:$0xff]  }
 0x3ee   :  { %10305 = vmatprep.subr.bf16.mxu0 %v14164_v45  ;;  %v14228_v43 = vld [vmem:[#allocation2 + $0x1f00] ss:$76 sps:$4 sm:$0xff]   ;;  %v14239_v45 = vld [vmem:[#allocation2 + $0x1ddc] ss:$76 sps:$4 sm:$0xff]  }
 0x3f0   :  { %10464 = vmatpush1.bf16.msra.mxu1 %v14165_v21  ;;  %v14236_v21 = vld [vmem:[#allocation2 + $0x1f9c] ss:$76 sps:$4 sm:$0xff]  }
 0x3f1   :  { %10306 = vmatpush1.bf16.msra.mxu0 %v14162_v47  ;;  %10465 = vmatprep.subr.bf16.mxu1 %v14173_v49  ;;  %v15059_v47 = vld [vmem:[%s16162_s4] sm:$0xff] }
 0x3f2   :  { %10307 = vmatprep.subr.bf16.mxu0 %v14170_v51  ;;  %v3329_v49 = vrot.slane %v15059_v47, %v15999_v27  ;;  %v14237_v51 = vld [vmem:[#allocation2 + $0x1dd8] ss:$76 sps:$4 sm:$0xff]  }
 0x3f4   :  { %10466 = vmatpush1.bf16.msra.mxu1 %v14171_v52  ;;  %v3333_v52 = vrot.slane %v15059_v47, %v15971_v32 }
 0x3f5   :  { %10308 = vmatpush1.bf16.msra.mxu0 %v14168_v54  ;;  %10467 = vmatprep.subr.bf16.mxu1 %v14179_v55  ;;  %v14234_v54 = vld [vmem:[#allocation2 + $0x1f98] ss:$76 sps:$4 sm:$0xff]   ;;  %v14245_v55 = vld [vmem:[#allocation2 + $0x1e74] ss:$76 sps:$4 sm:$0xff]  }
 0x3f6   :  { %10309 = vmatprep.subr.bf16.mxu0 %v14176_v56  ;;  %v14242_v56 = vld [vmem:[#allocation2 + $0x2034] ss:$76 sps:$4 sm:$0xff]  }
 0x3f8   :  { %10468 = vmatpush1.bf16.msra.mxu1 %v14177_v57 }
 0x3f9   :  { %10310 = vmatpush1.bf16.msra.mxu0 %v14174_v59  ;;  %10469 = vmatprep.subr.bf16.mxu1 %v14185_v61 }
 0x3fa   :  { %10311 = vmatprep.subr.bf16.mxu0 %v14182_v1  ;;  %v14243_v1 = vld [vmem:[#allocation2 + $0x1e70] ss:$76 sps:$4 sm:$0xff]  }
 0x3fc   :  { %10470 = vmatpush1.bf16.msra.mxu1 %v14183_v2 }
 0x3fd   :  { %10312 = vmatpush1.bf16.msra.mxu0 %v14180_v4  ;;  %10471 = vmatprep.subr.bf16.mxu1 %v14191_v7  ;;  %v14240_v7 = vld [vmem:[#allocation2 + $0x2030] ss:$76 sps:$4 sm:$0xff]  }
 0x3fe   :  { %10313 = vmatprep.subr.bf16.mxu0 %v14188_v44  ;;  %v14251_v44 = vld [vmem:[#allocation2 + $0x1f0c] ss:$76 sps:$4 sm:$0xff]  }
 0x400   :  { %10472 = vmatpush1.bf16.msra.mxu1 %v14189_v10 }
 0x401   :  { %10314 = vmatpush1.bf16.msra.mxu0 %v14186_v13  ;;  %10473 = vmatprep.subr.bf16.mxu1 %v14197_v14  ;;  %v14248_v14 = vld [vmem:[#allocation2 + $0x20cc] ss:$76 sps:$4 sm:$0xff]  }
 0x402   :  { %10315 = vmatprep.subr.bf16.mxu0 %v14194_v15 }
 0x404   :  { %10474 = vmatpush1.bf16.msra.mxu1 %v14195_v17  ;;  %v14249_v17 = vld [vmem:[#allocation2 + $0x1f08] ss:$76 sps:$4 sm:$0xff]  }
 0x405   :  { %10316 = vmatpush1.bf16.msra.mxu0 %v14192_v18  ;;  %10475 = vmatprep.subr.bf16.mxu1 %v14203_v19  ;;  %v14246_v18 = vld [vmem:[#allocation2 + $0x20c8] ss:$76 sps:$4 sm:$0xff]   ;;  %v14257_v19 = vld [vmem:[#allocation2 + $0x1fa4] ss:$76 sps:$4 sm:$0xff]  }
 0x406   :  { %10317 = vmatprep.subr.bf16.mxu0 %v14200_v20  ;;  %v14254_v20 = vld [vmem:[#allocation2 + $0x2164] ss:$76 sps:$4 sm:$0xff]  }
 0x408   :  { %10476 = vmatpush1.bf16.msra.mxu1 %v14201_v22  ;;  %v3337_v22 = vrot.slane %v15059_v47, %v16009_v58 }
 0x409   :  { %10318 = vmatpush1.bf16.msra.mxu0 %v14198_v23  ;;  %10477 = vmatprep.subr.bf16.mxu1 %v14209_v24  ;;  %v3341_v23 = vrot.slane %v15059_v47, %v16012_v60  ;;  %v14255_v24 = vld [vmem:[#allocation2 + $0x1fa0] ss:$76 sps:$4 sm:$0xff]  }
 0x40a   :  { %10328 = vmatprep.subr.bf16.mxu0 %v14206_v25  ;;  %v14252_v25 = vld [vmem:[#allocation2 + $0x2160] ss:$76 sps:$4 sm:$0xff]  }
 0x40b   :  { %v14275_v47 = vld [vmem:[#allocation2 + $0x216c] ss:$76 sps:$4 sm:$0xff]  }
 0x40c   :  { %10320 = vmatmul.mubr.bf16.vlgmr.msra.gmra.mrb[16].mxu0 %v16004_v30  ;;  %10478 = vmatpush1.bf16.msra.mxu1 %v14207_v26  ;;  %v14263_v26 = vld [vmem:[#allocation2 + $0x203c] ss:$76 sps:$4 sm:$0xff]  }
 0x40d   :  { %10329 = vmatpush1.bf16.msra.mxu0 %v14204_v29  ;;  %10360 = vmatprep.mubr.bf16.mxu0 %v16019_v6 }
 0x40e   :  { %10330 = vmatprep.subr.bf16.mxu0 %v14212_v31  ;;  %10479 = vmatprep.subr.bf16.mxu1 %v14215_v33  ;;  %v14260_v31 = vld [vmem:[#allocation2 + $0x21fc] ss:$76 sps:$4 sm:$0xff]  }
 0x410   :  { %10480 = vmatpush1.bf16.msra.mxu1 %v14213_v63 }
 0x411   :  { %10331 = vmatpush1.bf16.msra.mxu0 %v14210_v34  ;;  %10481 = vmatprep.subr.bf16.mxu1 %v14221_v35 }
 0x412   :  { %10332 = vmatprep.subr.bf16.mxu0 %v14218_v36  ;;  %v14258_v36 = vld [vmem:[#allocation2 + $0x21f8] ss:$76 sps:$4 sm:$0xff]  }
 0x414   :  { %10482 = vmatpush1.bf16.msra.mxu1 %v14219_v5  ;;  %v14261_v5 = vld [vmem:[#allocation2 + $0x2038] ss:$76 sps:$4 sm:$0xff]  }
 0x415   :  { %10333 = vmatpush1.bf16.msra.mxu0 %v14216_v28  ;;  %10492 = vmatprep.subr.bf16.mxu1 %v14227_v37 }
 0x416   :  { %10334 = vmatprep.subr.bf16.mxu0 %v14224_v38  ;;  %v14269_v38 = vld [vmem:[#allocation2 + $0x20d4] ss:$76 sps:$4 sm:$0xff]  }
 0x417   :  { %10484 = vmatmul.mubr.bf16.vlgmr.msra.gmra.mrb[20].mxu1 %v16004_v30 }
 0x418   :  { %10493 = vmatpush1.bf16.msra.mxu1 %v14225_v16  ;;  %10524 = vmatprep.mubr.bf16.mxu1 %v16019_v6 }
 0x419   :  { %10335 = vmatpush1.bf16.msra.mxu0 %v14222_v39  ;;  %10494 = vmatprep.subr.bf16.mxu1 %v14233_v40  ;;  %v14266_v40 = vld [vmem:[#allocation2 + $0x2294] ss:$76 sps:$4 sm:$0xff]  }
 0x41a   :  { %10336 = vmatprep.subr.bf16.mxu0 %v14230_v12 }
 0x41c   :  { %10495 = vmatpush1.bf16.msra.mxu1 %v14231_v41 }
 0x41d   :  { %10337 = vmatpush1.bf16.msra.mxu0 %v14228_v43  ;;  %10496 = vmatprep.subr.bf16.mxu1 %v14239_v45  ;;  %v14267_v45 = vld [vmem:[#allocation2 + $0x20d0] ss:$76 sps:$4 sm:$0xff]  }
 0x41e   :  { %10338 = vmatprep.subr.bf16.mxu0 %v14236_v21  ;;  %v14264_v21 = vld [vmem:[#allocation2 + $0x2290] ss:$76 sps:$4 sm:$0xff]  }
 0x41f   :  { %v10034_v57 = vpop.f32.mrb[12].mxu0 }
 0x420   :  { %v13018_v59 = vadd.f32 %v10034_v57, %v3329_v49  ;;  %v10036_v61 = vpop.f32.mrb[13].mxu0  ;;  %10497 = vmatpush1.bf16.msra.mxu1 %v14237_v51  ;;  %v14272_v49 = vld [vmem:[#allocation2 + $0x232c] ss:$76 sps:$4 sm:$0xff]   ;;  %v14273_v51 = vld [vmem:[#allocation2 + $0x2168] ss:$76 sps:$4 sm:$0xff]  }
 0x421   :  { %v13019_v2 = vadd.f32 %v10036_v61, %v3333_v52  ;;  %v10038_v4 = vpop.f32.mrb[14].mxu0  ;;  %10339 = vmatpush1.bf16.msra.mxu0 %v14234_v54  ;;  %10498 = vmatprep.subr.bf16.mxu1 %v14245_v55  ;;  %v14270_v52 = vld [vmem:[#allocation2 + $0x2328] ss:$76 sps:$4 sm:$0xff]   ;;  %v14281_v54 = vld [vmem:[#allocation2 + $0x2204] ss:$76 sps:$4 sm:$0xff]  }
 0x422   :  { %v12901_v10 = vmul.f32 -1.442695, %v13018_v59  ;;  %v10039_v13 = vpop.f32.mrb[15].mxu0  ;;  %10340 = vmatprep.subr.bf16.mxu0 %v14242_v56  ;;  %v14278_v55 = vld [vmem:[#allocation2 + $0x23c4] ss:$76 sps:$4 sm:$0xff]  }
 0x423   :  { %v12902_v15 = vmul.f32 -1.442695, %v13019_v2  ;;  %v14279_v56 = vld [vmem:[#allocation2 + $0x2200] ss:$76 sps:$4 sm:$0xff]   ;;  %v14287_v61 = vld [vmem:[#allocation2 + $0x229c] ss:$76 sps:$4 sm:$0xff]  }
 0x424   :  { %14997 = vpow2.f32 %v12901_v10  ;;  %10499 = vmatpush1.bf16.msra.mxu1 %v14243_v1  ;;  %v14276_v59 = vld [vmem:[#allocation2 + $0x23c0] ss:$76 sps:$4 sm:$0xff]   ;;  %v14284_v4 = vld [vmem:[#allocation2 + $0x245c] ss:$76 sps:$4 sm:$0xff]   ;;  %v14285_v13 = vld [vmem:[#allocation2 + $0x2298] ss:$76 sps:$4 sm:$0xff]  }
 0x425   :  { %14999 = vpow2.f32 %v12902_v15  ;;  %10341 = vmatpush1.bf16.msra.mxu0 %v14240_v7  ;;  %10500 = vmatprep.subr.bf16.mxu1 %v14251_v44  ;;  %v14282_v15 = vld [vmem:[#allocation2 + $0x2458] ss:$76 sps:$4 sm:$0xff]  }
 0x426   :  { %10342 = vmatprep.subr.bf16.mxu0 %v14248_v14 }
 0x428   :  { %10501 = vmatpush1.bf16.msra.mxu1 %v14249_v17  ;;  %v14293_v17 = vld [vmem:[#allocation2 + $0x2334] ss:$76 sps:$4 sm:$0xff]  }
 0x429   :  { %10343 = vmatpush1.bf16.msra.mxu0 %v14246_v18  ;;  %10502 = vmatprep.subr.bf16.mxu1 %v14257_v19  ;;  %v14290_v18 = vld [vmem:[#allocation2 + $0x24f4] ss:$76 sps:$4 sm:$0xff]   ;;  %v14291_v19 = vld [vmem:[#allocation2 + $0x2330] ss:$76 sps:$4 sm:$0xff]  }
 0x42a   :  { %v10198_v29 = vpop.f32.mrb[16].mxu1  ;;  %10344 = vmatprep.subr.bf16.mxu0 %v14254_v20  ;;  %v14288_v20 = vld [vmem:[#allocation2 + $0x24f0] ss:$76 sps:$4 sm:$0xff]  }
 0x42b   :  { %v13020_v33 = vadd.f32 %v10198_v29, %v3337_v22  ;;  %v10200_v63 = vpop.f32.mrb[17].mxu1  ;;  %v14299_v22 = vld [vmem:[#allocation2 + $0x23cc] ss:$76 sps:$4 sm:$0xff]  }
 0x42c   :  { %v13021_v34 = vadd.f32 %v10200_v63, %v3341_v23  ;;  %v10202_v35 = vpop.f32.mrb[18].mxu1  ;;  %10503 = vmatpush1.bf16.msra.mxu1 %v14255_v24  ;;  %v14296_v23 = vld [vmem:[#allocation2 + $0x258c] ss:$76 sps:$4 sm:$0xff]   ;;  %v14297_v24 = vld [vmem:[#allocation2 + $0x23c8] ss:$76 sps:$4 sm:$0xff]  }
 0x42d   :  { %v12903_v28 = vmul.f32 -1.442695, %v13020_v33  ;;  %10345 = vmatpush1.bf16.msra.mxu0 %v14252_v25  ;;  %v10203_v37 = vpop.f32.mrb[19].mxu1  ;;  %10504 = vmatprep.subr.bf16.mxu1 %v14263_v26  ;;  %v14294_v25 = vld [vmem:[#allocation2 + $0x2588] ss:$76 sps:$4 sm:$0xff]  }
 0x42e   :  { %v14998_v16 = vpop.eup %14997  ;;  %v12904_v39 = vmul.f32 -1.442695, %v13021_v34  ;;  %10346 = vmatprep.subr.bf16.mxu0 %v14260_v31  ;;  %v14305_v26 = vld [vmem:[#allocation2 + $0x2464] ss:$76 sps:$4 sm:$0xff]   ;;  %v14302_v31 = vld [vmem:[#allocation2 + $0x34] ss:$76 sps:$4 sm:$0xff]  }
 0x42f   :  { %v15000_v12 = vpop.eup %14999  ;;  %v11246_v41 = vadd.f32 1.0, %v14998_v16  ;;  %15001 = vpow2.f32 %v12903_v28  ;;  %v14303_v34 = vld [vmem:[#allocation2 + $0x2460] ss:$76 sps:$4 sm:$0xff]   ;;  %v14300_v35 = vld [vmem:[#allocation2 + $0x30] ss:$76 sps:$4 sm:$0xff]  }
 0x430   :  { %v11247_v43 = vadd.f32 1.0, %v15000_v12  ;;  %15003 = vpow2.f32 %v12904_v39  ;;  %10505 = vmatpush1.bf16.msra.mxu1 %v14261_v5  ;;  %v14308_v28 = vld [vmem:[#allocation2 + $0xcc] ss:$76 sps:$4 sm:$0xff]   ;;  %v14311_v37 = vld [vmem:[#allocation2 + $0x24fc] ss:$76 sps:$4 sm:$0xff]  }
 0x431   :  { %15005 = vrcp.f32 %v11246_v41  ;;  %10347 = vmatpush1.bf16.msra.mxu0 %v14258_v36  ;;  %10506 = vmatprep.subr.bf16.mxu1 %v14269_v38  ;;  %v14309_v16 = vld [vmem:[#allocation2 + $0x24f8] ss:$76 sps:$4 sm:$0xff]   ;;  %v14306_v39 = vld [vmem:[#allocation2 + $0xc8] ss:$76 sps:$4 sm:$0xff]   ;;  %v14315_v41 = vld [vmem:[#allocation2 + $0x2590] ss:$76 sps:$4 sm:$0xff]  }
 0x432   :  { %15007 = vrcp.f32 %v11247_v43  ;;  %10348 = vmatprep.subr.bf16.mxu0 %v14266_v40  ;;  %v14317_v40 = vld [vmem:[#allocation2 + $0x2594] ss:$76 sps:$4 sm:$0xff]   ;;  %v14314_v12 = vld [vmem:[#allocation2 + $0x164] ss:$76 sps:$4 sm:$0xff]  }
 0x433   :  { %v14312_v43 = vld [vmem:[#allocation2 + $0x160] ss:$76 sps:$4 sm:$0xff]  }
 0x434   :  { %10507 = vmatpush1.bf16.msra.mxu1 %v14267_v45  ;;  %v14323_v45 = vld [vmem:[#allocation2 + $0x3c] ss:$76 sps:$4 sm:$0xff]  }
 0x435   :  { %10349 = vmatpush1.bf16.msra.mxu0 %v14264_v21  ;;  %10508 = vmatprep.subr.bf16.mxu1 %v14275_v47  ;;  %v14320_v21 = vld [vmem:[#allocation2 + $0x1fc] ss:$76 sps:$4 sm:$0xff]   ;;  %v14321_v47 = vld [vmem:[#allocation2 + $0x38] ss:$76 sps:$4 sm:$0xff]  }
 0x436   :  { %10350 = vmatprep.subr.bf16.mxu0 %v14272_v49  ;;  %v14318_v49 = vld [vmem:[#allocation2 + $0x1f8] ss:$76 sps:$4 sm:$0xff]  }
 0x438   :  { %10509 = vmatpush1.bf16.msra.mxu1 %v14273_v51  ;;  %v14329_v51 = vld [vmem:[#allocation2 + $0xd4] ss:$76 sps:$4 sm:$0xff]  }
 0x439   :  { %v15002_v57 = vpop.eup %15001  ;;  %10351 = vmatpush1.bf16.msra.mxu0 %v14270_v52  ;;  %10510 = vmatprep.subr.bf16.mxu1 %v14281_v54  ;;  %v14326_v52 = vld [vmem:[#allocation2 + $0x294] ss:$76 sps:$4 sm:$0xff]   ;;  %v14327_v54 = vld [vmem:[#allocation2 + $0xd0] ss:$76 sps:$4 sm:$0xff]  }
 0x43a   :  { %v15004_v1 = vpop.eup %15003  ;;  %v11248_v2 = vadd.f32 1.0, %v15002_v57  ;;  %10352 = vmatprep.subr.bf16.mxu0 %v14278_v55  ;;  %v14324_v55 = vld [vmem:[#allocation2 + $0x290] ss:$76 sps:$4 sm:$0xff]   ;;  %v14332_v57 = vld [vmem:[#allocation2 + $0x32c] ss:$76 sps:$4 sm:$0xff]  }
 0x43b   :  { %v15006_v7 = vpop.eup %15005  ;;  %v11249_v44 = vadd.f32 1.0, %v15004_v1  ;;  %v14341_v1 = vld [vmem:[#allocation2 + $0x204] ss:$76 sps:$4 sm:$0xff]  }
 0x43c   :  { %v15008_v10 = vpop.eup %15007  ;;  %15009 = vrcp.f32 %v11248_v2  ;;  %10511 = vmatpush1.bf16.msra.mxu1 %v14279_v56  ;;  %v14335_v56 = vld [vmem:[#allocation2 + $0x16c] ss:$76 sps:$4 sm:$0xff]   ;;  %v14338_v2 = vld [vmem:[#allocation2 + $0x3c4] ss:$76 sps:$4 sm:$0xff]  }
 0x43d   :  { %v11335_v14 = vcombine.low %v15006_v7, %v15008_v10  ;;  %15011 = vrcp.f32 %v11249_v44  ;;  %10353 = vmatpush1.bf16.msra.mxu0 %v14276_v59  ;;  %10512 = vmatprep.subr.bf16.mxu1 %v14287_v61  ;;  %v14333_v59 = vld [vmem:[#allocation2 + $0x168] ss:$76 sps:$4 sm:$0xff]   ;;  %v14336_v7 = vld [vmem:[#allocation2 + $0x3c0] ss:$76 sps:$4 sm:$0xff]  }
 0x43e   :  { %10354 = vmatprep.subr.bf16.mxu0 %v14284_v4  ;;  %v14330_v61 = vld [vmem:[#allocation2 + $0x328] ss:$76 sps:$4 sm:$0xff]   ;;  %v14339_v4 = vld [vmem:[#allocation2 + $0x200] ss:$76 sps:$4 sm:$0xff]  }
 0x43f   :  { %v11343_v36 = vrot.slane %v11335_v14, %v15212_v53  ;;  %v14347_v44 = vld [vmem:[#allocation2 + $0x29c] ss:$76 sps:$4 sm:$0xff]   ;;  %v14342_v14 = vld [vmem:[#allocation2 + $0x458] ss:$76 sps:$4 sm:$0xff]  }
 0x440   :  { %10513 = vmatpush1.bf16.msra.mxu1 %v14285_v13  ;;  %v14344_v10 = vld [vmem:[#allocation2 + $0x45c] ss:$76 sps:$4 sm:$0xff]   ;;  %v14345_v13 = vld [vmem:[#allocation2 + $0x298] ss:$76 sps:$4 sm:$0xff]  }
 0x441   :  { %10355 = vmatpush1.bf16.msra.mxu0 %v14282_v15  ;;  %10514 = vmatprep.subr.bf16.mxu1 %v14293_v17  ;;  %v14353_v15 = vld [vmem:[#allocation2 + $0x334] ss:$76 sps:$4 sm:$0xff]  }
 0x442   :  { %10356 = vmatprep.subr.bf16.mxu0 %v14290_v18  ;;  %v14350_v17 = vld [vmem:[#allocation2 + $0x4f4] ss:$76 sps:$4 sm:$0xff]   ;;  %v14351_v18 = vld [vmem:[#allocation2 + $0x330] ss:$76 sps:$4 sm:$0xff]  }
 0x444   :  { %10515 = vmatpush1.bf16.msra.mxu1 %v14291_v19  ;;  %v14348_v19 = vld [vmem:[#allocation2 + $0x4f0] ss:$76 sps:$4 sm:$0xff]  }
 0x445   :  { %10357 = vmatpush1.bf16.msra.mxu0 %v14288_v20  ;;  %10516 = vmatprep.subr.bf16.mxu1 %v14299_v22  ;;  %v14359_v20 = vld [vmem:[#allocation2 + $0x3cc] ss:$76 sps:$4 sm:$0xff]  }
 0x446   :  { %v15010_v29 = vpop.eup %15009  ;;  %10358 = vmatprep.subr.bf16.mxu0 %v14296_v23  ;;  %v14356_v22 = vld [vmem:[#allocation2 + $0x58c] ss:$76 sps:$4 sm:$0xff]   ;;  %v14357_v23 = vld [vmem:[#allocation2 + $0x3c8] ss:$76 sps:$4 sm:$0xff]  }
 0x447   :  { %v15012_v33 = vpop.eup %15011 }
 0x448   :  { %v11336_v63 = vcombine.low %v15010_v29, %v15012_v33  ;;  %10517 = vmatpush1.bf16.msra.mxu1 %v14297_v24  ;;  %v14354_v24 = vld [vmem:[#allocation2 + $0x588] ss:$76 sps:$4 sm:$0xff]   ;;  %v14363_v29 = vld [vmem:[#allocation2 + $0x460] ss:$76 sps:$4 sm:$0xff]  }
 0x449   :  { %10359 = vmatpush1.bf16.msra.mxu0 %v14294_v25  ;;  %10518 = vmatprep.subr.bf16.mxu1 %v14305_v26  ;;  %v14365_v25 = vld [vmem:[#allocation2 + $0x464] ss:$76 sps:$4 sm:$0xff]   ;;  %v14371_v33 = vld [vmem:[#allocation2 + $0x4fc] ss:$76 sps:$4 sm:$0xff]  }
 0x44a   :  { %v11350_v5 = vrot.slane %v11336_v63, %v15212_v53  ;;  %10533 = vmatprep.subr.bf16.mxu0 %v14302_v31  ;;  %v14362_v26 = vld [vmem:[#allocation2 + $0x624] ss:$76 sps:$4 sm:$0xff]   ;;  %v14360_v31 = vld [vmem:[#allocation2 + $0x620] ss:$76 sps:$4 sm:$0xff]   ;;  %v14368_v63 = vld [vmem:[#allocation2 + $0x6bc] ss:$76 sps:$4 sm:$0xff]  }
 0x44c   :  { %v11351_v38 = vcombine.low %v11343_v36, %v11350_v5  ;;  %10361 = vmatmul.mubr.bf16.vlgmr.msra.gmra.mrb[16].mxu0 %v16021_v11  ;;  %10519 = vmatpush1.bf16.msra.mxu1 %v14303_v34  ;;  %v14369_v34 = vld [vmem:[#allocation2 + $0x4f8] ss:$76 sps:$4 sm:$0xff]   ;;  %v14377_v36 = vld [vmem:[#allocation2 + $0x594] ss:$76 sps:$4 sm:$0xff]  }
 0x44d   :  { %10534 = vmatpush1.bf16.msra.mxu0 %v14300_v35  ;;  %10565 = vmatprep.mubr.bf16.mxu0 %v15957_v50  ;;  %v14366_v35 = vld [vmem:[#allocation2 + $0x6b8] ss:$76 sps:$4 sm:$0xff]   ;;  %v14374_v5 = vld [vmem:[#allocation2 + $0x754] ss:$76 sps:$4 sm:$0xff]  }
 0x44e   :  { %11408 = vst [vmem:[%s16163_s5 + $0x8] sm:$0xff] %v11351_v38  ;;  %10535 = vmatprep.subr.bf16.mxu0 %v14308_v28  ;;  %10520 = vmatprep.subr.bf16.mxu1 %v14311_v37  ;;  %v14375_v28 = vld [vmem:[#allocation2 + $0x590] ss:$76 sps:$4 sm:$0xff]   ;;  %v14383_v38 = vld [vmem:[#allocation2 + $0x62c] ss:$76 sps:$4 sm:$0xff]  }
 0x44f   :  { %v14372_v37 = vld [vmem:[#allocation2 + $0x750] ss:$76 sps:$4 sm:$0xff]  }
 0x450   :  { %10521 = vmatpush1.bf16.msra.mxu1 %v14309_v16  ;;  %v14380_v16 = vld [vmem:[#allocation2 + $0x7ec] ss:$76 sps:$4 sm:$0xff]  }
 0x451   :  { %10536 = vmatpush1.bf16.msra.mxu0 %v14306_v39  ;;  %10522 = vmatprep.subr.bf16.mxu1 %v14317_v40  ;;  %v14381_v39 = vld [vmem:[#allocation2 + $0x628] ss:$76 sps:$4 sm:$0xff]  }
 0x452   :  { %10537 = vmatprep.subr.bf16.mxu0 %v14314_v12  ;;  %v14378_v40 = vld [vmem:[#allocation2 + $0x7e8] ss:$76 sps:$4 sm:$0xff]   ;;  %v14389_v12 = vld [vmem:[#allocation2 + $0x6c4] ss:$76 sps:$4 sm:$0xff]  }
 0x454   :  { %10523 = vmatpush1.bf16.msra.mxu1 %v14315_v41  ;;  %v14386_v41 = vld [vmem:[#allocation2 + $0x884] ss:$76 sps:$4 sm:$0xff]  }
 0x455   :  { %10538 = vmatpush1.bf16.msra.mxu0 %v14312_v43  ;;  %10697 = vmatprep.subr.bf16.mxu1 %v14323_v45  ;;  %v14387_v43 = vld [vmem:[#allocation2 + $0x6c0] ss:$76 sps:$4 sm:$0xff]  }
 0x456   :  { %10539 = vmatprep.subr.bf16.mxu0 %v14320_v21  ;;  %v14384_v45 = vld [vmem:[#allocation2 + $0x880] ss:$76 sps:$4 sm:$0xff]   ;;  %v14395_v21 = vld [vmem:[#allocation2 + $0x75c] ss:$76 sps:$4 sm:$0xff]  }
 0x457   :  { %10525 = vmatmul.mubr.bf16.vlgmr.msra.gmra.mrb[20].mxu1 %v16021_v11 }
 0x458   :  { %10698 = vmatpush1.bf16.msra.mxu1 %v14321_v47  ;;  %10729 = vmatprep.mubr.bf16.mxu1 %v15957_v50  ;;  %v14392_v47 = vld [vmem:[#allocation2 + $0x91c] ss:$76 sps:$4 sm:$0xff]  }
 0x459   :  { %10540 = vmatpush1.bf16.msra.mxu0 %v14318_v49  ;;  %10699 = vmatprep.subr.bf16.mxu1 %v14329_v51  ;;  %v14393_v49 = vld [vmem:[#allocation2 + $0x758] ss:$76 sps:$4 sm:$0xff]  }
 0x45a   :  { %10541 = vmatprep.subr.bf16.mxu0 %v14326_v52  ;;  %v14390_v51 = vld [vmem:[#allocation2 + $0x918] ss:$76 sps:$4 sm:$0xff]   ;;  %v14401_v52 = vld [vmem:[#allocation2 + $0x7f4] ss:$76 sps:$4 sm:$0xff]  }
 0x45c   :  { %10700 = vmatpush1.bf16.msra.mxu1 %v14327_v54  ;;  %v14398_v54 = vld [vmem:[#allocation2 + $0x9b4] ss:$76 sps:$4 sm:$0xff]  }
 0x45d   :  { %10542 = vmatpush1.bf16.msra.mxu0 %v14324_v55  ;;  %10701 = vmatprep.subr.bf16.mxu1 %v14335_v56  ;;  %v14399_v55 = vld [vmem:[#allocation2 + $0x7f0] ss:$76 sps:$4 sm:$0xff]  }
 0x45e   :  { %10543 = vmatprep.subr.bf16.mxu0 %v14332_v57  ;;  %v14396_v56 = vld [vmem:[#allocation2 + $0x9b0] ss:$76 sps:$4 sm:$0xff]   ;;  %v14404_v57 = vld [vmem:[#allocation2 + $0xa4c] ss:$76 sps:$4 sm:$0xff]  }
 0x460   :  { %10702 = vmatpush1.bf16.msra.mxu1 %v14333_v59  ;;  %v14407_v59 = vld [vmem:[#allocation2 + $0x88c] ss:$76 sps:$4 sm:$0xff]  }
 0x461   :  { %10544 = vmatpush1.bf16.msra.mxu0 %v14330_v61  ;;  %10703 = vmatprep.subr.bf16.mxu1 %v14341_v1  ;;  %v14405_v61 = vld [vmem:[#allocation2 + $0x888] ss:$76 sps:$4 sm:$0xff]  }
 0x462   :  { %10545 = vmatprep.subr.bf16.mxu0 %v14338_v2  ;;  %v14402_v1 = vld [vmem:[#allocation2 + $0xa48] ss:$76 sps:$4 sm:$0xff]   ;;  %v14413_v2 = vld [vmem:[#allocation2 + $0x924] ss:$76 sps:$4 sm:$0xff]  }
 0x464   :  { %10704 = vmatpush1.bf16.msra.mxu1 %v14339_v4  ;;  %v14410_v4 = vld [vmem:[#allocation2 + $0xae4] ss:$76 sps:$4 sm:$0xff]  }
 0x465   :  { %10546 = vmatpush1.bf16.msra.mxu0 %v14336_v7  ;;  %10705 = vmatprep.subr.bf16.mxu1 %v14347_v44  ;;  %v14411_v7 = vld [vmem:[#allocation2 + $0x920] ss:$76 sps:$4 sm:$0xff]  }
 0x466   :  { %10547 = vmatprep.subr.bf16.mxu0 %v14344_v10  ;;  %v14408_v44 = vld [vmem:[#allocation2 + $0xae0] ss:$76 sps:$4 sm:$0xff]   ;;  %v14419_v10 = vld [vmem:[#allocation2 + $0x9bc] ss:$76 sps:$4 sm:$0xff]  }
 0x468   :  { %10706 = vmatpush1.bf16.msra.mxu1 %v14345_v13  ;;  %v14416_v13 = vld [vmem:[#allocation2 + $0xb7c] ss:$76 sps:$4 sm:$0xff]  }
 0x469   :  { %10548 = vmatpush1.bf16.msra.mxu0 %v14342_v14  ;;  %10707 = vmatprep.subr.bf16.mxu1 %v14353_v15  ;;  %v14417_v14 = vld [vmem:[#allocation2 + $0x9b8] ss:$76 sps:$4 sm:$0xff]  }
 0x46a   :  { %10549 = vmatprep.subr.bf16.mxu0 %v14350_v17  ;;  %v14414_v15 = vld [vmem:[#allocation2 + $0xb78] ss:$76 sps:$4 sm:$0xff]   ;;  %v14425_v17 = vld [vmem:[#allocation2 + $0xa54] ss:$76 sps:$4 sm:$0xff]  }
 0x46c   :  { %10708 = vmatpush1.bf16.msra.mxu1 %v14351_v18  ;;  %v14422_v18 = vld [vmem:[#allocation2 + $0xc14] ss:$76 sps:$4 sm:$0xff]  }
 0x46d   :  { %10550 = vmatpush1.bf16.msra.mxu0 %v14348_v19  ;;  %10709 = vmatprep.subr.bf16.mxu1 %v14359_v20  ;;  %v14423_v19 = vld [vmem:[#allocation2 + $0xa50] ss:$76 sps:$4 sm:$0xff]  }
 0x46e   :  { %10551 = vmatprep.subr.bf16.mxu0 %v14356_v22  ;;  %v14420_v20 = vld [vmem:[#allocation2 + $0xc10] ss:$76 sps:$4 sm:$0xff]   ;;  %v14431_v22 = vld [vmem:[#allocation2 + $0xaec] ss:$76 sps:$4 sm:$0xff]  }
 0x470   :  { %10710 = vmatpush1.bf16.msra.mxu1 %v14357_v23  ;;  %v14428_v23 = vld [vmem:[#allocation2 + $0xcac] ss:$76 sps:$4 sm:$0xff]  }
 0x471   :  { %10552 = vmatpush1.bf16.msra.mxu0 %v14354_v24  ;;  %10711 = vmatprep.subr.bf16.mxu1 %v14365_v25  ;;  %v14429_v24 = vld [vmem:[#allocation2 + $0xae8] ss:$76 sps:$4 sm:$0xff]  }
 0x472   :  { %10553 = vmatprep.subr.bf16.mxu0 %v14362_v26  ;;  %v14426_v25 = vld [vmem:[#allocation2 + $0xca8] ss:$76 sps:$4 sm:$0xff]   ;;  %v14437_v26 = vld [vmem:[#allocation2 + $0xb84] ss:$76 sps:$4 sm:$0xff]  }
 0x474   :  { %10712 = vmatpush1.bf16.msra.mxu1 %v14363_v29  ;;  %v14434_v29 = vld [vmem:[#allocation2 + $0xd44] ss:$76 sps:$4 sm:$0xff]  }
 0x475   :  { %10554 = vmatpush1.bf16.msra.mxu0 %v14360_v31  ;;  %10713 = vmatprep.subr.bf16.mxu1 %v14371_v33  ;;  %v14435_v31 = vld [vmem:[#allocation2 + $0xb80] ss:$76 sps:$4 sm:$0xff]  }
 0x476   :  { %10555 = vmatprep.subr.bf16.mxu0 %v14368_v63  ;;  %v14432_v33 = vld [vmem:[#allocation2 + $0xd40] ss:$76 sps:$4 sm:$0xff]   ;;  %v14443_v63 = vld [vmem:[#allocation2 + $0xc1c] ss:$76 sps:$4 sm:$0xff]  }
 0x478   :  { %10714 = vmatpush1.bf16.msra.mxu1 %v14369_v34  ;;  %v14440_v34 = vld [vmem:[#allocation2 + $0xddc] ss:$76 sps:$4 sm:$0xff]  }
 0x479   :  { %10556 = vmatpush1.bf16.msra.mxu0 %v14366_v35  ;;  %10715 = vmatprep.subr.bf16.mxu1 %v14377_v36  ;;  %v14441_v35 = vld [vmem:[#allocation2 + $0xc18] ss:$76 sps:$4 sm:$0xff]  }
 0x47a   :  { %10557 = vmatprep.subr.bf16.mxu0 %v14374_v5  ;;  %v14438_v36 = vld [vmem:[#allocation2 + $0xdd8] ss:$76 sps:$4 sm:$0xff]   ;;  %v14449_v5 = vld [vmem:[#allocation2 + $0xcb4] ss:$76 sps:$4 sm:$0xff]  }
 0x47c   :  { %10716 = vmatpush1.bf16.msra.mxu1 %v14375_v28  ;;  %v14446_v28 = vld [vmem:[#allocation2 + $0xe74] ss:$76 sps:$4 sm:$0xff]  }
 0x47d   :  { %10558 = vmatpush1.bf16.msra.mxu0 %v14372_v37  ;;  %10717 = vmatprep.subr.bf16.mxu1 %v14383_v38  ;;  %v14447_v37 = vld [vmem:[#allocation2 + $0xcb0] ss:$76 sps:$4 sm:$0xff]  }
 0x47e   :  { %10559 = vmatprep.subr.bf16.mxu0 %v14380_v16  ;;  %v14444_v38 = vld [vmem:[#allocation2 + $0xe70] ss:$76 sps:$4 sm:$0xff]   ;;  %v14455_v16 = vld [vmem:[#allocation2 + $0xd4c] ss:$76 sps:$4 sm:$0xff]  }
 0x480   :  { %10718 = vmatpush1.bf16.msra.mxu1 %v14381_v39  ;;  %v14452_v39 = vld [vmem:[#allocation2 + $0xf0c] ss:$76 sps:$4 sm:$0xff]  }
 0x481   :  { %10560 = vmatpush1.bf16.msra.mxu0 %v14378_v40  ;;  %10719 = vmatprep.subr.bf16.mxu1 %v14389_v12  ;;  %v14453_v40 = vld [vmem:[#allocation2 + $0xd48] ss:$76 sps:$4 sm:$0xff]  }
 0x482   :  { %10561 = vmatprep.subr.bf16.mxu0 %v14386_v41  ;;  %v14450_v12 = vld [vmem:[#allocation2 + $0xf08] ss:$76 sps:$4 sm:$0xff]   ;;  %v14461_v41 = vld [vmem:[#allocation2 + $0xde4] ss:$76 sps:$4 sm:$0xff]  }
 0x484   :  { %10720 = vmatpush1.bf16.msra.mxu1 %v14387_v43  ;;  %v14458_v43 = vld [vmem:[#allocation2 + $0xfa4] ss:$76 sps:$4 sm:$0xff]  }
 0x485   :  { %10562 = vmatpush1.bf16.msra.mxu0 %v14384_v45  ;;  %10721 = vmatprep.subr.bf16.mxu1 %v14395_v21  ;;  %v14459_v45 = vld [vmem:[#allocation2 + $0xde0] ss:$76 sps:$4 sm:$0xff]  }
 0x486   :  { %10563 = vmatprep.subr.bf16.mxu0 %v14392_v47  ;;  %v14456_v21 = vld [vmem:[#allocation2 + $0xfa0] ss:$76 sps:$4 sm:$0xff]   ;;  %v14467_v47 = vld [vmem:[#allocation2 + $0xe7c] ss:$76 sps:$4 sm:$0xff]  }
 0x488   :  { %10722 = vmatpush1.bf16.msra.mxu1 %v14393_v49  ;;  %v14464_v49 = vld [vmem:[#allocation2 + $0x103c] ss:$76 sps:$4 sm:$0xff]  }
 0x489   :  { %10564 = vmatpush1.bf16.msra.mxu0 %v14390_v51  ;;  %10723 = vmatprep.subr.bf16.mxu1 %v14401_v52  ;;  %v14465_v51 = vld [vmem:[#allocation2 + $0xe78] ss:$76 sps:$4 sm:$0xff]  }
 0x48a   :  { %10574 = vmatprep.subr.bf16.mxu0 %v14398_v54  ;;  %v14462_v52 = vld [vmem:[#allocation2 + $0x1038] ss:$76 sps:$4 sm:$0xff]   ;;  %v14473_v54 = vld [vmem:[#allocation2 + $0xf14] ss:$76 sps:$4 sm:$0xff]  }
 0x48c   :  { %10566 = vmatmul.mubr.bf16.vlgmr.msra.gmra.mrb[20].mxu0 %v15955_v48  ;;  %10724 = vmatpush1.bf16.msra.mxu1 %v14399_v55  ;;  %v14470_v55 = vld [vmem:[#allocation2 + $0x10d4] ss:$76 sps:$4 sm:$0xff]  }
 0x48d   :  { %10575 = vmatpush1.bf16.msra.mxu0 %v14396_v56  ;;  %10606 = vmatprep.mubr.bf16.mxu0 %v15986_v62  ;;  %v14471_v56 = vld [vmem:[#allocation2 + $0xf10] ss:$76 sps:$4 sm:$0xff]  }
 0x48e   :  { %10576 = vmatprep.subr.bf16.mxu0 %v14404_v57  ;;  %10725 = vmatprep.subr.bf16.mxu1 %v14407_v59  ;;  %v14468_v57 = vld [vmem:[#allocation2 + $0x10d0] ss:$76 sps:$4 sm:$0xff]   ;;  %v14479_v59 = vld [vmem:[#allocation2 + $0xfac] ss:$76 sps:$4 sm:$0xff]  }
 0x490   :  { %10726 = vmatpush1.bf16.msra.mxu1 %v14405_v61  ;;  %v14476_v61 = vld [vmem:[#allocation2 + $0x116c] ss:$76 sps:$4 sm:$0xff]  }
 0x491   :  { %10577 = vmatpush1.bf16.msra.mxu0 %v14402_v1  ;;  %10727 = vmatprep.subr.bf16.mxu1 %v14413_v2  ;;  %v14477_v1 = vld [vmem:[#allocation2 + $0xfa8] ss:$76 sps:$4 sm:$0xff]  }
 0x492   :  { %10578 = vmatprep.subr.bf16.mxu0 %v14410_v4  ;;  %v14474_v2 = vld [vmem:[#allocation2 + $0x1168] ss:$76 sps:$4 sm:$0xff]   ;;  %v14485_v4 = vld [vmem:[#allocation2 + $0x1044] ss:$76 sps:$4 sm:$0xff]  }
 0x494   :  { %10728 = vmatpush1.bf16.msra.mxu1 %v14411_v7  ;;  %v14482_v7 = vld [vmem:[#allocation2 + $0x1204] ss:$76 sps:$4 sm:$0xff]  }
 0x495   :  { %10579 = vmatpush1.bf16.msra.mxu0 %v14408_v44  ;;  %10738 = vmatprep.subr.bf16.mxu1 %v14419_v10  ;;  %v14483_v44 = vld [vmem:[#allocation2 + $0x1040] ss:$76 sps:$4 sm:$0xff]  }
 0x496   :  { %10580 = vmatprep.subr.bf16.mxu0 %v14416_v13  ;;  %v14480_v10 = vld [vmem:[#allocation2 + $0x1200] ss:$76 sps:$4 sm:$0xff]   ;;  %v14491_v13 = vld [vmem:[#allocation2 + $0x10dc] ss:$76 sps:$4 sm:$0xff]  }
 0x497   :  { %10730 = vmatmul.mubr.bf16.vlgmr.msra.gmra.mrb[24].mxu1 %v15955_v48 }
 0x498   :  { %10739 = vmatpush1.bf16.msra.mxu1 %v14417_v14  ;;  %10770 = vmatprep.mubr.bf16.mxu1 %v15986_v62  ;;  %v14488_v14 = vld [vmem:[#allocation2 + $0x129c] ss:$76 sps:$4 sm:$0xff]  }
 0x499   :  { %10581 = vmatpush1.bf16.msra.mxu0 %v14414_v15  ;;  %10740 = vmatprep.subr.bf16.mxu1 %v14425_v17  ;;  %v14489_v15 = vld [vmem:[#allocation2 + $0x10d8] ss:$76 sps:$4 sm:$0xff]  }
 0x49a   :  { %10582 = vmatprep.subr.bf16.mxu0 %v14422_v18  ;;  %v14486_v17 = vld [vmem:[#allocation2 + $0x1298] ss:$76 sps:$4 sm:$0xff]   ;;  %v14497_v18 = vld [vmem:[#allocation2 + $0x1174] ss:$76 sps:$4 sm:$0xff]  }
 0x49c   :  { %10741 = vmatpush1.bf16.msra.mxu1 %v14423_v19  ;;  %v14494_v19 = vld [vmem:[#allocation2 + $0x1334] ss:$76 sps:$4 sm:$0xff]  }
 0x49d   :  { %10583 = vmatpush1.bf16.msra.mxu0 %v14420_v20  ;;  %10742 = vmatprep.subr.bf16.mxu1 %v14431_v22  ;;  %v14495_v20 = vld [vmem:[#allocation2 + $0x1170] ss:$76 sps:$4 sm:$0xff]  }
 0x49e   :  { %10584 = vmatprep.subr.bf16.mxu0 %v14428_v23  ;;  %v14492_v22 = vld [vmem:[#allocation2 + $0x1330] ss:$76 sps:$4 sm:$0xff]   ;;  %v14500_v23 = vld [vmem:[#allocation2 + $0x13cc] ss:$76 sps:$4 sm:$0xff]  }
 0x4a0   :  { %10743 = vmatpush1.bf16.msra.mxu1 %v14429_v24  ;;  %v14503_v24 = vld [vmem:[#allocation2 + $0x120c] ss:$76 sps:$4 sm:$0xff]  }
 0x4a1   :  { %10585 = vmatpush1.bf16.msra.mxu0 %v14426_v25  ;;  %10744 = vmatprep.subr.bf16.mxu1 %v14437_v26  ;;  %v14501_v25 = vld [vmem:[#allocation2 + $0x1208] ss:$76 sps:$4 sm:$0xff]  }
 0x4a2   :  { %10586 = vmatprep.subr.bf16.mxu0 %v14434_v29  ;;  %v14498_v26 = vld [vmem:[#allocation2 + $0x13c8] ss:$76 sps:$4 sm:$0xff]   ;;  %v14509_v29 = vld [vmem:[#allocation2 + $0x12a4] ss:$76 sps:$4 sm:$0xff]  }
 0x4a4   :  { %10745 = vmatpush1.bf16.msra.mxu1 %v14435_v31  ;;  %v14506_v31 = vld [vmem:[#allocation2 + $0x1464] ss:$76 sps:$4 sm:$0xff]  }
 0x4a5   :  { %10587 = vmatpush1.bf16.msra.mxu0 %v14432_v33  ;;  %10746 = vmatprep.subr.bf16.mxu1 %v14443_v63  ;;  %v14507_v33 = vld [vmem:[#allocation2 + $0x12a0] ss:$76 sps:$4 sm:$0xff]  }
 0x4a6   :  { %10588 = vmatprep.subr.bf16.mxu0 %v14440_v34  ;;  %v14504_v63 = vld [vmem:[#allocation2 + $0x1460] ss:$76 sps:$4 sm:$0xff]   ;;  %v14515_v34 = vld [vmem:[#allocation2 + $0x133c] ss:$76 sps:$4 sm:$0xff]  }
 0x4a8   :  { %10747 = vmatpush1.bf16.msra.mxu1 %v14441_v35  ;;  %v14512_v35 = vld [vmem:[#allocation2 + $0x14fc] ss:$76 sps:$4 sm:$0xff]  }
 0x4a9   :  { %10589 = vmatpush1.bf16.msra.mxu0 %v14438_v36  ;;  %10748 = vmatprep.subr.bf16.mxu1 %v14449_v5  ;;  %v14513_v36 = vld [vmem:[#allocation2 + $0x1338] ss:$76 sps:$4 sm:$0xff]  }
 0x4aa   :  { %10590 = vmatprep.subr.bf16.mxu0 %v14446_v28  ;;  %v14510_v5 = vld [vmem:[#allocation2 + $0x14f8] ss:$76 sps:$4 sm:$0xff]   ;;  %v14521_v28 = vld [vmem:[#allocation2 + $0x13d4] ss:$76 sps:$4 sm:$0xff]  }
 0x4ac   :  { %10749 = vmatpush1.bf16.msra.mxu1 %v14447_v37  ;;  %v14518_v37 = vld [vmem:[#allocation2 + $0x1594] ss:$76 sps:$4 sm:$0xff]  }
 0x4ad   :  { %10591 = vmatpush1.bf16.msra.mxu0 %v14444_v38  ;;  %10750 = vmatprep.subr.bf16.mxu1 %v14455_v16  ;;  %v14519_v38 = vld [vmem:[#allocation2 + $0x13d0] ss:$76 sps:$4 sm:$0xff]  }
 0x4ae   :  { %10592 = vmatprep.subr.bf16.mxu0 %v14452_v39  ;;  %v14516_v16 = vld [vmem:[#allocation2 + $0x1590] ss:$76 sps:$4 sm:$0xff]   ;;  %v14527_v39 = vld [vmem:[#allocation2 + $0x146c] ss:$76 sps:$4 sm:$0xff]  }
 0x4b0   :  { %10751 = vmatpush1.bf16.msra.mxu1 %v14453_v40  ;;  %v14524_v40 = vld [vmem:[#allocation2 + $0x162c] ss:$76 sps:$4 sm:$0xff]  }
 0x4b1   :  { %10593 = vmatpush1.bf16.msra.mxu0 %v14450_v12  ;;  %10752 = vmatprep.subr.bf16.mxu1 %v14461_v41  ;;  %v14525_v12 = vld [vmem:[#allocation2 + $0x1468] ss:$76 sps:$4 sm:$0xff]  }
 0x4b2   :  { %10594 = vmatprep.subr.bf16.mxu0 %v14458_v43  ;;  %v14522_v41 = vld [vmem:[#allocation2 + $0x1628] ss:$76 sps:$4 sm:$0xff]   ;;  %v14533_v43 = vld [vmem:[#allocation2 + $0x1504] ss:$76 sps:$4 sm:$0xff]  }
 0x4b4   :  { %10753 = vmatpush1.bf16.msra.mxu1 %v14459_v45  ;;  %v14530_v45 = vld [vmem:[#allocation2 + $0x16c4] ss:$76 sps:$4 sm:$0xff]  }
 0x4b5   :  { %10595 = vmatpush1.bf16.msra.mxu0 %v14456_v21  ;;  %10754 = vmatprep.subr.bf16.mxu1 %v14467_v47  ;;  %v14531_v21 = vld [vmem:[#allocation2 + $0x1500] ss:$76 sps:$4 sm:$0xff]  }
 0x4b6   :  { %10596 = vmatprep.subr.bf16.mxu0 %v14464_v49  ;;  %v14528_v47 = vld [vmem:[#allocation2 + $0x16c0] ss:$76 sps:$4 sm:$0xff]   ;;  %v14539_v49 = vld [vmem:[#allocation2 + $0x159c] ss:$76 sps:$4 sm:$0xff]  }
 0x4b8   :  { %10755 = vmatpush1.bf16.msra.mxu1 %v14465_v51  ;;  %v14536_v51 = vld [vmem:[#allocation2 + $0x175c] ss:$76 sps:$4 sm:$0xff]  }
 0x4b9   :  { %10597 = vmatpush1.bf16.msra.mxu0 %v14462_v52  ;;  %10756 = vmatprep.subr.bf16.mxu1 %v14473_v54  ;;  %v14537_v52 = vld [vmem:[#allocation2 + $0x1598] ss:$76 sps:$4 sm:$0xff]  }
 0x4ba   :  { %10598 = vmatprep.subr.bf16.mxu0 %v14470_v55  ;;  %v14534_v54 = vld [vmem:[#allocation2 + $0x1758] ss:$76 sps:$4 sm:$0xff]   ;;  %v14545_v55 = vld [vmem:[#allocation2 + $0x1634] ss:$76 sps:$4 sm:$0xff]  }
 0x4bc   :  { %10757 = vmatpush1.bf16.msra.mxu1 %v14471_v56  ;;  %v14542_v56 = vld [vmem:[#allocation2 + $0x17f4] ss:$76 sps:$4 sm:$0xff]  }
 0x4bd   :  { %10599 = vmatpush1.bf16.msra.mxu0 %v14468_v57  ;;  %10758 = vmatprep.subr.bf16.mxu1 %v14479_v59  ;;  %v14543_v57 = vld [vmem:[#allocation2 + $0x1630] ss:$76 sps:$4 sm:$0xff]  }
 0x4be   :  { %10600 = vmatprep.subr.bf16.mxu0 %v14476_v61  ;;  %v14540_v59 = vld [vmem:[#allocation2 + $0x17f0] ss:$76 sps:$4 sm:$0xff]   ;;  %v14551_v61 = vld [vmem:[#allocation2 + $0x16cc] ss:$76 sps:$4 sm:$0xff]  }
 0x4c0   :  { %10759 = vmatpush1.bf16.msra.mxu1 %v14477_v1  ;;  %v14548_v1 = vld [vmem:[#allocation2 + $0x188c] ss:$76 sps:$4 sm:$0xff]  }
 0x4c1   :  { %10601 = vmatpush1.bf16.msra.mxu0 %v14474_v2  ;;  %10760 = vmatprep.subr.bf16.mxu1 %v14485_v4  ;;  %v14549_v2 = vld [vmem:[#allocation2 + $0x16c8] ss:$76 sps:$4 sm:$0xff]  }
 0x4c2   :  { %10602 = vmatprep.subr.bf16.mxu0 %v14482_v7  ;;  %v14546_v4 = vld [vmem:[#allocation2 + $0x1888] ss:$76 sps:$4 sm:$0xff]   ;;  %v14557_v7 = vld [vmem:[#allocation2 + $0x1764] ss:$76 sps:$4 sm:$0xff]  }
 0x4c4   :  { %10761 = vmatpush1.bf16.msra.mxu1 %v14483_v44  ;;  %v14554_v44 = vld [vmem:[#allocation2 + $0x1924] ss:$76 sps:$4 sm:$0xff]  }
 0x4c5   :  { %10603 = vmatpush1.bf16.msra.mxu0 %v14480_v10  ;;  %10762 = vmatprep.subr.bf16.mxu1 %v14491_v13  ;;  %v14555_v10 = vld [vmem:[#allocation2 + $0x1760] ss:$76 sps:$4 sm:$0xff]  }
 0x4c6   :  { %10604 = vmatprep.subr.bf16.mxu0 %v14488_v14  ;;  %v14552_v13 = vld [vmem:[#allocation2 + $0x1920] ss:$76 sps:$4 sm:$0xff]   ;;  %v14563_v14 = vld [vmem:[#allocation2 + $0x17fc] ss:$76 sps:$4 sm:$0xff]  }
 0x4c8   :  { %10763 = vmatpush1.bf16.msra.mxu1 %v14489_v15  ;;  %v14560_v15 = vld [vmem:[#allocation2 + $0x19bc] ss:$76 sps:$4 sm:$0xff]  }
 0x4c9   :  { %10605 = vmatpush1.bf16.msra.mxu0 %v14486_v17  ;;  %10764 = vmatprep.subr.bf16.mxu1 %v14497_v18  ;;  %v14561_v17 = vld [vmem:[#allocation2 + $0x17f8] ss:$76 sps:$4 sm:$0xff]  }
 0x4ca   :  { %10615 = vmatprep.subr.bf16.mxu0 %v14494_v19  ;;  %v14558_v18 = vld [vmem:[#allocation2 + $0x19b8] ss:$76 sps:$4 sm:$0xff]   ;;  %v14569_v19 = vld [vmem:[#allocation2 + $0x1894] ss:$76 sps:$4 sm:$0xff]  }
 0x4cc   :  { %10607 = vmatmul.mubr.bf16.vlgmr.msra.gmra.mrb[20].mxu0 %v15988_v0  ;;  %10765 = vmatpush1.bf16.msra.mxu1 %v14495_v20  ;;  %v14566_v20 = vld [vmem:[#allocation2 + $0x1a54] ss:$76 sps:$4 sm:$0xff]  }
 0x4cd   :  { %10616 = vmatpush1.bf16.msra.mxu0 %v14492_v22  ;;  %10647 = vmatprep.mubr.bf16.mxu0 %v15990_v3  ;;  %v14567_v22 = vld [vmem:[#allocation2 + $0x1890] ss:$76 sps:$4 sm:$0xff]  }
 0x4ce   :  { %10617 = vmatprep.subr.bf16.mxu0 %v14500_v23  ;;  %10766 = vmatprep.subr.bf16.mxu1 %v14503_v24  ;;  %v14564_v23 = vld [vmem:[#allocation2 + $0x1a50] ss:$76 sps:$4 sm:$0xff]   ;;  %v14575_v24 = vld [vmem:[#allocation2 + $0x192c] ss:$76 sps:$4 sm:$0xff]  }
 0x4d0   :  { %10767 = vmatpush1.bf16.msra.mxu1 %v14501_v25  ;;  %v14572_v25 = vld [vmem:[#allocation2 + $0x1aec] ss:$76 sps:$4 sm:$0xff]  }
 0x4d1   :  { %10618 = vmatpush1.bf16.msra.mxu0 %v14498_v26  ;;  %10768 = vmatprep.subr.bf16.mxu1 %v14509_v29  ;;  %v14573_v26 = vld [vmem:[#allocation2 + $0x1928] ss:$76 sps:$4 sm:$0xff]  }
 0x4d2   :  { %10619 = vmatprep.subr.bf16.mxu0 %v14506_v31  ;;  %v14570_v29 = vld [vmem:[#allocation2 + $0x1ae8] ss:$76 sps:$4 sm:$0xff]   ;;  %v14581_v31 = vld [vmem:[#allocation2 + $0x19c4] ss:$76 sps:$4 sm:$0xff]  }
 0x4d4   :  { %10769 = vmatpush1.bf16.msra.mxu1 %v14507_v33  ;;  %v14578_v33 = vld [vmem:[#allocation2 + $0x1b84] ss:$76 sps:$4 sm:$0xff]  }
 0x4d5   :  { %10620 = vmatpush1.bf16.msra.mxu0 %v14504_v63  ;;  %10779 = vmatprep.subr.bf16.mxu1 %v14515_v34  ;;  %v14579_v63 = vld [vmem:[#allocation2 + $0x19c0] ss:$76 sps:$4 sm:$0xff]  }
 0x4d6   :  { %10621 = vmatprep.subr.bf16.mxu0 %v14512_v35  ;;  %v14576_v34 = vld [vmem:[#allocation2 + $0x1b80] ss:$76 sps:$4 sm:$0xff]   ;;  %v14587_v35 = vld [vmem:[#allocation2 + $0x1a5c] ss:$76 sps:$4 sm:$0xff]  }
 0x4d7   :  { %10771 = vmatmul.mubr.bf16.vlgmr.msra.gmra.mrb[24].mxu1 %v15988_v0 }
 0x4d8   :  { %10780 = vmatpush1.bf16.msra.mxu1 %v14513_v36  ;;  %10811 = vmatprep.mubr.bf16.mxu1 %v15990_v3  ;;  %v14584_v36 = vld [vmem:[#allocation2 + $0x1c1c] ss:$76 sps:$4 sm:$0xff]  }
 0x4d9   :  { %10622 = vmatpush1.bf16.msra.mxu0 %v14510_v5  ;;  %10781 = vmatprep.subr.bf16.mxu1 %v14521_v28  ;;  %v14585_v5 = vld [vmem:[#allocation2 + $0x1a58] ss:$76 sps:$4 sm:$0xff]  }
 0x4da   :  { %10623 = vmatprep.subr.bf16.mxu0 %v14518_v37  ;;  %v14582_v28 = vld [vmem:[#allocation2 + $0x1c18] ss:$76 sps:$4 sm:$0xff]   ;;  %v14593_v37 = vld [vmem:[#allocation2 + $0x1af4] ss:$76 sps:$4 sm:$0xff]  }
 0x4dc   :  { %10782 = vmatpush1.bf16.msra.mxu1 %v14519_v38  ;;  %v14590_v38 = vld [vmem:[#allocation2 + $0x1cb4] ss:$76 sps:$4 sm:$0xff]  }
 0x4dd   :  { %10624 = vmatpush1.bf16.msra.mxu0 %v14516_v16  ;;  %10783 = vmatprep.subr.bf16.mxu1 %v14527_v39  ;;  %v14591_v16 = vld [vmem:[#allocation2 + $0x1af0] ss:$76 sps:$4 sm:$0xff]  }
 0x4de   :  { %10625 = vmatprep.subr.bf16.mxu0 %v14524_v40  ;;  %v14588_v39 = vld [vmem:[#allocation2 + $0x1cb0] ss:$76 sps:$4 sm:$0xff]   ;;  %v14596_v40 = vld [vmem:[#allocation2 + $0x1d4c] ss:$76 sps:$4 sm:$0xff]  }
 0x4e0   :  { %10784 = vmatpush1.bf16.msra.mxu1 %v14525_v12  ;;  %v14599_v12 = vld [vmem:[#allocation2 + $0x1b8c] ss:$76 sps:$4 sm:$0xff]  }
 0x4e1   :  { %10626 = vmatpush1.bf16.msra.mxu0 %v14522_v41  ;;  %10785 = vmatprep.subr.bf16.mxu1 %v14533_v43  ;;  %v14597_v41 = vld [vmem:[#allocation2 + $0x1b88] ss:$76 sps:$4 sm:$0xff]  }
 0x4e2   :  { %10627 = vmatprep.subr.bf16.mxu0 %v14530_v45  ;;  %v14594_v43 = vld [vmem:[#allocation2 + $0x1d48] ss:$76 sps:$4 sm:$0xff]   ;;  %v14605_v45 = vld [vmem:[#allocation2 + $0x1c24] ss:$76 sps:$4 sm:$0xff]  }
 0x4e4   :  { %10786 = vmatpush1.bf16.msra.mxu1 %v14531_v21  ;;  %v14602_v21 = vld [vmem:[#allocation2 + $0x1de4] ss:$76 sps:$4 sm:$0xff]  }
 0x4e5   :  { %10628 = vmatpush1.bf16.msra.mxu0 %v14528_v47  ;;  %10787 = vmatprep.subr.bf16.mxu1 %v14539_v49  ;;  %v14603_v47 = vld [vmem:[#allocation2 + $0x1c20] ss:$76 sps:$4 sm:$0xff]  }
 0x4e6   :  { %10629 = vmatprep.subr.bf16.mxu0 %v14536_v51  ;;  %v14600_v49 = vld [vmem:[#allocation2 + $0x1de0] ss:$76 sps:$4 sm:$0xff]   ;;  %v14611_v51 = vld [vmem:[#allocation2 + $0x1cbc] ss:$76 sps:$4 sm:$0xff]  }
 0x4e8   :  { %10788 = vmatpush1.bf16.msra.mxu1 %v14537_v52  ;;  %v14608_v52 = vld [vmem:[#allocation2 + $0x1e7c] ss:$76 sps:$4 sm:$0xff]  }
 0x4e9   :  { %10630 = vmatpush1.bf16.msra.mxu0 %v14534_v54  ;;  %10789 = vmatprep.subr.bf16.mxu1 %v14545_v55  ;;  %v14609_v54 = vld [vmem:[#allocation2 + $0x1cb8] ss:$76 sps:$4 sm:$0xff]  }
 0x4ea   :  { %10631 = vmatprep.subr.bf16.mxu0 %v14542_v56  ;;  %v14606_v55 = vld [vmem:[#allocation2 + $0x1e78] ss:$76 sps:$4 sm:$0xff]   ;;  %v14617_v56 = vld [vmem:[#allocation2 + $0x1d54] ss:$76 sps:$4 sm:$0xff]  }
 0x4ec   :  { %10790 = vmatpush1.bf16.msra.mxu1 %v14543_v57  ;;  %v14614_v57 = vld [vmem:[#allocation2 + $0x1f14] ss:$76 sps:$4 sm:$0xff]  }
 0x4ed   :  { %10632 = vmatpush1.bf16.msra.mxu0 %v14540_v59  ;;  %10791 = vmatprep.subr.bf16.mxu1 %v14551_v61  ;;  %v14615_v59 = vld [vmem:[#allocation2 + $0x1d50] ss:$76 sps:$4 sm:$0xff]  }
 0x4ee   :  { %10633 = vmatprep.subr.bf16.mxu0 %v14548_v1  ;;  %v14612_v61 = vld [vmem:[#allocation2 + $0x1f10] ss:$76 sps:$4 sm:$0xff]   ;;  %v16100_v1 = vld [vmem:[%s16162_s4 + $0x8] sm:$0xff] }
 0x4f0   :  { %10792 = vmatpush1.bf16.msra.mxu1 %v14549_v2  ;;  %v14623_v2 = vld [vmem:[#allocation2 + $0x1dec] ss:$76 sps:$4 sm:$0xff]  }
 0x4f1   :  { %10634 = vmatpush1.bf16.msra.mxu0 %v14546_v4  ;;  %10793 = vmatprep.subr.bf16.mxu1 %v14557_v7  ;;  %v14620_v4 = vld [vmem:[#allocation2 + $0x1fac] ss:$76 sps:$4 sm:$0xff]   ;;  %v3345_v7 = vrot.slane %v16100_v1, %v15885_v42 }
 0x4f2   :  { %10635 = vmatprep.subr.bf16.mxu0 %v14554_v44  ;;  %v14621_v44 = vld [vmem:[#allocation2 + $0x1de8] ss:$76 sps:$4 sm:$0xff]  }
 0x4f4   :  { %10794 = vmatpush1.bf16.msra.mxu1 %v14555_v10  ;;  %v3349_v10 = vrot.slane %v16100_v1, %v15891_v46 }
 0x4f5   :  { %10636 = vmatpush1.bf16.msra.mxu0 %v14552_v13  ;;  %10795 = vmatprep.subr.bf16.mxu1 %v14563_v14  ;;  %v14618_v13 = vld [vmem:[#allocation2 + $0x1fa8] ss:$76 sps:$4 sm:$0xff]   ;;  %v14629_v14 = vld [vmem:[#allocation2 + $0x1e84] ss:$76 sps:$4 sm:$0xff]  }
 0x4f6   :  { %10637 = vmatprep.subr.bf16.mxu0 %v14560_v15  ;;  %v14626_v15 = vld [vmem:[#allocation2 + $0x2044] ss:$76 sps:$4 sm:$0xff]  }
 0x4f8   :  { %10796 = vmatpush1.bf16.msra.mxu1 %v14561_v17 }
 0x4f9   :  { %10638 = vmatpush1.bf16.msra.mxu0 %v14558_v18  ;;  %10797 = vmatprep.subr.bf16.mxu1 %v14569_v19 }
 0x4fa   :  { %10639 = vmatprep.subr.bf16.mxu0 %v14566_v20  ;;  %v14627_v20 = vld [vmem:[#allocation2 + $0x1e80] ss:$76 sps:$4 sm:$0xff]  }
 0x4fc   :  { %10798 = vmatpush1.bf16.msra.mxu1 %v14567_v22 }
 0x4fd   :  { %10640 = vmatpush1.bf16.msra.mxu0 %v14564_v23  ;;  %10799 = vmatprep.subr.bf16.mxu1 %v14575_v24  ;;  %v14624_v24 = vld [vmem:[#allocation2 + $0x2040] ss:$76 sps:$4 sm:$0xff]  }
 0x4fe   :  { %10641 = vmatprep.subr.bf16.mxu0 %v14572_v25  ;;  %v14635_v25 = vld [vmem:[#allocation2 + $0x1f1c] ss:$76 sps:$4 sm:$0xff]  }
 0x500   :  { %10800 = vmatpush1.bf16.msra.mxu1 %v14573_v26 }
 0x501   :  { %10642 = vmatpush1.bf16.msra.mxu0 %v14570_v29  ;;  %10801 = vmatprep.subr.bf16.mxu1 %v14581_v31  ;;  %v14632_v31 = vld [vmem:[#allocation2 + $0x20dc] ss:$76 sps:$4 sm:$0xff]  }
 0x502   :  { %10643 = vmatprep.subr.bf16.mxu0 %v14578_v33 }
 0x504   :  { %10802 = vmatpush1.bf16.msra.mxu1 %v14579_v63  ;;  %v14633_v63 = vld [vmem:[#allocation2 + $0x1f18] ss:$76 sps:$4 sm:$0xff]  }
 0x505   :  { %10644 = vmatpush1.bf16.msra.mxu0 %v14576_v34  ;;  %10803 = vmatprep.subr.bf16.mxu1 %v14587_v35  ;;  %v14630_v34 = vld [vmem:[#allocation2 + $0x20d8] ss:$76 sps:$4 sm:$0xff]   ;;  %v14641_v35 = vld [vmem:[#allocation2 + $0x1fb4] ss:$76 sps:$4 sm:$0xff]  }
 0x506   :  { %10645 = vmatprep.subr.bf16.mxu0 %v14584_v36  ;;  %v14638_v36 = vld [vmem:[#allocation2 + $0x2174] ss:$76 sps:$4 sm:$0xff]  }
 0x508   :  { %10804 = vmatpush1.bf16.msra.mxu1 %v14585_v5  ;;  %v3353_v5 = vrot.slane %v16100_v1, %v15965_v8 }
 0x509   :  { %10646 = vmatpush1.bf16.msra.mxu0 %v14582_v28  ;;  %10805 = vmatprep.subr.bf16.mxu1 %v14593_v37  ;;  %v3357_v28 = vrot.slane %v16100_v1, %v15968_v9  ;;  %v14639_v37 = vld [vmem:[#allocation2 + $0x1fb0] ss:$76 sps:$4 sm:$0xff]  }
 0x50a   :  { %10656 = vmatprep.subr.bf16.mxu0 %v14590_v38  ;;  %v14636_v38 = vld [vmem:[#allocation2 + $0x2170] ss:$76 sps:$4 sm:$0xff]  }
 0x50b   :  { %v14653_v9 = vld [vmem:[#allocation2 + $0x20e4] ss:$76 sps:$4 sm:$0xff]  }
 0x50c   :  { %10648 = vmatmul.mubr.bf16.vlgmr.msra.gmra.mrb[20].mxu0 %v16004_v30  ;;  %10806 = vmatpush1.bf16.msra.mxu1 %v14591_v16  ;;  %v14647_v16 = vld [vmem:[#allocation2 + $0x204c] ss:$76 sps:$4 sm:$0xff]  }
 0x50d   :  { %10657 = vmatpush1.bf16.msra.mxu0 %v14588_v39  ;;  %10688 = vmatprep.mubr.bf16.mxu0 %v16019_v6 }
 0x50e   :  { %10658 = vmatprep.subr.bf16.mxu0 %v14596_v40  ;;  %10807 = vmatprep.subr.bf16.mxu1 %v14599_v12  ;;  %v14644_v40 = vld [vmem:[#allocation2 + $0x220c] ss:$76 sps:$4 sm:$0xff]  }
 0x510   :  { %10808 = vmatpush1.bf16.msra.mxu1 %v14597_v41 }
 0x511   :  { %10659 = vmatpush1.bf16.msra.mxu0 %v14594_v43  ;;  %10809 = vmatprep.subr.bf16.mxu1 %v14605_v45 }
 0x512   :  { %10660 = vmatprep.subr.bf16.mxu0 %v14602_v21  ;;  %v14642_v21 = vld [vmem:[#allocation2 + $0x2208] ss:$76 sps:$4 sm:$0xff]  }
 0x514   :  { %10810 = vmatpush1.bf16.msra.mxu1 %v14603_v47  ;;  %v14645_v47 = vld [vmem:[#allocation2 + $0x2048] ss:$76 sps:$4 sm:$0xff]  }
 0x515   :  { %10661 = vmatpush1.bf16.msra.mxu0 %v14600_v49  ;;  %10820 = vmatprep.subr.bf16.mxu1 %v14611_v51 }
 0x516   :  { %10662 = vmatprep.subr.bf16.mxu0 %v14608_v52 }
 0x517   :  { %10812 = vmatmul.mubr.bf16.vlgmr.msra.gmra.mrb[24].mxu1 %v16004_v30 }
 0x518   :  { %10821 = vmatpush1.bf16.msra.mxu1 %v14609_v54  ;;  %10852 = vmatprep.mubr.bf16.mxu1 %v16019_v6 }
 0x519   :  { %10663 = vmatpush1.bf16.msra.mxu0 %v14606_v55  ;;  %10822 = vmatprep.subr.bf16.mxu1 %v14617_v56  ;;  %v14650_v55 = vld [vmem:[#allocation2 + $0x22a4] ss:$76 sps:$4 sm:$0xff]  }
 0x51a   :  { %10664 = vmatprep.subr.bf16.mxu0 %v14614_v57 }
 0x51c   :  { %10823 = vmatpush1.bf16.msra.mxu1 %v14615_v59 }
 0x51d   :  { %10665 = vmatpush1.bf16.msra.mxu0 %v14612_v61  ;;  %10824 = vmatprep.subr.bf16.mxu1 %v14623_v2  ;;  %v14651_v61 = vld [vmem:[#allocation2 + $0x20e0] ss:$76 sps:$4 sm:$0xff]  }
 0x51e   :  { %10666 = vmatprep.subr.bf16.mxu0 %v14620_v4  ;;  %v14648_v2 = vld [vmem:[#allocation2 + $0x22a0] ss:$76 sps:$4 sm:$0xff]   ;;  %v14659_v4 = vld [vmem:[#allocation2 + $0x217c] ss:$76 sps:$4 sm:$0xff]  }
 0x51f   :  { %v10362_v17 = vpop.f32.mrb[16].mxu0 }
 0x520   :  { %v13022_v18 = vadd.f32 %v10362_v17, %v3345_v7  ;;  %v10364_v19 = vpop.f32.mrb[17].mxu0  ;;  %10825 = vmatpush1.bf16.msra.mxu1 %v14621_v44  ;;  %v14656_v7 = vld [vmem:[#allocation2 + $0x233c] ss:$76 sps:$4 sm:$0xff]   ;;  %v14657_v44 = vld [vmem:[#allocation2 + $0x2178] ss:$76 sps:$4 sm:$0xff]  }
 0x521   :  { %v13023_v22 = vadd.f32 %v10364_v19, %v3349_v10  ;;  %v10366_v23 = vpop.f32.mrb[18].mxu0  ;;  %10667 = vmatpush1.bf16.msra.mxu0 %v14618_v13  ;;  %10826 = vmatprep.subr.bf16.mxu1 %v14629_v14  ;;  %v14654_v10 = vld [vmem:[#allocation2 + $0x2338] ss:$76 sps:$4 sm:$0xff]   ;;  %v14665_v13 = vld [vmem:[#allocation2 + $0x2214] ss:$76 sps:$4 sm:$0xff]  }
 0x522   :  { %v12905_v26 = vmul.f32 -1.442695, %v13022_v18  ;;  %v10367_v29 = vpop.f32.mrb[19].mxu0  ;;  %10668 = vmatprep.subr.bf16.mxu0 %v14626_v15  ;;  %v14662_v14 = vld [vmem:[#allocation2 + $0x23d4] ss:$76 sps:$4 sm:$0xff]  }
 0x523   :  { %v12906_v33 = vmul.f32 -1.442695, %v13023_v22  ;;  %v14663_v15 = vld [vmem:[#allocation2 + $0x2210] ss:$76 sps:$4 sm:$0xff]   ;;  %v14671_v19 = vld [vmem:[#allocation2 + $0x22ac] ss:$76 sps:$4 sm:$0xff]  }
 0x524   :  { %15013 = vpow2.f32 %v12905_v26  ;;  %10827 = vmatpush1.bf16.msra.mxu1 %v14627_v20  ;;  %v14660_v18 = vld [vmem:[#allocation2 + $0x23d0] ss:$76 sps:$4 sm:$0xff]   ;;  %v14668_v23 = vld [vmem:[#allocation2 + $0x246c] ss:$76 sps:$4 sm:$0xff]   ;;  %v14669_v29 = vld [vmem:[#allocation2 + $0x22a8] ss:$76 sps:$4 sm:$0xff]  }
 0x525   :  { %15015 = vpow2.f32 %v12906_v33  ;;  %10669 = vmatpush1.bf16.msra.mxu0 %v14624_v24  ;;  %10828 = vmatprep.subr.bf16.mxu1 %v14635_v25  ;;  %v14666_v33 = vld [vmem:[#allocation2 + $0x2468] ss:$76 sps:$4 sm:$0xff]  }
 0x526   :  { %10670 = vmatprep.subr.bf16.mxu0 %v14632_v31 }
 0x528   :  { %10829 = vmatpush1.bf16.msra.mxu1 %v14633_v63  ;;  %v14677_v63 = vld [vmem:[#allocation2 + $0x2344] ss:$76 sps:$4 sm:$0xff]  }
 0x529   :  { %10671 = vmatpush1.bf16.msra.mxu0 %v14630_v34  ;;  %10830 = vmatprep.subr.bf16.mxu1 %v14641_v35  ;;  %v14674_v34 = vld [vmem:[#allocation2 + $0x2504] ss:$76 sps:$4 sm:$0xff]   ;;  %v14675_v35 = vld [vmem:[#allocation2 + $0x2340] ss:$76 sps:$4 sm:$0xff]  }
 0x52a   :  { %v10526_v39 = vpop.f32.mrb[20].mxu1  ;;  %10672 = vmatprep.subr.bf16.mxu0 %v14638_v36  ;;  %v14672_v36 = vld [vmem:[#allocation2 + $0x2500] ss:$76 sps:$4 sm:$0xff]  }
 0x52b   :  { %v13024_v12 = vadd.f32 %v10526_v39, %v3353_v5  ;;  %v10528_v41 = vpop.f32.mrb[21].mxu1  ;;  %v14683_v5 = vld [vmem:[#allocation2 + $0x23dc] ss:$76 sps:$4 sm:$0xff]  }
 0x52c   :  { %v13025_v43 = vadd.f32 %v10528_v41, %v3357_v28  ;;  %v10530_v45 = vpop.f32.mrb[22].mxu1  ;;  %10831 = vmatpush1.bf16.msra.mxu1 %v14639_v37  ;;  %v14680_v28 = vld [vmem:[#allocation2 + $0x259c] ss:$76 sps:$4 sm:$0xff]   ;;  %v14681_v37 = vld [vmem:[#allocation2 + $0x23d8] ss:$76 sps:$4 sm:$0xff]  }
 0x52d   :  { %v12907_v49 = vmul.f32 -1.442695, %v13024_v12  ;;  %10673 = vmatpush1.bf16.msra.mxu0 %v14636_v38  ;;  %v10531_v51 = vpop.f32.mrb[23].mxu1  ;;  %10832 = vmatprep.subr.bf16.mxu1 %v14647_v16  ;;  %v14678_v38 = vld [vmem:[#allocation2 + $0x2598] ss:$76 sps:$4 sm:$0xff]  }
 0x52e   :  { %v15014_v52 = vpop.eup %15013  ;;  %v12908_v54 = vmul.f32 -1.442695, %v13025_v43  ;;  %10674 = vmatprep.subr.bf16.mxu0 %v14644_v40  ;;  %v14689_v16 = vld [vmem:[#allocation2 + $0x2474] ss:$76 sps:$4 sm:$0xff]   ;;  %v14686_v40 = vld [vmem:[#allocation2 + $0x44] ss:$76 sps:$4 sm:$0xff]  }
 0x52f   :  { %v15016_v56 = vpop.eup %15015  ;;  %v11250_v57 = vadd.f32 1.0, %v15014_v52  ;;  %15017 = vpow2.f32 %v12907_v49  ;;  %v14687_v43 = vld [vmem:[#allocation2 + $0x2470] ss:$76 sps:$4 sm:$0xff]   ;;  %v14684_v45 = vld [vmem:[#allocation2 + $0x40] ss:$76 sps:$4 sm:$0xff]  }
 0x530   :  { %v11251_v59 = vadd.f32 1.0, %v15016_v56  ;;  %15019 = vpow2.f32 %v12908_v54  ;;  %10833 = vmatpush1.bf16.msra.mxu1 %v14645_v47  ;;  %v14692_v49 = vld [vmem:[#allocation2 + $0xdc] ss:$76 sps:$4 sm:$0xff]   ;;  %v14695_v51 = vld [vmem:[#allocation2 + $0x250c] ss:$76 sps:$4 sm:$0xff]  }
 0x531   :  { %15021 = vrcp.f32 %v11250_v57  ;;  %10675 = vmatpush1.bf16.msra.mxu0 %v14642_v21  ;;  %10834 = vmatprep.subr.bf16.mxu1 %v14653_v9  ;;  %v14693_v52 = vld [vmem:[#allocation2 + $0x2508] ss:$76 sps:$4 sm:$0xff]   ;;  %v14690_v54 = vld [vmem:[#allocation2 + $0xd8] ss:$76 sps:$4 sm:$0xff]   ;;  %v14699_v57 = vld [vmem:[#allocation2 + $0x25a0] ss:$76 sps:$4 sm:$0xff]  }
 0x532   :  { %15023 = vrcp.f32 %v11251_v59  ;;  %10676 = vmatprep.subr.bf16.mxu0 %v14650_v55  ;;  %v14701_v55 = vld [vmem:[#allocation2 + $0x25a4] ss:$76 sps:$4 sm:$0xff]   ;;  %v14698_v56 = vld [vmem:[#allocation2 + $0x174] ss:$76 sps:$4 sm:$0xff]  }
 0x533   :  { %v14696_v59 = vld [vmem:[#allocation2 + $0x170] ss:$76 sps:$4 sm:$0xff]  }
 0x534   :  { %10835 = vmatpush1.bf16.msra.mxu1 %v14651_v61  ;;  %v14705_v61 = vld [vmem:[#allocation2 + $0x508] ss:$76 sps:$4 sm:$0xff]  }
 0x535   :  { %10677 = vmatpush1.bf16.msra.mxu0 %v14648_v2  ;;  %10836 = vmatprep.subr.bf16.mxu1 %v14659_v4  ;;  %v14704_v2 = vld [vmem:[#allocation2 + $0x20c] ss:$76 sps:$4 sm:$0xff]   ;;  %v14706_v4 = vld [vmem:[#allocation2 + $0x48] ss:$76 sps:$4 sm:$0xff]  }
 0x536   :  { %10678 = vmatprep.subr.bf16.mxu0 %v14656_v7  ;;  %v14702_v7 = vld [vmem:[#allocation2 + $0x208] ss:$76 sps:$4 sm:$0xff]  }
 0x538   :  { %10837 = vmatpush1.bf16.msra.mxu1 %v14657_v44  ;;  %v14710_v44 = vld [vmem:[#allocation2 + $0x5a0] ss:$76 sps:$4 sm:$0xff]  }
 0x539   :  { %v15018_v17 = vpop.eup %15017  ;;  %10679 = vmatpush1.bf16.msra.mxu0 %v14654_v10  ;;  %10838 = vmatprep.subr.bf16.mxu1 %v14665_v13  ;;  %v14709_v10 = vld [vmem:[#allocation2 + $0x2a4] ss:$76 sps:$4 sm:$0xff]   ;;  %v14711_v13 = vld [vmem:[#allocation2 + $0xe0] ss:$76 sps:$4 sm:$0xff]  }
 0x53a   :  { %v15020_v20 = vpop.eup %15019  ;;  %v11252_v22 = vadd.f32 1.0, %v15018_v17  ;;  %10680 = vmatprep.subr.bf16.mxu0 %v14662_v14  ;;  %v14707_v14 = vld [vmem:[#allocation2 + $0x2a0] ss:$76 sps:$4 sm:$0xff]   ;;  %v14714_v17 = vld [vmem:[#allocation2 + $0x33c] ss:$76 sps:$4 sm:$0xff]  }
 0x53b   :  { %v15022_v24 = vpop.eup %15021  ;;  %v11253_v25 = vadd.f32 1.0, %v15020_v20  ;;  %v14720_v20 = vld [vmem:[#allocation2 + $0x6d0] ss:$76 sps:$4 sm:$0xff]  }
 0x53c   :  { %v15024_v26 = vpop.eup %15023  ;;  %15025 = vrcp.f32 %v11252_v22  ;;  %10839 = vmatpush1.bf16.msra.mxu1 %v14663_v15  ;;  %v14715_v15 = vld [vmem:[#allocation2 + $0x638] ss:$76 sps:$4 sm:$0xff]   ;;  %v14719_v22 = vld [vmem:[#allocation2 + $0x3d4] ss:$76 sps:$4 sm:$0xff]  }
 0x53d   :  { %v11352_v31 = vcombine.low %v15022_v24, %v15024_v26  ;;  %15027 = vrcp.f32 %v11253_v25  ;;  %10681 = vmatpush1.bf16.msra.mxu0 %v14660_v18  ;;  %10840 = vmatprep.subr.bf16.mxu1 %v14671_v19  ;;  %v14716_v18 = vld [vmem:[#allocation2 + $0x178] ss:$76 sps:$4 sm:$0xff]   ;;  %v14717_v24 = vld [vmem:[#allocation2 + $0x3d0] ss:$76 sps:$4 sm:$0xff]   ;;  %v14726_v26 = vld [vmem:[#allocation2 + $0x2a8] ss:$76 sps:$4 sm:$0xff]  }
 0x53e   :  { %10682 = vmatprep.subr.bf16.mxu0 %v14668_v23  ;;  %v14712_v19 = vld [vmem:[#allocation2 + $0x338] ss:$76 sps:$4 sm:$0xff]   ;;  %v14721_v23 = vld [vmem:[#allocation2 + $0x210] ss:$76 sps:$4 sm:$0xff]  }
 0x53f   :  { %v11360_v21 = vrot.slane %v11352_v31, %v15212_v53  ;;  %v14724_v25 = vld [vmem:[#allocation2 + $0x46c] ss:$76 sps:$4 sm:$0xff]  }
 0x540   :  { %10841 = vmatpush1.bf16.msra.mxu1 %v14669_v29  ;;  %v14722_v29 = vld [vmem:[#allocation2 + $0x468] ss:$76 sps:$4 sm:$0xff]   ;;  %v14730_v31 = vld [vmem:[#allocation2 + $0x800] ss:$76 sps:$4 sm:$0xff]  }
 0x541   :  { %10683 = vmatpush1.bf16.msra.mxu0 %v14666_v33  ;;  %10842 = vmatprep.subr.bf16.mxu1 %v14677_v63  ;;  %v14729_v33 = vld [vmem:[#allocation2 + $0x504] ss:$76 sps:$4 sm:$0xff]   ;;  %v14731_v63 = vld [vmem:[#allocation2 + $0x340] ss:$76 sps:$4 sm:$0xff]  }
 0x542   :  { %10684 = vmatprep.subr.bf16.mxu0 %v14674_v34  ;;  %v14727_v34 = vld [vmem:[#allocation2 + $0x500] ss:$76 sps:$4 sm:$0xff]  }
 0x544   :  { %10843 = vmatpush1.bf16.msra.mxu1 %v14675_v35  ;;  %v14735_v35 = vld [vmem:[#allocation2 + $0x898] ss:$76 sps:$4 sm:$0xff]  }
 0x545   :  { %10685 = vmatpush1.bf16.msra.mxu0 %v14672_v36  ;;  %10844 = vmatprep.subr.bf16.mxu1 %v14683_v5  ;;  %v14734_v36 = vld [vmem:[#allocation2 + $0x59c] ss:$76 sps:$4 sm:$0xff]   ;;  %v14736_v5 = vld [vmem:[#allocation2 + $0x3d8] ss:$76 sps:$4 sm:$0xff]  }
 0x546   :  { %v15026_v39 = vpop.eup %15025  ;;  %10686 = vmatprep.subr.bf16.mxu0 %v14680_v28  ;;  %v14732_v28 = vld [vmem:[#allocation2 + $0x598] ss:$76 sps:$4 sm:$0xff]  }
 0x547   :  { %v15028_v12 = vpop.eup %15027 }
 0x548   :  { %v11353_v41 = vcombine.low %v15026_v39, %v15028_v12  ;;  %10845 = vmatpush1.bf16.msra.mxu1 %v14681_v37  ;;  %v14740_v37 = vld [vmem:[#allocation2 + $0x930] ss:$76 sps:$4 sm:$0xff]   ;;  %v14744_v12 = vld [vmem:[#allocation2 + $0x6cc] ss:$76 sps:$4 sm:$0xff]  }
 0x549   :  { %10687 = vmatpush1.bf16.msra.mxu0 %v14678_v38  ;;  %10846 = vmatprep.subr.bf16.mxu1 %v14689_v16  ;;  %v14739_v38 = vld [vmem:[#allocation2 + $0x634] ss:$76 sps:$4 sm:$0xff]   ;;  %v14741_v16 = vld [vmem:[#allocation2 + $0x470] ss:$76 sps:$4 sm:$0xff]  }
 0x54a   :  { %v11367_v47 = vrot.slane %v11353_v41, %v15212_v53  ;;  %10861 = vmatprep.subr.bf16.mxu0 %v14686_v40  ;;  %v14737_v39 = vld [vmem:[#allocation2 + $0x630] ss:$76 sps:$4 sm:$0xff]   ;;  %v14745_v40 = vld [vmem:[#allocation2 + $0xe88] ss:$76 sps:$4 sm:$0xff]  }
 0x54b   :  { %v14746_v41 = vld [vmem:[#allocation2 + $0x9c8] ss:$76 sps:$4 sm:$0xff]  }
 0x54c   :  { %v11368_v9 = vcombine.low %v11360_v21, %v11367_v47  ;;  %10689 = vmatmul.mubr.bf16.vlgmr.msra.gmra.mrb[20].mxu0 %v16021_v11  ;;  %10847 = vmatpush1.bf16.msra.mxu1 %v14687_v43  ;;  %v14742_v43 = vld [vmem:[#allocation2 + $0x6c8] ss:$76 sps:$4 sm:$0xff]   ;;  %v14749_v21 = vld [vmem:[#allocation2 + $0x764] ss:$76 sps:$4 sm:$0xff]   ;;  %v14751_v47 = vld [vmem:[#allocation2 + $0xa60] ss:$76 sps:$4 sm:$0xff]  }
 0x54d   :  { %10862 = vmatpush1.bf16.msra.mxu0 %v14684_v45  ;;  %10893 = vmatprep.mubr.bf16.mxu0 %v15957_v50  ;;  %v14750_v45 = vld [vmem:[#allocation2 + $0xf20] ss:$76 sps:$4 sm:$0xff]  }
 0x54e   :  { %11409 = vst [vmem:[%s16163_s5 + $0x10] sm:$0xff] %v11368_v9  ;;  %10863 = vmatprep.subr.bf16.mxu0 %v14692_v49  ;;  %10848 = vmatprep.subr.bf16.mxu1 %v14695_v51  ;;  %v14747_v49 = vld [vmem:[#allocation2 + $0x760] ss:$76 sps:$4 sm:$0xff]   ;;  %v14755_v51 = vld [vmem:[#allocation2 + $0xfb8] ss:$76 sps:$4 sm:$0xff]  }
 0x54f   :  { %v14754_v9 = vld [vmem:[#allocation2 + $0x7fc] ss:$76 sps:$4 sm:$0xff]  }
 0x550   :  { %10849 = vmatpush1.bf16.msra.mxu1 %v14693_v52  ;;  %v14756_v52 = vld [vmem:[#allocation2 + $0xaf8] ss:$76 sps:$4 sm:$0xff]  }
 0x551   :  { %10864 = vmatpush1.bf16.msra.mxu0 %v14690_v54  ;;  %10850 = vmatprep.subr.bf16.mxu1 %v14701_v55  ;;  %v14752_v54 = vld [vmem:[#allocation2 + $0x7f8] ss:$76 sps:$4 sm:$0xff]   ;;  %v14760_v55 = vld [vmem:[#allocation2 + $0x1050] ss:$76 sps:$4 sm:$0xff]  }
 0x552   :  { %10865 = vmatprep.subr.bf16.mxu0 %v14698_v56  ;;  %v14759_v56 = vld [vmem:[#allocation2 + $0x894] ss:$76 sps:$4 sm:$0xff]  }
 0x554   :  { %10851 = vmatpush1.bf16.msra.mxu1 %v14699_v57  ;;  %v14761_v57 = vld [vmem:[#allocation2 + $0xb90] ss:$76 sps:$4 sm:$0xff]  }
 0x555   :  { %10866 = vmatpush1.bf16.msra.mxu0 %v14696_v59  ;;  %12916 = vmatprep.subr.bf16.mxu1 %v14705_v61  ;;  %v14757_v59 = vld [vmem:[#allocation2 + $0x890] ss:$76 sps:$4 sm:$0xff]   ;;  %v14765_v61 = vld [vmem:[#allocation2 + $0x10e8] ss:$76 sps:$4 sm:$0xff]  }
 0x556   :  { %10867 = vmatprep.subr.bf16.mxu0 %v14704_v2  ;;  %v14764_v2 = vld [vmem:[#allocation2 + $0x92c] ss:$76 sps:$4 sm:$0xff]  }
 0x557   :  { %10853 = vmatmul.mubr.bf16.vlgmr.msra.gmra.mrb[24].mxu1 %v16021_v11 }
 0x558   :  { %12917 = vmatpush3.bf16.msra.mxu1 %v14706_v4  ;;  %11057 = vmatprep.mubr.bf16.mxu1 %v15957_v50  ;;  %v14725_v50 = vld [vmem:[#allocation2 + $0x768] ss:$76 sps:$4 sm:$0xff]  }
 0x559   :  { %10868 = vmatpush1.bf16.msra.mxu0 %v14702_v7  ;;  %12918 = vmatprep.subr.bf16.mxu1 %v14710_v44  ;;  %v14766_v4 = vld [vmem:[#allocation2 + $0xc28] ss:$76 sps:$4 sm:$0xff]   ;;  %v14770_v44 = vld [vmem:[#allocation2 + $0x1180] ss:$76 sps:$4 sm:$0xff]  }
 0x55a   :  { %10869 = vmatprep.subr.bf16.mxu0 %v14709_v10  ;;  %v14762_v7 = vld [vmem:[#allocation2 + $0x928] ss:$76 sps:$4 sm:$0xff]   ;;  %v14769_v10 = vld [vmem:[#allocation2 + $0x9c4] ss:$76 sps:$4 sm:$0xff]  }
 0x55c   :  { %12919 = vmatpush3.bf16.msra.mxu1 %v14711_v13  ;;  %v14771_v13 = vld [vmem:[#allocation2 + $0xcc0] ss:$76 sps:$4 sm:$0xff]  }
 0x55d   :  { %10870 = vmatpush1.bf16.msra.mxu0 %v14707_v14  ;;  %12920 = vmatprep.subr.bf16.mxu1 %v14715_v15  ;;  %v14767_v14 = vld [vmem:[#allocation2 + $0x9c0] ss:$76 sps:$4 sm:$0xff]   ;;  %v14774_v15 = vld [vmem:[#allocation2 + $0xa5c] ss:$76 sps:$4 sm:$0xff]  }
 0x55e   :  { %10871 = vmatprep.subr.bf16.mxu0 %v14714_v17  ;;  %v14775_v17 = vld [vmem:[#allocation2 + $0x1218] ss:$76 sps:$4 sm:$0xff]  }
 0x560   :  { %12921 = vmatpush3.bf16.msra.mxu1 %v14716_v18  ;;  %v14776_v18 = vld [vmem:[#allocation2 + $0xd58] ss:$76 sps:$4 sm:$0xff]  }
 0x561   :  { %10872 = vmatpush1.bf16.msra.mxu0 %v14712_v19  ;;  %12922 = vmatprep.subr.bf16.mxu1 %v14720_v20  ;;  %v14772_v19 = vld [vmem:[#allocation2 + $0xa58] ss:$76 sps:$4 sm:$0xff]   ;;  %v14780_v20 = vld [vmem:[#allocation2 + $0x12b0] ss:$76 sps:$4 sm:$0xff]  }
 0x562   :  { %10873 = vmatprep.subr.bf16.mxu0 %v14719_v22  ;;  %v14779_v22 = vld [vmem:[#allocation2 + $0xaf4] ss:$76 sps:$4 sm:$0xff]  }
 0x564   :  { %12923 = vmatpush3.bf16.msra.mxu1 %v14721_v23  ;;  %v14781_v23 = vld [vmem:[#allocation2 + $0xdf0] ss:$76 sps:$4 sm:$0xff]  }
 0x565   :  { %10874 = vmatpush1.bf16.msra.mxu0 %v14717_v24  ;;  %12924 = vmatprep.subr.bf16.mxu1 %v14725_v50  ;;  %v14777_v24 = vld [vmem:[#allocation2 + $0xaf0] ss:$76 sps:$4 sm:$0xff]   ;;  %v14785_v50 = vld [vmem:[#allocation2 + $0x1808] ss:$76 sps:$4 sm:$0xff]  }
 0x566   :  { %10875 = vmatprep.subr.bf16.mxu0 %v14724_v25  ;;  %v14784_v25 = vld [vmem:[#allocation2 + $0xb8c] ss:$76 sps:$4 sm:$0xff]  }
 0x568   :  { %12925 = vmatpush3.bf16.msra.mxu1 %v14726_v26  ;;  %v14782_v26 = vld [vmem:[#allocation2 + $0xb88] ss:$76 sps:$4 sm:$0xff]  }
 0x569   :  { %10876 = vmatpush1.bf16.msra.mxu0 %v14722_v29  ;;  %12926 = vmatprep.subr.bf16.mxu1 %v14730_v31  ;;  %v14790_v29 = vld [vmem:[#allocation2 + $0x18a0] ss:$76 sps:$4 sm:$0xff]  }
 0x56a   :  { %10877 = vmatprep.subr.bf16.mxu0 %v14729_v33  ;;  %v14791_v31 = vld [vmem:[#allocation2 + $0x13e0] ss:$76 sps:$4 sm:$0xff]  }
 0x56b   :  { %v14787_v33 = vld [vmem:[#allocation2 + $0xc20] ss:$76 sps:$4 sm:$0xff]  }
 0x56c   :  { %12927 = vmatpush3.bf16.msra.mxu1 %v14731_v63  ;;  %v14795_v63 = vld [vmem:[#allocation2 + $0x1938] ss:$76 sps:$4 sm:$0xff]  }
 0x56d   :  { %10878 = vmatpush1.bf16.msra.mxu0 %v14727_v34  ;;  %12928 = vmatprep.subr.bf16.mxu1 %v14735_v35  ;;  %v14794_v34 = vld [vmem:[#allocation2 + $0xcbc] ss:$76 sps:$4 sm:$0xff]   ;;  %v14796_v35 = vld [vmem:[#allocation2 + $0x1478] ss:$76 sps:$4 sm:$0xff]  }
 0x56e   :  { %10879 = vmatprep.subr.bf16.mxu0 %v14734_v36  ;;  %v14792_v36 = vld [vmem:[#allocation2 + $0xcb8] ss:$76 sps:$4 sm:$0xff]  }
 0x570   :  { %12929 = vmatpush3.bf16.msra.mxu1 %v14736_v5  ;;  %v14800_v5 = vld [vmem:[#allocation2 + $0x19d0] ss:$76 sps:$4 sm:$0xff]  }
 0x571   :  { %10880 = vmatpush1.bf16.msra.mxu0 %v14732_v28  ;;  %12930 = vmatprep.subr.bf16.mxu1 %v14740_v37  ;;  %v14799_v28 = vld [vmem:[#allocation2 + $0xd54] ss:$76 sps:$4 sm:$0xff]   ;;  %v14801_v37 = vld [vmem:[#allocation2 + $0x1510] ss:$76 sps:$4 sm:$0xff]  }
 0x572   :  { %10881 = vmatprep.subr.bf16.mxu0 %v14739_v38  ;;  %v14797_v38 = vld [vmem:[#allocation2 + $0xd50] ss:$76 sps:$4 sm:$0xff]  }
 0x574   :  { %12931 = vmatpush3.bf16.msra.mxu1 %v14741_v16  ;;  %v14805_v16 = vld [vmem:[#allocation2 + $0x1a68] ss:$76 sps:$4 sm:$0xff]  }
 0x575   :  { %10882 = vmatpush1.bf16.msra.mxu0 %v14737_v39  ;;  %12938 = vmatprep.subr.bf16.mxu1 %v14745_v40  ;;  %v14804_v39 = vld [vmem:[#allocation2 + $0xdec] ss:$76 sps:$4 sm:$0xff]   ;;  %v14806_v40 = vld [vmem:[#allocation2 + $0x15a8] ss:$76 sps:$4 sm:$0xff]  }
 0x576   :  { %10883 = vmatprep.subr.bf16.mxu0 %v14744_v12  ;;  %v14802_v12 = vld [vmem:[#allocation2 + $0xde8] ss:$76 sps:$4 sm:$0xff]  }
 0x577   :  { %11058 = vmatmul.mubr.bf16.vlgmr.msra.gmra.mrb[28].mxu1 %v15955_v48 }
 0x578   :  { %12939 = vmatpush3.bf16.msra.mxu1 %v14746_v41  ;;  %11097 = vmatprep.mubr.bf16.mxu1 %v15986_v62  ;;  %v14810_v41 = vld [vmem:[#allocation2 + $0x1b00] ss:$76 sps:$4 sm:$0xff]  }
 0x579   :  { %10884 = vmatpush1.bf16.msra.mxu0 %v14742_v43  ;;  %12940 = vmatprep.subr.bf16.mxu1 %v14750_v45  ;;  %v14809_v43 = vld [vmem:[#allocation2 + $0xe84] ss:$76 sps:$4 sm:$0xff]   ;;  %v14811_v45 = vld [vmem:[#allocation2 + $0x1640] ss:$76 sps:$4 sm:$0xff]  }
 0x57a   :  { %10885 = vmatprep.subr.bf16.mxu0 %v14749_v21  ;;  %v14807_v21 = vld [vmem:[#allocation2 + $0xe80] ss:$76 sps:$4 sm:$0xff]  }
 0x57c   :  { %12941 = vmatpush3.bf16.msra.mxu1 %v14751_v47  ;;  %v14815_v47 = vld [vmem:[#allocation2 + $0x1b98] ss:$76 sps:$4 sm:$0xff]  }
 0x57d   :  { %10886 = vmatpush1.bf16.msra.mxu0 %v14747_v49  ;;  %12942 = vmatprep.subr.bf16.mxu1 %v14755_v51  ;;  %v14814_v49 = vld [vmem:[#allocation2 + $0xf1c] ss:$76 sps:$4 sm:$0xff]   ;;  %v14816_v51 = vld [vmem:[#allocation2 + $0x16d8] ss:$76 sps:$4 sm:$0xff]  }
 0x57e   :  { %10887 = vmatprep.subr.bf16.mxu0 %v14754_v9  ;;  %v14812_v9 = vld [vmem:[#allocation2 + $0xf18] ss:$76 sps:$4 sm:$0xff]  }
 0x580   :  { %12943 = vmatpush3.bf16.msra.mxu1 %v14756_v52  ;;  %v14820_v52 = vld [vmem:[#allocation2 + $0x1c30] ss:$76 sps:$4 sm:$0xff]  }
 0x581   :  { %10888 = vmatpush1.bf16.msra.mxu0 %v14752_v54  ;;  %12944 = vmatprep.subr.bf16.mxu1 %v14760_v55  ;;  %v14819_v54 = vld [vmem:[#allocation2 + $0xfb4] ss:$76 sps:$4 sm:$0xff]   ;;  %v14821_v55 = vld [vmem:[#allocation2 + $0x1770] ss:$76 sps:$4 sm:$0xff]  }
 0x582   :  { %10889 = vmatprep.subr.bf16.mxu0 %v14759_v56  ;;  %v14817_v56 = vld [vmem:[#allocation2 + $0xfb0] ss:$76 sps:$4 sm:$0xff]  }
 0x584   :  { %12945 = vmatpush3.bf16.msra.mxu1 %v14761_v57  ;;  %v14825_v57 = vld [vmem:[#allocation2 + $0x2188] ss:$76 sps:$4 sm:$0xff]  }
 0x585   :  { %10890 = vmatpush1.bf16.msra.mxu0 %v14757_v59  ;;  %12946 = vmatprep.subr.bf16.mxu1 %v14765_v61  ;;  %v14824_v59 = vld [vmem:[#allocation2 + $0x104c] ss:$76 sps:$4 sm:$0xff]   ;;  %v14826_v61 = vld [vmem:[#allocation2 + $0x1cc8] ss:$76 sps:$4 sm:$0xff]  }
 0x586   :  { %10891 = vmatprep.subr.bf16.mxu0 %v14764_v2  ;;  %v14822_v2 = vld [vmem:[#allocation2 + $0x1048] ss:$76 sps:$4 sm:$0xff]  }
 0x588   :  { %12947 = vmatpush3.bf16.msra.mxu1 %v14766_v4  ;;  %v14830_v4 = vld [vmem:[#allocation2 + $0x2220] ss:$76 sps:$4 sm:$0xff]  }
 0x589   :  { %10892 = vmatpush1.bf16.msra.mxu0 %v14762_v7  ;;  %12948 = vmatprep.subr.bf16.mxu1 %v14770_v44  ;;  %v14829_v7 = vld [vmem:[#allocation2 + $0x10e4] ss:$76 sps:$4 sm:$0xff]   ;;  %v14831_v44 = vld [vmem:[#allocation2 + $0x1d60] ss:$76 sps:$4 sm:$0xff]  }
 0x58a   :  { %10902 = vmatprep.subr.bf16.mxu0 %v14769_v10  ;;  %v14827_v10 = vld [vmem:[#allocation2 + $0x10e0] ss:$76 sps:$4 sm:$0xff]  }
 0x58c   :  { %10894 = vmatmul.mubr.bf16.vlgmr.msra.gmra.mrb[24].mxu0 %v15955_v48  ;;  %12949 = vmatpush3.bf16.msra.mxu1 %v14771_v13  ;;  %v14786_v48 = vld [vmem:[#allocation2 + $0x1348] ss:$76 sps:$4 sm:$0xff]   ;;  %v14835_v13 = vld [vmem:[#allocation2 + $0x22b8] ss:$76 sps:$4 sm:$0xff]  }
 0x58d   :  { %10903 = vmatpush1.bf16.msra.mxu0 %v14767_v14  ;;  %10934 = vmatprep.mubr.bf16.mxu0 %v15986_v62  ;;  %v14789_v62 = vld [vmem:[#allocation2 + $0xc24] ss:$76 sps:$4 sm:$0xff]   ;;  %v14834_v14 = vld [vmem:[#allocation2 + $0x117c] ss:$76 sps:$4 sm:$0xff]  }
 0x58e   :  { %10904 = vmatprep.subr.bf16.mxu0 %v14774_v15  ;;  %12950 = vmatprep.subr.bf16.mxu1 %v14775_v17  ;;  %v14836_v15 = vld [vmem:[#allocation2 + $0x1df8] ss:$76 sps:$4 sm:$0xff]  }
 0x58f   :  { %v14832_v17 = vld [vmem:[#allocation2 + $0x1178] ss:$76 sps:$4 sm:$0xff]  }
 0x590   :  { %12951 = vmatpush3.bf16.msra.mxu1 %v14776_v18  ;;  %v14840_v18 = vld [vmem:[#allocation2 + $0x2350] ss:$76 sps:$4 sm:$0xff]  }
 0x591   :  { %10905 = vmatpush1.bf16.msra.mxu0 %v14772_v19  ;;  %12952 = vmatprep.subr.bf16.mxu1 %v14780_v20  ;;  %v14839_v19 = vld [vmem:[#allocation2 + $0x1214] ss:$76 sps:$4 sm:$0xff]   ;;  %v14841_v20 = vld [vmem:[#allocation2 + $0x1e90] ss:$76 sps:$4 sm:$0xff]  }
 0x592   :  { %10906 = vmatprep.subr.bf16.mxu0 %v14779_v22  ;;  %v14837_v22 = vld [vmem:[#allocation2 + $0x1210] ss:$76 sps:$4 sm:$0xff]  }
 0x594   :  { %12953 = vmatpush3.bf16.msra.mxu1 %v14781_v23  ;;  %v14845_v23 = vld [vmem:[#allocation2 + $0x23e8] ss:$76 sps:$4 sm:$0xff]  }
 0x595   :  { %10907 = vmatpush1.bf16.msra.mxu0 %v14777_v24  ;;  %12960 = vmatprep.subr.bf16.mxu1 %v14785_v50  ;;  %v14844_v24 = vld [vmem:[#allocation2 + $0x12ac] ss:$76 sps:$4 sm:$0xff]   ;;  %v14846_v50 = vld [vmem:[#allocation2 + $0x1f28] ss:$76 sps:$4 sm:$0xff]  }
 0x596   :  { %10908 = vmatprep.subr.bf16.mxu0 %v14784_v25  ;;  %v14842_v25 = vld [vmem:[#allocation2 + $0x12a8] ss:$76 sps:$4 sm:$0xff]  }
 0x597   :  { %11098 = vmatmul.mubr.bf16.vlgmr.msra.gmra.mrb[32].mxu1 %v15988_v0 }
 0x598   :  { %12961 = vmatpush3.bf16.msra.mxu1 %v14786_v48  ;;  %11137 = vmatprep.mubr.bf16.mxu1 %v15990_v3  ;;  %v14850_v48 = vld [vmem:[#allocation2 + $0x2480] ss:$76 sps:$4 sm:$0xff]  }
 0x599   :  { %10909 = vmatpush1.bf16.msra.mxu0 %v14782_v26  ;;  %12962 = vmatprep.subr.bf16.mxu1 %v14790_v29  ;;  %v14849_v26 = vld [vmem:[#allocation2 + $0x1344] ss:$76 sps:$4 sm:$0xff]   ;;  %v14851_v29 = vld [vmem:[#allocation2 + $0x1fc0] ss:$76 sps:$4 sm:$0xff]  }
 0x59a   :  { %10910 = vmatprep.subr.bf16.mxu0 %v14789_v62  ;;  %v14847_v62 = vld [vmem:[#allocation2 + $0x1340] ss:$76 sps:$4 sm:$0xff]  }
 0x59c   :  { %12963 = vmatpush3.bf16.msra.mxu1 %v14791_v31  ;;  %v14854_v31 = vld [vmem:[#allocation2 + $0x13dc] ss:$76 sps:$4 sm:$0xff]  }
 0x59d   :  { %10911 = vmatpush1.bf16.msra.mxu0 %v14787_v33  ;;  %12964 = vmatprep.subr.bf16.mxu1 %v14795_v63  ;;  %v14855_v33 = vld [vmem:[#allocation2 + $0x2518] ss:$76 sps:$4 sm:$0xff]  }
 0x59e   :  { %10912 = vmatprep.subr.bf16.mxu0 %v14794_v34  ;;  %v14856_v63 = vld [vmem:[#allocation2 + $0x2058] ss:$76 sps:$4 sm:$0xff]  }
 0x59f   :  { %v14852_v34 = vld [vmem:[#allocation2 + $0x13d8] ss:$76 sps:$4 sm:$0xff]  }
 0x5a0   :  { %12965 = vmatpush3.bf16.msra.mxu1 %v14796_v35  ;;  %v14860_v35 = vld [vmem:[#allocation2 + $0x25b0] ss:$76 sps:$4 sm:$0xff]  }
 0x5a1   :  { %10913 = vmatpush1.bf16.msra.mxu0 %v14792_v36  ;;  %12966 = vmatprep.subr.bf16.mxu1 %v14800_v5  ;;  %v14859_v36 = vld [vmem:[#allocation2 + $0x1474] ss:$76 sps:$4 sm:$0xff]   ;;  %v14861_v5 = vld [vmem:[#allocation2 + $0x20f0] ss:$76 sps:$4 sm:$0xff]  }
 0x5a2   :  { %10914 = vmatprep.subr.bf16.mxu0 %v14799_v28  ;;  %v14857_v28 = vld [vmem:[#allocation2 + $0x1470] ss:$76 sps:$4 sm:$0xff]  }
 0x5a4   :  { %12967 = vmatpush3.bf16.msra.mxu1 %v14801_v37  ;;  %v14864_v37 = vld [vmem:[#allocation2 + $0x150c] ss:$76 sps:$4 sm:$0xff]  }
 0x5a5   :  { %10915 = vmatpush1.bf16.msra.mxu0 %v14797_v38  ;;  %12968 = vmatprep.subr.bf16.mxu1 %v14805_v16  ;;  %v14867_v38 = vld [vmem:[#allocation2 + $0x15a4] ss:$76 sps:$4 sm:$0xff]   ;;  %v14870_v16 = vld [vmem:[#allocation2 + $0x163c] ss:$76 sps:$4 sm:$0xff]  }
 0x5a6   :  { %10916 = vmatprep.subr.bf16.mxu0 %v14804_v39  ;;  %v14868_v39 = vld [vmem:[#allocation2 + $0x1638] ss:$76 sps:$4 sm:$0xff]  }
 0x5a8   :  { %12969 = vmatpush3.bf16.msra.mxu1 %v14806_v40  ;;  %v14873_v40 = vld [vmem:[#allocation2 + $0x16d4] ss:$76 sps:$4 sm:$0xff]  }
 0x5a9   :  { %10917 = vmatpush1.bf16.msra.mxu0 %v14802_v12  ;;  %12970 = vmatprep.subr.bf16.mxu1 %v14810_v41  ;;  %v14871_v12 = vld [vmem:[#allocation2 + $0x16d0] ss:$76 sps:$4 sm:$0xff]   ;;  %v14876_v41 = vld [vmem:[#allocation2 + $0x176c] ss:$76 sps:$4 sm:$0xff]  }
 0x5aa   :  { %10918 = vmatprep.subr.bf16.mxu0 %v14809_v43  ;;  %v14874_v43 = vld [vmem:[#allocation2 + $0x1768] ss:$76 sps:$4 sm:$0xff]  }
 0x5ac   :  { %12971 = vmatpush3.bf16.msra.mxu1 %v14811_v45  ;;  %v14879_v45 = vld [vmem:[#allocation2 + $0x1804] ss:$76 sps:$4 sm:$0xff]  }
 0x5ad   :  { %10919 = vmatpush1.bf16.msra.mxu0 %v14807_v21  ;;  %12972 = vmatprep.subr.bf16.mxu1 %v14815_v47  ;;  %v14877_v21 = vld [vmem:[#allocation2 + $0x1800] ss:$76 sps:$4 sm:$0xff]   ;;  %v14882_v47 = vld [vmem:[#allocation2 + $0x189c] ss:$76 sps:$4 sm:$0xff]  }
 0x5ae   :  { %10920 = vmatprep.subr.bf16.mxu0 %v14814_v49  ;;  %v14880_v49 = vld [vmem:[#allocation2 + $0x1898] ss:$76 sps:$4 sm:$0xff]  }
 0x5b0   :  { %12973 = vmatpush3.bf16.msra.mxu1 %v14816_v51  ;;  %v14885_v51 = vld [vmem:[#allocation2 + $0x1934] ss:$76 sps:$4 sm:$0xff]  }
 0x5b1   :  { %10921 = vmatpush1.bf16.msra.mxu0 %v14812_v9  ;;  %12974 = vmatprep.subr.bf16.mxu1 %v14820_v52  ;;  %v14883_v9 = vld [vmem:[#allocation2 + $0x1930] ss:$76 sps:$4 sm:$0xff]   ;;  %v14888_v52 = vld [vmem:[#allocation2 + $0x19cc] ss:$76 sps:$4 sm:$0xff]  }
 0x5b2   :  { %10922 = vmatprep.subr.bf16.mxu0 %v14819_v54  ;;  %v14886_v54 = vld [vmem:[#allocation2 + $0x19c8] ss:$76 sps:$4 sm:$0xff]  }
 0x5b4   :  { %12975 = vmatpush3.bf16.msra.mxu1 %v14821_v55  ;;  %v14891_v55 = vld [vmem:[#allocation2 + $0x1a64] ss:$76 sps:$4 sm:$0xff]  }
 0x5b5   :  { %10923 = vmatpush1.bf16.msra.mxu0 %v14817_v56  ;;  %12982 = vmatprep.subr.bf16.mxu1 %v14825_v57  ;;  %v14889_v56 = vld [vmem:[#allocation2 + $0x1a60] ss:$76 sps:$4 sm:$0xff]   ;;  %v14894_v57 = vld [vmem:[#allocation2 + $0x1afc] ss:$76 sps:$4 sm:$0xff]  }
 0x5b6   :  { %10924 = vmatprep.subr.bf16.mxu0 %v14824_v59  ;;  %v14892_v59 = vld [vmem:[#allocation2 + $0x1af8] ss:$76 sps:$4 sm:$0xff]  }
 0x5b7   :  { %11138 = vmatmul.mubr.bf16.vlgmr.msra.gmra.mrb[36].mxu1 %v16004_v30 }
 0x5b8   :  { %12983 = vmatpush3.bf16.msra.mxu1 %v14826_v61  ;;  %11177 = vmatprep.mubr.bf16.mxu1 %v16019_v6  ;;  %v14897_v61 = vld [vmem:[#allocation2 + $0x1b94] ss:$76 sps:$4 sm:$0xff]  }
 0x5b9   :  { %10925 = vmatpush1.bf16.msra.mxu0 %v14822_v2  ;;  %12984 = vmatprep.subr.bf16.mxu1 %v14830_v4  ;;  %v14895_v2 = vld [vmem:[#allocation2 + $0x1b90] ss:$76 sps:$4 sm:$0xff]   ;;  %v14900_v4 = vld [vmem:[#allocation2 + $0x1c2c] ss:$76 sps:$4 sm:$0xff]  }
 0x5ba   :  { %10926 = vmatprep.subr.bf16.mxu0 %v14829_v7  ;;  %v14898_v7 = vld [vmem:[#allocation2 + $0x1c28] ss:$76 sps:$4 sm:$0xff]  }
 0x5bc   :  { %12985 = vmatpush3.bf16.msra.mxu1 %v14831_v44  ;;  %v14903_v44 = vld [vmem:[#allocation2 + $0x1cc4] ss:$76 sps:$4 sm:$0xff]  }
 0x5bd   :  { %10927 = vmatpush1.bf16.msra.mxu0 %v14827_v10  ;;  %12986 = vmatprep.subr.bf16.mxu1 %v14835_v13  ;;  %v14901_v10 = vld [vmem:[#allocation2 + $0x1cc0] ss:$76 sps:$4 sm:$0xff]   ;;  %v14906_v13 = vld [vmem:[#allocation2 + $0x1d5c] ss:$76 sps:$4 sm:$0xff]  }
 0x5be   :  { %10928 = vmatprep.subr.bf16.mxu0 %v14834_v14  ;;  %v14904_v14 = vld [vmem:[#allocation2 + $0x1d58] ss:$76 sps:$4 sm:$0xff]  }
 0x5c0   :  { %12987 = vmatpush3.bf16.msra.mxu1 %v14836_v15  ;;  %v14909_v15 = vld [vmem:[#allocation2 + $0x1df4] ss:$76 sps:$4 sm:$0xff]  }
 0x5c1   :  { %10929 = vmatpush1.bf16.msra.mxu0 %v14832_v17  ;;  %12988 = vmatprep.subr.bf16.mxu1 %v14840_v18  ;;  %v14907_v17 = vld [vmem:[#allocation2 + $0x1df0] ss:$76 sps:$4 sm:$0xff]   ;;  %v14912_v18 = vld [vmem:[#allocation2 + $0x1e8c] ss:$76 sps:$4 sm:$0xff]  }
 0x5c2   :  { %10930 = vmatprep.subr.bf16.mxu0 %v14839_v19  ;;  %v14910_v19 = vld [vmem:[#allocation2 + $0x1e88] ss:$76 sps:$4 sm:$0xff]  }
 0x5c4   :  { %12989 = vmatpush3.bf16.msra.mxu1 %v14841_v20  ;;  %v14915_v20 = vld [vmem:[#allocation2 + $0x1f24] ss:$76 sps:$4 sm:$0xff]  }
 0x5c5   :  { %10931 = vmatpush1.bf16.msra.mxu0 %v14837_v22  ;;  %12990 = vmatprep.subr.bf16.mxu1 %v14845_v23  ;;  %v14913_v22 = vld [vmem:[#allocation2 + $0x1f20] ss:$76 sps:$4 sm:$0xff]   ;;  %v14918_v23 = vld [vmem:[#allocation2 + $0x1fbc] ss:$76 sps:$4 sm:$0xff]  }
 0x5c6   :  { %10932 = vmatprep.subr.bf16.mxu0 %v14844_v24  ;;  %v14916_v24 = vld [vmem:[#allocation2 + $0x1fb8] ss:$76 sps:$4 sm:$0xff]  }
 0x5c8   :  { %12991 = vmatpush3.bf16.msra.mxu1 %v14846_v50  ;;  %v14921_v50 = vld [vmem:[#allocation2 + $0x2054] ss:$76 sps:$4 sm:$0xff]  }
 0x5c9   :  { %10933 = vmatpush1.bf16.msra.mxu0 %v14842_v25  ;;  %12992 = vmatprep.subr.bf16.mxu1 %v14850_v48 }
 0x5ca   :  { %10943 = vmatprep.subr.bf16.mxu0 %v14849_v26 }
 0x5cc   :  { %10935 = vmatmul.mubr.bf16.vlgmr.msra.gmra.mrb[24].mxu0 %v15988_v0  ;;  %12993 = vmatpush3.bf16.msra.mxu1 %v14851_v29  ;;  %v14862_v0 = vld [vmem:[#allocation2 + $0x1508] ss:$76 sps:$4 sm:$0xff]  }
 0x5cd   :  { %10944 = vmatpush1.bf16.msra.mxu0 %v14847_v62  ;;  %10975 = vmatprep.mubr.bf16.mxu0 %v15990_v3  ;;  %v14865_v3 = vld [vmem:[#allocation2 + $0x15a0] ss:$76 sps:$4 sm:$0xff]  }
 0x5ce   :  { %10945 = vmatprep.subr.bf16.mxu0 %v14854_v31  ;;  %12994 = vmatprep.subr.bf16.mxu1 %v14855_v33  ;;  %v14919_v31 = vld [vmem:[#allocation2 + $0x2050] ss:$76 sps:$4 sm:$0xff]  }
 0x5d0   :  { %12995 = vmatpush3.bf16.msra.mxu1 %v14856_v63 }
 0x5d1   :  { %10946 = vmatpush1.bf16.msra.mxu0 %v14852_v34  ;;  %12996 = vmatprep.subr.bf16.mxu1 %v14860_v35  ;;  %v14924_v34 = vld [vmem:[#allocation2 + $0x20ec] ss:$76 sps:$4 sm:$0xff]  }
 0x5d2   :  { %10947 = vmatprep.subr.bf16.mxu0 %v14859_v36 }
 0x5d4   :  { %12997 = vmatpush3.bf16.msra.mxu1 %v14861_v5 }
 0x5d5   :  { %10948 = vmatpush1.bf16.msra.mxu0 %v14857_v28  ;;  %v14925_v28 = vld [vmem:[#allocation2 + $0x2180] ss:$76 sps:$4 sm:$0xff]  }
 0x5d6   :  { %10949 = vmatprep.subr.bf16.mxu0 %v14864_v37 }
 0x5d7   :  { %11178 = vmatmul.mubr.bf16.vlgmr.msra.gmra.mrb[40].mxu1 %v16021_v11 }
 0x5d9   :  { %10950 = vmatpush1.bf16.msra.mxu0 %v14862_v0  ;;  %v14930_v0 = vld [vmem:[#allocation2 + $0x221c] ss:$76 sps:$4 sm:$0xff]  }
 0x5da   :  { %10951 = vmatprep.subr.bf16.mxu0 %v14867_v38 }
 0x5dd   :  { %10952 = vmatpush1.bf16.msra.mxu0 %v14865_v3 }
 0x5de   :  { %10953 = vmatprep.subr.bf16.mxu0 %v14870_v16 }
 0x5e1   :  { %10954 = vmatpush1.bf16.msra.mxu0 %v14868_v39 }
 0x5e2   :  { %10955 = vmatprep.subr.bf16.mxu0 %v14873_v40 }
 0x5e5   :  { %10956 = vmatpush1.bf16.msra.mxu0 %v14871_v12 }
 0x5e6   :  { %10957 = vmatprep.subr.bf16.mxu0 %v14876_v41  ;;  %v14928_v41 = vld [vmem:[#allocation2 + $0x2218] ss:$76 sps:$4 sm:$0xff]  }
 0x5e9   :  { %10958 = vmatpush1.bf16.msra.mxu0 %v14874_v43 }
 0x5ea   :  { %10959 = vmatprep.subr.bf16.mxu0 %v14879_v45 }
 0x5ed   :  { %10960 = vmatpush1.bf16.msra.mxu0 %v14877_v21  ;;  %v14933_v21 = vld [vmem:[#allocation2 + $0x22b4] ss:$76 sps:$4 sm:$0xff]  }
 0x5ee   :  { %10961 = vmatprep.subr.bf16.mxu0 %v14882_v47 }
 0x5f1   :  { %10962 = vmatpush1.bf16.msra.mxu0 %v14880_v49  ;;  %v14931_v49 = vld [vmem:[#allocation2 + $0x22b0] ss:$76 sps:$4 sm:$0xff]  }
 0x5f2   :  { %10963 = vmatprep.subr.bf16.mxu0 %v14885_v51  ;;  %v14936_v51 = vld [vmem:[#allocation2 + $0x234c] ss:$76 sps:$4 sm:$0xff]  }
 0x5f5   :  { %10964 = vmatpush1.bf16.msra.mxu0 %v14883_v9  ;;  %v14934_v9 = vld [vmem:[#allocation2 + $0x2348] ss:$76 sps:$4 sm:$0xff]  }
 0x5f6   :  { %10965 = vmatprep.subr.bf16.mxu0 %v14888_v52  ;;  %v14939_v52 = vld [vmem:[#allocation2 + $0x23e4] ss:$76 sps:$4 sm:$0xff]  }
 0x5f9   :  { %10966 = vmatpush1.bf16.msra.mxu0 %v14886_v54 }
 0x5fa   :  { %10967 = vmatprep.subr.bf16.mxu0 %v14891_v55  ;;  %v14937_v55 = vld [vmem:[#allocation2 + $0x23e0] ss:$76 sps:$4 sm:$0xff]  }
 0x5fd   :  { %10968 = vmatpush1.bf16.msra.mxu0 %v14889_v56 }
 0x5fe   :  { %10969 = vmatprep.subr.bf16.mxu0 %v14894_v57 }
 0x601   :  { %10970 = vmatpush1.bf16.msra.mxu0 %v14892_v59  ;;  %v14942_v59 = vld [vmem:[#allocation2 + $0x247c] ss:$76 sps:$4 sm:$0xff]  }
 0x602   :  { %10971 = vmatprep.subr.bf16.mxu0 %v14897_v61 }
 0x605   :  { %10972 = vmatpush1.bf16.msra.mxu0 %v14895_v2 }
 0x606   :  { %10973 = vmatprep.subr.bf16.mxu0 %v14900_v4 }
 0x609   :  { %10974 = vmatpush1.bf16.msra.mxu0 %v14898_v7 }
 0x60a   :  { %10984 = vmatprep.subr.bf16.mxu0 %v14903_v44  ;;  %v14940_v44 = vld [vmem:[#allocation2 + $0x2478] ss:$76 sps:$4 sm:$0xff]  }
 0x60c   :  { %10976 = vmatmul.mubr.bf16.vlgmr.msra.gmra.mrb[24].mxu0 %v16004_v30  ;;  %v3361_v30 = vrot.slane %v16100_v1, %v15999_v27  ;;  %v14922_v27 = vld [vmem:[#allocation2 + $0x20e8] ss:$76 sps:$4 sm:$0xff]  }
 0x60d   :  { %10985 = vmatpush1.bf16.msra.mxu0 %v14901_v10  ;;  %11016 = vmatprep.mubr.bf16.mxu0 %v16019_v6  ;;  %v3365_v6 = vrot.slane %v16100_v1, %v15971_v32  ;;  %v14927_v32 = vld [vmem:[#allocation2 + $0x2184] ss:$76 sps:$4 sm:$0xff]   ;;  %v15060_v1 = vld [vmem:[%s16162_s4 + $0x8] sm:$0xff]  ;;  %v14945_v10 = vld [vmem:[#allocation2 + $0x2514] ss:$76 sps:$4 sm:$0xff]  }
 0x60e   :  { %10986 = vmatprep.subr.bf16.mxu0 %v14906_v13  ;;  %v3369_v36 = vrot.slane %v15060_v1, %v16009_v58  ;;  %v3373_v5 = vrot.slane %v15060_v1, %v16012_v60  ;;  %v14943_v13 = vld [vmem:[#allocation2 + $0x2510] ss:$76 sps:$4 sm:$0xff]  }
 0x611   :  { %10987 = vmatpush1.bf16.msra.mxu0 %v14904_v14  ;;  %v14948_v14 = vld [vmem:[#allocation2 + $0x25ac] ss:$76 sps:$4 sm:$0xff]  }
 0x612   :  { %10988 = vmatprep.subr.bf16.mxu0 %v14909_v15  ;;  %v14946_v15 = vld [vmem:[#allocation2 + $0x25a8] ss:$76 sps:$4 sm:$0xff]  }
 0x615   :  { %10989 = vmatpush1.bf16.msra.mxu0 %v14907_v17 }
 0x616   :  { %10990 = vmatprep.subr.bf16.mxu0 %v14912_v18 }
 0x619   :  { %10991 = vmatpush1.bf16.msra.mxu0 %v14910_v19 }
 0x61a   :  { %10992 = vmatprep.subr.bf16.mxu0 %v14915_v20 }
 0x61d   :  { %10993 = vmatpush1.bf16.msra.mxu0 %v14913_v22 }
 0x61e   :  { %10994 = vmatprep.subr.bf16.mxu0 %v14918_v23 }
 0x61f   :  { %v10690_v25 = vpop.f32.mrb[20].mxu0 }
 0x620   :  { %v13026_v48 = vadd.f32 %v10690_v25, %v3361_v30  ;;  %v10692_v26 = vpop.f32.mrb[21].mxu0 }
 0x621   :  { %v13027_v29 = vadd.f32 %v10692_v26, %v3365_v6  ;;  %v10694_v62 = vpop.f32.mrb[22].mxu0  ;;  %10995 = vmatpush1.bf16.msra.mxu0 %v14916_v24 }
 0x622   :  { %v12909_v33 = vmul.f32 -1.442695, %v13026_v48  ;;  %v10695_v63 = vpop.f32.mrb[23].mxu0  ;;  %10996 = vmatprep.subr.bf16.mxu0 %v14921_v50  ;;  %v3306_v48 = vld [vmem:[%s16162_s4 + $0x10] sm:$0x7] }
 0x623   :  { %v12910_v35 = vmul.f32 -1.442695, %v13027_v29  ;;  %v3385_v26 = vrot.slane %v3306_v48, %v15965_v8 }
 0x624   :  { %15029 = vpow2.f32 %v12909_v33 }
 0x625   :  { %15031 = vpow2.f32 %v12910_v35  ;;  %10997 = vmatpush1.bf16.msra.mxu0 %v14919_v31 }
 0x626   :  { %10998 = vmatprep.subr.bf16.mxu0 %v14924_v34 }
 0x629   :  { %10999 = vmatpush1.bf16.msra.mxu0 %v14922_v27 }
 0x62a   :  { %v10854_v37 = vpop.f32.mrb[24].mxu1  ;;  %11000 = vmatprep.subr.bf16.mxu0 %v14927_v32 }
 0x62b   :  { %v13028_v38 = vadd.f32 %v10854_v37, %v3369_v36  ;;  %v10856_v3 = vpop.f32.mrb[25].mxu1 }
 0x62c   :  { %v13029_v16 = vadd.f32 %v10856_v3, %v3373_v5  ;;  %v10858_v39 = vpop.f32.mrb[26].mxu1 }
 0x62d   :  { %v12911_v40 = vmul.f32 -1.442695, %v13028_v38  ;;  %11001 = vmatpush1.bf16.msra.mxu0 %v14925_v28  ;;  %v10859_v12 = vpop.f32.mrb[27].mxu1  ;;  %v3377_v39 = vrot.slane %v3306_v48, %v15885_v42 }
 0x62e   :  { %v15030_v43 = vpop.eup %15029  ;;  %v12912_v45 = vmul.f32 -1.442695, %v13029_v16  ;;  %11002 = vmatprep.subr.bf16.mxu0 %v14930_v0 }
 0x62f   :  { %v15032_v58 = vpop.eup %15031  ;;  %v11254_v47 = vadd.f32 1.0, %v15030_v43  ;;  %15033 = vpow2.f32 %v12911_v40  ;;  %v3381_v40 = vrot.slane %v3306_v48, %v15891_v46 }
 0x630   :  { %v11255_v60 = vadd.f32 1.0, %v15032_v58  ;;  %15035 = vpow2.f32 %v12912_v45 }
 0x631   :  { %15037 = vrcp.f32 %v11254_v47  ;;  %11003 = vmatpush1.bf16.msra.mxu0 %v14928_v41 }
 0x632   :  { %15039 = vrcp.f32 %v11255_v60  ;;  %11004 = vmatprep.subr.bf16.mxu0 %v14933_v21 }
 0x635   :  { %11005 = vmatpush1.bf16.msra.mxu0 %v14931_v49 }
 0x636   :  { %11006 = vmatprep.subr.bf16.mxu0 %v14936_v51 }
 0x639   :  { %v15034_v54 = vpop.eup %15033  ;;  %11007 = vmatpush1.bf16.msra.mxu0 %v14934_v9 }
 0x63a   :  { %v15036_v56 = vpop.eup %15035  ;;  %v11256_v57 = vadd.f32 1.0, %v15034_v54  ;;  %11008 = vmatprep.subr.bf16.mxu0 %v14939_v52 }
 0x63b   :  { %v15038_v61 = vpop.eup %15037  ;;  %v11257_v2 = vadd.f32 1.0, %v15036_v56 }
 0x63c   :  { %v15040_v4 = vpop.eup %15039  ;;  %15041 = vrcp.f32 %v11256_v57 }
 0x63d   :  { %v11369_v7 = vcombine.low %v15038_v61, %v15040_v4  ;;  %15043 = vrcp.f32 %v11257_v2  ;;  %11009 = vmatpush1.bf16.msra.mxu0 %v14937_v55 }
 0x63e   :  { %11010 = vmatprep.subr.bf16.mxu0 %v14942_v59 }
 0x63f   :  { %v11377_v20 = vrot.slane %v11369_v7, %v15212_v53 }
 0x641   :  { %11011 = vmatpush1.bf16.msra.mxu0 %v14940_v44 }
 0x642   :  { %11012 = vmatprep.subr.bf16.mxu0 %v14945_v10 }
 0x645   :  { %11013 = vmatpush1.bf16.msra.mxu0 %v14943_v13 }
 0x646   :  { %v15042_v17 = vpop.eup %15041  ;;  %11014 = vmatprep.subr.bf16.mxu0 %v14948_v14 }
 0x647   :  { %v15044_v18 = vpop.eup %15043 }
 0x648   :  { %v11370_v19 = vcombine.low %v15042_v17, %v15044_v18 }
 0x649   :  { %11015 = vmatpush1.bf16.msra.mxu0 %v14946_v15 }
 0x64a   :  { %v11384_v22 = vrot.slane %v11370_v19, %v15212_v53  ;;  %v12932_v23 = vpop.f32.mrb[28].mxu1 }
 0x64b   :  { %v12933_v30 = vpop.f32.mrb[29].mxu1 }
 0x64c   :  { %v11385_v6 = vcombine.low %v11377_v20, %v11384_v22  ;;  %11017 = vmatmul.mubr.bf16.vlgmr.msra.gmra.mrb[24].mxu0 %v16021_v11  ;;  %v12934_v24 = vadd.f32 %v12933_v30, %v12932_v23  ;;  %v12935_v50 = vpop.f32.mrb[30].mxu1 }
 0x64d   :  { %v12936_v25 = vpop.f32.mrb[31].mxu1 }
 0x64e   :  { %11410 = vst [vmem:[%s16163_s5 + $0x18] sm:$0xff] %v11385_v6  ;;  %v11060_v31 = vadd.f32 %v12934_v24, %v3385_v26 }
 0x66a   :  { %v12954_v29 = vpop.f32.mrb[32].mxu1 }
 0x66b   :  { %v12955_v62 = vpop.f32.mrb[33].mxu1 }
 0x66c   :  { %v12956_v33 = vadd.f32 %v12955_v62, %v12954_v29  ;;  %v12957_v63 = vpop.f32.mrb[34].mxu1 }
 0x66d   :  { %v12958_v34 = vpop.f32.mrb[35].mxu1 }
 0x66e   :  { %v11100_v11 = vadd.f32 %v12956_v33, %v11060_v31 }
 0x68a   :  { %v12976_v35 = vpop.f32.mrb[36].mxu1 }
 0x68b   :  { %v12977_v27 = vpop.f32.mrb[37].mxu1 }
 0x68c   :  { %v12978_v32 = vadd.f32 %v12977_v27, %v12976_v35  ;;  %v12979_v1 = vpop.f32.mrb[38].mxu1 }
 0x68d   :  { %v12980_v36 = vpop.f32.mrb[39].mxu1 }
 0x68e   :  { %v11140_v5 = vadd.f32 %v12978_v32, %v11100_v11 }
 0x6aa   :  { %v12998_v28 = vpop.f32.mrb[40].mxu1 }
 0x6ab   :  { %v12999_v37 = vpop.f32.mrb[41].mxu1 }
 0x6ac   :  { %v13000_v0 = vadd.f32 %v12999_v37, %v12998_v28  ;;  %v13001_v38 = vpop.f32.mrb[42].mxu1 }
 0x6ad   :  { %v13002_v3 = vpop.f32.mrb[43].mxu1 }
 0x6ae   :  { %v11180_v16 = vadd.f32 %v13000_v0, %v11140_v5 }
 0x6b0   :  { %v12915_v8 = vmul.f32 -1.442695, %v11180_v16 }
 0x6b2   :  { %15045 = vpow2.f32 %v12915_v8 }
 0x6bc   :  { %v15046_v49 = vpop.eup %15045 }
 0x6bd   :  { %v11260_v51 = vadd.f32 1.0, %v15046_v49 }
 0x71f   :  { %v11018_v12 = vpop.f32.mrb[24].mxu0 }
 0x720   :  { %v13030_v41 = vadd.f32 %v11018_v12, %v3377_v39  ;;  %v11020_v43 = vpop.f32.mrb[25].mxu0 }
 0x721   :  { %v13031_v45 = vadd.f32 %v11020_v43, %v3381_v40  ;;  %v11022_v21 = vpop.f32.mrb[26].mxu0 }
 0x722   :  { %v12913_v58 = vmul.f32 -1.442695, %v13030_v41  ;;  %v11023_v47 = vpop.f32.mrb[27].mxu0 }
 0x723   :  { %v12914_v60 = vmul.f32 -1.442695, %v13031_v45 }
 0x724   :  { %15047 = vpow2.f32 %v12913_v58 }
 0x725   :  { %15049 = vpow2.f32 %v12914_v60 }
 0x726   :  { %15051 = vrcp.f32 %v11260_v51 }
 0x72e   :  { %v15048_v9 = vpop.eup %15047 }
 0x72f   :  { %v15050_v52 = vpop.eup %15049  ;;  %v11258_v54 = vadd.f32 1.0, %v15048_v9 }
 0x730   :  { %v11259_v42 = vadd.f32 1.0, %v15050_v52  ;;  %v15052_v46 = vpop.eup %15051 }
 0x731   :  { %15053 = vrcp.f32 %v11258_v54  ;;  %v11400_v59 = vrot.slane %v15052_v46, %v15212_v53 }
 0x732   :  { %15055 = vrcp.f32 %v11259_v42 }
 0x73b   :  { %v15054_v55 = vpop.eup %15053 }
 0x73c   :  { %v15056_v56 = vpop.eup %15055 }
 0x73d   :  { %v11386_v57 = vcombine.low %v15054_v55, %v15056_v56 }
 0x73f   :  { %v11393_v61 = vrot.slane %v11386_v57, %v15212_v53 }
 0x741   :  { %v11401_v2 = vcombine.low %v11393_v61, %v11400_v59 }
 0x743   :  { %11411 = vst [vmem:[%s16163_s5 + $0x20] sm:$0x3f] %v11401_v2 }
 0x744   :  { %11416 = vsyncpa [#allocation3], 1 }

</bundles_post_ra>
